<compile_context>
chip_gen: v7x
topology: tpu7x:2x2x1
jax: 0.10.0
libtpu: 0.0.40
codegen_flags: <defaults>
</compile_context>

<pallas_src>
import functools

import numpy as np
import jax
import jax.numpy as jnp
from jax.experimental import pallas as pl
from jax.experimental.pallas import tpu as pltpu


# -----------------------------------------------------------------------------
# Fused kernel: conv1 + ReLU + conv2 + ReLU + residual + ReLU, n_img images/step.
# -----------------------------------------------------------------------------
def _residual_block_kernel(x_ref, w1_ref, b1_ref, w2_ref, b2_ref, out_ref, buf_ref,
                           *, H, W, n_img, gap, pad):
    """buf_ref ("im2col-by-kw" scratch), shape (pad + M_ext + pad, 3*C) bf16:

    lane slice kw*C:(kw+1)*C of row pad + b*(N+gap) + s holds
        act_b[s + (kw - 1)]  masked to zero where the read would cross a row edge,
    and gap / slack rows stay all-zero, so a 3x3 conv is just 3 matmuls (one per kh
    row, K = 3*C) and dy = +-1 taps at image edges read zeros (== zero padding)
    without any row masks.
    """
    N = H * W
    C = x_ref.shape[-1]
    M_ext = n_img * N + (n_img - 1) * gap          # folded tokens incl. image gaps

    def row0(b):                                    # first scratch row of image b
        return pad + b * (N + gap)

    # --- zero only the rows the per-conv builds never rewrite ------------------
    # (top/bottom slack, inter-image gaps, and per image the s=0 / s=N-1 rows whose
    #  kw=0 / kw=2 lane slices are always zero-by-padding).
    zero_blocks = [(0, pad), (pad + M_ext, pad)]
    for b in range(n_img):
        zero_blocks += [(row0(b), 1), (row0(b) + N - 1, 1)]
        if b + 1 < n_img:
            zero_blocks.append((row0(b) + N, gap))
    for start, size in zero_blocks:
        buf_ref[pl.ds(start, size), :] = jnp.zeros((size, 3 * C), buf_ref.dtype)

    # --- the only masks left: column (dx) validity, baked in at build time -----
    col = jax.lax.broadcasted_iota(jnp.int32, (N, 1), 0) % W
    not_last_col = col != (W - 1)      # token is a valid dx = -1 source for row s+1
    not_first_col = col != 0           # token is a valid dx = +1 source for row s-1

    def build_inputs(get_img):
        # Write the kw-stacked activation of every image of this step into buf_ref.
        for b in range(n_img):
            r = row0(b)
            a = get_img(b).astype(buf_ref.dtype)                      # (N, C) bf16
            buf_ref[pl.ds(r, N), pl.ds(C, C)] = a                     # kw=1 (dx= 0)
            buf_ref[pl.ds(r + 1, N), pl.ds(0, C)] = jnp.where(        # kw=0 (dx=-1)
                not_last_col, a, jnp.zeros_like(a))
            buf_ref[pl.ds(r - 1, N), pl.ds(2 * C, C)] = jnp.where(    # kw=2 (dx=+1)
                not_first_col, a, jnp.zeros_like(a))

    def conv3x3_relu(w_ref, b_ref):
        # 3 fat MXU matmuls (K = 3*C) spanning all images (+ gap rows) of this step.
        acc = b_ref[...].astype(jnp.float32)                          # (1, C)
        for kh in range(3):
            lhs = buf_ref[pl.ds(pad + (kh - 1) * W, M_ext), :]        # (M_ext, 3C) bf16
            acc = acc + jnp.dot(lhs, w_ref[kh],
                                preferred_element_type=jnp.float32)
        return jnp.maximum(acc, 0.0)                                  # (M_ext, C) f32

    build_inputs(lambda b: x_ref[b])
    h1 = conv3x3_relu(w1_ref, b1_ref)
    build_inputs(lambda b: h1[b * (N + gap): b * (N + gap) + N])      # skip gap rows
    h2 = conv3x3_relu(w2_ref, b2_ref)

    # Residual + final ReLU.  x is re-read here instead of being held live across
    # both convs (vreg pressure); garbage gap rows of h2 are simply never written out.
    for b in range(n_img):
        s = b * (N + gap)
        out_ref[b] = jnp.maximum(h2[s:s + N] + x_ref[b], 0.0).astype(out_ref.dtype)


# -----------------------------------------------------------------------------
# Wrapper
# -----------------------------------------------------------------------------
def _stack_conv_weight(w_oihw):
    """(C_out, C_in, 3, 3) PyTorch layout -> (3, 3*C_in, C_out): [kh, kw*C_in+ci, co]."""
    co, ci, kh, kw = w_oihw.shape
    w = jnp.transpose(w_oihw, (2, 3, 1, 0))        # (kh, kw, ci, co)
    return w.reshape(kh, kw * ci, co).astype(jnp.bfloat16)


def residual_block_forward(x_nchw, params, *, grid_b=1):
    """Fused ResidualBlock forward.

    grid_b: number of grid steps the batch is split into.  1 (default) folds the
    whole batch into one fat set of matmuls (best on single-TensorCore v5e/v6e);
    2 keeps a 2-way "parallel" axis so v7x's two TensorCores both get work.
    """
    B, C, H, W = x_nchw.shape
    assert B % grid_b == 0
    n_img = B // grid_b
    N = H * W
    pad = gap = ((W + 15) // 16) * 16              # >= W, multiple of 16 (bf16 sublanes)
    M_ext = n_img * N + (n_img - 1) * gap
    rows = pad + M_ext + pad

    # NCHW -> (B, N, C): tokens on sublanes, channels on lanes (layout glue only).
    x_tok = x_nchw.reshape(B, C, N).transpose(0, 2, 1)

    w1 = _stack_conv_weight(params["w1"])          # (3, 3C, C) bf16
    w2 = _stack_conv_weight(params["w2"])
    b1 = params["b1"].reshape(1, C).astype(jnp.float32)
    b2 = params["b2"].reshape(1, C).astype(jnp.float32)

    tok_spec = pl.BlockSpec((n_img, N, C), lambda g: (g, 0, 0))
    w_spec = pl.BlockSpec((3, 3 * C, C), lambda g: (0, 0, 0))
    b_spec = pl.BlockSpec((1, C), lambda g: (0, 0))

    flops = 2 * B * N * 9 * 2 * C * C              # two 3x3 convs
    bytes_accessed = (2 * x_tok.size * 4 + (w1.size + w2.size) * 2
                      + (b1.size + b2.size) * 4)

    out_tok = pl.pallas_call(
        functools.partial(_residual_block_kernel, H=H, W=W, n_img=n_img,
                          gap=gap, pad=pad),
        out_shape=jax.ShapeDtypeStruct((B, N, C), jnp.float32),
        grid_spec=pltpu.PrefetchScalarGridSpec(
            num_scalar_prefetch=0,
            grid=(grid_b,),
            in_specs=[tok_spec, w_spec, b_spec, w_spec, b_spec],
            out_specs=tok_spec,
            scratch_shapes=[pltpu.VMEM((rows, 3 * C), jnp.bfloat16)]),
        compiler_params=pltpu.CompilerParams(
            dimension_semantics=("parallel",)),
        cost_estimate=pl.CostEstimate(flops=flops, transcendentals=0,
                                      bytes_accessed=bytes_accessed),
    )(x_tok, w1, b1, w2, b2)

    # (B, N, C) -> (B, C, H, W)
    return out_tok.transpose(0, 2, 1).reshape(B, C, H, W)


# -----------------------------------------------------------------------------
# References (pure JAX, mirror the PyTorch forward op-for-op)
# -----------------------------------------------------------------------------
def reference_forward(x, params, *, quantize=False):
    # quantize=True rounds matmul operands to bf16 exactly like the kernel does,
    # isolating structural correctness from bf16 rounding.
    if quantize:
        cast = lambda a: a.astype(jnp.bfloat16).astype(jnp.float32)
    else:
        cast = lambda a: a

    def conv(h, w, b):
        y = jax.lax.conv_general_dilated(
            cast(h), cast(w), window_strides=(1, 1), padding=((1, 1), (1, 1)),
            dimension_numbers=("NCHW", "OIHW", "NCHW"),
            precision=jax.lax.Precision.HIGHEST)
        return y + b.reshape(1, -1, 1, 1)

    h1 = jax.nn.relu(conv(x, params["w1"], params["b1"]))
    h2 = jax.nn.relu(conv(h1, params["w2"], params["b2"]))
    return jax.nn.relu(h2 + x)


def make_params(key, C):
    k1, k2, k3, k4 = jax.random.split(key, 4)
    s = 0.1
    return {
        "w1": s * jax.random.normal(k1, (C, C, 3, 3), jnp.float32),   # OIHW, like nn.Conv2d
        "b1": s * jax.random.normal(k2, (C,), jnp.float32),
        "w2": s * jax.random.normal(k3, (C, C, 3, 3), jnp.float32),
        "b2": s * jax.random.normal(k4, (C,), jnp.float32),
    }


if __name__ == "__main__":
    B, C, H, W = 2, 64, 16, 16          # in_channels == out_channels (residual add)

    key = jax.random.PRNGKey(0)
    kx, kp = jax.random.split(key)
    x = jax.random.normal(kx, (B, C, H, W), jnp.float32)
    params = make_params(kp, C)

    ref_q = np.asarray(reference_forward(x, params, quantize=True))
    ref_f = np.asarray(reference_forward(x, params, quantize=False))

    # grid_b=1: full batch fold (single step, v5e/v6e); grid_b=2: 2-way parallel (v7x).
    for grid_b in (1, 2):
        out = jax.block_until_ready(residual_block_forward(x, params, grid_b=grid_b))
        assert out.shape == (B, C, H, W), out.shape
        out_np = np.asarray(out)

        # 1) Structural check vs bf16-operand / f32-accumulate reference (tight).
        err_q = float(np.max(np.abs(out_np - ref_q)))
        assert np.allclose(out_np, ref_q, atol=2e-2, rtol=2e-2), \
            f"structural mismatch (grid_b={grid_b}), max abs err = {err_q}"

        # 2) End-to-end check vs the full-f32 reference (loose: bf16 operand rounding).
        err_f = float(np.max(np.abs(out_np - ref_f)))
        assert np.allclose(out_np, ref_f, atol=2e-1, rtol=2e-1), \
            f"f32 mismatch (grid_b={grid_b}), max abs err = {err_f}"

    print("KERNEL_OK")
</pallas_src>

<mosaic_0001>
module attributes {stable_mosaic.version = 11 : i64} {
  func.func @_residual_block_kernel(%arg0: i32, %arg1: memref<2x256x64xf32, #tpu.memory_space<vmem>>, %arg2: memref<3x192x64xbf16, #tpu.memory_space<vmem>>, %arg3: memref<1x64xf32, #tpu.memory_space<vmem>>, %arg4: memref<3x192x64xbf16, #tpu.memory_space<vmem>>, %arg5: memref<1x64xf32, #tpu.memory_space<vmem>>, %arg6: memref<2x256x64xf32, #tpu.memory_space<vmem>>, %arg7: memref<560x192xbf16, #tpu.memory_space<vmem>>) attributes {dimension_semantics = [#tpu.dimension_semantics<parallel>], iteration_bounds = array<i64: 1>, scalar_prefetch = 0 : i64, scratch_operands = 1 : i64, tpu.core_type = #tpu.core_type<tc>, window_params = [{transform_indices = @transform_0, window_bounds = array<i64: 2, 256, 64>}, {pipeline_mode = #tpu.pipeline_mode<synchronous>, transform_indices = @transform_1, window_bounds = array<i64: 3, 192, 64>}, {pipeline_mode = #tpu.pipeline_mode<synchronous>, transform_indices = @transform_2, window_bounds = array<i64: 1, 64>}, {pipeline_mode = #tpu.pipeline_mode<synchronous>, transform_indices = @transform_3, window_bounds = array<i64: 3, 192, 64>}, {pipeline_mode = #tpu.pipeline_mode<synchronous>, transform_indices = @transform_4, window_bounds = array<i64: 1, 64>}, {transform_indices = @transform_5, window_bounds = array<i64: 2, 256, 64>}]} {
    %cst = arith.constant 0.000000e+00 : bf16
    %0 = vector.broadcast %cst : bf16 to vector<16x192xbf16>
    %c0 = arith.constant 0 : index
    %c0_0 = arith.constant 0 : index
    %1 = vector.load %arg7[%c0, %c0_0] : memref<560x192xbf16, #tpu.memory_space<vmem>>, vector<16x192xbf16>
    tpu.vector_store %arg7[%c0, %c0_0], %0 {strides = array<i32>} : memref<560x192xbf16, #tpu.memory_space<vmem>>, vector<16x192xbf16>,
    %cst_1 = arith.constant 0.000000e+00 : bf16
    %2 = vector.broadcast %cst_1 : bf16 to vector<16x192xbf16>
    %c544 = arith.constant 544 : index
    %c0_2 = arith.constant 0 : index
    %3 = vector.load %arg7[%c544, %c0_2] : memref<560x192xbf16, #tpu.memory_space<vmem>>, vector<16x192xbf16>
    tpu.vector_store %arg7[%c544, %c0_2], %2 {strides = array<i32>} : memref<560x192xbf16, #tpu.memory_space<vmem>>, vector<16x192xbf16>,
    %cst_3 = arith.constant 0.000000e+00 : bf16
    %4 = vector.broadcast %cst_3 : bf16 to vector<1x192xbf16>
    %c16 = arith.constant 16 : index
    %c0_4 = arith.constant 0 : index
    %5 = vector.load %arg7[%c16, %c0_4] : memref<560x192xbf16, #tpu.memory_space<vmem>>, vector<1x192xbf16>
    tpu.vector_store %arg7[%c16, %c0_4], %4 {strides = array<i32>} : memref<560x192xbf16, #tpu.memory_space<vmem>>, vector<1x192xbf16>,
    %cst_5 = arith.constant 0.000000e+00 : bf16
    %6 = vector.broadcast %cst_5 : bf16 to vector<1x192xbf16>
    %c271 = arith.constant 271 : index
    %c0_6 = arith.constant 0 : index
    %7 = vector.load %arg7[%c271, %c0_6] : memref<560x192xbf16, #tpu.memory_space<vmem>>, vector<1x192xbf16>
    tpu.vector_store %arg7[%c271, %c0_6], %6 {strides = array<i32>} : memref<560x192xbf16, #tpu.memory_space<vmem>>, vector<1x192xbf16>,
    %cst_7 = arith.constant 0.000000e+00 : bf16
    %8 = vector.broadcast %cst_7 : bf16 to vector<16x192xbf16>
    %c272 = arith.constant 272 : index
    %c0_8 = arith.constant 0 : index
    %9 = vector.load %arg7[%c272, %c0_8] : memref<560x192xbf16, #tpu.memory_space<vmem>>, vector<16x192xbf16>
    tpu.vector_store %arg7[%c272, %c0_8], %8 {strides = array<i32>} : memref<560x192xbf16, #tpu.memory_space<vmem>>, vector<16x192xbf16>,
    %cst_9 = arith.constant 0.000000e+00 : bf16
    %10 = vector.broadcast %cst_9 : bf16 to vector<1x192xbf16>
    %c288 = arith.constant 288 : index
    %c0_10 = arith.constant 0 : index
    %11 = vector.load %arg7[%c288, %c0_10] : memref<560x192xbf16, #tpu.memory_space<vmem>>, vector<1x192xbf16>
    tpu.vector_store %arg7[%c288, %c0_10], %10 {strides = array<i32>} : memref<560x192xbf16, #tpu.memory_space<vmem>>, vector<1x192xbf16>,
    %cst_11 = arith.constant 0.000000e+00 : bf16
    %12 = vector.broadcast %cst_11 : bf16 to vector<1x192xbf16>
    %c543 = arith.constant 543 : index
    %c0_12 = arith.constant 0 : index
    %13 = vector.load %arg7[%c543, %c0_12] : memref<560x192xbf16, #tpu.memory_space<vmem>>, vector<1x192xbf16>
    tpu.vector_store %arg7[%c543, %c0_12], %12 {strides = array<i32>} : memref<560x192xbf16, #tpu.memory_space<vmem>>, vector<1x192xbf16>,
    %14 = tpu.iota {dimensions = array<i32: 0>} : vector<256x1xi32>
    %c16_i32 = arith.constant 16 : i32
    %c0_i32 = arith.constant 0 : i32
    %15 = arith.cmpi eq, %c16_i32, %c0_i32 : i32
    %c1_i32 = arith.constant 1 : i32
    %16 = arith.select %15, %c1_i32, %c16_i32 : i32
    %17 = vector.broadcast %16 : i32 to vector<256x1xi32>
    %18 = arith.remsi %14, %17 : vector<256x1xi32>
    %c0_i32_13 = arith.constant 0 : i32
    %19 = vector.broadcast %c0_i32_13 : i32 to vector<256x1xi32>
    %20 = arith.cmpi ne, %18, %19 : vector<256x1xi32>
    %c0_i32_14 = arith.constant 0 : i32
    %21 = vector.broadcast %c0_i32_14 : i32 to vector<256x1xi32>
    %22 = arith.cmpi slt, %18, %21 : vector<256x1xi32>
    %c0_i32_15 = arith.constant 0 : i32
    %23 = arith.cmpi slt, %16, %c0_i32_15 : i32
    %24 = vector.broadcast %23 : i1 to vector<256x1xi1>
    %25 = vector.broadcast %24 : vector<256x1xi1> to vector<256x1xi1>
    %26 = arith.xori %22, %25 : vector<256x1xi1>
    %27 = arith.andi %26, %20 : vector<256x1xi1>
    %28 = vector.broadcast %16 : i32 to vector<256x1xi32>
    %29 = arith.addi %18, %28 : vector<256x1xi32>
    %30 = arith.select %27, %29, %18 : vector<256x1xi1>, vector<256x1xi32>
    %c15_i32 = arith.constant 15 : i32
    %31 = vector.broadcast %c15_i32 : i32 to vector<256x1xi32>
    %32 = arith.cmpi ne, %30, %31 : vector<256x1xi32>
    %c0_i32_16 = arith.constant 0 : i32
    %33 = vector.broadcast %c0_i32_16 : i32 to vector<256x1xi32>
    %34 = arith.cmpi ne, %30, %33 : vector<256x1xi32>
    %c0_17 = arith.constant 0 : index
    %c0_18 = arith.constant 0 : index
    %c0_19 = arith.constant 0 : index
    %35 = vector.load %arg1[%c0_17, %c0_18, %c0_19] : memref<2x256x64xf32, #tpu.memory_space<vmem>>, vector<1x256x64xf32>
    %36 = vector.shape_cast %35 : vector<1x256x64xf32> to vector<256x64xf32>
    %37 = arith.truncf %36 : vector<256x64xf32> to vector<256x64xbf16>
    %c16_20 = arith.constant 16 : index
    %c64 = arith.constant 64 : index
    %38 = vector.load %arg7[%c16_20, %c64] : memref<560x192xbf16, #tpu.memory_space<vmem>>, vector<256x64xbf16>
    tpu.vector_store %arg7[%c16_20, %c64], %37 {strides = array<i32>} : memref<560x192xbf16, #tpu.memory_space<vmem>>, vector<256x64xbf16>,
    %cst_21 = arith.constant 0.000000e+00 : bf16
    %39 = vector.broadcast %cst_21 : bf16 to vector<256x64xbf16>
    %40 = vector.shape_cast %32 : vector<256x1xi1> to vector<256x1xi1>
    %41 = vector.broadcast %40 : vector<256x1xi1> to vector<256x64xi1>
    %42 = arith.select %41, %37, %39 : vector<256x64xi1>, vector<256x64xbf16>
    %c17 = arith.constant 17 : index
    %c0_22 = arith.constant 0 : index
    %43 = vector.load %arg7[%c17, %c0_22] : memref<560x192xbf16, #tpu.memory_space<vmem>>, vector<256x64xbf16>
    tpu.vector_store %arg7[%c17, %c0_22], %42 {strides = array<i32>} : memref<560x192xbf16, #tpu.memory_space<vmem>>, vector<256x64xbf16>,
    %cst_23 = arith.constant 0.000000e+00 : bf16
    %44 = vector.broadcast %cst_23 : bf16 to vector<256x64xbf16>
    %45 = vector.shape_cast %34 : vector<256x1xi1> to vector<256x1xi1>
    %46 = vector.broadcast %45 : vector<256x1xi1> to vector<256x64xi1>
    %47 = arith.select %46, %37, %44 : vector<256x64xi1>, vector<256x64xbf16>
    %c15 = arith.constant 15 : index
    %c128 = arith.constant 128 : index
    %48 = vector.load %arg7[%c15, %c128] : memref<560x192xbf16, #tpu.memory_space<vmem>>, vector<256x64xbf16>
    tpu.vector_store %arg7[%c15, %c128], %47 {strides = array<i32>} : memref<560x192xbf16, #tpu.memory_space<vmem>>, vector<256x64xbf16>,
    %c1 = arith.constant 1 : index
    %c0_24 = arith.constant 0 : index
    %c0_25 = arith.constant 0 : index
    %49 = vector.load %arg1[%c1, %c0_24, %c0_25] : memref<2x256x64xf32, #tpu.memory_space<vmem>>, vector<1x256x64xf32>
    %50 = vector.shape_cast %49 : vector<1x256x64xf32> to vector<256x64xf32>
    %51 = arith.truncf %50 : vector<256x64xf32> to vector<256x64xbf16>
    %c288_26 = arith.constant 288 : index
    %c64_27 = arith.constant 64 : index
    %52 = vector.load %arg7[%c288_26, %c64_27] : memref<560x192xbf16, #tpu.memory_space<vmem>>, vector<256x64xbf16>
    tpu.vector_store %arg7[%c288_26, %c64_27], %51 {strides = array<i32>} : memref<560x192xbf16, #tpu.memory_space<vmem>>, vector<256x64xbf16>,
    %cst_28 = arith.constant 0.000000e+00 : bf16
    %53 = vector.broadcast %cst_28 : bf16 to vector<256x64xbf16>
    %54 = vector.shape_cast %32 : vector<256x1xi1> to vector<256x1xi1>
    %55 = vector.broadcast %54 : vector<256x1xi1> to vector<256x64xi1>
    %56 = arith.select %55, %51, %53 : vector<256x64xi1>, vector<256x64xbf16>
    %c289 = arith.constant 289 : index
    %c0_29 = arith.constant 0 : index
    %57 = vector.load %arg7[%c289, %c0_29] : memref<560x192xbf16, #tpu.memory_space<vmem>>, vector<256x64xbf16>
    tpu.vector_store %arg7[%c289, %c0_29], %56 {strides = array<i32>} : memref<560x192xbf16, #tpu.memory_space<vmem>>, vector<256x64xbf16>,
    %cst_30 = arith.constant 0.000000e+00 : bf16
    %58 = vector.broadcast %cst_30 : bf16 to vector<256x64xbf16>
    %59 = vector.shape_cast %34 : vector<256x1xi1> to vector<256x1xi1>
    %60 = vector.broadcast %59 : vector<256x1xi1> to vector<256x64xi1>
    %61 = arith.select %60, %51, %58 : vector<256x64xi1>, vector<256x64xbf16>
    %c287 = arith.constant 287 : index
    %c128_31 = arith.constant 128 : index
    %62 = vector.load %arg7[%c287, %c128_31] : memref<560x192xbf16, #tpu.memory_space<vmem>>, vector<256x64xbf16>
    tpu.vector_store %arg7[%c287, %c128_31], %61 {strides = array<i32>} : memref<560x192xbf16, #tpu.memory_space<vmem>>, vector<256x64xbf16>,
    %c0_32 = arith.constant 0 : index
    %c0_33 = arith.constant 0 : index
    %63 = vector.load %arg3[%c0_32, %c0_33] : memref<1x64xf32, #tpu.memory_space<vmem>>, vector<1x64xf32>
    %c0_34 = arith.constant 0 : index
    %c0_35 = arith.constant 0 : index
    %64 = vector.load %arg7[%c0_34, %c0_35] : memref<560x192xbf16, #tpu.memory_space<vmem>>, vector<528x192xbf16>
    %c0_36 = arith.constant 0 : index
    %c0_37 = arith.constant 0 : index
    %c0_38 = arith.constant 0 : index
    %65 = vector.load %arg2[%c0_36, %c0_37, %c0_38] : memref<3x192x64xbf16, #tpu.memory_space<vmem>>, vector<1x192x64xbf16>
    %66 = vector.shape_cast %65 : vector<1x192x64xbf16> to vector<192x64xbf16>
    %cst_39 = arith.constant dense<0.000000e+00> : vector<528x64xf32>
    %67 = tpu.matmul %64, %66, %cst_39 {dimension_numbers = #tpu.dot_dimension_numbers<[1], [0], [0], [1], [0, 0, 1, 1], [], []>} : vector<528x192xbf16>, vector<192x64xbf16>, vector<528x64xf32> -> vector<528x64xf32>
    %68 = vector.broadcast %63 : vector<1x64xf32> to vector<528x64xf32>
    %69 = arith.addf %68, %67 : vector<528x64xf32>
    %c16_40 = arith.constant 16 : index
    %c0_41 = arith.constant 0 : index
    %70 = vector.load %arg7[%c16_40, %c0_41] : memref<560x192xbf16, #tpu.memory_space<vmem>>, vector<528x192xbf16>
    %c1_42 = arith.constant 1 : index
    %c0_43 = arith.constant 0 : index
    %c0_44 = arith.constant 0 : index
    %71 = vector.load %arg2[%c1_42, %c0_43, %c0_44] : memref<3x192x64xbf16, #tpu.memory_space<vmem>>, vector<1x192x64xbf16>
    %72 = vector.shape_cast %71 : vector<1x192x64xbf16> to vector<192x64xbf16>
    %cst_45 = arith.constant dense<0.000000e+00> : vector<528x64xf32>
    %73 = tpu.matmul %70, %72, %cst_45 {dimension_numbers = #tpu.dot_dimension_numbers<[1], [0], [0], [1], [0, 0, 1, 1], [], []>} : vector<528x192xbf16>, vector<192x64xbf16>, vector<528x64xf32> -> vector<528x64xf32>
    %74 = arith.addf %69, %73 : vector<528x64xf32>
    %c32 = arith.constant 32 : index
    %c0_46 = arith.constant 0 : index
    %75 = vector.load %arg7[%c32, %c0_46] : memref<560x192xbf16, #tpu.memory_space<vmem>>, vector<528x192xbf16>
    %c2 = arith.constant 2 : index
    %c0_47 = arith.constant 0 : index
    %c0_48 = arith.constant 0 : index
    %76 = vector.load %arg2[%c2, %c0_47, %c0_48] : memref<3x192x64xbf16, #tpu.memory_space<vmem>>, vector<1x192x64xbf16>
    %77 = vector.shape_cast %76 : vector<1x192x64xbf16> to vector<192x64xbf16>
    %cst_49 = arith.constant dense<0.000000e+00> : vector<528x64xf32>
    %78 = tpu.matmul %75, %77, %cst_49 {dimension_numbers = #tpu.dot_dimension_numbers<[1], [0], [0], [1], [0, 0, 1, 1], [], []>} : vector<528x192xbf16>, vector<192x64xbf16>, vector<528x64xf32> -> vector<528x64xf32>
    %79 = arith.addf %74, %78 : vector<528x64xf32>
    %cst_50 = arith.constant 0.000000e+00 : f32
    %80 = vector.broadcast %cst_50 : f32 to vector<528x64xf32>
    %81 = arith.maximumf %79, %80 : vector<528x64xf32>
    %82 = vector.extract_strided_slice %81 {offsets = [0, 0], sizes = [256, 64], strides = [1, 1]} : vector<528x64xf32> to vector<256x64xf32>
    %83 = arith.truncf %82 : vector<256x64xf32> to vector<256x64xbf16>
    %c16_51 = arith.constant 16 : index
    %c64_52 = arith.constant 64 : index
    %84 = vector.load %arg7[%c16_51, %c64_52] : memref<560x192xbf16, #tpu.memory_space<vmem>>, vector<256x64xbf16>
    tpu.vector_store %arg7[%c16_51, %c64_52], %83 {strides = array<i32>} : memref<560x192xbf16, #tpu.memory_space<vmem>>, vector<256x64xbf16>,
    %cst_53 = arith.constant 0.000000e+00 : bf16
    %85 = vector.broadcast %cst_53 : bf16 to vector<256x64xbf16>
    %86 = vector.shape_cast %32 : vector<256x1xi1> to vector<256x1xi1>
    %87 = vector.broadcast %86 : vector<256x1xi1> to vector<256x64xi1>
    %88 = arith.select %87, %83, %85 : vector<256x64xi1>, vector<256x64xbf16>
    %c17_54 = arith.constant 17 : index
    %c0_55 = arith.constant 0 : index
    %89 = vector.load %arg7[%c17_54, %c0_55] : memref<560x192xbf16, #tpu.memory_space<vmem>>, vector<256x64xbf16>
    tpu.vector_store %arg7[%c17_54, %c0_55], %88 {strides = array<i32>} : memref<560x192xbf16, #tpu.memory_space<vmem>>, vector<256x64xbf16>,
    %cst_56 = arith.constant 0.000000e+00 : bf16
    %90 = vector.broadcast %cst_56 : bf16 to vector<256x64xbf16>
    %91 = vector.shape_cast %34 : vector<256x1xi1> to vector<256x1xi1>
    %92 = vector.broadcast %91 : vector<256x1xi1> to vector<256x64xi1>
    %93 = arith.select %92, %83, %90 : vector<256x64xi1>, vector<256x64xbf16>
    %c15_57 = arith.constant 15 : index
    %c128_58 = arith.constant 128 : index
    %94 = vector.load %arg7[%c15_57, %c128_58] : memref<560x192xbf16, #tpu.memory_space<vmem>>, vector<256x64xbf16>
    tpu.vector_store %arg7[%c15_57, %c128_58], %93 {strides = array<i32>} : memref<560x192xbf16, #tpu.memory_space<vmem>>, vector<256x64xbf16>,
    %95 = vector.extract_strided_slice %81 {offsets = [272, 0], sizes = [256, 64], strides = [1, 1]} : vector<528x64xf32> to vector<256x64xf32>
    %96 = arith.truncf %95 : vector<256x64xf32> to vector<256x64xbf16>
    %c288_59 = arith.constant 288 : index
    %c64_60 = arith.constant 64 : index
    %97 = vector.load %arg7[%c288_59, %c64_60] : memref<560x192xbf16, #tpu.memory_space<vmem>>, vector<256x64xbf16>
    tpu.vector_store %arg7[%c288_59, %c64_60], %96 {strides = array<i32>} : memref<560x192xbf16, #tpu.memory_space<vmem>>, vector<256x64xbf16>,
    %cst_61 = arith.constant 0.000000e+00 : bf16
    %98 = vector.broadcast %cst_61 : bf16 to vector<256x64xbf16>
    %99 = vector.shape_cast %32 : vector<256x1xi1> to vector<256x1xi1>
    %100 = vector.broadcast %99 : vector<256x1xi1> to vector<256x64xi1>
    %101 = arith.select %100, %96, %98 : vector<256x64xi1>, vector<256x64xbf16>
    %c289_62 = arith.constant 289 : index
    %c0_63 = arith.constant 0 : index
    %102 = vector.load %arg7[%c289_62, %c0_63] : memref<560x192xbf16, #tpu.memory_space<vmem>>, vector<256x64xbf16>
    tpu.vector_store %arg7[%c289_62, %c0_63], %101 {strides = array<i32>} : memref<560x192xbf16, #tpu.memory_space<vmem>>, vector<256x64xbf16>,
    %cst_64 = arith.constant 0.000000e+00 : bf16
    %103 = vector.broadcast %cst_64 : bf16 to vector<256x64xbf16>
    %104 = vector.shape_cast %34 : vector<256x1xi1> to vector<256x1xi1>
    %105 = vector.broadcast %104 : vector<256x1xi1> to vector<256x64xi1>
    %106 = arith.select %105, %96, %103 : vector<256x64xi1>, vector<256x64xbf16>
    %c287_65 = arith.constant 287 : index
    %c128_66 = arith.constant 128 : index
    %107 = vector.load %arg7[%c287_65, %c128_66] : memref<560x192xbf16, #tpu.memory_space<vmem>>, vector<256x64xbf16>
    tpu.vector_store %arg7[%c287_65, %c128_66], %106 {strides = array<i32>} : memref<560x192xbf16, #tpu.memory_space<vmem>>, vector<256x64xbf16>,
    %c0_67 = arith.constant 0 : index
    %c0_68 = arith.constant 0 : index
    %108 = vector.load %arg5[%c0_67, %c0_68] : memref<1x64xf32, #tpu.memory_space<vmem>>, vector<1x64xf32>
    %c0_69 = arith.constant 0 : index
    %c0_70 = arith.constant 0 : index
    %109 = vector.load %arg7[%c0_69, %c0_70] : memref<560x192xbf16, #tpu.memory_space<vmem>>, vector<528x192xbf16>
    %c0_71 = arith.constant 0 : index
    %c0_72 = arith.constant 0 : index
    %c0_73 = arith.constant 0 : index
    %110 = vector.load %arg4[%c0_71, %c0_72, %c0_73] : memref<3x192x64xbf16, #tpu.memory_space<vmem>>, vector<1x192x64xbf16>
    %111 = vector.shape_cast %110 : vector<1x192x64xbf16> to vector<192x64xbf16>
    %cst_74 = arith.constant dense<0.000000e+00> : vector<528x64xf32>
    %112 = tpu.matmul %109, %111, %cst_74 {dimension_numbers = #tpu.dot_dimension_numbers<[1], [0], [0], [1], [0, 0, 1, 1], [], []>} : vector<528x192xbf16>, vector<192x64xbf16>, vector<528x64xf32> -> vector<528x64xf32>
    %113 = vector.broadcast %108 : vector<1x64xf32> to vector<528x64xf32>
    %114 = arith.addf %113, %112 : vector<528x64xf32>
    %c16_75 = arith.constant 16 : index
    %c0_76 = arith.constant 0 : index
    %115 = vector.load %arg7[%c16_75, %c0_76] : memref<560x192xbf16, #tpu.memory_space<vmem>>, vector<528x192xbf16>
    %c1_77 = arith.constant 1 : index
    %c0_78 = arith.constant 0 : index
    %c0_79 = arith.constant 0 : index
    %116 = vector.load %arg4[%c1_77, %c0_78, %c0_79] : memref<3x192x64xbf16, #tpu.memory_space<vmem>>, vector<1x192x64xbf16>
    %117 = vector.shape_cast %116 : vector<1x192x64xbf16> to vector<192x64xbf16>
    %cst_80 = arith.constant dense<0.000000e+00> : vector<528x64xf32>
    %118 = tpu.matmul %115, %117, %cst_80 {dimension_numbers = #tpu.dot_dimension_numbers<[1], [0], [0], [1], [0, 0, 1, 1], [], []>} : vector<528x192xbf16>, vector<192x64xbf16>, vector<528x64xf32> -> vector<528x64xf32>
    %119 = arith.addf %114, %118 : vector<528x64xf32>
    %c32_81 = arith.constant 32 : index
    %c0_82 = arith.constant 0 : index
    %120 = vector.load %arg7[%c32_81, %c0_82] : memref<560x192xbf16, #tpu.memory_space<vmem>>, vector<528x192xbf16>
    %c2_83 = arith.constant 2 : index
    %c0_84 = arith.constant 0 : index
    %c0_85 = arith.constant 0 : index
    %121 = vector.load %arg4[%c2_83, %c0_84, %c0_85] : memref<3x192x64xbf16, #tpu.memory_space<vmem>>, vector<1x192x64xbf16>
    %122 = vector.shape_cast %121 : vector<1x192x64xbf16> to vector<192x64xbf16>
    %cst_86 = arith.constant dense<0.000000e+00> : vector<528x64xf32>
    %123 = tpu.matmul %120, %122, %cst_86 {dimension_numbers = #tpu.dot_dimension_numbers<[1], [0], [0], [1], [0, 0, 1, 1], [], []>} : vector<528x192xbf16>, vector<192x64xbf16>, vector<528x64xf32> -> vector<528x64xf32>
    %124 = arith.addf %119, %123 : vector<528x64xf32>
    %cst_87 = arith.constant 0.000000e+00 : f32
    %125 = vector.broadcast %cst_87 : f32 to vector<528x64xf32>
    %126 = arith.maximumf %124, %125 : vector<528x64xf32>
    %127 = vector.extract_strided_slice %126 {offsets = [0, 0], sizes = [256, 64], strides = [1, 1]} : vector<528x64xf32> to vector<256x64xf32>
    %c0_88 = arith.constant 0 : index
    %c0_89 = arith.constant 0 : index
    %c0_90 = arith.constant 0 : index
    %128 = vector.load %arg1[%c0_88, %c0_89, %c0_90] : memref<2x256x64xf32, #tpu.memory_space<vmem>>, vector<1x256x64xf32>
    %129 = vector.shape_cast %128 : vector<1x256x64xf32> to vector<256x64xf32>
    %130 = arith.addf %127, %129 : vector<256x64xf32>
    %cst_91 = arith.constant 0.000000e+00 : f32
    %131 = vector.broadcast %cst_91 : f32 to vector<256x64xf32>
    %132 = arith.maximumf %130, %131 : vector<256x64xf32>
    %c0_92 = arith.constant 0 : index
    %c0_93 = arith.constant 0 : index
    %c0_94 = arith.constant 0 : index
    %133 = vector.load %arg6[%c0_92, %c0_93, %c0_94] : memref<2x256x64xf32, #tpu.memory_space<vmem>>, vector<1x256x64xf32>
    %134 = vector.shape_cast %133 : vector<1x256x64xf32> to vector<256x64xf32>
    %135 = vector.shape_cast %132 : vector<256x64xf32> to vector<1x256x64xf32>
    tpu.vector_store %arg6[%c0_92, %c0_93, %c0_94], %135 {strides = array<i32>} : memref<2x256x64xf32, #tpu.memory_space<vmem>>, vector<1x256x64xf32>,
    %136 = vector.extract_strided_slice %126 {offsets = [272, 0], sizes = [256, 64], strides = [1, 1]} : vector<528x64xf32> to vector<256x64xf32>
    %c1_95 = arith.constant 1 : index
    %c0_96 = arith.constant 0 : index
    %c0_97 = arith.constant 0 : index
    %137 = vector.load %arg1[%c1_95, %c0_96, %c0_97] : memref<2x256x64xf32, #tpu.memory_space<vmem>>, vector<1x256x64xf32>
    %138 = vector.shape_cast %137 : vector<1x256x64xf32> to vector<256x64xf32>
    %139 = arith.addf %136, %138 : vector<256x64xf32>
    %cst_98 = arith.constant 0.000000e+00 : f32
    %140 = vector.broadcast %cst_98 : f32 to vector<256x64xf32>
    %141 = arith.maximumf %139, %140 : vector<256x64xf32>
    %c1_99 = arith.constant 1 : index
    %c0_100 = arith.constant 0 : index
    %c0_101 = arith.constant 0 : index
    %142 = vector.load %arg6[%c1_99, %c0_100, %c0_101] : memref<2x256x64xf32, #tpu.memory_space<vmem>>, vector<1x256x64xf32>
    %143 = vector.shape_cast %142 : vector<1x256x64xf32> to vector<256x64xf32>
    %144 = vector.shape_cast %141 : vector<256x64xf32> to vector<1x256x64xf32>
    tpu.vector_store %arg6[%c1_99, %c0_100, %c0_101], %144 {strides = array<i32>} : memref<2x256x64xf32, #tpu.memory_space<vmem>>, vector<1x256x64xf32>,
    return
  }
  func.func @transform_0(%arg0: i32) -> (i32, i32, i32) {
    %c0_i32 = arith.constant 0 : i32
    %c0_i32_0 = arith.constant 0 : i32
    %c0_i32_1 = arith.constant 0 : i32
    return %arg0, %c0_i32, %c0_i32_0 : i32, i32, i32
  }
  func.func @transform_1(%arg0: i32) -> (i32, i32, i32) {
    %c0_i32 = arith.constant 0 : i32
    %c0_i32_0 = arith.constant 0 : i32
    %c0_i32_1 = arith.constant 0 : i32
    %c0_i32_2 = arith.constant 0 : i32
    return %c0_i32, %c0_i32_0, %c0_i32_1 : i32, i32, i32
  }
  func.func @transform_2(%arg0: i32) -> (i32, i32) {
    %c0_i32 = arith.constant 0 : i32
    %c0_i32_0 = arith.constant 0 : i32
    %c0_i32_1 = arith.constant 0 : i32
    return %c0_i32, %c0_i32_0 : i32, i32
  }
  func.func @transform_3(%arg0: i32) -> (i32, i32, i32) {
    %c0_i32 = arith.constant 0 : i32
    %c0_i32_0 = arith.constant 0 : i32
    %c0_i32_1 = arith.constant 0 : i32
    %c0_i32_2 = arith.constant 0 : i32
    return %c0_i32, %c0_i32_0, %c0_i32_1 : i32, i32, i32
  }
  func.func @transform_4(%arg0: i32) -> (i32, i32) {
    %c0_i32 = arith.constant 0 : i32
    %c0_i32_0 = arith.constant 0 : i32
    %c0_i32_1 = arith.constant 0 : i32
    return %c0_i32, %c0_i32_0 : i32, i32
  }
  func.func @transform_5(%arg0: i32) -> (i32, i32, i32) {
    %c0_i32 = arith.constant 0 : i32
    %c0_i32_0 = arith.constant 0 : i32
    %c0_i32_1 = arith.constant 0 : i32
    return %arg0, %c0_i32, %c0_i32_0 : i32, i32, i32
  }
}

</mosaic_0001>

<bundles_post_ra>
// kernel: tpu_custom_call.1
= control target key start
LH: loop header
LB: loop body
LE: loop exit
PB: predicated region body
PF: predicated region fallthrough
CT: control target
= control target key end

     0   :  { %vm11793_vm0 = vcmask 523264   ;;  %v11818_v0 = vmov 0   ;;  %v64_v1 = vlaneseq  ;;  %vm11789_vm1 = vsmask.f32 256  ;;  %v36_v5 = vld [vmem:[#allocation2 + $0x18] sm:$0x1]  ;;  %s11782_s0 = inlined_call_operand.vmem [shape: f32[2,256,64], index: 0, kind: input, shape index: {}]   ;;  %s11783_s1 = inlined_call_operand.vmem [shape: bf16[3,192,64], index: 1, kind: input, shape index: {}]   ;;  %s11784_s3 = inlined_call_operand.vmem [shape: bf16[3,192,64], index: 3, kind: input, shape index: {}]   ;;  %s11785_s2 = inlined_call_operand.vmem [shape: f32[1,64], index: 2, kind: input, shape index: {}]   ;;  %s11786_s4 = inlined_call_operand.vmem [shape: f32[1,64], index: 4, kind: input, shape index: {}]   ;;  %s11787_s5 = inlined_call_operand.vmem [shape: f32[2,256,64], index: 5, kind: output, shape index: {}]  }
   0x1   :  { %25 = vst.msk [vmem:[#allocation2 + $0x8] sm:$0xff] %vm11793_vm0, %v11818_v0  ;;  %v545_v2 = vld [vmem:[%s11782_s0] sm:$0xff]  ;;  %v546_v3 = vld [vmem:[%s11782_s0 + $0x8] sm:$0xff]  ;;  %23 = vst [vmem:[#allocation2] sm:$0xff] %v11818_v0  ;;  %vm34_vm2 = vcmask 516096   ;;  %2178 = vmatprep.subr.bf16.mxu0 %v11818_v0  ;;  %5027 = vmatprep.subr.bf16.mxu1 %v11818_v0  ;;  %v11945_v8 = vmov 0 }
   0x2   :  { %26 = vst [vmem:[#allocation2 + $0x220] sm:$0xff] %v11818_v0  ;;  %27 = vst.msk [vmem:[#allocation2 + $0x228] sm:$0xff] %vm11793_vm0, %v11818_v0  ;;  %v8228_v4 = vpack.c.bf16 %v546_v3, %v545_v2  ;;  %v547_v6 = vld [vmem:[%s11782_s0 + $0x10] sm:$0xff]  ;;  %v8233_v7 = vshrl.u32 %v64_v1, 7  ;;  %v548_v9 = vld [vmem:[%s11782_s0 + $0x18] sm:$0xff]  ;;  %vm8179_vm4 = vmmov 1  }
   0x3   :  { %50 = vst [vmem:[#allocation2 + $0x110] sm:$0xff] %v11818_v0  ;;  %51 = vst.msk [vmem:[#allocation2 + $0x118] sm:$0xff] %vm11793_vm0, %v11818_v0  ;;  %v549_v10 = vld [vmem:[%s11782_s0 + $0x20] sm:$0xff]  ;;  %s8180_s28 = smov 64   ;;  %v8250_v12 = vpack.c.bf16 %v548_v9, %v547_v6  ;;  %v550_v13 = vld [vmem:[%s11782_s0 + $0x28] sm:$0xff]  ;;  %vm45_vm11 = vcmask 523271  }
   0x4   :  { %vm8236_vm3 = vmand %vm34_vm2, %vm11789_vm1  ;;  %609 = vrot.lane.b32.xlu0 %v8228_v4, %s8180_s28  ;;  %v101_v14 = vand.u32 15, %v8233_v7  ;;  %v67_v15 = vadd.s32 16, %v8233_v7  ;;  %v69_v16 = vadd.s32 32, %v8233_v7  ;;  %v8258_v17 = vpack.c.bf16 %v550_v13, %v549_v10  ;;  %v551_v22 = vld [vmem:[%s11782_s0 + $0x30] sm:$0xff]  ;;  %v552_v23 = vld [vmem:[%s11782_s0 + $0x38] sm:$0xff] }
   0x5   :  { %v11946_v8 = vsel %vm8236_vm3, 4294967295, %v11945_v8  ;;  %vm738_vm5 = vmpackc.low %vm8179_vm4, %vm8179_vm4  ;;  %v37_v11 = vsel %vm8236_vm3, 0, %v36_v5  ;;  %v71_v21 = vadd.s32 48, %v8233_v7  ;;  %v66_v24 = vadd.s32 8, %v8233_v7  ;;  %v8098_v29 = vld [vmem:[%s11783_s1] sm:$0xff]   ;;  %v8099_v36 = vld [vmem:[%s11783_s1 + $0x8] sm:$0xff]  }
   0x6   :  { %11947 = vst [vmem:[#allocation3_spill] sm:$0xff] %v11946_v8  ;;  %38 = vst [vmem:[#allocation2 + $0x18] sm:$0x1] %v37_v11  ;;  %vm513_vm6 = vcmp.ne.s32.totalorder %v101_v14, 0  ;;  %v8261_v18 = vsel %vm738_vm5, 65537, %v11818_v0  ;;  %v115_v19 = vand.u32 15, %v67_v15  ;;  %613 = vrot.lane.b32.xlu1 %v8258_v17, %s8180_s28  ;;  %v8281_v28 = vpack.c.bf16 %v552_v23, %v551_v22  ;;  %2179 = vmatpush1.bf16.msra.mxu0 %v8098_v29 }
   0x7   :  { %vm1114_vm7 = vmpackc.low %vm513_vm6, %vm513_vm6  ;;  %v129_v20 = vand.u32 15, %v69_v16  ;;  %vm11788_vm9 = vsmask.f32 7966  ;;  %v11950_v30 = vmov 0  ;;  %v68_v31 = vadd.s32 24, %v8233_v7  ;;  %2180 = vmatprep.subr.bf16.mxu0 %v11818_v0  ;;  %v8100_v49 = vld [vmem:[%s11783_s1 + $0x10] sm:$0xff]  }
   0x8   :  { %611 = vrot.lane.b32.xlu0 %v8250_v12, %s8180_s28  ;;  %v1146_v25 = vsel %vm1114_vm7, 65537, %v11818_v0  ;;  %vm515_vm8 = vcmp.ne.s32.totalorder %v115_v19, 0  ;;  %v143_v32 = vand.u32 15, %v71_v21  ;;  %v108_v33 = vand.u32 15, %v66_v24  ;;  %vm8308_vm15 = vmand %vm45_vm11, %vm11788_vm9  ;;  %v1403_v41 = vld [vmem:[#allocation2 + $0x8] sm:$0x80] }
   0x9   :  { %v6975_v26 = vcombine.low %v1146_v25, %v8261_v18  ;;  %vm8277_vm10 = vcmp.ne.s32.totalorder %v129_v20, 0  ;;  %vm1116_vm13 = vmpackc.low %vm515_vm8, %vm515_vm8  ;;  %v70_v39 = vadd.s32 40, %v8233_v7  ;;  %v11953_v40 = vmov 0  ;;  %v8101_v61 = vld [vmem:[%s11783_s1 + $0x18] sm:$0xff]   ;;  %v553_v3 = vld [vmem:[%s11782_s0 + $0x40] sm:$0xff] }
   0xa   :  { %v1148_v35 = vsel %vm1116_vm13, 65537, %v11818_v0  ;;  %615 = vrot.lane.b32.xlu1 %v8281_v28, %s8180_s28  ;;  %vm1118_vm14 = vmpackc.low %vm8277_vm10, %vm8277_vm10  ;;  %v11954_v40 = vsel %vm8308_vm15, 4294967295, %v11953_v40  ;;  %v122_v44 = vand.u32 15, %v68_v31  ;;  %vm8312_vm2 = vcmp.ne.s32.totalorder %v143_v32, 0  ;;  %2181 = vmatpush1.bf16.msra.mxu0 %v8099_v36  ;;  %v554_v5 = vld [vmem:[%s11782_s0 + $0x48] sm:$0xff]  ;;  %v8102_v20 = vld [vmem:[%s11783_s1 + $0x20] sm:$0xff]  }
   0xb   :  { %vm8286_vm12 = vcmp.ne.s16.totalorder %v6975_v26, 0  ;;  %v6976_v38 = vcombine.low %v1148_v35, %v8261_v18  ;;  %11955 = vst [vmem:[#allocation5_spill] sm:$0xff] %v11954_v40  ;;  %vm8316_vm4 = vcmp.ne.s32.totalorder %v108_v33, 15  ;;  %v11960_v47 = vmov 0  ;;  %2182 = vmatprep.subr.bf16.mxu0 %v11818_v0  ;;  %vm1120_vm7 = vmpackc.low %vm8312_vm2, %vm8312_vm2  ;;  %v555_v24 = vld [vmem:[%s11782_s0 + $0x50] sm:$0xff]  ;;  %v556_v31 = vld [vmem:[%s11782_s0 + $0x58] sm:$0xff] }
   0xc   :  { %v11951_v30 = vsel %vm8286_vm12, 4294967295, %v11950_v30  ;;  %v1242_v34 = vsel %vm8286_vm12, %v8228_v4, 0  ;;  %v1150_v48 = vsel %vm1118_vm14, 65537, %v11818_v0  ;;  %v136_v52 = vand.u32 15, %v70_v39  ;;  %vm739_vm8 = vmpackc.low %vm8316_vm4, %vm8316_vm4  ;;  %v8103_v39 = vld [vmem:[%s11783_s1 + $0x28] sm:$0xff]   ;;  %v8104_v58 = vld [vmem:[%s11783_s1 + $0x30] sm:$0xff]  }
   0xd   :  { %11952 = vst [vmem:[#allocation4_spill] sm:$0xff] %v11951_v30  ;;  %v1260_v37 = vshll.u32 %v1242_v34, 16  ;;  %v1263_v42 = vshrl.u32 %v1242_v34, 16  ;;  %vm8320_vm5 = vcmp.ne.s16.totalorder %v6976_v38, 0  ;;  %v73_v53 = vadd.s32 64, %v8233_v7  ;;  %v8105_v16 = vld [vmem:[%s11783_s1 + $0x38] sm:$0xff]  }
   0xe   :  { %v11961_v47 = vsel %vm8320_vm5, 4294967295, %v11960_v47  ;;  %v1243_v51 = vsel %vm8320_vm5, %v8250_v12, 0  ;;  %vm11790_vm6 = vsmask.f32 7424  ;;  %v6977_v57 = vcombine.low %v1150_v48, %v8261_v18  ;;  %2183 = vmatpush1.bf16.msra.mxu0 %v8100_v49  ;;  %v557_v49 = vld [vmem:[%s11782_s0 + $0x60] sm:$0xff] }
   0xf   :  { %v1262_v43 = vrot.slane %v1260_v37, 1  ;;  %11962 = vst [vmem:[#allocation6_spill] sm:$0xff] %v11961_v47  ;;  %v1267_v55 = vshll.u32 %v1243_v51, 16  ;;  %v1271_v56 = vshrl.u32 %v1243_v51, 16  ;;  %vm8342_vm10 = vcmp.ne.s32.totalorder %v122_v44, 15  ;;  %2184 = vmatprep.subr.bf16.mxu0 %v11818_v0  ;;  %v561_v46 = vld [vmem:[%s11782_s0 + $0x80] sm:$0xff] }
  0x10   :  { %v72_v60 = vadd.s32 56, %v8233_v7  ;;  %vm8350_vm11 = vcmp.ne.s32.totalorder %v136_v52, 15  ;;  %vm8354_vm13 = vcmp.ne.s16.totalorder %v6977_v57, 0  ;;  %v11967_v63 = vmov 0  ;;  %vm741_vm14 = vmpackc.low %vm8342_vm10, %vm8342_vm10 }
  0x11   :  { %v1404_v50 = vsel %vm8308_vm15, %v1262_v43, %v1403_v41  ;;  %v1265_v54 = vor.u32 %v1263_v42, %v1262_v43  ;;  %v1269_v59 = vrot.slane %v1267_v55, 1  ;;  %v11968_v63 = vsel %vm8354_vm13, 4294967295, %v11967_v63  ;;  %vm743_vm4 = vmpackc.low %vm8350_vm11, %vm8350_vm11 }
  0x12   :  { %1405 = vst [vmem:[#allocation2 + $0x8] sm:$0x80] %v1404_v50  ;;  %11969 = vst [vmem:[#allocation7_spill] sm:$0xff] %v11968_v63  ;;  %v1152_v1 = vsel %vm1120_vm7, 65537, %v11818_v0  ;;  %v157_v2 = vand.u32 15, %v73_v53  ;;  %v771_v6 = vsel %vm739_vm8, 65537, %v11818_v0  ;;  %v8380_v19 = vpack.c.bf16 %v554_v5, %v553_v3  ;;  %2185 = vmatpush1.bf16.msra.mxu0 %v8101_v61 }
  0x13   :  { %v1270_v9 = vsel %vm11790_vm6, %v1265_v54, %v1269_v59  ;;  %v1244_v10 = vsel %vm8354_vm13, %v8258_v17, 0  ;;  %v1273_v11 = vor.u32 %v1271_v56, %v1269_v59  ;;  %v6978_v15 = vcombine.low %v1152_v1, %v8261_v18  ;;  %2186 = vmatprep.subr.bf16.mxu0 %v11818_v0  ;;  %v558_v50 = vld [vmem:[%s11782_s0 + $0x68] sm:$0xff] }
  0x14   :  { %1406 = vst.msk [vmem:[#allocation2 + $0x18] sm:$0xff] %vm11793_vm0, %v1270_v9  ;;  %v1275_v13 = vshll.u32 %v1244_v10, 16  ;;  %v1279_v14 = vshrl.u32 %v1244_v10, 16  ;;  %vm8376_vm2 = vcmp.ne.s32.totalorder %v157_v2, 0  ;;  %v150_v22 = vand.u32 15, %v72_v60  ;;  %617 = vrot.lane.b32.xlu0 %v8380_v19, %s8180_s28 }
  0x15   :  { %vm8388_vm7 = vcmp.ne.s16.totalorder %v6978_v15, 0  ;;  %v11972_v23 = vmov 0  ;;  %v6959_v25 = vcombine.low %v8261_v18, %v771_v6  ;;  %v773_v26 = vsel %vm741_vm14, 65537, %v11818_v0  ;;  %vm1122_vm8 = vmpackc.low %vm8376_vm2, %vm8376_vm2 }
  0x16   :  { %v1277_v21 = vrot.slane %v1275_v13, 1  ;;  %v11973_v23 = vsel %vm8388_vm7, 4294967295, %v11972_v23  ;;  %v1245_v27 = vsel %vm8388_vm7, %v8281_v28, 0  ;;  %v75_v29 = vadd.s32 80, %v8233_v7  ;;  %2187 = vmatpush1.bf16.msra.mxu0 %v8102_v20 }
  0x17   :  { %11974 = vst [vmem:[#allocation8_spill] sm:$0xff] %v11973_v23  ;;  %v1283_v34 = vshll.u32 %v1245_v27, 16  ;;  %v74_v35 = vadd.s32 72, %v8233_v7  ;;  %v775_v36 = vsel %vm743_vm4, 65537, %v11818_v0  ;;  %v1154_v37 = vsel %vm1122_vm8, 65537, %v11818_v0  ;;  %2188 = vmatprep.subr.bf16.mxu0 %v11818_v0 }
  0x18   :  { %v1278_v32 = vsel %vm11790_vm6, %v1273_v11, %v1277_v21  ;;  %v1281_v33 = vor.u32 %v1279_v14, %v1277_v21  ;;  %v171_v38 = vand.u32 15, %v75_v29  ;;  %v1287_v42 = vshrl.u32 %v1245_v27, 16  ;;  %v559_v29 = vld [vmem:[%s11782_s0 + $0x70] sm:$0xff] }
  0x19   :  { %1407 = vst.msk [vmem:[#allocation2 + $0x28] sm:$0xff] %vm11793_vm0, %v1278_v32  ;;  %v1285_v41 = vrot.slane %v1283_v34, 1  ;;  %v6979_v43 = vcombine.low %v1154_v37, %v8261_v18  ;;  %v8429_v44 = vpack.c.bf16 %v556_v31, %v555_v24  ;;  %v6960_v45 = vcombine.low %v8261_v18, %v773_v26  ;;  %v1918_v11 = vld [vmem:[#allocation2 + $0x8] sm:$0xff]  ;;  %v560_v31 = vld [vmem:[%s11782_s0 + $0x78] sm:$0xff] }
  0x1a   :  { %vm8433_vm10 = vcmp.ne.s32.totalorder %v171_v38, 0  ;;  %v77_v48 = vadd.s32 96, %v8233_v7  ;;  %vm8444_vm11 = vcmp.ne.s16.totalorder %v6959_v25, 0  ;;  %v11977_v51 = vmov 0  ;;  %2189 = vmatpush1.bf16.msra.mxu0 %v8103_v39  ;;  %7035 = vmatprep.mubr.msk.bf16.mxu0 %vm11793_vm0, %v1918_v11 }
  0x1b   :  { %v11978_v51 = vsel %vm8444_vm11, 4294967295, %v11977_v51  ;;  %v6961_v52 = vcombine.low %v8261_v18, %v775_v36  ;;  %v1286_v53 = vsel %vm11790_vm6, %v1281_v33, %v1285_v41  ;;  %vm8450_vm14 = vcmp.ne.s16.totalorder %v6979_v43, 0  ;;  %vm1124_vm2 = vmpackc.low %vm8433_vm10, %vm8433_vm10  ;;  %619 = vrot.lane.b32.xlu1 %v8429_v44, %s8180_s28  ;;  %2190 = vmatprep.subr.bf16.mxu0 %v11818_v0 }
  0x1c   :  { %11979 = vst [vmem:[#allocation9_spill] sm:$0xff] %v11978_v51  ;;  %v11980_v54 = vmov 0  ;;  %vm8459_vm4 = vcmp.ne.s32.totalorder %v150_v22, 15  ;;  %1408 = vst.msk [vmem:[#allocation2 + $0x38] sm:$0xff] %vm11793_vm0, %v1286_v53  ;;  %v164_v56 = vand.u32 15, %v74_v35  ;;  %v1246_v57 = vsel %vm8450_vm14, %v8380_v19, 0 }
  0x1d   :  { %v11981_v54 = vsel %vm8450_vm14, 4294967295, %v11980_v54  ;;  %v1289_v59 = vor.u32 %v1287_v42, %v1285_v41  ;;  %v1291_v60 = vshll.u32 %v1246_v57, 16  ;;  %v1156_v61 = vsel %vm1124_vm2, 65537, %v11818_v0  ;;  %vm11999_vm2 = vmpackc.low %vm8459_vm4, %vm8459_vm4  ;;  %v562_v53 = vld [vmem:[%s11782_s0 + $0x88] sm:$0xff] }
  0x1e   :  { %11982 = vst [vmem:[#allocation10_spill] sm:$0xff] %v11981_v54  ;;  %v185_v62 = vand.u32 15, %v77_v48  ;;  %v8475_v1 = vsel %vm8444_vm11, %v8228_v4, 0  ;;  %vm8477_vm8 = vcmp.ne.s16.totalorder %v6960_v45, 0  ;;  %v11985_v2 = vmov 0  ;;  %2191 = vmatpush1.bf16.msra.mxu0 %v8104_v58 }
  0x1f   :  { %v11986_v2 = vsel %vm8477_vm8, 4294967295, %v11985_v2  ;;  %v1295_v3 = vshrl.u32 %v1246_v57, 16  ;;  %v6980_v5 = vcombine.low %v1156_v61, %v8261_v18  ;;  %vm8482_vm10 = vcmp.ne.s16.totalorder %v6961_v52, 0  ;;  %2192 = vmatprep.subr.bf16.mxu0 %v11818_v0 }
  0x20   :  { %11987 = vst [vmem:[#allocation11_spill] sm:$0xff] %v11986_v2  ;;  %v11988_v6 = vmov 0  ;;  %v1293_v9 = vrot.slane %v1291_v60, 1  ;;  %vm8489_vm9 = vcmp.ne.s32.totalorder %v185_v62, 0  ;;  %v8493_v4 = vpack.c.bf16 %v558_v50, %v557_v49  ;;  %v8107_v62 = vld [vmem:[%s11783_s1 + $0x48] sm:$0xff]  }
  0x21   :  { %v11989_v6 = vsel %vm8482_vm10, 4294967295, %v11988_v6  ;;  %vm8495_vm1 = vcmp.ne.s32.totalorder %v164_v56, 15  ;;  %vm8499_vm6 = vcmp.ne.s16.totalorder %v6980_v5, 0  ;;  %v11995_v14 = vmov 0  ;;  %vm12000_vm4 = vmpackc.low %vm8489_vm9, %vm8489_vm9  ;;  %v9970_v47 = vld [vmem:[#allocation2 + $0x28] sm:$0xff] }
  0x22   :  { %11990 = vst [vmem:[#allocation12_spill] sm:$0xff] %v11989_v6  ;;  %v11996_v14 = vsel %vm8499_vm6, 4294967295, %v11995_v14  ;;  %v79_v15 = vadd.s32 112, %v8233_v7  ;;  %v883_v20 = vshrl.u32 %v8475_v1, 16  ;;  %v8515_v21 = vsel %vm8477_vm8, %v8250_v12, 0  ;;  %621 = vrot.lane.b32.xlu0 %v8493_v4, %s8180_s28  ;;  %2193 = vmatpush1.bf16.msra.mxu0 %v8105_v16 }
  0x23   :  { %11997 = vst [vmem:[#allocation13_spill] sm:$0xff] %v11996_v14  ;;  %vm11998_vm11 = vsmask.f32 7424  ;;  %v1247_v24 = vsel %vm8499_vm6, %v8429_v44, 0  ;;  %v777_v25 = vsel %vm11999_vm2, 65537, %v11818_v0  ;;  %v1297_v12 = vor.u32 %v1295_v3, %v1293_v9  ;;  %2194 = vmatprep.subr.bf16.mxu0 %v11818_v0 }
  0x24   :  { %v1294_v22 = vsel %vm11998_vm11, %v1289_v59, %v1293_v9  ;;  %v76_v26 = vadd.s32 88, %v8233_v7  ;;  %v1299_v27 = vshll.u32 %v1247_v24, 16  ;;  %v8542_v33 = vsel %vm8482_vm10, %v8258_v17, 0  ;;  %vm747_vm11 = vmpackc.low %vm8495_vm1, %vm8495_vm1  ;;  %v8106_v17 = vld [vmem:[%s11783_s1 + $0x40] sm:$0xff]  }
  0x25   :  { %1409 = vst.msk [vmem:[#allocation2 + $0x48] sm:$0xff] %vm11793_vm0, %v1294_v22  ;;  %v78_v34 = vadd.s32 104, %v8233_v7  ;;  %v1158_v35 = vsel %vm12000_vm4, 65537, %v11818_v0  ;;  %v1303_v37 = vshrl.u32 %v1247_v24, 16  ;;  %v199_v39 = vand.u32 15, %v79_v15 }
  0x26   :  { %v1301_v36 = vrot.slane %v1299_v27, 1  ;;  %v6981_v38 = vcombine.low %v1158_v35, %v8261_v18  ;;  %v890_v41 = vshrl.u32 %v8515_v21, 16  ;;  %v6962_v42 = vcombine.low %v8261_v18, %v777_v25  ;;  %2195 = vmatpush1.bf16.msra.mxu0 %v8106_v17  ;;  %v8108_v25 = vld [vmem:[%s11783_s1 + $0x50] sm:$0xff]  }
  0x27   :  { %v8560_v43 = vpack.c.bf16 %v560_v31, %v559_v29  ;;  %v81_v45 = vadd.s32 128, %v8233_v7  ;;  %v779_v48 = vsel %vm747_vm11, 65537, %v11818_v0  ;;  %v178_v49 = vand.u32 15, %v76_v26  ;;  %2196 = vmatprep.subr.bf16.mxu0 %v11818_v0 }
  0x28   :  { %vm12001_vm1 = vsmask.f32 7424  ;;  %vm8569_vm9 = vcmp.ne.s16.totalorder %v6981_v38, 0  ;;  %v12002_v52 = vmov 0  ;;  %v8576_v55 = vrot.slane %v883_v20, 7 }
  0x29   :  { %v1302_v50 = vsel %vm12001_vm1, %v1297_v12, %v1301_v36  ;;  %v12003_v52 = vsel %vm8569_vm9, 4294967295, %v12002_v52  ;;  %v898_v57 = vshrl.u32 %v8542_v33, 16  ;;  %v1248_v58 = vsel %vm8569_vm9, %v8493_v4, 0  ;;  %623 = vrot.lane.b32.xlu1 %v8560_v43, %s8180_s28 }
  0x2a   :  { %12004 = vst [vmem:[#allocation14_spill] sm:$0xff] %v12003_v52  ;;  %1410 = vst.msk [vmem:[#allocation2 + $0x58] sm:$0xff] %vm11793_vm0, %v1302_v50  ;;  %v1305_v59 = vor.u32 %v1303_v37, %v1301_v36  ;;  %v192_v60 = vand.u32 15, %v78_v34  ;;  %v1307_v61 = vshll.u32 %v1248_v58, 16  ;;  %vm527_vm2 = vcmp.ne.s32.totalorder %v199_v39, 0  ;;  %2197 = vmatpush1.bf16.msra.mxu0 %v8107_v62  ;;  %v563_v36 = vld [vmem:[%s11782_s0 + $0x90] sm:$0xff] }
  0x2b   :  { %vm8589_vm11 = vcmp.ne.s16.totalorder %v6962_v42, 0  ;;  %v12005_v3 = vmov 0  ;;  %v6963_v5 = vcombine.low %v8261_v18, %v779_v48  ;;  %vm1128_vm4 = vmpackc.low %vm527_vm2, %vm527_vm2  ;;  %v213_v9 = vand.u32 15, %v81_v45  ;;  %v564_v37 = vld [vmem:[%s11782_s0 + $0x98] sm:$0xff]  ;;  %2198 = vmatprep.subr.bf16.mxu0 %v11818_v0 }
  0x2c   :  { %v12006_v3 = vsel %vm8589_vm11, 4294967295, %v12005_v3  ;;  %v8594_v10 = vpack.c.bf16 %v562_v53, %v561_v46  ;;  %vm8597_vm1 = vcmp.ne.s32.totalorder %v178_v49, 15  ;;  %v1309_v13 = vrot.slane %v1307_v61, 1  ;;  %v8109_v53 = vld [vmem:[%s11783_s1 + $0x58] sm:$0xff]  }
  0x2d   :  { %12007 = vst [vmem:[#allocation15_spill] sm:$0xff] %v12006_v3  ;;  %v80_v15 = vadd.s32 120, %v8233_v7  ;;  %v1160_v16 = vsel %vm1128_vm4, 65537, %v11818_v0  ;;  %v1311_v20 = vshrl.u32 %v1248_v58, 16  ;;  %vm529_vm0 = vcmp.ne.s32.totalorder %v213_v9, 0  ;;  %vm749_vm8 = vmpackc.low %vm8597_vm1, %vm8597_vm1 }
  0x2e   :  { %v6982_v22 = vcombine.low %v1160_v16, %v8261_v18  ;;  %625 = vrot.lane.b32.xlu0 %v8594_v10, %s8180_s28  ;;  %v83_v24 = vadd.s32 144, %v8233_v7  ;;  %v8610_v12 = vrot.slane %v890_v41, 7  ;;  %vm8612_vm2 = vcmp.ne.s32.totalorder %v192_v60, 15  ;;  %vm1130_vm10 = vmpackc.low %vm529_vm0, %vm529_vm0  ;;  %2199 = vmatpush1.bf16.msra.mxu0 %v8108_v25 }
  0x2f   :  { %vm12012_vm4 = vsmask.f32 7424  ;;  %vm12013_vm9 = vcmask 523264   ;;  %v12014_v31 = vmov 0  ;;  %v1162_v34 = vsel %vm1130_vm10, 65537, %v11818_v0  ;;  %2200 = vmatprep.subr.bf16.mxu0 %v11818_v0 }
  0x30   :  { %v1310_v27 = vsel %vm12012_vm4, %v1305_v59, %v1309_v13  ;;  %vm8622_vm6 = vcmp.ne.s16.totalorder %v6982_v22, 0  ;;  %v227_v35 = vand.u32 15, %v83_v24  ;;  %v8634_v38 = vrot.slane %v898_v57, 7  ;;  %v566_v22 = vld [vmem:[%s11782_s0 + $0xa8] sm:$0xff] }
  0x31   :  { %1411 = vst.msk [vmem:[#allocation2 + $0x68] sm:$0xff] %vm12013_vm9, %v1310_v27  ;;  %v12015_v31 = vsel %vm8622_vm6, 4294967295, %v12014_v31  ;;  %v8639_v39 = vsel %vm8589_vm11, %v8281_v28, 0  ;;  %vm8641_vm0 = vcmp.ne.s16.totalorder %v6963_v5, 0  ;;  %v12017_v17 = vmov 0  ;;  %v8110_v27 = vld [vmem:[%s11783_s1 + $0x60] sm:$0xff]  }
  0x32   :  { %12016 = vst [vmem:[#allocation16_spill] sm:$0xff] %v12015_v31  ;;  %v12018_v17 = vsel %vm8641_vm0, 4294967295, %v12017_v17  ;;  %v1249_v41 = vsel %vm8622_vm6, %v8560_v43, 0  ;;  %v1313_v42 = vor.u32 %v1311_v20, %v1309_v13  ;;  %v206_v45 = vand.u32 15, %v80_v15  ;;  %v565_v20 = vld [vmem:[%s11782_s0 + $0xa0] sm:$0xff]  ;;  %2201 = vmatpush1.bf16.msra.mxu0 %v8109_v53  ;;  %v8112_v15 = vld [vmem:[%s11783_s1 + $0x70] sm:$0xff]  }
  0x33   :  { %12019 = vst [vmem:[#allocation17_spill] sm:$0xff] %v12018_v17  ;;  %v1315_v46 = vshll.u32 %v1249_v41, 16  ;;  %v6983_v48 = vcombine.low %v1162_v34, %v8261_v18  ;;  %v781_v28 = vsel %vm749_vm8, 65537, %v11818_v0  ;;  %v1319_v49 = vshrl.u32 %v1249_v41, 16  ;;  %vm12023_vm8 = vmpackc.low %vm8612_vm2, %vm8612_vm2  ;;  %2805 = vmatprep.subr.bf16.mxu0 %v11818_v0  ;;  %v31_v53 = vld [vmem:[#allocation2 + $0x10] sm:$0x1] }
  0x34   :  { %vm531_vm9 = vcmp.ne.s32.totalorder %v227_v35, 0  ;;  %v8658_v50 = vpack.c.bf16 %v564_v37, %v563_v36  ;;  %v82_v58 = vadd.s32 136, %v8233_v7  ;;  %v12020_v59 = vmov 0 }
  0x35   :  { %v1317_v57 = vrot.slane %v1315_v46, 1  ;;  %vm8664_vm4 = vcmp.ne.s16.totalorder %v6983_v48, 0  ;;  %vm1132_vm10 = vmpackc.low %vm531_vm9, %vm531_vm9  ;;  %v85_v60 = vadd.s32 160, %v8233_v7  ;;  %v906_v61 = vshrl.u32 %v8639_v39, 16  ;;  %v567_v48 = vld [vmem:[%s11782_s0 + $0xb0] sm:$0xff]  ;;  %2211 = vmatmul.mubr.bf16.vlgmr.msra.gmra.mrb[0].mxu0 %v11818_v0 }
  0x36   :  { %v12021_v59 = vsel %vm8664_vm4, 4294967295, %v12020_v59  ;;  %v783_v62 = vsel %vm12023_vm8, 65537, %v11818_v0  ;;  %v1250_v5 = vsel %vm8664_vm4, %v8594_v10, 0  ;;  %v1164_v9 = vsel %vm1132_vm10, 65537, %v11818_v0  ;;  %627 = vrot.lane.b32.xlu1 %v8658_v50, %s8180_s28  ;;  %2806 = vmatpush1.bf16.msra.mxu0 %v8110_v27 }
  0x37   :  { %12022 = vst [vmem:[#allocation18_spill] sm:$0xff] %v12021_v59  ;;  %v8686_v11 = vsel %vm8641_vm0, %v8380_v19, 0  ;;  %v6964_v13 = vcombine.low %v8261_v18, %v781_v28  ;;  %vm8689_vm1 = vcmp.ne.s32.totalorder %v206_v45, 15  ;;  %vm12026_vm2 = vsmask.f32 7424  ;;  %v568_v28 = vld [vmem:[%s11782_s0 + $0xb8] sm:$0xff]  ;;  %2807 = vmatprep.subr.bf16.mxu0 %v11818_v0 }
  0x38   :  { %v1318_v16 = vsel %vm12026_vm2, %v1313_v42, %v1317_v57  ;;  %v1321_v24 = vor.u32 %v1319_v49, %v1317_v57  ;;  %vm12027_vm10 = vcmask 523264   ;;  %v1323_v19 = vshll.u32 %v1250_v5, 16  ;;  %v1920_v49 = vld [vmem:[#allocation2 + $0x18] sm:$0xff]  ;;  %vm12044_vm6 = vmpackc.low %vm8689_vm1, %vm8689_vm1 }
  0x39   :  { %1412 = vst.msk [vmem:[#allocation2 + $0x78] sm:$0xff] %vm12027_vm10, %v1318_v16  ;;  %v1327_v25 = vshrl.u32 %v1250_v5, 16  ;;  %v6984_v26 = vcombine.low %v1164_v9, %v8261_v18  ;;  %v6965_v34 = vcombine.low %v8261_v18, %v783_v62  ;;  %v220_v35 = vand.u32 15, %v82_v58 }
  0x3a   :  { %v84_v36 = vadd.s32 152, %v8233_v7  ;;  %v241_v37 = vand.u32 15, %v85_v60  ;;  %v1325_v41 = vrot.slane %v1323_v19, 1  ;;  %v12028_v42 = vmov 0  ;;  %v8111_v60 = vld [vmem:[%s11783_s1 + $0x68] sm:$0xff]  }
  0x3b   :  { %vm8708_vm9 = vcmp.ne.s16.totalorder %v6984_v26, 0  ;;  %v8712_v45 = vpack.c.bf16 %v566_v22, %v565_v20  ;;  %v87_v46 = vadd.s32 176, %v8233_v7  ;;  %v8736_v62 = vrot.slane %v906_v61, 7  ;;  %2808 = vmatpush1.bf16.msra.mxu0 %v8111_v60 }
  0x3c   :  { %v12029_v42 = vsel %vm8708_vm9, 4294967295, %v12028_v42  ;;  %v1251_v57 = vsel %vm8708_vm9, %v8658_v50, 0  ;;  %vm8728_vm2 = vcmp.ne.s32.totalorder %v241_v37, 0  ;;  %vm12033_vm10 = vsmask.f32 7424  ;;  %2809 = vmatprep.subr.bf16.mxu0 %v11818_v0 }
  0x3d   :  { %12030 = vst [vmem:[#allocation19_spill] sm:$0xff] %v12029_v42  ;;  %v1326_v5 = vsel %vm12033_vm10, %v1321_v24, %v1325_v41  ;;  %v1329_v9 = vor.u32 %v1327_v25, %v1325_v41  ;;  %v1331_v16 = vshll.u32 %v1251_v57, 16  ;;  %vm1134_vm8 = vmpackc.low %vm8728_vm2, %vm8728_vm2  ;;  %629 = vrot.lane.b32.xlu0 %v8712_v45, %s8180_s28  ;;  %v914_v20 = vshrl.u32 %v8686_v11, 16  ;;  %v570_v41 = vld [vmem:[%s11782_s0 + $0xc8] sm:$0xff] }
  0x3e   :  { %vm8745_vm0 = vcmp.ne.s16.totalorder %v6964_v13, 0  ;;  %v12034_v22 = vmov 0  ;;  %vm8749_vm11 = vcmp.ne.s16.totalorder %v6965_v34, 0  ;;  %v12037_v61 = vmov 0 }
  0x3f   :  { %v12035_v22 = vsel %vm8745_vm0, 4294967295, %v12034_v22  ;;  %v12038_v61 = vsel %vm8749_vm11, 4294967295, %v12037_v61  ;;  %vm8753_vm10 = vcmp.ne.s32.totalorder %v220_v35, 15  ;;  %vm12042_vm9 = vcmask 523264   ;;  %2810 = vmatpush1.bf16.msra.mxu0 %v8112_v15 }
  0x40   :  { %12036 = vst [vmem:[#allocation20_spill] sm:$0xff] %v12035_v22  ;;  %12039 = vst [vmem:[#allocation21_spill] sm:$0xff] %v12038_v61  ;;  %v234_v19 = vand.u32 15, %v84_v36  ;;  %v1333_v25 = vrot.slane %v1331_v16, 1  ;;  %v1166_v13 = vsel %vm1134_vm8, 65537, %v11818_v0  ;;  %v255_v26 = vand.u32 15, %v87_v46  ;;  %2811 = vmatprep.subr.bf16.mxu0 %v11818_v0 }
  0x41   :  { %1413 = vst.msk [vmem:[#allocation2 + $0x88] sm:$0xff] %vm12042_vm9, %v1326_v5  ;;  %vm12043_vm2 = vmmov %vm12042_vm9  ;;  %v785_v27 = vsel %vm12044_vm6, 65537, %v11818_v0  ;;  %v1335_v34 = vshrl.u32 %v1251_v57, 16  ;;  %v6985_v35 = vcombine.low %v1166_v13, %v8261_v18  ;;  %v8768_v37 = vpack.c.bf16 %v568_v28, %v567_v48  ;;  %v569_v36 = vld [vmem:[%s11782_s0 + $0xc0] sm:$0xff] }
  0x42   :  { %7036 = vmatprep.mubr.msk.bf16.mxu0 %vm12043_vm2, %v1920_v49  ;;  %vm12045_vm9 = vsmask.f32 7424  ;;  %v86_v49 = vadd.s32 168, %v8233_v7  ;;  %v8784_v48 = vsel %vm8745_vm0, %v8429_v44, 0  ;;  %vm755_vm6 = vmpackc.low %vm8753_vm10, %vm8753_vm10  ;;  %v12047_v28 = vmov 0 }
  0x43   :  { %v1334_v46 = vsel %vm12045_vm9, %v1329_v9, %v1333_v25  ;;  %vm12046_vm1 = vmmov %vm12043_vm2  ;;  %vm8790_vm8 = vcmp.ne.s16.totalorder %v6985_v35, 0  ;;  %vm535_vm2 = vcmp.ne.s32.totalorder %v255_v26, 0  ;;  %631 = vrot.lane.b32.xlu1 %v8768_v37, %s8180_s28  ;;  %v89_v57 = vadd.s32 192, %v8233_v7 }
  0x44   :  { %1414 = vst.msk [vmem:[#allocation2 + $0x98] sm:$0xff] %vm12046_vm1, %v1334_v46  ;;  %v12048_v28 = vsel %vm8790_vm8, 4294967295, %v12047_v28  ;;  %v8801_v44 = vsel %vm8749_vm11, %v8493_v4, 0  ;;  %vm8803_vm9 = vcmp.ne.s32.totalorder %v234_v19, 15  ;;  %v1252_v60 = vsel %vm8790_vm8, %v8712_v45, 0  ;;  %vm1136_vm1 = vmpackc.low %vm535_vm2, %vm535_vm2 }
  0x45   :  { %12049 = vst [vmem:[#allocation22_spill] sm:$0xff] %v12048_v28  ;;  %v8810_v5 = vpack.c.bf16 %v570_v41, %v569_v36  ;;  %v6966_v9 = vcombine.low %v8261_v18, %v785_v27  ;;  %v1337_v16 = vor.u32 %v1335_v34, %v1333_v25  ;;  %v1339_v13 = vshll.u32 %v1252_v60, 16  ;;  %v8113_v25 = vld [vmem:[%s11783_s1 + $0x78] sm:$0xff]   ;;  %vm757_vm10 = vmpackc.low %vm8803_vm9, %vm8803_vm9  ;;  %v6992_v28 = vld [vmem:[%s11782_s0 + $0x108] sm:$0xff] }
  0x46   :  { %v1168_v26 = vsel %vm1136_vm1, 65537, %v11818_v0  ;;  %v787_v4 = vsel %vm755_vm6, 65537, %v11818_v0  ;;  %v248_v19 = vand.u32 15, %v86_v49  ;;  %v1343_v35 = vshrl.u32 %v1252_v60, 16  ;;  %2812 = vmatpush1.bf16.msra.mxu0 %v8113_v25 }
  0x47   :  { %v6986_v46 = vcombine.low %v1168_v26, %v8261_v18  ;;  %633 = vrot.lane.b32.xlu0 %v8810_v5, %s8180_s28  ;;  %v922_v34 = vshrl.u32 %v8784_v48, 16  ;;  %v1341_v24 = vrot.slane %v1339_v13, 1  ;;  %v269_v36 = vand.u32 15, %v89_v57  ;;  %v571_v13 = vld [vmem:[%s11782_s0 + $0xd0] sm:$0xff] }
  0x48   :  { %v8832_v41 = vrot.slane %v914_v20, 7  ;;  %v930_v49 = vshrl.u32 %v8801_v44, 16  ;;  %v12052_v15 = vmov 0  ;;  %v91_v60 = vadd.s32 208, %v8233_v7 }
  0x49   :  { %vm8835_vm6 = vcmp.ne.s16.totalorder %v6986_v46, 0  ;;  %vm8840_vm2 = vcmp.ne.s16.totalorder %v6966_v9, 0  ;;  %v12055_v26 = vmov 0  ;;  %v6967_v58 = vcombine.low %v8261_v18, %v787_v4  ;;  %v572_v46 = vld [vmem:[%s11782_s0 + $0xd8] sm:$0xff] }
  0x4a   :  { %v12053_v15 = vsel %vm8835_vm6, 4294967295, %v12052_v15  ;;  %v12056_v26 = vsel %vm8840_vm2, 4294967295, %v12055_v26  ;;  %vm12058_vm9 = vsmask.f32 7424  ;;  %v1253_v20 = vsel %vm8835_vm6, %v8768_v37, 0 }
  0x4b   :  { %12054 = vst [vmem:[#allocation23_spill] sm:$0xff] %v12053_v15  ;;  %12057 = vst [vmem:[#allocation24_spill] sm:$0xff] %v12056_v26  ;;  %v1342_v57 = vsel %vm12058_vm9, %v1337_v16, %v1341_v24  ;;  %v789_v9 = vsel %vm757_vm10, 65537, %v11818_v0  ;;  %vm8856_vm1 = vcmp.ne.s32.totalorder %v248_v19, 15  ;;  %v1345_v4 = vor.u32 %v1343_v35, %v1341_v24 }
  0x4c   :  { %vm12061_vm9 = vcmask 523264   ;;  %v1347_v16 = vshll.u32 %v1253_v20, 16  ;;  %v8861_v29 = vrot.slane %v922_v34, 7  ;;  %vm537_vm4 = vcmp.ne.s32.totalorder %v269_v36, 0 }
  0x4d   :  { %1415 = vst.msk [vmem:[#allocation2 + $0xa8] sm:$0xff] %vm12061_vm9, %v1342_v57  ;;  %v283_v32 = vand.u32 15, %v91_v60  ;;  %vm12062_vm11 = vsmask.f32 256  ;;  %vm12063_vm0 = vcmask 1040384   ;;  %v12064_v0 = vmov 0  ;;  %vm1138_vm10 = vmpackc.low %vm537_vm4, %vm537_vm4 }
  0x4e   :  { %vm8866_vm6 = vmand %vm12063_vm0, %vm12062_vm11  ;;  %v12067_v19 = vmov 0   ;;  %v8871_v35 = vrot.slane %v930_v49, 7  ;;  %v1349_v57 = vrot.slane %v1347_v16, 1  ;;  %v8874_v25 = vpack.c.bf16 %v572_v46, %v571_v13 }
  0x4f   :  { %v12065_v0 = vsel %vm8866_vm6, 4294967295, %v12064_v0  ;;  %2813 = vmatprep.subr.bf16.mxu0 %v12067_v19  ;;  %v8879_v34 = vsel %vm8840_vm2, %v8560_v43, 0  ;;  %v6968_v36 = vcombine.low %v8261_v18, %v789_v9  ;;  %vm759_vm11 = vmpackc.low %vm8856_vm1, %vm8856_vm1  ;;  %v1170_v49 = vsel %vm1138_vm10, 65537, %v12067_v19 }
  0x50   :  { %12066 = vst [vmem:[#allocation25_spill] sm:$0xff] %v12065_v0  ;;  %vm539_vm0 = vcmp.ne.s32.totalorder %v283_v32, 0  ;;  %vm8886_vm9 = vcmp.ne.s16.totalorder %v6967_v58, 0  ;;  %v12068_v60 = vmov 0  ;;  %vm12071_vm4 = vsmask.f32 7424  ;;  %635 = vrot.lane.b32.xlu1 %v8874_v25, %s8180_s28 }
  0x51   :  { %v12069_v60 = vsel %vm8886_vm9, 4294967295, %v12068_v60  ;;  %v1350_v13 = vsel %vm12071_vm4, %v1345_v4, %v1349_v57  ;;  %v1351_v46 = vshrl.u32 %v1253_v20, 16  ;;  %v6987_v16 = vcombine.low %v1170_v49, %v8261_v18  ;;  %vm1140_vm2 = vmpackc.low %vm539_vm0, %vm539_vm0  ;;  %12316 = vst [vmem:[#allocation25_spill] sm:$0xff] %v9970_v47 }
  0x52   :  { %12070 = vst [vmem:[#allocation26_spill] sm:$0xff] %v12069_v60  ;;  %v88_v43 = vadd.s32 184, %v8233_v7  ;;  %vm12072_vm8 = vcmask 523264   ;;  %v1172_v27 = vsel %vm1140_vm2, 65537, %v12067_v19  ;;  %v32_v32 = vsel %vm8866_vm6, 0, %v31_v53 }
  0x53   :  { %1416 = vst.msk [vmem:[#allocation2 + $0xb8] sm:$0xff] %vm12072_vm8, %v1350_v13  ;;  %v93_v58 = vadd.s32 224, %v8233_v7  ;;  %v938_v9 = vshrl.u32 %v8879_v34, 16  ;;  %v791_v20 = vsel %vm759_vm11, 65537, %v12067_v19  ;;  %vm8902_vm1 = vcmp.ne.s16.totalorder %v6987_v16, 0  ;;  %vm12082_vm11 = vmmov %vm12071_vm4 }
  0x54   :  { %v12073_v4 = vmov 0  ;;  %v6988_v49 = vcombine.low %v1172_v27, %v8261_v18  ;;  %33 = vst [vmem:[#allocation2 + $0x10] sm:$0x1] %v32_v32  ;;  %v8910_v13 = vsel %vm8886_vm9, %v8594_v10, 0  ;;  %vm8912_vm8 = vcmp.ne.s16.totalorder %v6968_v36, 0  ;;  %v8114_v27 = vld [vmem:[%s11783_s1 + $0x80] sm:$0xff]  }
  0x55   :  { %v12074_v4 = vsel %vm8902_vm1, 4294967295, %v12073_v4  ;;  %v12076_v53 = vmov 0  ;;  %v90_v24 = vadd.s32 200, %v8233_v7  ;;  %v1254_v16 = vsel %vm8902_vm1, %v8810_v5, 0  ;;  %v573_v36 = vld [vmem:[%s11782_s0 + $0xe0] sm:$0xff]  ;;  %2814 = vmatpush1.bf16.msra.mxu0 %v8114_v27 }
  0x56   :  { %12075 = vst [vmem:[#allocation27_spill] sm:$0xff] %v12074_v4  ;;  %v12077_v53 = vsel %vm8912_vm8, 4294967295, %v12076_v53  ;;  %v1353_v32 = vor.u32 %v1351_v46, %v1349_v57  ;;  %v1355_v56 = vshll.u32 %v1254_v16, 16  ;;  %v1359_v26 = vshrl.u32 %v1254_v16, 16  ;;  %v47_v60 = vld [vmem:[#allocation2 + $0x108] sm:$0x80]  ;;  %2815 = vmatprep.subr.bf16.mxu0 %v12067_v19 }
  0x57   :  { %12078 = vst [vmem:[#allocation28_spill] sm:$0xff] %v12077_v53  ;;  %vm8923_vm2 = vcmp.ne.s16.totalorder %v6988_v49, 0  ;;  %v12079_v10 = vmov 0  ;;  %v6969_v61 = vcombine.low %v8261_v18, %v791_v20  ;;  %v262_v22 = vand.u32 15, %v88_v43  ;;  %v574_v57 = vld [vmem:[%s11782_s0 + $0xe8] sm:$0xff]  ;;  %v575_v43 = vld [vmem:[%s11782_s0 + $0xf0] sm:$0xff] }
  0x58   :  { %v12080_v10 = vsel %vm8923_vm2, 4294967295, %v12079_v10  ;;  %v1255_v0 = vsel %vm8923_vm2, %v8874_v25, 0  ;;  %v297_v4 = vand.u32 15, %v93_v58  ;;  %v61_v46 = vld [vmem:[#allocation2 + $0x218] sm:$0x80]  ;;  %v8937_v49 = vrot.slane %v938_v9, 7 }
  0x59   :  { %12081 = vst [vmem:[#allocation29_spill] sm:$0xff] %v12080_v10  ;;  %v1357_v17 = vrot.slane %v1355_v56, 1  ;;  %v1363_v3 = vshll.u32 %v1255_v0, 16  ;;  %v576_v58 = vld [vmem:[%s11782_s0 + $0xf8] sm:$0xff]  ;;  %v946_v20 = vshrl.u32 %v8910_v13, 16  ;;  %v8951_v9 = vsel %vm8912_vm8, %v8658_v50, 0 }
  0x5a   :  { %v276_v27 = vand.u32 15, %v90_v24  ;;  %vm541_vm10 = vcmp.ne.s32.totalorder %v297_v4, 0  ;;  %v8954_v15 = vpack.c.bf16 %v574_v57, %v573_v36  ;;  %v6991_v19 = vld [vmem:[%s11782_s0 + $0x100] sm:$0xff]  ;;  %vm8962_vm4 = vcmp.ne.s16.totalorder %v6969_v61, 0 }
  0x5b   :  { %v1358_v56 = vsel %vm12082_vm11, %v1353_v32, %v1357_v17  ;;  %v1361_v16 = vor.u32 %v1359_v26, %v1357_v17  ;;  %v1365_v10 = vrot.slane %v1363_v3, 1  ;;  %vm1142_vm0 = vmpackc.low %vm541_vm10, %vm541_vm10  ;;  %v12083_v50 = vmov 0  ;;  %v8971_v3 = vld [vmem:[#allocation2] sm:$0xff] }
  0x5c   :  { %v12084_v50 = vsel %vm8962_vm4, 4294967295, %v12083_v50  ;;  %vm8966_vm8 = vcmp.ne.s32.totalorder %v262_v22, 15  ;;  %vm12088_vm11 = vcmask 523264   ;;  %v1174_v17 = vsel %vm1142_vm0, 65537, %v8971_v3  ;;  %637 = vrot.lane.b32.xlu0 %v8954_v15, %s8180_s28 }
  0x5d   :  { %12085 = vst [vmem:[#allocation30_spill] sm:$0xff] %v12084_v50  ;;  %1417 = vst.msk [vmem:[#allocation2 + $0xc8] sm:$0xff] %vm12088_vm11, %v1358_v56  ;;  %v48_v26 = vsel %vm8308_vm15, 0, %v47_v60  ;;  %vm12089_vm10 = vsmask.f32 7424  ;;  %v1367_v32 = vshrl.u32 %v1255_v0, 16  ;;  %v6989_v61 = vcombine.low %v1174_v17, %v8261_v18 }
  0x5e   :  { %v1366_v4 = vsel %vm12089_vm10, %v1361_v16, %v1365_v10  ;;  %49 = vst [vmem:[#allocation2 + $0x108] sm:$0x80] %v48_v26  ;;  %v62_v22 = vsel %vm8308_vm15, 0, %v61_v46  ;;  %vm8982_vm11 = vcmp.ne.s32.totalorder %v276_v27, 15  ;;  %vm12092_vm0 = vcmask 523264  }
  0x5f   :  { %1418 = vst.msk [vmem:[#allocation2 + $0xd8] sm:$0xff] %vm12092_vm0, %v1366_v4  ;;  %63 = vst [vmem:[#allocation2 + $0x218] sm:$0x80] %v62_v22  ;;  %v95_v60 = vadd.s32 240, %v8233_v7  ;;  %v96_v0 = vadd.s32 248, %v8233_v7  ;;  %v592_v57 = vpack.c.bf16 %v576_v58, %v575_v43  ;;  %v12093_v16 = vshll.u32 %v8475_v1, 16 }
  0x60   :  { %v92_v17 = vadd.s32 216, %v8233_v7  ;;  %vm8995_vm10 = vcmp.ne.s16.totalorder %v6989_v61, 0  ;;  %v12094_v46 = vmov 0  ;;  %v12097_v27 = vshll.u32 %v8515_v21, 16 }
  0x61   :  { %v8992_v56 = vor.u32 %v12093_v16, %v8576_v55  ;;  %v12095_v46 = vsel %vm8995_vm10, 4294967295, %v12094_v46  ;;  %v1256_v1 = vsel %vm8995_vm10, %v8954_v15, 0  ;;  %v311_v43 = vand.u32 15, %v95_v60  ;;  %639 = vrot.lane.b32.xlu1 %v592_v57, %s8180_s28 }
  0x62   :  { %12096 = vst [vmem:[#allocation31_spill] sm:$0xff] %v12095_v46  ;;  %v895_v26 = vor.u32 %v12097_v27, %v8610_v12  ;;  %v318_v58 = vand.u32 15, %v96_v0  ;;  %v9009_v4 = vpack.c.bf16 %v6992_v28, %v6991_v19  ;;  %v1369_v21 = vor.u32 %v1367_v32, %v1365_v10  ;;  %v7021_v19 = vld [vmem:[%s11782_s0 + $0x1f0] sm:$0xff]  ;;  %v7022_v32 = vld [vmem:[%s11782_s0 + $0x1f8] sm:$0xff] }
  0x63   :  { %v94_v61 = vadd.s32 232, %v8233_v7  ;;  %v1371_v22 = vshll.u32 %v1256_v1, 16  ;;  %vm12099_vm0 = vsmask.f32 256  ;;  %v9019_v27 = vrot.slane %v946_v20, 7 }
  0x64   :  { %12098 = vst [vmem:[#allocation32_spill] sm:$0xff] %v9009_v4  ;;  %v9017_v16 = vsel %vm12099_vm0, %v8576_v55, %v895_v26  ;;  %vm512_vm10 = vcmp.ne.s32.totalorder %v318_v58, 15  ;;  %vm9022_vm2 = vcmp.ne.s32.totalorder %v311_v43, 0  ;;  %1490 = vrot.lane.b32.xlu0 %v9009_v4, %s8180_s28  ;;  %v9032_v7 = vsel %vm8962_vm4, %v8712_v45, 0  ;;  %vm12102_vm0 = vmpackc.low %vm8966_vm8, %vm8966_vm8 }
  0x65   :  { %v9040_v55 = vsel %vm12102_vm0, 65537, %v8971_v3  ;;  %v1373_v20 = vrot.slane %v1371_v22, 1  ;;  %vm769_vm9 = vmpackc.low %vm512_vm10, %vm512_vm10  ;;  %v9063_v0 = vsel %vm8286_vm12, %v9009_v4, 0  ;;  %v12104_v26 = vshll.u32 %v8542_v33, 16 }
  0x66   :  { %vm12103_vm4 = vmpackc.low %vm8982_vm11, %vm8982_vm11  ;;  %v801_v24 = vsel %vm769_vm9, 65537, %v8971_v3  ;;  %v290_v58 = vand.u32 15, %v92_v17  ;;  %v304_v36 = vand.u32 15, %v94_v61  ;;  %vm12105_vm11 = vsmask.f32 7424 }
  0x67   :  { %v9054_v45 = vsel %vm12103_vm4, 65537, %v8971_v3  ;;  %vm1144_vm8 = vmpackc.low %vm9022_vm2, %vm9022_vm2  ;;  %v903_v43 = vor.u32 %v12104_v26, %v8634_v38  ;;  %v1374_v22 = vsel %vm12105_vm11, %v1369_v21, %v1373_v20  ;;  %v6974_v10 = vcombine.low %v8261_v18, %v801_v24  ;;  %v8115_v21 = vld [vmem:[%s11783_s1 + $0x88] sm:$0xff]  }
  0x68   :  { %v1375_v60 = vshrl.u32 %v1256_v1, 16  ;;  %vm12106_vm9 = vcmask 523264   ;;  %v1176_v28 = vsel %vm1144_vm8, 65537, %v8971_v3  ;;  %v9072_v50 = vpack.c.bf16 %v7022_v32, %v7021_v19  ;;  %v1895_v32 = vld [vmem:[#allocation2 + $0x118] sm:$0x80]  ;;  %2816 = vmatpush1.bf16.msra.mxu0 %v8115_v21 }
  0x69   :  { %1419 = vst.msk [vmem:[#allocation2 + $0xe8] sm:$0xff] %vm12106_vm9, %v1374_v22  ;;  %v1752_v30 = vshll.u32 %v9063_v0, 16  ;;  %v6970_v53 = vcombine.low %v8261_v18, %v9040_v55  ;;  %vm9077_vm2 = vcmp.ne.s16.totalorder %v6974_v10, 0  ;;  %v12108_v33 = vmov 0  ;;  %v1047_v10 = vld [vmem:[#allocation2 + $0x110] sm:$0x1]  ;;  %2817 = vmatprep.subr.bf16.mxu0 %v8971_v3 }
  0x6a   :  { %12107 = vst [vmem:[#allocation33_spill] sm:$0xff] %v9072_v50  ;;  %v12109_v33 = vsel %vm9077_vm2, 4294967295, %v12108_v33  ;;  %v6990_v17 = vcombine.low %v1176_v28, %v8261_v18  ;;  %vm12111_vm4 = vsmask.f32 256  ;;  %v6971_v61 = vcombine.low %v8261_v18, %v9054_v45  ;;  %v55_v45 = vld [vmem:[#allocation2 + $0x128] sm:$0x1] }
  0x6b   :  { %12110 = vst [vmem:[#allocation34_spill] sm:$0xff] %v12109_v33  ;;  %v9084_v1 = vsel %vm12111_vm4, %v8610_v12, %v903_v43  ;;  %v881_v55 = vsel %vm9077_vm2, %v592_v57, 0  ;;  %v9093_v19 = vrot.slane %v1752_v30, 1  ;;  %v12112_v24 = vshll.u32 %v8639_v39, 16  ;;  %v6994_v21 = vld [vmem:[%s11782_s0 + $0x118] sm:$0xff]  ;;  %vm12120_vm11 = vmmov %vm12111_vm4 }
  0x6c   :  { %vm9098_vm10 = vcmp.ne.s32.totalorder %v290_v58, 15  ;;  %v1002_v43 = vshrl.u32 %v881_v55, 16  ;;  %v1005_v22 = vshll.u32 %v881_v55, 16  ;;  %vm9102_vm0 = vcmp.ne.s16.totalorder %v6990_v17, 0  ;;  %v6993_v17 = vld [vmem:[%s11782_s0 + $0x110] sm:$0xff]  ;;  %v7002_v30 = vld [vmem:[%s11782_s0 + $0x158] sm:$0xff] }
  0x6d   :  { %v911_v26 = vor.u32 %v12112_v24, %v8736_v62  ;;  %v12115_v28 = vmov 0  ;;  %vm9106_vm8 = vcmp.ne.s32.totalorder %v304_v36, 15  ;;  %v1377_v33 = vor.u32 %v1375_v60, %v1373_v20  ;;  %v6996_v24 = vld [vmem:[%s11782_s0 + $0x128] sm:$0xff] }
  0x6e   :  { %v12116_v28 = vsel %vm9102_vm0, 4294967295, %v12115_v28  ;;  %v1257_v39 = vsel %vm9102_vm0, %v592_v57, 0  ;;  %v1750_v58 = vsel %vm9102_vm0, %v9072_v50, 0  ;;  %v1004_v36 = vrot.slane %v1002_v43, 7  ;;  %v6995_v57 = vld [vmem:[%s11782_s0 + $0x120] sm:$0xff] }
  0x6f   :  { %12117 = vst [vmem:[#allocation35_spill] sm:$0xff] %v12116_v28  ;;  %v1379_v55 = vshll.u32 %v1257_v39, 16  ;;  %v1383_v60 = vshrl.u32 %v1257_v39, 16  ;;  %v1871_v20 = vshll.u32 %v1750_v58, 16  ;;  %v1875_v28 = vshrl.u32 %v1750_v58, 16 }
  0x70   :  { %v1896_v50 = vsel %vm8308_vm15, %v9093_v19, %v1895_v32  ;;  %v9133_v46 = vsel %vm12120_vm11, %v8634_v38, %v911_v26  ;;  %v56_v43 = vsel %vm8236_vm3, 0, %v55_v45  ;;  %v9140_v39 = vor.u32 %v1005_v22, %v1004_v36  ;;  %v6997_v38 = vld [vmem:[%s11782_s0 + $0x130] sm:$0xff]  ;;  %v6998_v32 = vld [vmem:[%s11782_s0 + $0x138] sm:$0xff]  ;;  %vm12123_vm11 = vmmov %vm12106_vm9 }
  0x71   :  { %v1048_v58 = vsel %vm8236_vm3, %v1004_v36, %v1047_v10  ;;  %v1381_v51 = vrot.slane %v1379_v55, 1  ;;  %v9144_v4 = vrot.slane %v1871_v20, 1  ;;  %1897 = vst [vmem:[#allocation2 + $0x118] sm:$0x80] %v1896_v50  ;;  %57 = vst [vmem:[#allocation2 + $0x128] sm:$0x1] %v56_v43  ;;  %v9159_v45 = vpack.c.bf16 %v6994_v21, %v6993_v17 }
  0x72   :  { %12121 = vst [vmem:[#allocation36_spill] sm:$0xff] %v9140_v39  ;;  %1049 = vst [vmem:[#allocation2 + $0x110] sm:$0x1] %v1048_v58  ;;  %vm12122_vm4 = vsmask.f32 7424  ;;  %v12124_v26 = vmov 0  ;;  %v9164_v20 = vpack.c.bf16 %v6996_v24, %v6995_v57 }
  0x73   :  { %vm9154_vm9 = vmand %vm12123_vm11, %vm12122_vm4  ;;  %v1422_v10 = vld [vmem:[#allocation2 + $0x108] sm:$0xff]  ;;  %v1913_v22 = vld [vmem:[#allocation2 + $0x218] sm:$0xff]  ;;  %v1755_v50 = vshrl.u32 %v9063_v0, 16  ;;  %v12127_v36 = vshll.u32 %v8686_v11, 16  ;;  %v1385_v58 = vor.u32 %v1383_v60, %v1381_v51  ;;  %v1877_v40 = vor.u32 %v1875_v28, %v9144_v4  ;;  %1492 = vrot.lane.b32.xlu1 %v9159_v45, %s8180_s28 }
  0x74   :  { %v12125_v26 = vsel %vm9154_vm9, 4294967295, %v12124_v26  ;;  %vm12128_vm0 = vmmov %vm12122_vm4  ;;  %v12129_v8 = vshll.u32 %v8784_v48, 16  ;;  %v1736_v11 = vsel %vm8320_vm5, %v9159_v45, 0  ;;  %1494 = vrot.lane.b32.xlu0 %v9164_v20, %s8180_s28  ;;  %v957_v48 = vshll.u32 %v8951_v9, 16 }
  0x75   :  { %12126 = vst [vmem:[#allocation37_spill] sm:$0xff] %v12125_v26  ;;  %v919_v55 = vor.u32 %v12127_v36, %v8832_v41  ;;  %v1382_v43 = vsel %vm12128_vm0, %v1377_v33, %v1381_v51  ;;  %vm12130_vm4 = vmpackc.low %vm9098_vm10, %vm9098_vm10  ;;  %vm12131_vm0 = vsmask.f32 256  ;;  %vm9192_vm10 = vcmp.ne.s16.totalorder %v6970_v53, 0 }
  0x76   :  { %v927_v39 = vor.u32 %v12129_v8, %v8861_v29  ;;  %v797_v0 = vsel %vm12130_vm4, 65537, %v8971_v3  ;;  %1420 = vst.msk [vmem:[#allocation2 + $0xf8] sm:$0xff] %vm12123_vm11, %v1382_v43  ;;  %v9189_v8 = vpack.c.bf16 %v6998_v32, %v6997_v38  ;;  %v12132_v33 = vmov 0 }
  0x77   :  { %v9185_v51 = vsel %vm12131_vm0, %v8736_v62, %v919_v55  ;;  %v12133_v33 = vsel %vm9192_vm10, 4294967295, %v12132_v33  ;;  %v9198_v12 = vsel %vm9154_vm9, %v1385_v58, %v1422_v10  ;;  %v1914_v28 = vsel %vm9154_vm9, %v1877_v40, %v1913_v22  ;;  %vm767_vm0 = vmpackc.low %vm9106_vm8, %vm9106_vm8  ;;  %v6999_v10 = vld [vmem:[%s11782_s0 + $0x140] sm:$0xff] }
  0x78   :  { %12134 = vst [vmem:[#allocation38_spill] sm:$0xff] %v12133_v33  ;;  %vm9202_vm4 = vcmp.ne.s16.totalorder %v6971_v61, 0  ;;  %v12135_v62 = vmov 0  ;;  %1424 = vst [vmem:[#allocation2 + $0x108] sm:$0xff] %v9198_v12  ;;  %v1757_v53 = vor.u32 %v1755_v50, %v9093_v19  ;;  %v1759_v17 = vshll.u32 %v1736_v11, 16  ;;  %1496 = vrot.lane.b32.xlu1 %v9189_v8, %s8180_s28 }
  0x79   :  { %v12136_v62 = vsel %vm9202_vm4, 4294967295, %v12135_v62  ;;  %1915 = vst [vmem:[#allocation2 + $0x218] sm:$0xff] %v1914_v28  ;;  %v1763_v21 = vshrl.u32 %v1736_v11, 16  ;;  %v962_v60 = vshrl.u32 %v9032_v7, 16  ;;  %v6972_v40 = vcombine.low %v8261_v18, %v797_v0  ;;  %v7001_v0 = vld [vmem:[%s11782_s0 + $0x150] sm:$0xff] }
  0x7a   :  { %12137 = vst [vmem:[#allocation39_spill] sm:$0xff] %v12136_v62  ;;  %v1737_v61 = vsel %vm8354_vm13, %v9164_v20, 0  ;;  %vm12138_vm11 = vsmask.f32 256  ;;  %v9223_v24 = vsel %vm9192_vm10, %v8768_v37, 0  ;;  %v1761_v19 = vrot.slane %v1759_v17, 1 }
  0x7b   :  { %v9218_v57 = vsel %vm12138_vm11, %v8832_v41, %v927_v39  ;;  %v1767_v38 = vshll.u32 %v1737_v61, 16  ;;  %v1771_v32 = vshrl.u32 %v1737_v61, 16  ;;  %v7000_v41 = vld [vmem:[%s11782_s0 + $0x148] sm:$0xff]  ;;  %v9236_v39 = vsel %vm9202_vm4, %v8810_v5, 0 }
  0x7c   :  { %v799_v37 = vsel %vm767_vm0, 65537, %v8971_v3  ;;  %v1738_v22 = vsel %vm8388_vm7, %v9189_v8, 0  ;;  %v12139_v50 = vshll.u32 %v8801_v44, 16  ;;  %vm12140_vm11 = vsmask.f32 7424 }
  0x7d   :  { %v1762_v55 = vsel %vm12140_vm11, %v1757_v53, %v1761_v19  ;;  %v1765_v43 = vor.u32 %v1763_v21, %v1761_v19  ;;  %v1769_v5 = vrot.slane %v1767_v38, 1  ;;  %v1775_v58 = vshll.u32 %v1738_v22, 16 }
  0x7e   :  { %v935_v36 = vor.u32 %v12139_v50, %v8871_v35  ;;  %vm9257_vm8 = vcmp.ne.s16.totalorder %v6972_v40, 0  ;;  %v12141_v11 = vmov 0  ;;  %vm12144_vm9 = vcmask 523264  }
  0x7f   :  { %v12142_v11 = vsel %vm9257_vm8, 4294967295, %v12141_v11  ;;  %1898 = vst.msk [vmem:[#allocation2 + $0x128] sm:$0xff] %vm12144_vm9, %v1762_v55  ;;  %v1779_v44 = vshrl.u32 %v1738_v22, 16  ;;  %vm12145_vm11 = vsmask.f32 256  ;;  %v9266_v53 = vpack.c.bf16 %v7000_v41, %v6999_v10  ;;  %vm12148_vm0 = vmmov %vm12144_vm9 }
  0x80   :  { %12143 = vst [vmem:[#allocation40_spill] sm:$0xff] %v12142_v11  ;;  %v9264_v28 = vsel %vm12145_vm11, %v8861_v29, %v935_v36  ;;  %vm12146_vm7 = vsmask.f32 7424  ;;  %v1773_v21 = vor.u32 %v1771_v32, %v1769_v5  ;;  %v1777_v61 = vrot.slane %v1775_v58, 1  ;;  %v7003_v36 = vld [vmem:[%s11782_s0 + $0x160] sm:$0xff]  ;;  %vm12151_vm9 = vmmov %vm12148_vm0  ;;  %v7006_v58 = vld [vmem:[%s11782_s0 + $0x178] sm:$0xff] }
  0x81   :  { %v1770_v17 = vsel %vm12146_vm7, %v1765_v43, %v1769_v5  ;;  %v12147_v40 = vshll.u32 %v8879_v34, 16  ;;  %v6973_v38 = vcombine.low %v8261_v18, %v799_v37  ;;  %v1739_v22 = vsel %vm8450_vm14, %v9266_v53, 0  ;;  %1498 = vrot.lane.b32.xlu0 %v9266_v53, %s8180_s28 }
  0x82   :  { %1899 = vst.msk [vmem:[#allocation2 + $0x138] sm:$0xff] %vm12148_vm0, %v1770_v17  ;;  %v9279_v29 = vpack.c.bf16 %v7002_v30, %v7001_v0  ;;  %v12149_v32 = vshll.u32 %v8910_v13, 16  ;;  %v12150_v34 = vshrl.u32 %v8951_v9, 16  ;;  %v9288_v18 = vrot.slane %v962_v60, 7  ;;  %vm12152_vm0 = vmmov %vm12145_vm11  ;;  %v7005_v60 = vld [vmem:[%s11782_s0 + $0x170] sm:$0xff] }
  0x83   :  { %v943_v19 = vor.u32 %v12147_v40, %v8937_v49  ;;  %v965_v37 = vshll.u32 %v9032_v7, 16  ;;  %v1778_v50 = vsel %vm12146_vm7, %v1773_v21, %v1777_v61  ;;  %v1781_v55 = vor.u32 %v1779_v44, %v1777_v61  ;;  %v7004_v7 = vld [vmem:[%s11782_s0 + $0x168] sm:$0xff]  ;;  %v610_v44 = vpop.permute.xlu0 %609 }
  0x84   :  { %v951_v10 = vor.u32 %v12149_v32, %v9019_v27  ;;  %v9286_v41 = vrot.slane %v12150_v34, 7  ;;  %1900 = vst.msk [vmem:[#allocation2 + $0x148] sm:$0xff] %vm12151_vm9, %v1778_v50  ;;  %v1783_v43 = vshll.u32 %v1739_v22, 16  ;;  %v1787_v13 = vshrl.u32 %v1739_v22, 16  ;;  %1500 = vrot.lane.b32.xlu1 %v9279_v29, %s8180_s28 }
  0x85   :  { %v9298_v5 = vsel %vm12152_vm0, %v8871_v35, %v943_v19  ;;  %v970_v0 = vshrl.u32 %v9223_v24, 16  ;;  %v978_v35 = vshrl.u32 %v9236_v39, 16  ;;  %v9316_v30 = vsel %vm9257_vm8, %v8874_v25, 0 }
  0x86   :  { %vm12153_vm11 = vnez %v11996_v14  ;;  %vm12154_vm7 = vcmask 1048064   ;;  %vm9322_vm9 = vcmp.ne.s16.totalorder %v6973_v38, 0  ;;  %v12155_v21 = vmov 0  ;;  %v8116_v38 = vld [vmem:[%s11783_s1 + $0x90] sm:$0xff]  }
  0x87   :  { %v1740_v17 = vsel %vm12153_vm11, %v9279_v29, 0  ;;  %658 = vst.msk [vmem:[#allocation2 + $0x10] sm:$0xff] %vm12154_vm7, %v610_v44  ;;  %v12156_v21 = vsel %vm9322_vm9, 4294967295, %v12155_v21  ;;  %v1785_v61 = vrot.slane %v1783_v43, 1  ;;  %v9328_v19 = vsel %vm12152_vm0, %v8937_v49, %v951_v10  ;;  %v612_v9 = vpop.permute.xlu0 %611  ;;  %2818 = vmatpush1.bf16.msra.mxu0 %v8116_v38  ;;  %v1922_v38 = vld [vmem:[#allocation2 + $0x28] sm:$0xff] }
  0x88   :  { %12157 = vst [vmem:[#allocation41_spill] sm:$0xff] %v12156_v21  ;;  %v1791_v40 = vshll.u32 %v1740_v17, 16  ;;  %v1795_v22 = vshrl.u32 %v1740_v17, 16  ;;  %v9330_v25 = vpack.c.bf16 %v7004_v7, %v7003_v36  ;;  %v959_v32 = vor.u32 %v957_v48, %v9286_v41  ;;  %v614_v48 = vpop.permute.xlu1 %613  ;;  %2819 = vmatprep.subr.bf16.mxu0 %v8971_v3 }
  0x89   :  { %v9335_v34 = vpack.c.bf16 %v7006_v58, %v7005_v60  ;;  %vm12158_vm7 = vsmask.f32 7424  ;;  %v1789_v43 = vor.u32 %v1787_v13, %v1785_v61  ;;  %v967_v49 = vor.u32 %v965_v37, %v9288_v18 }
  0x8a   :  { %v1786_v50 = vsel %vm12158_vm7, %v1781_v55, %v1785_v61  ;;  %v1793_v44 = vrot.slane %v1791_v40, 1  ;;  %v973_v10 = vshll.u32 %v9223_v24, 16  ;;  %v9346_v36 = vsel %vm9322_vm9, %v8954_v15, 0  ;;  %1502 = vrot.lane.b32.xlu0 %v9330_v25, %s8180_s28  ;;  %v7007_v15 = vld [vmem:[%s11782_s0 + $0x180] sm:$0xff]  ;;  %v7008_v24 = vld [vmem:[%s11782_s0 + $0x188] sm:$0xff] }
  0x8b   :  { %vm12159_vm0 = vcmask 523264   ;;  %vm12160_vm11 = vnez %v12003_v52  ;;  %vm12161_vm7 = vsmask.f32 256  ;;  %1504 = vrot.lane.b32.xlu1 %v9335_v34, %s8180_s28  ;;  %v9366_v55 = vrot.slane %v970_v0, 7 }
  0x8c   :  { %1901 = vst.msk [vmem:[#allocation2 + $0x158] sm:$0xff] %vm12159_vm0, %v1786_v50  ;;  %v1741_v7 = vsel %vm12160_vm11, %v9330_v25, 0  ;;  %v9356_v37 = vsel %vm12161_vm7, %v9019_v27, %v959_v32  ;;  %v981_v13 = vshll.u32 %v9236_v39, 16  ;;  %v986_v60 = vshrl.u32 %v9316_v30, 16 }
  0x8d   :  { %vm12162_vm0 = vcmask 1048064   ;;  %vm12164_vm11 = vsmask.f32 7424  ;;  %v9373_v58 = vrot.slane %v978_v35, 7  ;;  %vm12165_vm14 = vsmask.f32 7938 }
  0x8e   :  { %659 = vst.msk [vmem:[#allocation2 + $0x20] sm:$0xff] %vm12162_vm0, %v612_v9  ;;  %vm12163_vm7 = vmmov %vm12162_vm0  ;;  %v1794_v27 = vsel %vm12164_vm11, %v1789_v43, %v1793_v44  ;;  %vm12166_vm13 = vcmask 523264   ;;  %v12167_v17 = vmov 0  ;;  %v1797_v39 = vor.u32 %v1795_v22, %v1793_v44  ;;  %v1029_v22 = vld [vmem:[#allocation2 + $0x10] sm:$0xff] }
  0x8f   :  { %660 = vst.msk [vmem:[#allocation2 + $0x30] sm:$0xff] %vm12163_vm7, %v614_v48  ;;  %vm9377_vm5 = vmand %vm12166_vm13, %vm12165_vm14  ;;  %v1799_v0 = vshll.u32 %v1741_v7, 16  ;;  %v1803_v61 = vshrl.u32 %v1741_v7, 16  ;;  %v994_v35 = vshrl.u32 %v9346_v36, 16  ;;  %vm12174_vm14 = vsmask.f32 256  ;;  %v616_v7 = vpop.permute.xlu1 %615 }
  0x90   :  { %v12168_v17 = vsel %vm9377_vm5, 4294967295, %v12167_v17  ;;  %vm12170_vm15 = vmmov %vm12166_vm13  ;;  %v9393_v32 = vsel %vm12174_vm14, %v9286_v41, %v967_v49  ;;  %v9398_v9 = vrot.slane %v986_v60, 7  ;;  %v1030_v48 = vsel %vm9377_vm5, %v8992_v56, %v1029_v22  ;;  %v7009_v49 = vld [vmem:[%s11782_s0 + $0x190] sm:$0xff] }
  0x91   :  { %12169 = vst [vmem:[#allocation42_spill] sm:$0xff] %v12168_v17  ;;  %1032 = vst.msk [vmem:[#allocation2 + $0x20] sm:$0xff] %vm12170_vm15, %v9017_v16  ;;  %v9395_v16 = vpack.c.bf16 %v7008_v24, %v7007_v15  ;;  %v1801_v50 = vrot.slane %v1799_v0, 1  ;;  %v7010_v15 = vld [vmem:[%s11782_s0 + $0x198] sm:$0xff]  ;;  %v997_v56 = vshll.u32 %v9346_v36, 16  ;;  %2219 = vmatmul.mubr.bf16.gmra.mrb[4].mxu0 %v1030_v48  ;;  %v7012_v0 = vld [vmem:[%s11782_s0 + $0x1a8] sm:$0xff]  ;;  %vm12178_vm14 = vnez %v11986_v2 }
  0x92   :  { %vm12171_vm12 = vmmov %vm12166_vm13  ;;  %vm12173_vm13 = vnez %v12015_v31  ;;  %1031 = vst [vmem:[#allocation2 + $0x10] sm:$0xff] %v1030_v48  ;;  %v9432_v36 = vsel %vm12178_vm14, %v9159_v45, 0  ;;  %vm12207_vm14 = vsmask.f32 256 }
  0x93   :  { %1033 = vst.msk [vmem:[#allocation2 + $0x30] sm:$0xff] %vm12171_vm12, %v9084_v1  ;;  %vm12172_vm0 = vmmov %vm12171_vm12  ;;  %v1742_v40 = vsel %vm12173_vm13, %v9335_v34, 0  ;;  %v989_v1 = vshll.u32 %v9316_v30, 16  ;;  %vm12175_vm12 = vnez %v12021_v59  ;;  %1506 = vrot.lane.b32.xlu0 %v9395_v16, %s8180_s28  ;;  %v975_v30 = vor.u32 %v973_v10, %v9366_v55  ;;  %v7011_v10 = vld [vmem:[%s11782_s0 + $0x1a0] sm:$0xff] }
  0x94   :  { %1902 = vst.msk [vmem:[#allocation2 + $0x168] sm:$0xff] %vm12172_vm0, %v1794_v27  ;;  %v1807_v43 = vshll.u32 %v1742_v40, 16  ;;  %v1811_v44 = vshrl.u32 %v1742_v40, 16  ;;  %v1743_v41 = vsel %vm12175_vm12, %v9395_v16, 0  ;;  %vm12176_vm15 = vmmov %vm12163_vm7  ;;  %v1802_v24 = vsel %vm12164_vm11, %v1797_v39, %v1801_v50  ;;  %v42_v59 = vld [vmem:[#allocation2 + $0x100] sm:$0x80] }
  0x95   :  { %661 = vst.msk [vmem:[#allocation2 + $0x40] sm:$0xff] %vm12176_vm15, %v616_v7  ;;  %v1805_v60 = vor.u32 %v1803_v61, %v1801_v50  ;;  %v9424_v40 = vrot.slane %v994_v35, 7  ;;  %vm12177_vm7 = vmmov %vm12172_vm0  ;;  %v1815_v39 = vshll.u32 %v1743_v41, 16  ;;  %vm12180_vm11 = vsmask.f32 256  ;;  %v7013_v35 = vld [vmem:[%s11782_s0 + $0x1b0] sm:$0xff] }
  0x96   :  { %v1809_v27 = vrot.slane %v1807_v43, 1  ;;  %7037 = vmatprep.mubr.msk.bf16.mxu0 %vm12177_vm7, %v1922_v38  ;;  %1034 = vst.msk [vmem:[#allocation2 + $0x40] sm:$0xff] %vm12172_vm0, %v9133_v46  ;;  %vm12179_vm15 = vmmov %vm12172_vm0  ;;  %v9437_v61 = vsel %vm12180_vm11, %v9288_v18, %v975_v30  ;;  %v7014_v46 = vld [vmem:[%s11782_s0 + $0x1b8] sm:$0xff]  ;;  %vm12181_vm7 = vsmask.f32 7424  ;;  %v1819_v45 = vshrl.u32 %v1743_v41, 16 }
  0x97   :  { %1903 = vst.msk [vmem:[#allocation2 + $0x178] sm:$0xff] %vm12179_vm15, %v1802_v24  ;;  %v9446_v50 = vpack.c.bf16 %v7010_v15, %v7009_v49  ;;  %v1817_v43 = vrot.slane %v1815_v39, 1  ;;  %v983_v18 = vor.u32 %v981_v13, %v9373_v58  ;;  %v9450_v48 = vpack.c.bf16 %v7012_v0, %v7011_v10  ;;  %v1924_v24 = vld [vmem:[#allocation2 + $0x38] sm:$0xff]  ;;  %v12186_v39 = vld [vmem:[#allocation9_spill] sm:$0xff] }
  0x98   :  { %v1810_v22 = vsel %vm12181_vm7, %v1805_v60, %v1809_v27  ;;  %v1813_v38 = vor.u32 %v1811_v44, %v1809_v27  ;;  %vm12182_vm15 = vnez %v11989_v6  ;;  %vm12183_vm11 = vnez %v12029_v42  ;;  %v1921_v49 = vld [vmem:[#allocation2 + $0x20] sm:$0xff]  ;;  %v12185_v0 = vld [vmem:[#allocation32_spill] sm:$0xff] }
  0x99   :  { %1904 = vst.msk [vmem:[#allocation2 + $0x188] sm:$0xff] %vm12172_vm0, %v1810_v22  ;;  %v9455_v7 = vsel %vm12182_vm15, %v9164_v20, 0  ;;  %v1744_v30 = vsel %vm12183_vm11, %v9446_v50, 0  ;;  %1508 = vrot.lane.b32.xlu1 %v9446_v50, %s8180_s28  ;;  %v991_v44 = vor.u32 %v989_v1, %v9398_v9  ;;  %v9463_v41 = vpack.c.bf16 %v7014_v46, %v7013_v35  ;;  %1510 = vrot.lane.b32.xlu0 %v9450_v48, %s8180_s28  ;;  %v12188_v22 = vld [vmem:[#allocation22_spill] sm:$0xff]  ;;  %v8122_v6 = vld [vmem:[%s11783_s1 + $0xc0] sm:$0xff]   ;;  %v2543_v2 = vld [vmem:[#allocation2 + $0x10] sm:$0xff] }
  0x9a   :  { %v1578_v13 = vshrl.u32 %v9432_v36, 16  ;;  %v1818_v15 = vsel %vm12181_vm7, %v1813_v38, %v1817_v43  ;;  %v999_v20 = vor.u32 %v997_v56, %v9424_v40  ;;  %v1821_v60 = vor.u32 %v1819_v45, %v1817_v43  ;;  %2227 = vmatmul.mubr.bf16.gmra.mrb[8].mxu0 %v1921_v49 }
  0x9b   :  { %1905 = vst.msk [vmem:[#allocation2 + $0x198] sm:$0xff] %vm12172_vm0, %v1818_v15  ;;  %v1823_v27 = vshll.u32 %v1744_v30, 16  ;;  %v1827_v10 = vshrl.u32 %v1744_v30, 16  ;;  %vm12184_vm11 = vsmask.f32 256  ;;  %vm12187_vm12 = vnez %v12186_v39  ;;  %v8123_v39 = vld [vmem:[%s11783_s1 + $0xc8] sm:$0xff]  }
  0x9c   :  { %v9473_v1 = vsel %vm12184_vm11, %v9366_v55, %v983_v18  ;;  %v9478_v35 = vsel %vm12187_vm12, %v12185_v0, 0  ;;  %v1586_v46 = vshrl.u32 %v9455_v7, 16  ;;  %vm12189_vm7 = vnez %v12188_v22  ;;  %vm12190_vm0 = vmmov %vm12184_vm11  ;;  %v7015_v55 = vld [vmem:[%s11782_s0 + $0x1c0] sm:$0xff]  ;;  %v7016_v18 = vld [vmem:[%s11782_s0 + $0x1c8] sm:$0xff] }
  0x9d   :  { %v1745_v56 = vsel %vm12189_vm7, %v9450_v48, 0  ;;  %v1825_v38 = vrot.slane %v1823_v27, 1  ;;  %v9486_v30 = vsel %vm12190_vm0, %v9373_v58, %v991_v44  ;;  %1512 = vrot.lane.b32.xlu1 %v9463_v41, %s8180_s28  ;;  %vm12191_vm11 = vcmask 523264   ;;  %v12192_v58 = vld [vmem:[#allocation23_spill] sm:$0xff] }
  0x9e   :  { %v1831_v45 = vshll.u32 %v1745_v56, 16  ;;  %v1835_v43 = vshrl.u32 %v1745_v56, 16  ;;  %7038 = vmatprep.mubr.msk.bf16.mxu0 %vm12191_vm11, %v1924_v24  ;;  %v1581_v49 = vshll.u32 %v9432_v36, 16  ;;  %v1589_v15 = vshll.u32 %v9455_v7, 16  ;;  %v12196_v24 = vld [vmem:[#allocation15_spill] sm:$0xff] }
  0x9f   :  { %vm12193_vm0 = vnez %v12192_v58  ;;  %vm12194_vm7 = vsmask.f32 256  ;;  %v9506_v0 = vrot.slane %v1578_v13, 7  ;;  %vm12195_vm13 = vsmask.f32 7424 }
  0xa0   :  { %v1746_v44 = vsel %vm12193_vm0, %v9463_v41, 0  ;;  %v9504_v27 = vsel %vm12194_vm7, %v9398_v9, %v999_v20  ;;  %v1826_v56 = vsel %vm12195_vm13, %v1821_v60, %v1825_v38  ;;  %v1829_v26 = vor.u32 %v1827_v10, %v1825_v38  ;;  %v7017_v9 = vld [vmem:[%s11782_s0 + $0x1d0] sm:$0xff]  ;;  %v52_v10 = vld [vmem:[#allocation2 + $0x120] sm:$0x1] }
  0xa1   :  { %v1833_v22 = vrot.slane %v1831_v45, 1  ;;  %vm12197_vm11 = vnez %v12196_v24  ;;  %vm12198_vm15 = vcmask 523264   ;;  %v1839_v7 = vshll.u32 %v1746_v44, 16  ;;  %v7019_v38 = vld [vmem:[%s11782_s0 + $0x1e0] sm:$0xff]  ;;  %v1923_v45 = vld [vmem:[#allocation2 + $0x30] sm:$0xff] }
  0xa2   :  { %v9512_v36 = vsel %vm12197_vm11, %v9189_v8, 0  ;;  %1906 = vst.msk [vmem:[#allocation2 + $0x1a8] sm:$0xff] %vm12198_vm15, %v1826_v56  ;;  %v1843_v58 = vshrl.u32 %v1746_v44, 16  ;;  %v9515_v42 = vpack.c.bf16 %v7016_v18, %v7015_v55  ;;  %v9520_v13 = vrot.slane %v1586_v46, 7  ;;  %v7018_v8 = vld [vmem:[%s11782_s0 + $0x1d8] sm:$0xff]  ;;  %v618_v55 = vpop.permute.xlu0 %617  ;;  %v12199_v18 = vld [vmem:[#allocation17_spill] sm:$0xff]  ;;  %2235 = vmatmul.mubr.bf16.gmra.mrb[12].mxu0 %v1923_v45 }
  0xa3   :  { %v1834_v20 = vsel %vm12195_vm13, %v1829_v26, %v1833_v22  ;;  %v1837_v60 = vor.u32 %v1835_v43, %v1833_v22  ;;  %vm39_vm7 = vcmask 1047559   ;;  %vm12200_vm15 = vnez %v12199_v18  ;;  %v12206_v56 = vld [vmem:[#allocation36_spill] sm:$0xff]  ;;  %v1926_v22 = vld [vmem:[#allocation2 + $0x48] sm:$0xff] }
  0xa4   :  { %v9532_v46 = vsel %vm12200_vm15, %v9266_v53, 0  ;;  %vm12201_vm0 = vcmask 523264   ;;  %v1841_v26 = vrot.slane %v1839_v7, 1  ;;  %v1747_v43 = vsel %vm8902_vm1, %v9515_v42, 0  ;;  %1514 = vrot.lane.b32.xlu0 %v9515_v42, %s8180_s28  ;;  %v7020_v7 = vld [vmem:[%s11782_s0 + $0x1e8] sm:$0xff] }
  0xa5   :  { %1907 = vst.msk [vmem:[#allocation2 + $0x1b8] sm:$0xff] %vm12201_vm0, %v1834_v20  ;;  %vm12203_vm13 = vsmask.f32 7966  ;;  %v9548_v53 = vsel %vm12207_vm14, %v9424_v40, %v12206_v56  ;;  %v1571_v20 = vshrl.u32 %v9478_v35, 16  ;;  %vm12208_vm0 = vcmask 1048064  }
  0xa6   :  { %vm9541_vm11 = vmand %vm39_vm7, %vm12203_vm13  ;;  %662 = vst.msk [vmem:[#allocation2 + $0x50] sm:$0xff] %vm12208_vm0, %v618_v55  ;;  %v1594_v31 = vshrl.u32 %v9512_v36, 16  ;;  %v1847_v52 = vshll.u32 %v1747_v43, 16  ;;  %v1851_v14 = vshrl.u32 %v1747_v43, 16  ;;  %vm12209_vm7 = vcmask 523264  }
  0xa7   :  { %1035 = vst.msk [vmem:[#allocation2 + $0x50] sm:$0xff] %vm12209_vm7, %v9185_v51  ;;  %vm12210_vm13 = vsmask.f32 7424  ;;  %v1845_v40 = vor.u32 %v1843_v58, %v1841_v26  ;;  %v43_v56 = vsel %vm9541_vm11, 0, %v42_v59  ;;  %v9561_v18 = vpack.c.bf16 %v7018_v8, %v7017_v9  ;;  %vm12211_vm14 = vmmov %vm12209_vm7  ;;  %v8117_v51 = vld [vmem:[%s11783_s1 + $0x98] sm:$0xff]   ;;  %v12214_v59 = vld [vmem:[#allocation29_spill] sm:$0xff]  ;;  %v620_v9 = vpop.permute.xlu1 %619 }
  0xa8   :  { %v1842_v54 = vsel %vm12210_vm13, %v1837_v60, %v1841_v26  ;;  %v1602_v23 = vshrl.u32 %v9532_v46, 16  ;;  %v1849_v55 = vrot.slane %v1847_v52, 1  ;;  %44 = vst [vmem:[#allocation2 + $0x100] sm:$0x80] %v43_v56  ;;  %v53_v43 = vsel %vm8866_vm6, 0, %v52_v10  ;;  %vm12213_vm0 = vmmov %vm12209_vm7  ;;  %2820 = vmatpush1.bf16.msra.mxu0 %v8117_v51 }
  0xa9   :  { %1908 = vst.msk [vmem:[#allocation2 + $0x1c8] sm:$0xff] %vm12211_vm14, %v1842_v54  ;;  %v9567_v63 = vpack.c.bf16 %v7020_v7, %v7019_v38  ;;  %7039 = vmatprep.mubr.msk.bf16.mxu0 %vm12213_vm0, %v1926_v22  ;;  %vm12215_vm7 = vnez %v12214_v59  ;;  %1516 = vrot.lane.b32.xlu1 %v9561_v18, %s8180_s28  ;;  %54 = vst [vmem:[#allocation2 + $0x120] sm:$0x1] %v53_v43  ;;  %v1583_v54 = vor.u32 %v1581_v49, %v9506_v0  ;;  %v12222_v22 = vld [vmem:[#allocation20_spill] sm:$0xff]  ;;  %vm12230_vm1 = vcmask 1048064  }
  0xaa   :  { %v1748_v58 = vsel %vm12215_vm7, %v9561_v18, 0  ;;  %v1591_v52 = vor.u32 %v1589_v15, %v9520_v13  ;;  %v9580_v24 = vrot.slane %v1571_v20, 7  ;;  %v1596_v60 = vrot.slane %v1594_v31, 7  ;;  %vm12216_vm6 = vmmov %vm12210_vm13  ;;  %v12219_v15 = vld [vmem:[#allocation31_spill] sm:$0xff]  ;;  %2821 = vmatprep.subr.bf16.mxu0 %v8971_v3  ;;  %v1925_v20 = vld [vmem:[#allocation2 + $0x40] sm:$0xff] }
  0xab   :  { %v1597_v8 = vshll.u32 %v9512_v36, 16  ;;  %v1850_v10 = vsel %vm12216_vm6, %v1845_v40, %v1849_v55  ;;  %1518 = vrot.lane.b32.xlu0 %v9567_v63, %s8180_s28  ;;  %vm12217_vm13 = vcmask 1048064   ;;  %v1853_v38 = vor.u32 %v1851_v14, %v1849_v55  ;;  %vm12218_vm14 = vmmov %vm12213_vm0  ;;  %2243 = vmatmul.mubr.bf16.gmra.mrb[16].mxu0 %v1925_v20  ;;  %v9634_v20 = vld [vmem:[#allocation2 + $0x68] sm:$0xff] }
  0xac   :  { %663 = vst.msk [vmem:[#allocation2 + $0x60] sm:$0xff] %vm12217_vm13, %v620_v9  ;;  %v1855_v49 = vshll.u32 %v1748_v58, 16  ;;  %v1859_v45 = vshrl.u32 %v1748_v58, 16  ;;  %vm12220_vm0 = vnez %v12219_v15  ;;  %vm12221_vm7 = vmmov %vm12218_vm14  ;;  %v1604_v31 = vrot.slane %v1602_v23, 7  ;;  %v12226_v23 = vld [vmem:[#allocation33_spill] sm:$0xff]  ;;  %v622_v9 = vpop.permute.xlu0 %621 }
  0xad   :  { %1909 = vst.msk [vmem:[#allocation2 + $0x1d8] sm:$0xff] %vm12218_vm14, %v1850_v10  ;;  %v1749_v26 = vsel %vm12220_vm0, %v9567_v63, 0  ;;  %v1605_v36 = vshll.u32 %v9532_v46, 16  ;;  %vm12223_vm6 = vnez %v12222_v22  ;;  %vm12224_vm13 = vsmask.f32 256  ;;  %1520 = vrot.lane.b32.xlu1 %v12226_v23, %s8180_s28  ;;  %v2544_v22 = vld [vmem:[#allocation2 + $0x18] sm:$0xff] }
  0xae   :  { %1036 = vst.msk [vmem:[#allocation2 + $0x60] sm:$0xff] %vm12221_vm7, %v9218_v57  ;;  %v1559_v14 = vsel %vm12223_vm6, %v9279_v29, 0  ;;  %v1863_v7 = vshll.u32 %v1749_v26, 16  ;;  %v1857_v40 = vrot.slane %v1855_v49, 1  ;;  %v1867_v56 = vshrl.u32 %v1749_v26, 16  ;;  %vm12225_vm14 = vmmov %vm12224_vm13  ;;  %v9608_v57 = vld [vmem:[#allocation2 + $0x58] sm:$0xff] }
  0xaf   :  { %v9600_v55 = vsel %vm12224_vm13, %v9580_v24, %v1583_v54  ;;  %v9604_v43 = vsel %vm12225_vm14, %v9506_v0, %v1591_v52  ;;  %v1599_v51 = vor.u32 %v1597_v8, %v1596_v60  ;;  %vm12227_vm7 = vsmask.f32 7424  ;;  %664 = vst.msk [vmem:[#allocation2 + $0x70] sm:$0xff] %vm12230_vm1, %v622_v9  ;;  %vm12234_vm12 = vmmov %vm12224_vm13  ;;  %v9629_v26 = vld [vmem:[#allocation2 + $0x50] sm:$0xff] }
  0xb0   :  { %v1865_v46 = vrot.slane %v1863_v7, 1  ;;  %v1858_v29 = vsel %vm12227_vm7, %v1853_v38, %v1857_v40  ;;  %v1861_v58 = vor.u32 %v1859_v45, %v1857_v40  ;;  %v1610_v10 = vshrl.u32 %v1559_v14, 16  ;;  %vm12231_vm6 = vmmov %vm12227_vm7  ;;  %v9930_v21 = vld [vmem:[#allocation2 + $0x1c8] sm:$0xff] }
  0xb1   :  { %vm12228_vm0 = vcmask 523264   ;;  %v9614_v0 = vsel %vm12224_vm13, %v9520_v13, %v1599_v51  ;;  %v1607_v52 = vor.u32 %v1605_v36, %v1604_v31  ;;  %vm12233_vm15 = vmmov %vm12231_vm6  ;;  %v1613_v45 = vshll.u32 %v1559_v14, 16  ;;  %v12236_v36 = vld [vmem:[#allocation21_spill] sm:$0xff]  ;;  %v626_v14 = vpop.permute.xlu0 %625 }
  0xb2   :  { %1910 = vst.msk [vmem:[#allocation2 + $0x1e8] sm:$0xff] %vm12228_vm0, %v1858_v29  ;;  %v1869_v54 = vor.u32 %v1867_v56, %v1865_v46  ;;  %vm12229_vm14 = vmmov %vm12228_vm0  ;;  %v1866_v8 = vsel %vm12231_vm6, %v1861_v58, %v1865_v46  ;;  %v1612_v13 = vrot.slane %v1610_v10, 7  ;;  %vm12237_vm1 = vnez %v12236_v36  ;;  %v9653_v29 = vld [vmem:[#allocation2 + $0x78] sm:$0xff] }
  0xb3   :  { %7040 = vmatprep.mubr.msk.bf16.mxu0 %vm12229_vm14, %v9608_v57  ;;  %vm12232_vm7 = vmmov %vm12228_vm0  ;;  %1911 = vst.msk [vmem:[#allocation2 + $0x1f8] sm:$0xff] %vm12228_vm0, %v1866_v8  ;;  %v9626_v49 = vsel %vm12234_vm12, %v1596_v60, %v1607_v52  ;;  %v1560_v7 = vsel %vm12237_vm1, %v9330_v25, 0  ;;  %vm12238_vm6 = vcmask 1048064   ;;  %vm12241_vm14 = vsmask.f32 256  ;;  %v12249_v8 = vld [vmem:[#allocation26_spill] sm:$0xff] }
  0xb4   :  { %1037 = vst.msk [vmem:[#allocation2 + $0x70] sm:$0xff] %vm12232_vm7, %v9264_v28  ;;  %v1874_v38 = vsel %vm12233_vm15, %v1869_v54, %v9144_v4  ;;  %vm12235_vm13 = vmmov %vm12228_vm0  ;;  %v624_v28 = vpop.permute.xlu1 %623  ;;  %2251 = vmatmul.mubr.bf16.gmra.mrb[20].mxu0 %v9629_v26  ;;  %v1618_v4 = vshrl.u32 %v1560_v7, 16  ;;  %v1615_v60 = vor.u32 %v1613_v45, %v1612_v13  ;;  %v1621_v56 = vshll.u32 %v1560_v7, 16  ;;  %v9673_v45 = vld [vmem:[#allocation2 + $0x88] sm:$0xff]  ;;  %v9937_v11 = vld [vmem:[#allocation2 + $0x1d8] sm:$0xff] }
  0xb5   :  { %1912 = vst.msk [vmem:[#allocation2 + $0x208] sm:$0xff] %vm12235_vm13, %v1874_v38  ;;  %vm12239_vm12 = vmmov %vm12228_vm0  ;;  %v9648_v46 = vld [vmem:[#allocation2 + $0x60] sm:$0xff]  ;;  %v630_v7 = vpop.permute.xlu0 %629 }
  0xb6   :  { %665 = vst.msk [vmem:[#allocation2 + $0x80] sm:$0xff] %vm12238_vm6, %v624_v28  ;;  %vm12240_vm15 = vmmov %vm12228_vm0  ;;  %v9643_v40 = vsel %vm12241_vm14, %v1604_v31, %v1615_v60  ;;  %v1620_v25 = vrot.slane %v1618_v4, 7  ;;  %v8118_v31 = vld [vmem:[%s11783_s1 + $0xa0] sm:$0xff]  }
  0xb7   :  { %1038 = vst.msk [vmem:[#allocation2 + $0x80] sm:$0xff] %vm12239_vm12, %v9298_v5  ;;  %7041 = vmatprep.mubr.msk.bf16.mxu0 %vm12240_vm15, %v9634_v20  ;;  %vm12242_vm7 = vmmov %vm12238_vm6  ;;  %v12243_v5 = vld [vmem:[#allocation24_spill] sm:$0xff]  ;;  %2822 = vmatpush1.bf16.msra.mxu0 %v8118_v31 }
  0xb8   :  { %666 = vst.msk [vmem:[#allocation2 + $0x90] sm:$0xff] %vm12242_vm7, %v626_v14  ;;  %vm12244_vm13 = vnez %v12243_v5  ;;  %v1623_v9 = vor.u32 %v1621_v56, %v1620_v25  ;;  %vm12245_vm6 = vmmov %vm12228_vm0  ;;  %2823 = vmatprep.subr.bf16.mxu0 %v8971_v3  ;;  %v12254_v56 = vld [vmem:[#allocation28_spill] sm:$0xff] }
  0xb9   :  { %1039 = vst.msk [vmem:[#allocation2 + $0x90] sm:$0xff] %vm12228_vm0, %v9328_v19  ;;  %v1561_v51 = vsel %vm12244_vm13, %v9335_v34, 0  ;;  %v628_v19 = vpop.permute.xlu1 %627  ;;  %vm12246_vm12 = vmmov %vm12242_vm7  ;;  %vm12250_vm7 = vnez %v12249_v8  ;;  %v9944_v33 = vld [vmem:[#allocation2 + $0x1e8] sm:$0xff] }
  0xba   :  { %v1626_v58 = vshrl.u32 %v1561_v51, 16  ;;  %667 = vst.msk [vmem:[#allocation2 + $0xa0] sm:$0xff] %vm12246_vm12, %v628_v19  ;;  %vm12247_vm15 = vmmov %vm12241_vm14  ;;  %v1629_v54 = vshll.u32 %v1561_v51, 16  ;;  %v1562_v38 = vsel %vm12250_vm7, %v9395_v16, 0 }
  0xbb   :  { %v9663_v10 = vsel %vm12247_vm15, %v1612_v13, %v1623_v9  ;;  %vm12248_vm14 = vmmov %vm12228_vm0  ;;  %v9668_v52 = vld [vmem:[#allocation2 + $0x70] sm:$0xff]  ;;  %v1634_v13 = vshrl.u32 %v1562_v38, 16  ;;  %v1637_v16 = vshll.u32 %v1562_v38, 16  ;;  %v8119_v9 = vld [vmem:[%s11783_s1 + $0xa8] sm:$0xff]  }
  0xbc   :  { %2259 = vmatmul.mubr.bf16.gmra.mrb[24].mxu0 %v9648_v46  ;;  %1040 = vst.msk [vmem:[#allocation2 + $0xa0] sm:$0xff] %vm12248_vm14, %v9356_v37  ;;  %v1628_v34 = vrot.slane %v1626_v58, 7  ;;  %vm12251_vm0 = vmmov %vm12246_vm12  ;;  %v9690_v58 = vld [vmem:[#allocation2 + $0x98] sm:$0xff]  ;;  %v12260_v38 = vld [vmem:[#allocation30_spill] sm:$0xff] }
  0xbd   :  { %7042 = vmatprep.mubr.msk.bf16.mxu0 %vm12245_vm6, %v9653_v29  ;;  %668 = vst.msk [vmem:[#allocation2 + $0xb0] sm:$0xff] %vm12251_vm0, %v630_v7  ;;  %vm12252_vm12 = vmmov %vm12245_vm6  ;;  %v1636_v4 = vrot.slane %v1634_v13, 7  ;;  %v632_v60 = vpop.permute.xlu1 %631  ;;  %2824 = vmatpush1.bf16.msra.mxu0 %v8119_v9  ;;  %v9712_v13 = vld [vmem:[#allocation2 + $0xa8] sm:$0xff] }
  0xbe   :  { %v1631_v28 = vor.u32 %v1629_v54, %v1628_v34  ;;  %1041 = vst.msk [vmem:[#allocation2 + $0xb0] sm:$0xff] %vm12252_vm12, %v9393_v32  ;;  %v9684_v14 = vld [vmem:[#allocation2 + $0x80] sm:$0xff]  ;;  %vm12253_vm14 = vmmov %vm12251_vm0  ;;  %vm12255_vm0 = vnez %v12254_v56  ;;  %v634_v32 = vpop.permute.xlu0 %633  ;;  %2825 = vmatprep.subr.bf16.mxu0 %v8971_v3  ;;  %v9951_v56 = vld [vmem:[#allocation2 + $0x1f8] sm:$0xff] }
  0xbf   :  { %669 = vst.msk [vmem:[#allocation2 + $0xc0] sm:$0xff] %vm12253_vm14, %v632_v60  ;;  %v1563_v51 = vsel %vm12255_vm0, %v9446_v50, 0  ;;  %vm12256_vm12 = vmmov %vm12253_vm14  ;;  %v1639_v31 = vor.u32 %v1637_v16, %v1636_v4  ;;  %vm12259_vm0 = vsmask.f32 256  ;;  %v9958_v5 = vld [vmem:[#allocation2 + $0x208] sm:$0xff] }
  0xc0   :  { %v9682_v37 = vsel %vm12247_vm15, %v1620_v25, %v1631_v28  ;;  %1042 = vst.msk [vmem:[#allocation2 + $0xc0] sm:$0xff] %vm12245_vm6, %v9437_v61  ;;  %v1642_v25 = vshrl.u32 %v1563_v51, 16  ;;  %vm12257_vm15 = vmmov %vm12245_vm6  ;;  %v1645_v19 = vshll.u32 %v1563_v51, 16  ;;  %v9707_v54 = vld [vmem:[#allocation2 + $0x90] sm:$0xff]  ;;  %v1565_v51 = vsel %vm9192_vm10, %v9463_v41, 0 }
  0xc1   :  { %670 = vst.msk [vmem:[#allocation2 + $0xd0] sm:$0xff] %vm12256_vm12, %v634_v32  ;;  %vm12258_vm14 = vmmov %vm12245_vm6  ;;  %v9704_v50 = vsel %vm12259_vm0, %v1628_v34, %v1639_v31  ;;  %v9728_v32 = vld [vmem:[#allocation2 + $0xb8] sm:$0xff]  ;;  %v1661_v41 = vshll.u32 %v1565_v51, 16 }
  0xc2   :  { %1043 = vst.msk [vmem:[#allocation2 + $0xd0] sm:$0xff] %vm12258_vm14, %v9473_v1  ;;  %v1644_v61 = vrot.slane %v1642_v25, 7  ;;  %v636_v28 = vpop.permute.xlu1 %635  ;;  %vm12262_vm0 = vmmov %vm12258_vm14  ;;  %vm12264_vm14 = vsmask.f32 256  ;;  %v1658_v25 = vshrl.u32 %v1565_v51, 16 }
  0xc3   :  { %671 = vst.msk [vmem:[#allocation2 + $0xe0] sm:$0xff] %vm12256_vm12, %v636_v28  ;;  %v9723_v60 = vld [vmem:[#allocation2 + $0xa0] sm:$0xff]  ;;  %vm12265_vm12 = vmmov %vm12262_vm0  ;;  %v1566_v28 = vsel %vm9202_vm4, %v9515_v42, 0 }
  0xc4   :  { %2267 = vmatmul.mubr.bf16.gmra.mrb[28].mxu0 %v9668_v52  ;;  %v1647_v34 = vor.u32 %v1645_v19, %v1644_v61  ;;  %v1660_v9 = vrot.slane %v1658_v25, 7  ;;  %12312 = vst [vmem:[#allocation32_spill] sm:$0xff] %v9958_v5 }
  0xc5   :  { %7043 = vmatprep.mubr.msk.bf16.mxu0 %vm12245_vm6, %v9673_v45  ;;  %vm12261_vm6 = vnez %v12260_v38 }
  0xc6   :  { %v1564_v7 = vsel %vm12261_vm6, %v9450_v48, 0  ;;  %v9721_v3 = vsel %vm12264_vm14, %v1636_v4, %v1647_v34  ;;  %v1574_v34 = vshll.u32 %v9478_v35, 16  ;;  %v1663_v42 = vor.u32 %v1661_v41, %v1660_v9  ;;  %v9761_v35 = vld [vmem:[#allocation2] sm:$0xff] }
  0xc7   :  { %v1650_v1 = vshrl.u32 %v1564_v7, 16  ;;  %v1653_v48 = vshll.u32 %v1564_v7, 16  ;;  %v9739_v7 = vld [vmem:[#allocation2 + $0xb0] sm:$0xff]  ;;  %v1567_v41 = vsel %vm9257_vm8, %v9561_v18, 0 }
  0xc9   :  { %v1652_v16 = vrot.slane %v1650_v1, 7  ;;  %v9745_v1 = vld [vmem:[#allocation2 + $0xc8] sm:$0xff]  ;;  %v9782_v15 = vld [vmem:[#allocation2 + $0xd0] sm:$0xff] }
  0xcb   :  { %v1655_v31 = vor.u32 %v1653_v48, %v1652_v16  ;;  %v8120_v48 = vld [vmem:[%s11783_s1 + $0xb0] sm:$0xff]   ;;  %v12349_v44 = vld [vmem:[#allocation32_spill] sm:$0xff] }
  0xcc   :  { %2275 = vmatmul.mubr.bf16.gmra.mrb[32].mxu0 %v9684_v14 }
  0xcd   :  { %7044 = vmatprep.mubr.msk.bf16.mxu0 %vm12257_vm15, %v9690_v58  ;;  %vm12263_vm15 = vmmov %vm12262_vm0  ;;  %2826 = vmatpush1.bf16.msra.mxu0 %v8120_v48 }
  0xce   :  { %1044 = vst.msk [vmem:[#allocation2 + $0xe0] sm:$0xff] %vm12263_vm15, %v9486_v30  ;;  %v638_v30 = vpop.permute.xlu0 %637  ;;  %vm12267_vm15 = vmmov %vm12264_vm14  ;;  %2827 = vmatprep.subr.bf16.mxu0 %v9761_v35 }
  0xcf   :  { %v9735_v4 = vsel %vm12267_vm15, %v1644_v61, %v1655_v31  ;;  %vm12268_vm14 = vmmov %vm12265_vm12  ;;  %v9758_v51 = vsel %vm12267_vm15, %v1652_v16, %v1663_v42  ;;  %v1669_v31 = vshll.u32 %v1566_v28, 16 }
  0xd3   :  { %v640_v19 = vpop.permute.xlu1 %639 }
  0xd4   :  { %2283 = vmatmul.mubr.bf16.gmra.mrb[36].mxu0 %v9707_v54 }
  0xd5   :  { %7045 = vmatprep.mubr.msk.bf16.mxu0 %vm12262_vm0, %v9712_v13  ;;  %vm12266_vm0 = vcmask 1048064  }
  0xd6   :  { %672 = vst.msk [vmem:[#allocation2 + $0xf0] sm:$0xff] %vm12266_vm0, %v638_v30  ;;  %vm12269_vm10 = vmmov %vm12266_vm0  ;;  %v1491_v61 = vpop.permute.xlu0 %1490  ;;  %v9764_v30 = vld [vmem:[#allocation2 + $0xc0] sm:$0xff] }
  0xd7   :  { %1045 = vst.msk [vmem:[#allocation2 + $0xf0] sm:$0xff] %vm12268_vm14, %v9504_v27  ;;  %v1666_v27 = vshrl.u32 %v1566_v28, 16 }
  0xd8   :  { %673 = vst.msk [vmem:[#allocation2 + $0x100] sm:$0xff] %vm12269_vm10, %v640_v19  ;;  %vm12270_vm10 = vmmov %vm12265_vm12  ;;  %v9769_v19 = vld [vmem:[#allocation2 + $0xd8] sm:$0xff] }
  0xd9   :  { %1046 = vst.msk [vmem:[#allocation2 + $0x100] sm:$0xff] %vm12265_vm12, %v9548_v53  ;;  %v1576_v53 = vor.u32 %v1574_v34, %v9580_v24  ;;  %v1668_v25 = vrot.slane %v1666_v27, 7  ;;  %v1674_v24 = vshrl.u32 %v1567_v41, 16  ;;  %vm12271_vm14 = vmmov %vm12270_vm10  ;;  %v1677_v27 = vshll.u32 %v1567_v41, 16 }
  0xda   :  { %1538 = vst.msk [vmem:[#allocation2 + $0x120] sm:$0xff] %vm12266_vm0, %v1491_v61 }
  0xdb   :  { %v1671_v34 = vor.u32 %v1669_v31, %v1668_v25  ;;  %v1676_v18 = vrot.slane %v1674_v24, 7  ;;  %v9789_v31 = vld [vmem:[#allocation2 + $0xe8] sm:$0xff] }
  0xdc   :  { %2291 = vmatmul.mubr.bf16.gmra.mrb[40].mxu0 %v9723_v60 }
  0xdd   :  { %7046 = vmatprep.mubr.msk.bf16.mxu0 %vm12265_vm12, %v9728_v32  ;;  %vm12272_vm12 = vmmov %vm12267_vm15 }
  0xde   :  { %v9780_v28 = vsel %vm12272_vm12, %v1660_v9, %v1671_v34  ;;  %vm12274_vm15 = vmmov %vm12271_vm14  ;;  %v9804_v34 = vld [vmem:[#allocation2 + $0xe0] sm:$0xff] }
  0xdf   :  { %vm12275_vm12 = vmmov %vm12271_vm14 }
  0xe1   :  { %v1714_v61 = vld [vmem:[#allocation2 + $0x120] sm:$0xff] }
  0xe2   :  { %v9773_v16 = vsel %vm9377_vm5, %v1576_v53, %v1714_v61  ;;  %v1568_v53 = vsel %vm9322_vm9, %v9567_v63, 0  ;;  %v1679_v61 = vor.u32 %v1677_v27, %v1676_v18  ;;  %vm12276_vm5 = vmmov %vm12266_vm0 }
  0xe3   :  { %1716 = vst [vmem:[#allocation2 + $0x120] sm:$0xff] %v9773_v16  ;;  %v1682_v9 = vshrl.u32 %v1568_v53, 16 }
  0xe4   :  { %2299 = vmatmul.mubr.bf16.gmra.mrb[44].mxu0 %v9739_v7 }
  0xe5   :  { %7047 = vmatprep.mubr.msk.bf16.mxu0 %vm12270_vm10, %v9745_v1  ;;  %v1493_v48 = vpop.permute.xlu1 %1492  ;;  %vm12273_vm10 = vmmov %vm12266_vm0  ;;  %v9802_v24 = vrot.slane %v1682_v9, 7  ;;  %v9823_v9 = vld [vmem:[#allocation2 + $0xf0] sm:$0xff] }
  0xe6   :  { %v1495_v42 = vpop.permute.xlu0 %1494  ;;  %1539 = vst.msk [vmem:[#allocation2 + $0x130] sm:$0xff] %vm12266_vm0, %v1493_v48  ;;  %vm12277_vm0 = vmmov %vm12275_vm12  ;;  %v9806_v48 = vld [vmem:[#allocation2 + $0xf8] sm:$0xff] }
  0xe7   :  { %1540 = vst.msk [vmem:[#allocation2 + $0x140] sm:$0xff] %vm12273_vm10, %v1495_v42  ;;  %vm12278_vm10 = vsmask.f32 256  ;;  %vm12287_vm9 = vmmov %vm12277_vm0 }
  0xe8   :  { %1717 = vst.msk [vmem:[#allocation2 + $0x130] sm:$0xff] %vm12274_vm15, %v9600_v55  ;;  %v1680_v63 = vsel %vm12278_vm10, %v1668_v25, %v1679_v61  ;;  %v1685_v55 = vshll.u32 %v1568_v53, 16  ;;  %vm12279_vm15 = vmmov %vm12276_vm5 }
  0xe9   :  { %1718 = vst.msk [vmem:[#allocation2 + $0x140] sm:$0xff] %vm12271_vm14, %v9604_v43 }
  0xea   :  { %v1497_v41 = vpop.permute.xlu1 %1496  ;;  %v1687_v25 = vor.u32 %v1685_v55, %v9802_v24 }
  0xeb   :  { %1541 = vst.msk [vmem:[#allocation2 + $0x150] sm:$0xff] %vm12276_vm5, %v1497_v41  ;;  %v9839_v41 = vld [vmem:[#allocation2 + $0x118] sm:$0xff] }
  0xec   :  { %2307 = vmatmul.mubr.bf16.gmra.mrb[48].mxu0 %v9764_v30  ;;  %1719 = vst.msk [vmem:[#allocation2 + $0x150] sm:$0xff] %vm12277_vm0, %v9614_v0  ;;  %v8121_v0 = vld [vmem:[%s11783_s1 + $0xb8] sm:$0xff]  }
  0xed   :  { %7048 = vmatprep.mubr.msk.bf16.mxu0 %vm12271_vm14, %v9769_v19  ;;  %vm12280_vm14 = vmmov %vm12277_vm0  ;;  %2828 = vmatpush1.bf16.msra.mxu0 %v8121_v0 }
  0xee   :  { %3426 = vmatprep.subr.bf16.mxu0 %v9761_v35 }
  0xf3   :  { %v1499_v43 = vpop.permute.xlu0 %1498  ;;  %v9886_v0 = vld [vmem:[#allocation2 + $0x150] sm:$0xff] }
  0xf4   :  { %2315 = vmatmul.mubr.bf16.gmra.mrb[52].mxu0 %v9782_v15  ;;  %1542 = vst.msk [vmem:[#allocation2 + $0x160] sm:$0xff] %vm12279_vm15, %v1499_v43  ;;  %vm12282_vm15 = vmmov %vm12276_vm5  ;;  %v9872_v43 = vld [vmem:[#allocation2 + $0x130] sm:$0xff] }
  0xf5   :  { %7049 = vmatprep.mubr.msk.bf16.mxu0 %vm12275_vm12, %v9789_v31  ;;  %1720 = vst.msk [vmem:[#allocation2 + $0x160] sm:$0xff] %vm12280_vm14, %v9626_v49  ;;  %vm12281_vm12 = vmmov %vm12277_vm0  ;;  %v1688_v49 = vsel %vm12278_vm10, %v1676_v18, %v1687_v25  ;;  %v9837_v18 = vld [vmem:[#allocation2 + $0x100] sm:$0xff]  ;;  %v9888_v25 = vld [vmem:[#allocation2 + $0x168] sm:$0xff] }
  0xf6   :  { %v1501_v27 = vpop.permute.xlu1 %1500  ;;  %vm12283_vm14 = vmmov %vm12276_vm5 }
  0xf7   :  { %1543 = vst.msk [vmem:[#allocation2 + $0x170] sm:$0xff] %vm12276_vm5, %v1501_v27  ;;  %vm12284_vm5 = vmmov %vm12277_vm0  ;;  %v9881_v27 = vld [vmem:[#allocation2 + $0x158] sm:$0xff] }
  0xf8   :  { %1721 = vst.msk [vmem:[#allocation2 + $0x170] sm:$0xff] %vm12277_vm0, %v9643_v40  ;;  %vm12286_vm10 = vmmov %vm12283_vm14 }
  0xfc   :  { %2323 = vmatmul.mubr.bf16.gmra.mrb[56].mxu0 %v9804_v34  ;;  %v1503_v42 = vpop.permute.xlu0 %1502 }
  0xfd   :  { %7050 = vmatprep.mubr.msk.bf16.mxu0 %vm12281_vm12, %v9806_v48  ;;  %v1505_v53 = vpop.permute.xlu1 %1504  ;;  %1544 = vst.msk [vmem:[#allocation2 + $0x180] sm:$0xff] %vm12282_vm15, %v1503_v42  ;;  %vm12285_vm12 = vmmov %vm12277_vm0  ;;  %v9895_v42 = vld [vmem:[#allocation2 + $0x178] sm:$0xff] }
  0xfe   :  { %1545 = vst.msk [vmem:[#allocation2 + $0x190] sm:$0xff] %vm12283_vm14, %v1505_v53  ;;  %vm12288_vm15 = vmmov %vm12286_vm10 }
  0xff   :  { %1722 = vst.msk [vmem:[#allocation2 + $0x180] sm:$0xff] %vm12284_vm5, %v9663_v10  ;;  %vm12289_vm14 = vmmov %vm12277_vm0  ;;  %v9900_v53 = vld [vmem:[#allocation2 + $0x170] sm:$0xff] }
 0x100   :  { %1723 = vst.msk [vmem:[#allocation2 + $0x190] sm:$0xff] %vm12285_vm12, %v9682_v37  ;;  %vm12290_vm5 = vmmov %vm12286_vm10  ;;  %v9853_v37 = vld [vmem:[#allocation2 + $0x110] sm:$0xff] }
 0x101   :  { %vm12291_vm12 = vmmov %vm12277_vm0 }
 0x104   :  { %2331 = vmatmul.mubr.bf16.gmra.mrb[60].mxu0 %v9823_v9 }
 0x105   :  { %7051 = vmatprep.mubr.msk.bf16.mxu0 %vm12277_vm0, %v9198_v12  ;;  %v1507_v40 = vpop.permute.xlu0 %1506 }
 0x106   :  { %1546 = vst.msk [vmem:[#allocation2 + $0x1a0] sm:$0xff] %vm12286_vm10, %v1507_v40  ;;  %v9902_v40 = vld [vmem:[#allocation2 + $0x188] sm:$0xff] }
 0x107   :  { %1724 = vst.msk [vmem:[#allocation2 + $0x1a0] sm:$0xff] %vm12287_vm9, %v9704_v50  ;;  %vm12292_vm9 = vmmov %vm12277_vm0  ;;  %v9855_v50 = vld [vmem:[#allocation2 + $0x128] sm:$0xff] }
 0x108   :  { %vm12293_vm0 = vmmov %vm12290_vm5 }
 0x109   :  { %vm12294_vm10 = vmmov %vm12292_vm9 }
 0x10b   :  { %v1509_v61 = vpop.permute.xlu1 %1508  ;;  %v1511_v10 = vpop.permute.xlu0 %1510 }
 0x10c   :  { %1547 = vst.msk [vmem:[#allocation2 + $0x1b0] sm:$0xff] %vm12288_vm15, %v1509_v61  ;;  %2339 = vmatmul.mubr.bf16.gmra.mrb[64].mxu0 %v9837_v18  ;;  %vm12295_vm15 = vmmov %vm12293_vm0  ;;  %v9907_v61 = vld [vmem:[#allocation2 + $0x180] sm:$0xff] }
 0x10d   :  { %1725 = vst.msk [vmem:[#allocation2 + $0x1b0] sm:$0xff] %vm12289_vm14, %v9721_v3  ;;  %7052 = vmatprep.mubr.msk.bf16.mxu0 %vm12291_vm12, %v9839_v41  ;;  %vm12296_vm14 = vmmov %vm12292_vm9 }
 0x10e   :  { %1548 = vst.msk [vmem:[#allocation2 + $0x1c0] sm:$0xff] %vm12290_vm5, %v1511_v10  ;;  %vm12297_vm5 = vmmov %vm12292_vm9  ;;  %v9909_v10 = vld [vmem:[#allocation2 + $0x198] sm:$0xff] }
 0x10f   :  { %1726 = vst.msk [vmem:[#allocation2 + $0x1c0] sm:$0xff] %vm12292_vm9, %v9735_v4  ;;  %v1513_v12 = vpop.permute.xlu1 %1512  ;;  %vm12298_vm12 = vmmov %vm12293_vm0 }
 0x110   :  { %1549 = vst.msk [vmem:[#allocation2 + $0x1d0] sm:$0xff] %vm12293_vm0, %v1513_v12  ;;  %vm12299_vm9 = vmmov %vm12297_vm5  ;;  %v9914_v12 = vld [vmem:[#allocation2 + $0x190] sm:$0xff] }
 0x111   :  { %1727 = vst.msk [vmem:[#allocation2 + $0x1d0] sm:$0xff] %vm12294_vm10, %v9758_v51  ;;  %v9866_v51 = vld [vmem:[#allocation2 + $0x138] sm:$0xff]  ;;  %vm12300_vm10 = vmmov %vm12297_vm5 }
 0x114   :  { %2345 = vmatmul.mubr.bf16.gmra.mrb[68].mxu0 %v9853_v37  ;;  %v9928_v17 = vld [vmem:[#allocation2 + $0x1b0] sm:$0xff] }
 0x115   :  { %7053 = vmatprep.mubr.msk.bf16.mxu0 %vm12296_vm14, %v9855_v50  ;;  %vm12302_vm14 = vmmov %vm12297_vm5 }
 0x116   :  { %v1515_v55 = vpop.permute.xlu0 %1514  ;;  %v9935_v59 = vld [vmem:[#allocation2 + $0x1c0] sm:$0xff] }
 0x117   :  { %1550 = vst.msk [vmem:[#allocation2 + $0x1e0] sm:$0xff] %vm12295_vm15, %v1515_v55  ;;  %vm12301_vm15 = vmmov %vm12297_vm5  ;;  %v9916_v55 = vld [vmem:[#allocation2 + $0x1a8] sm:$0xff] }
 0x118   :  { %1728 = vst.msk [vmem:[#allocation2 + $0x1e0] sm:$0xff] %vm12297_vm5, %v9780_v28  ;;  %v9874_v28 = vld [vmem:[#allocation2 + $0x148] sm:$0xff]  ;;  %v9942_v62 = vld [vmem:[#allocation2 + $0x1d0] sm:$0xff] }
 0x11b   :  { %v1517_v3 = vpop.permute.xlu1 %1516 }
 0x11c   :  { %1551 = vst.msk [vmem:[#allocation2 + $0x1f0] sm:$0xff] %vm12298_vm12, %v1517_v3  ;;  %2353 = vmatmul.mubr.bf16.gmra.mrb[72].mxu0 %v9773_v16  ;;  %vm12303_vm12 = vmmov %vm12297_vm5  ;;  %v9921_v3 = vld [vmem:[#allocation2 + $0x1a0] sm:$0xff] }
 0x11d   :  { %v1519_v4 = vpop.permute.xlu0 %1518  ;;  %1729 = vst.msk [vmem:[#allocation2 + $0x1f0] sm:$0xff] %vm12299_vm9, %v1680_v63  ;;  %7054 = vmatprep.mubr.msk.bf16.mxu0 %vm12301_vm15, %v9866_v51  ;;  %v9879_v63 = vld [vmem:[#allocation2 + $0x140] sm:$0xff]  ;;  %vm12304_vm9 = vmmov %vm12297_vm5 }
 0x11e   :  { %1552 = vst.msk [vmem:[#allocation2 + $0x200] sm:$0xff] %vm12293_vm0, %v1519_v4  ;;  %vm12305_vm0 = vmmov %vm12297_vm5  ;;  %v9923_v4 = vld [vmem:[#allocation2 + $0x1b8] sm:$0xff] }
 0x11f   :  { %1730 = vst.msk [vmem:[#allocation2 + $0x200] sm:$0xff] %vm12300_vm10, %v1688_v49  ;;  %v9893_v49 = vld [vmem:[#allocation2 + $0x160] sm:$0xff]  ;;  %vm12306_vm10 = vmmov %vm12305_vm0 }
 0x120   :  { %vm12307_vm15 = vmmov %vm12305_vm0  ;;  %v9949_v38 = vld [vmem:[#allocation2 + $0x1e0] sm:$0xff] }
 0x124   :  { %2361 = vmatmul.mubr.bf16.gmra.mrb[76].mxu0 %v9872_v43  ;;  %v9956_v8 = vld [vmem:[#allocation2 + $0x1f0] sm:$0xff] }
 0x125   :  { %7055 = vmatprep.mubr.msk.bf16.mxu0 %vm12302_vm14, %v9874_v28  ;;  %vm12308_vm14 = vmmov %vm12305_vm0 }
 0x126   :  { %v9963_v36 = vld [vmem:[#allocation2 + $0x200] sm:$0xff] }
 0x127   :  { %12314 = vst [vmem:[#allocation36_spill] sm:$0xff] %v9963_v36 }
 0x12c   :  { %2369 = vmatmul.mubr.bf16.gmra.mrb[80].mxu0 %v9879_v63 }
 0x12d   :  { %7056 = vmatprep.mubr.msk.bf16.mxu0 %vm12297_vm5, %v9881_v27  ;;  %vm12309_vm5 = vmmov %vm12305_vm0 }
 0x134   :  { %2377 = vmatmul.mubr.bf16.gmra.mrb[84].mxu0 %v9886_v0 }
 0x135   :  { %7057 = vmatprep.mubr.msk.bf16.mxu0 %vm12303_vm12, %v9888_v25  ;;  %vm12310_vm12 = vmmov %vm12305_vm0 }
 0x13c   :  { %2385 = vmatmul.mubr.bf16.gmra.mrb[88].mxu0 %v9893_v49 }
 0x13d   :  { %7058 = vmatprep.mubr.msk.bf16.mxu0 %vm12304_vm9, %v9895_v42  ;;  %vm12311_vm9 = vmmov %vm12305_vm0 }
 0x144   :  { %2393 = vmatmul.mubr.bf16.gmra.mrb[92].mxu0 %v9900_v53 }
 0x145   :  { %7059 = vmatprep.mubr.msk.bf16.mxu0 %vm12305_vm0, %v9902_v40 }
 0x14c   :  { %2401 = vmatmul.mubr.bf16.gmra.mrb[96].mxu0 %v9907_v61 }
 0x14d   :  { %7060 = vmatprep.mubr.msk.bf16.mxu0 %vm12306_vm10, %v9909_v10  ;;  %vm12313_vm10 = vmmov %vm12305_vm0 }
 0x154   :  { %2409 = vmatmul.mubr.bf16.gmra.mrb[100].mxu0 %v9914_v12 }
 0x155   :  { %7061 = vmatprep.mubr.msk.bf16.mxu0 %vm12307_vm15, %v9916_v55  ;;  %vm12315_vm15 = vmmov %vm12305_vm0 }
 0x15c   :  { %2417 = vmatmul.mubr.bf16.gmra.mrb[104].mxu0 %v9921_v3 }
 0x15d   :  { %7062 = vmatprep.mubr.msk.bf16.mxu0 %vm12308_vm14, %v9923_v4  ;;  %vm12317_vm14 = vmmov %vm12305_vm0 }
 0x164   :  { %2425 = vmatmul.mubr.bf16.gmra.mrb[108].mxu0 %v9928_v17 }
 0x165   :  { %7063 = vmatprep.mubr.msk.bf16.mxu0 %vm12309_vm5, %v9930_v21  ;;  %vm12319_vm5 = vmmov %vm12305_vm0 }
 0x16c   :  { %2433 = vmatmul.mubr.bf16.gmra.mrb[112].mxu0 %v9935_v59 }
 0x16d   :  { %7064 = vmatprep.mubr.msk.bf16.mxu0 %vm12310_vm12, %v9937_v11  ;;  %vm12320_vm12 = vmmov %vm12305_vm0 }
 0x174   :  { %2441 = vmatmul.mubr.bf16.gmra.mrb[116].mxu0 %v9942_v62 }
 0x175   :  { %7065 = vmatprep.mubr.msk.bf16.mxu0 %vm12311_vm9, %v9944_v33  ;;  %vm12321_vm9 = vmmov %vm12305_vm0 }
 0x17c   :  { %2449 = vmatmul.mubr.bf16.gmra.mrb[120].mxu0 %v9949_v38 }
 0x17d   :  { %7066 = vmatprep.mubr.msk.bf16.mxu0 %vm12305_vm0, %v9951_v56 }
 0x184   :  { %2457 = vmatmul.mubr.bf16.gmra.mrb[124].mxu0 %v9956_v8 }
 0x185   :  { %7067 = vmatprep.mubr.msk.bf16.mxu0 %vm12313_vm10, %v9958_v5  ;;  %v9983_v5 = vld [vmem:[#allocation2 + $0x38] sm:$0xff]  ;;  %vm12322_vm10 = vmmov %vm12305_vm0 }
 0x186   :  { %12318 = vst [vmem:[#allocation33_spill] sm:$0xff] %v9983_v5 }
 0x18c   :  { %2465 = vmatmul.mubr.bf16.gmra.mrb[128].mxu0 %v9963_v36  ;;  %v9978_v36 = vld [vmem:[#allocation2 + $0x20] sm:$0xff] }
 0x18d   :  { %7105 = vmatprep.mubr.msk.bf16.mxu0 %vm12315_vm15, %v2544_v22  ;;  %v8124_v22 = vld [vmem:[%s11783_s1 + $0xd0] sm:$0xff]   ;;  %vm12323_vm15 = vmmov %vm12305_vm0 }
 0x194   :  { %2838 = vmatmul.mubr.bf16.vlgmr.msra.gmra.mrb[0].mxu0 %v2543_v2  ;;  %v8125_v2 = vld [vmem:[%s11783_s1 + $0xd8] sm:$0xff]  }
 0x195   :  { %3427 = vmatpush1.bf16.msra.mxu0 %v8122_v6  ;;  %7106 = vmatprep.mubr.msk.bf16.mxu0 %vm12317_vm14, %v9970_v47  ;;  %v9993_v6 = vld [vmem:[#allocation2 + $0x30] sm:$0xff]  ;;  %v9998_v47 = vld [vmem:[#allocation2 + $0x48] sm:$0xff]  ;;  %vm12324_vm14 = vmmov %vm12305_vm0 }
 0x196   :  { %3428 = vmatprep.subr.bf16.mxu0 %v9761_v35 }
 0x199   :  { %3429 = vmatpush1.bf16.msra.mxu0 %v8123_v39  ;;  %v8126_v39 = vld [vmem:[%s11783_s1 + $0xe0] sm:$0xff]  }
 0x19a   :  { %3430 = vmatprep.subr.bf16.mxu0 %v9761_v35 }
 0x19c   :  { %2846 = vmatmul.mubr.bf16.gmra.mrb[4].mxu0 %v9978_v36 }
 0x19d   :  { %7107 = vmatprep.mubr.msk.bf16.mxu0 %vm12319_vm5, %v9983_v5  ;;  %3431 = vmatpush1.bf16.msra.mxu0 %v8124_v22  ;;  %v8127_v22 = vld [vmem:[%s11783_s1 + $0xe8] sm:$0xff]   ;;  %v8128_v5 = vld [vmem:[%s11783_s1 + $0xf0] sm:$0xff]   ;;  %vm12325_vm5 = vmmov %vm12305_vm0 }
 0x19e   :  { %3432 = vmatprep.subr.bf16.mxu0 %v9761_v35 }
 0x1a1   :  { %3433 = vmatpush1.bf16.msra.mxu0 %v8125_v2  ;;  %v10008_v2 = vld [vmem:[#allocation2 + $0x40] sm:$0xff] }
 0x1a2   :  { %3434 = vmatprep.subr.bf16.mxu0 %v9761_v35 }
 0x1a4   :  { %2854 = vmatmul.mubr.bf16.gmra.mrb[8].mxu0 %v9993_v6 }
 0x1a5   :  { %7108 = vmatprep.mubr.msk.bf16.mxu0 %vm12320_vm12, %v9998_v47  ;;  %3435 = vmatpush1.bf16.msra.mxu0 %v8126_v39  ;;  %v8129_v39 = vld [vmem:[%s11783_s1 + $0xf8] sm:$0xff]   ;;  %vm12326_vm12 = vmmov %vm12305_vm0 }
 0x1a6   :  { %3436 = vmatprep.subr.bf16.mxu0 %v9761_v35 }
 0x1a9   :  { %3437 = vmatpush1.bf16.msra.mxu0 %v8127_v22 }
 0x1aa   :  { %3438 = vmatprep.subr.bf16.mxu0 %v9761_v35 }
 0x1ac   :  { %2862 = vmatmul.mubr.bf16.gmra.mrb[12].mxu0 %v10008_v2 }
 0x1ad   :  { %7109 = vmatprep.mubr.msk.bf16.mxu0 %vm12321_vm9, %v9608_v57  ;;  %3439 = vmatpush1.bf16.msra.mxu0 %v8128_v5  ;;  %v8130_v57 = vld [vmem:[%s11783_s1 + $0x100] sm:$0xff]   ;;  %vm12327_vm9 = vmmov %vm12305_vm0 }
 0x1ae   :  { %3440 = vmatprep.subr.bf16.mxu0 %v9761_v35 }
 0x1b1   :  { %3441 = vmatpush1.bf16.msra.mxu0 %v8129_v39 }
 0x1b2   :  { %3442 = vmatprep.subr.bf16.mxu0 %v9761_v35 }
 0x1b4   :  { %2870 = vmatmul.mubr.bf16.gmra.mrb[16].mxu0 %v9629_v26  ;;  %v8131_v26 = vld [vmem:[%s11783_s1 + $0x108] sm:$0xff]  }
 0x1b5   :  { %7110 = vmatprep.mubr.msk.bf16.mxu0 %vm12305_vm0, %v9634_v20  ;;  %3443 = vmatpush1.bf16.msra.mxu0 %v8130_v57  ;;  %v12351_v57 = vld [vmem:[#allocation36_spill] sm:$0xff] }
 0x1b6   :  { %3444 = vmatprep.subr.bf16.mxu0 %v9761_v35 }
 0x1b9   :  { %3445 = vmatpush1.bf16.msra.mxu0 %v8131_v26 }
 0x1ba   :  { %3446 = vmatprep.subr.bf16.mxu0 %v9761_v35 }
 0x1bc   :  { %2878 = vmatmul.mubr.bf16.gmra.mrb[20].mxu0 %v9648_v46 }
 0x1bd   :  { %7111 = vmatprep.mubr.msk.bf16.mxu0 %vm12322_vm10, %v9653_v29  ;;  %vm12328_vm10 = vmmov %vm12305_vm0 }
 0x1c4   :  { %2886 = vmatmul.mubr.bf16.gmra.mrb[24].mxu0 %v9668_v52  ;;  %v8132_v52 = vld [vmem:[%s11783_s1 + $0x110] sm:$0xff]  }
 0x1c5   :  { %7112 = vmatprep.mubr.msk.bf16.mxu0 %vm12323_vm15, %v9673_v45  ;;  %3447 = vmatpush1.bf16.msra.mxu0 %v8132_v52  ;;  %vm12330_vm15 = vmmov %vm12305_vm0  ;;  %v3173_v52 = vld [vmem:[#allocation2 + $0x68] sm:$0xff] }
 0x1c6   :  { %3448 = vmatprep.subr.bf16.mxu0 %v9761_v35  ;;  %v12455_v45 = vld [vmem:[#allocation42_spill] sm:$0xff] }
 0x1cc   :  { %2894 = vmatmul.mubr.bf16.gmra.mrb[28].mxu0 %v9684_v14  ;;  %v1569_v14 = vsel %vm9077_vm2, %v12226_v23, 0 }
 0x1cd   :  { %7113 = vmatprep.mubr.msk.bf16.mxu0 %vm12324_vm14, %v9690_v58  ;;  %v1690_v58 = vshrl.u32 %v1569_v14, 16  ;;  %vm12331_vm14 = vmmov %vm12305_vm0 }
 0x1d4   :  { %2902 = vmatmul.mubr.bf16.gmra.mrb[32].mxu0 %v9707_v54  ;;  %v1693_v54 = vshll.u32 %v1569_v14, 16  ;;  %v3172_v14 = vld [vmem:[#allocation2 + $0x60] sm:$0xff] }
 0x1d5   :  { %7114 = vmatprep.mubr.msk.bf16.mxu0 %vm12325_vm5, %v9712_v13  ;;  %v10067_v13 = vld [vmem:[#allocation2 + $0x108] sm:$0xff]  ;;  %vm12333_vm5 = vcmask 1048064  }
 0x1dc   :  { %2910 = vmatmul.mubr.bf16.gmra.mrb[36].mxu0 %v9723_v60  ;;  %v58_v60 = vld [vmem:[#allocation2 + $0x210] sm:$0x80] }
 0x1dd   :  { %7115 = vmatprep.mubr.msk.bf16.mxu0 %vm12326_vm12, %v9728_v32  ;;  %v1692_v32 = vrot.slane %v1690_v58, 7  ;;  %v59_v23 = vsel %vm9541_vm11, 0, %v58_v60  ;;  %vm12334_vm12 = vsmask.f32 256  ;;  %vm12336_vm11 = vmmov %vm12305_vm0  ;;  %v3174_v58 = vld [vmem:[#allocation2 + $0x70] sm:$0xff]  ;;  %v3180_v60 = vld [vmem:[#allocation2 + $0xa0] sm:$0xff] }
 0x1de   :  { %60 = vst [vmem:[#allocation2 + $0x210] sm:$0x80] %v59_v23  ;;  %v3182_v23 = vld [vmem:[#allocation2 + $0xb0] sm:$0xff] }
 0x1df   :  { %v2340_v20 = vpop.f32.mrb[64].mxu0 }
 0x1e0   :  { %v2341_v46 = vpop.f32.mrb[65].mxu0  ;;  %v12352_v20 = vld [vmem:[#allocation25_spill] sm:$0xff] }
 0x1e1   :  { %v2342_v5 = vpop.f32.mrb[66].mxu0  ;;  %v12354_v46 = vld [vmem:[#allocation33_spill] sm:$0xff] }
 0x1e2   :  { %v2343_v29 = vpop.f32.mrb[67].mxu0  ;;  %v3171_v5 = vld [vmem:[#allocation2 + $0x58] sm:$0xff] }
 0x1e3   :  { %v3170_v29 = vld [vmem:[#allocation2 + $0x50] sm:$0xff] }
 0x1e4   :  { %2918 = vmatmul.mubr.bf16.gmra.mrb[40].mxu0 %v9739_v7  ;;  %v1732_v7 = vld [vmem:[#allocation2 + $0x220] sm:$0x1] }
 0x1e5   :  { %7116 = vmatprep.mubr.msk.bf16.mxu0 %vm12327_vm9, %v9745_v1  ;;  %v1521_v1 = vpop.permute.xlu1 %1520  ;;  %v1733_v22 = vsel %vm8236_vm3, %v1692_v32, %v1732_v7  ;;  %vm12335_vm9 = vmmov %vm12305_vm0  ;;  %v8134_v7 = vld [vmem:[%s11784_s3] sm:$0xff]  }
 0x1e6   :  { %1734 = vst [vmem:[#allocation2 + $0x220] sm:$0x1] %v1733_v22  ;;  %1553 = vst.msk [vmem:[#allocation2 + $0x210] sm:$0xff] %vm12333_vm5, %v1521_v1  ;;  %v8135_v1 = vld [vmem:[%s11784_s3 + $0x8] sm:$0xff]   ;;  %5028 = vmatpush1.bf16.msra.mxu1 %v8134_v7  ;;  %v8136_v22 = vld [vmem:[%s11784_s3 + $0x10] sm:$0xff]  }
 0x1e7   :  { %vm12340_vm5 = vmmov %vm12305_vm0  ;;  %5029 = vmatprep.subr.bf16.mxu1 %v9761_v35 }
 0x1ea   :  { %5030 = vmatpush1.bf16.msra.mxu1 %v8135_v1 }
 0x1eb   :  { %5031 = vmatprep.subr.bf16.mxu1 %v9761_v35 }
 0x1ec   :  { %2926 = vmatmul.mubr.bf16.gmra.mrb[44].mxu0 %v9764_v30  ;;  %v1695_v30 = vor.u32 %v1693_v54, %v1692_v32  ;;  %v3179_v54 = vld [vmem:[#allocation2 + $0x98] sm:$0xff] }
 0x1ed   :  { %7117 = vmatprep.mubr.msk.bf16.mxu0 %vm12305_vm0, %v9769_v19  ;;  %v3183_v32 = vld [vmem:[#allocation2 + $0xb8] sm:$0xff] }
 0x1ee   :  { %v1696_v39 = vsel %vm12334_vm12, %v9802_v24, %v1695_v30  ;;  %vm12341_vm12 = vmmov %vm12305_vm0  ;;  %v10131_v24 = vld [vmem:[#allocation2 + $0x218] sm:$0xff]  ;;  %v3185_v30 = vld [vmem:[#allocation2 + $0xc8] sm:$0xff]  ;;  %5032 = vmatpush1.bf16.msra.mxu1 %v8136_v22 }
 0x1ef   :  { %1731 = vst.msk [vmem:[#allocation2 + $0x210] sm:$0xff] %vm12335_vm9, %v1696_v39  ;;  %vm12342_vm9 = vmmov %vm12305_vm0  ;;  %v8137_v39 = vld [vmem:[%s11784_s3 + $0x18] sm:$0xff]   ;;  %5033 = vmatprep.subr.bf16.mxu1 %v9761_v35 }
 0x1f2   :  { %5034 = vmatpush1.bf16.msra.mxu1 %v8137_v39 }
 0x1f3   :  { %5035 = vmatprep.subr.bf16.mxu1 %v9761_v35 }
 0x1f4   :  { %2934 = vmatmul.mubr.bf16.gmra.mrb[48].mxu0 %v9782_v15  ;;  %v8133_v15 = vld [vmem:[%s11783_s1 + $0x118] sm:$0xff]  }
 0x1f5   :  { %7118 = vmatprep.mubr.msk.bf16.mxu0 %vm12328_vm10, %v9789_v31  ;;  %3449 = vmatpush1.bf16.msra.mxu0 %v8133_v15  ;;  %vm12337_vm10 = vmmov %vm12305_vm0  ;;  %v3181_v15 = vld [vmem:[#allocation2 + $0xa8] sm:$0xff] }
 0x1f6   :  { %v10136_v26 = vld [vmem:[#allocation2 + $0x210] sm:$0xff] }
 0x1fc   :  { %2942 = vmatmul.mubr.bf16.gmra.mrb[52].mxu0 %v9804_v34 }
 0x1fd   :  { %7119 = vmatprep.mubr.msk.bf16.mxu0 %vm12330_vm15, %v9806_v48  ;;  %vm12338_vm15 = vmmov %vm12305_vm0 }
 0x204   :  { %2950 = vmatmul.mubr.bf16.gmra.mrb[56].mxu0 %v9823_v9 }
 0x205   :  { %7120 = vmatprep.mubr.msk.bf16.mxu0 %vm12331_vm14, %v10067_v13  ;;  %vm12339_vm14 = vmmov %vm12305_vm0 }
 0x20c   :  { %2958 = vmatmul.mubr.bf16.gmra.mrb[60].mxu0 %v9837_v18 }
 0x20d   :  { %7121 = vmatprep.mubr.msk.bf16.mxu0 %vm12305_vm0, %v9839_v41 }
 0x214   :  { %2966 = vmatmul.mubr.bf16.gmra.mrb[132].mxu0 %v9853_v37 }
 0x215   :  { %7122 = vmatprep.mubr.msk.bf16.mxu0 %vm12336_vm11, %v9855_v50  ;;  %vm12343_vm11 = vmmov %vm12305_vm0 }
 0x21c   :  { %2972 = vmatmul.mubr.bf16.gmra.mrb[68].mxu0 %v9773_v16 }
 0x21d   :  { %7123 = vmatprep.mubr.msk.bf16.mxu0 %vm12337_vm10, %v9866_v51  ;;  %vm12344_vm10 = vmmov %vm12305_vm0 }
 0x224   :  { %2980 = vmatmul.mubr.bf16.gmra.mrb[72].mxu0 %v9872_v43 }
 0x225   :  { %7124 = vmatprep.mubr.msk.bf16.mxu0 %vm12338_vm15, %v9874_v28  ;;  %vm12345_vm15 = vmmov %vm12305_vm0 }
 0x22c   :  { %2988 = vmatmul.mubr.bf16.gmra.mrb[76].mxu0 %v9879_v63 }
 0x22d   :  { %7125 = vmatprep.mubr.msk.bf16.mxu0 %vm12339_vm14, %v9881_v27  ;;  %vm12346_vm14 = vmmov %vm12305_vm0 }
 0x234   :  { %2996 = vmatmul.mubr.bf16.gmra.mrb[80].mxu0 %v9886_v0 }
 0x235   :  { %7126 = vmatprep.mubr.msk.bf16.mxu0 %vm12340_vm5, %v9888_v25  ;;  %vm12347_vm5 = vmmov %vm12305_vm0 }
 0x23c   :  { %3004 = vmatmul.mubr.bf16.gmra.mrb[84].mxu0 %v9893_v49 }
 0x23d   :  { %7127 = vmatprep.mubr.msk.bf16.mxu0 %vm12341_vm12, %v9895_v42  ;;  %vm12348_vm12 = vmmov %vm12305_vm0 }
 0x244   :  { %3012 = vmatmul.mubr.bf16.gmra.mrb[88].mxu0 %v9900_v53 }
 0x245   :  { %7128 = vmatprep.mubr.msk.bf16.mxu0 %vm12342_vm9, %v9902_v40  ;;  %vm12350_vm9 = vmmov %vm12305_vm0 }
 0x24c   :  { %3020 = vmatmul.mubr.bf16.gmra.mrb[92].mxu0 %v9907_v61 }
 0x24d   :  { %7129 = vmatprep.mubr.msk.bf16.mxu0 %vm12305_vm0, %v9909_v10 }
 0x254   :  { %3028 = vmatmul.mubr.bf16.gmra.mrb[96].mxu0 %v9914_v12 }
 0x255   :  { %7130 = vmatprep.mubr.msk.bf16.mxu0 %vm12343_vm11, %v9916_v55  ;;  %vm12353_vm11 = vmmov %vm12305_vm0 }
 0x25c   :  { %3036 = vmatmul.mubr.bf16.gmra.mrb[100].mxu0 %v9921_v3 }
 0x25d   :  { %7131 = vmatprep.mubr.msk.bf16.mxu0 %vm12344_vm10, %v9923_v4  ;;  %vm12355_vm10 = vmmov %vm12305_vm0 }
 0x264   :  { %3044 = vmatmul.mubr.bf16.gmra.mrb[104].mxu0 %v9928_v17 }
 0x265   :  { %7132 = vmatprep.mubr.msk.bf16.mxu0 %vm12345_vm15, %v9930_v21  ;;  %vm12356_vm15 = vmmov %vm12305_vm0 }
 0x26c   :  { %3052 = vmatmul.mubr.bf16.gmra.mrb[108].mxu0 %v9935_v59 }
 0x26d   :  { %7133 = vmatprep.mubr.msk.bf16.mxu0 %vm12346_vm14, %v9937_v11  ;;  %vm12357_vm14 = vmmov %vm12305_vm0 }
 0x274   :  { %3060 = vmatmul.mubr.bf16.gmra.mrb[112].mxu0 %v9942_v62 }
 0x275   :  { %7134 = vmatprep.mubr.msk.bf16.mxu0 %vm12347_vm5, %v9944_v33  ;;  %vm12358_vm5 = vmmov %vm12305_vm0 }
 0x27c   :  { %3068 = vmatmul.mubr.bf16.gmra.mrb[116].mxu0 %v9949_v38 }
 0x27d   :  { %7135 = vmatprep.mubr.msk.bf16.mxu0 %vm12348_vm12, %v9951_v56  ;;  %vm12359_vm12 = vmmov %vm12305_vm0 }
 0x284   :  { %3076 = vmatmul.mubr.bf16.gmra.mrb[120].mxu0 %v9956_v8 }
 0x285   :  { %7136 = vmatprep.mubr.msk.bf16.mxu0 %vm12350_vm9, %v12349_v44  ;;  %vm12360_vm9 = vmmov %vm12305_vm0 }
 0x28c   :  { %3084 = vmatmul.mubr.bf16.gmra.mrb[124].mxu0 %v12351_v57 }
 0x28d   :  { %7137 = vmatprep.mubr.msk.bf16.mxu0 %vm12305_vm0, %v10131_v24 }
 0x294   :  { %3092 = vmatmul.mubr.bf16.gmra.mrb[128].mxu0 %v10136_v26 }
 0x295   :  { %7174 = vmatprep.mubr.msk.bf16.mxu0 %vm12353_vm11, %v12352_v20  ;;  %vm12361_vm11 = vmmov %vm12305_vm0 }
 0x29c   :  { %3459 = vmatmul.mubr.bf16.vlgmr.msra.gmra.mrb[0].mxu0 %v9978_v36  ;;  %v3175_v36 = vld [vmem:[#allocation2 + $0x78] sm:$0xff] }
 0x29d   :  { %7175 = vmatprep.mubr.msk.bf16.mxu0 %vm12355_vm10, %v12354_v46  ;;  %vm12362_vm10 = vmmov %vm12305_vm0 }
 0x2a4   :  { %3467 = vmatmul.mubr.bf16.gmra.mrb[4].mxu0 %v9993_v6  ;;  %v3177_v6 = vld [vmem:[#allocation2 + $0x88] sm:$0xff] }
 0x2a5   :  { %7176 = vmatprep.mubr.msk.bf16.mxu0 %vm12356_vm15, %v9998_v47  ;;  %v3176_v47 = vld [vmem:[#allocation2 + $0x80] sm:$0xff]  ;;  %vm12363_vm15 = vmmov %vm12305_vm0 }
 0x2ac   :  { %3475 = vmatmul.mubr.bf16.gmra.mrb[8].mxu0 %v10008_v2  ;;  %v3178_v2 = vld [vmem:[#allocation2 + $0x90] sm:$0xff] }
 0x2ad   :  { %7177 = vmatprep.mubr.msk.bf16.mxu0 %vm12357_vm14, %v3171_v5  ;;  %vm12364_vm14 = vmmov %vm12305_vm0 }
 0x2b4   :  { %3483 = vmatmul.mubr.bf16.gmra.mrb[12].mxu0 %v3170_v29  ;;  %v3184_v29 = vld [vmem:[#allocation2 + $0xc0] sm:$0xff] }
 0x2b5   :  { %7178 = vmatprep.mubr.msk.bf16.mxu0 %vm12358_vm5, %v3173_v52  ;;  %vm12365_vm5 = vmmov %vm12305_vm0 }
 0x2bc   :  { %3491 = vmatmul.mubr.bf16.gmra.mrb[16].mxu0 %v3172_v14  ;;  %v3187_v14 = vld [vmem:[#allocation2 + $0xd8] sm:$0xff] }
 0x2bd   :  { %7179 = vmatprep.mubr.msk.bf16.mxu0 %vm12359_vm12, %v3175_v36  ;;  %v8138_v36 = vld [vmem:[%s11784_s3 + $0x20] sm:$0xff]   ;;  %vm12366_vm12 = vmmov %vm12305_vm0 }
 0x2be   :  { %5036 = vmatpush1.bf16.msra.mxu1 %v8138_v36  ;;  %v8146_v36 = vld [vmem:[%s11784_s3 + $0x60] sm:$0xff]  }
 0x2bf   :  { %5037 = vmatprep.subr.bf16.mxu1 %v9761_v35 }
 0x2c4   :  { %3499 = vmatmul.mubr.bf16.gmra.mrb[20].mxu0 %v3174_v58  ;;  %v3186_v58 = vld [vmem:[#allocation2 + $0xd0] sm:$0xff] }
 0x2c5   :  { %7180 = vmatprep.mubr.msk.bf16.mxu0 %vm12360_vm9, %v3177_v6  ;;  %v8139_v6 = vld [vmem:[%s11784_s3 + $0x28] sm:$0xff]   ;;  %vm12367_vm9 = vmmov %vm12305_vm0 }
 0x2c6   :  { %5038 = vmatpush1.bf16.msra.mxu1 %v8139_v6 }
 0x2c7   :  { %5039 = vmatprep.subr.bf16.mxu1 %v9761_v35 }
 0x2cc   :  { %3507 = vmatmul.mubr.bf16.gmra.mrb[24].mxu0 %v3176_v47  ;;  %v8140_v47 = vld [vmem:[%s11784_s3 + $0x30] sm:$0xff]  }
 0x2cd   :  { %7181 = vmatprep.mubr.msk.bf16.mxu0 %vm12305_vm0, %v3179_v54  ;;  %5040 = vmatpush1.bf16.msra.mxu1 %v8140_v47  ;;  %v8141_v54 = vld [vmem:[%s11784_s3 + $0x38] sm:$0xff]  }
 0x2ce   :  { %5041 = vmatprep.subr.bf16.mxu1 %v9761_v35 }
 0x2d1   :  { %5042 = vmatpush1.bf16.msra.mxu1 %v8141_v54 }
 0x2d2   :  { %5043 = vmatprep.subr.bf16.mxu1 %v9761_v35 }
 0x2d4   :  { %3515 = vmatmul.mubr.bf16.gmra.mrb[28].mxu0 %v3178_v2  ;;  %v8142_v2 = vld [vmem:[%s11784_s3 + $0x40] sm:$0xff]  }
 0x2d5   :  { %7182 = vmatprep.mubr.msk.bf16.mxu0 %vm12361_vm11, %v3181_v15  ;;  %5044 = vmatpush1.bf16.msra.mxu1 %v8142_v2  ;;  %vm12368_vm11 = vmmov %vm12305_vm0  ;;  %v12388_v15 = vld [vmem:[#allocation6_spill] sm:$0xff] }
 0x2d6   :  { %5045 = vmatprep.subr.bf16.mxu1 %v9761_v35 }
 0x2dc   :  { %3523 = vmatmul.mubr.bf16.gmra.mrb[32].mxu0 %v3180_v60 }
 0x2dd   :  { %7183 = vmatprep.mubr.msk.bf16.mxu0 %vm12362_vm10, %v3183_v32  ;;  %vm12369_vm10 = vmmov %vm12305_vm0 }
 0x2e4   :  { %3531 = vmatmul.mubr.bf16.gmra.mrb[36].mxu0 %v3182_v23 }
 0x2e5   :  { %7184 = vmatprep.mubr.msk.bf16.mxu0 %vm12363_vm15, %v3185_v30  ;;  %vm12370_vm15 = vmmov %vm12305_vm0 }
 0x2e7   :  { %v2967_v20 = vpop.f32.mrb[132].mxu0 }
 0x2e8   :  { %v2968_v46 = vpop.f32.mrb[133].mxu0 }
 0x2e9   :  { %v2969_v5 = vpop.f32.mrb[134].mxu0 }
 0x2ea   :  { %v2970_v52 = vpop.f32.mrb[135].mxu0 }
 0x2ec   :  { %3539 = vmatmul.mubr.bf16.gmra.mrb[40].mxu0 %v3184_v29 }
 0x2ed   :  { %7185 = vmatprep.mubr.msk.bf16.mxu0 %vm12364_vm14, %v3187_v14  ;;  %vm12371_vm14 = vmmov %vm12305_vm0 }
 0x2f4   :  { %3547 = vmatmul.mubr.bf16.gmra.mrb[44].mxu0 %v3186_v58 }
 0x2f5   :  { %7186 = vmatprep.mubr.msk.bf16.mxu0 %vm12365_vm5, %v9789_v31  ;;  %v8143_v31 = vld [vmem:[%s11784_s3 + $0x48] sm:$0xff]   ;;  %vm12372_vm5 = vmmov %vm12305_vm0 }
 0x2f6   :  { %5046 = vmatpush1.bf16.msra.mxu1 %v8143_v31 }
 0x2f7   :  { %5047 = vmatprep.subr.bf16.mxu1 %v9761_v35 }
 0x2fc   :  { %3555 = vmatmul.mubr.bf16.gmra.mrb[48].mxu0 %v9804_v34  ;;  %v8144_v34 = vld [vmem:[%s11784_s3 + $0x50] sm:$0xff]  }
 0x2fd   :  { %7187 = vmatprep.mubr.msk.bf16.mxu0 %vm12366_vm12, %v9806_v48  ;;  %5048 = vmatpush1.bf16.msra.mxu1 %v8144_v34  ;;  %v8145_v48 = vld [vmem:[%s11784_s3 + $0x58] sm:$0xff]   ;;  %vm12373_vm12 = vmmov %vm12305_vm0 }
 0x2fe   :  { %5049 = vmatprep.subr.bf16.mxu1 %v9761_v35 }
 0x301   :  { %5050 = vmatpush1.bf16.msra.mxu1 %v8145_v48  ;;  %v12394_v48 = vld [vmem:[#allocation12_spill] sm:$0xff] }
 0x302   :  { %5654 = vmatprep.subr.bf16.mxu1 %v9761_v35  ;;  %v10253_v35 = vld [vmem:[%s11785_s2] ss:$0 sm:$0xff] }
 0x304   :  { %3563 = vmatmul.mubr.bf16.gmra.mrb[52].mxu0 %v9823_v9 }
 0x305   :  { %7188 = vmatprep.mubr.msk.bf16.mxu0 %vm12367_vm9, %v10067_v13  ;;  %vm12374_vm9 = vmmov %vm12305_vm0 }
 0x30c   :  { %3571 = vmatmul.mubr.bf16.gmra.mrb[56].mxu0 %v9837_v18 }
 0x30d   :  { %7189 = vmatprep.mubr.msk.bf16.mxu0 %vm12305_vm0, %v9839_v41 }
 0x314   :  { %3579 = vmatmul.mubr.bf16.gmra.mrb[60].mxu0 %v9853_v37 }
 0x315   :  { %7190 = vmatprep.mubr.msk.bf16.mxu0 %vm12368_vm11, %v9855_v50  ;;  %vm12375_vm11 = vmmov %vm12305_vm0 }
 0x31c   :  { %3587 = vmatmul.mubr.bf16.gmra.mrb[136].mxu0 %v9773_v16 }
 0x31d   :  { %7191 = vmatprep.mubr.msk.bf16.mxu0 %vm12369_vm10, %v9866_v51  ;;  %vm12376_vm10 = vmmov %vm12305_vm0 }
 0x324   :  { %3593 = vmatmul.mubr.bf16.gmra.mrb[68].mxu0 %v9872_v43  ;;  %v12380_v43 = vld [vmem:[#allocation4_spill] sm:$0xff] }
 0x325   :  { %7192 = vmatprep.mubr.msk.bf16.mxu0 %vm12370_vm15, %v9874_v28  ;;  %vm12377_vm15 = vmmov %vm12305_vm0 }
 0x32c   :  { %3601 = vmatmul.mubr.bf16.gmra.mrb[72].mxu0 %v9879_v63 }
 0x32d   :  { %7193 = vmatprep.mubr.msk.bf16.mxu0 %vm12371_vm14, %v9881_v27  ;;  %vm12378_vm14 = vmmov %vm12305_vm0 }
 0x334   :  { %3609 = vmatmul.mubr.bf16.gmra.mrb[76].mxu0 %v9886_v0 }
 0x335   :  { %7194 = vmatprep.mubr.msk.bf16.mxu0 %vm12372_vm5, %v9888_v25  ;;  %vm12379_vm5 = vmmov %vm12305_vm0  ;;  %v4286_v25 = vld [vmem:[#allocation2 + $0x8] sm:$0x80] }
 0x33c   :  { %3617 = vmatmul.mubr.bf16.gmra.mrb[80].mxu0 %v9893_v49 }
 0x33d   :  { %7195 = vmatprep.mubr.msk.bf16.mxu0 %vm12373_vm12, %v9895_v42  ;;  %vm12381_vm12 = vnez %v12380_v43 }
 0x344   :  { %3625 = vmatmul.mubr.bf16.gmra.mrb[84].mxu0 %v9900_v53 }
 0x345   :  { %7196 = vmatprep.mubr.msk.bf16.mxu0 %vm12374_vm9, %v9902_v40 }
 0x34c   :  { %3633 = vmatmul.mubr.bf16.gmra.mrb[88].mxu0 %v9907_v61 }
 0x34d   :  { %7197 = vmatprep.mubr.msk.bf16.mxu0 %vm12305_vm0, %v9909_v10  ;;  %v12384_v10 = vld [vmem:[#allocation9_spill] sm:$0xff] }
 0x354   :  { %3641 = vmatmul.mubr.bf16.gmra.mrb[92].mxu0 %v9914_v12 }
 0x355   :  { %7198 = vmatprep.mubr.msk.bf16.mxu0 %vm12375_vm11, %v9916_v55  ;;  %vm12385_vm11 = vnez %v12384_v10 }
 0x35c   :  { %3649 = vmatmul.mubr.bf16.gmra.mrb[96].mxu0 %v9921_v3 }
 0x35d   :  { %7199 = vmatprep.mubr.msk.bf16.mxu0 %vm12376_vm10, %v9923_v4  ;;  %v12386_v4 = vld [vmem:[#allocation11_spill] sm:$0xff] }
 0x35e   :  { %vm12387_vm10 = vnez %v12386_v4 }
 0x364   :  { %3657 = vmatmul.mubr.bf16.gmra.mrb[100].mxu0 %v9928_v17 }
 0x365   :  { %7200 = vmatprep.mubr.msk.bf16.mxu0 %vm12377_vm15, %v9930_v21  ;;  %vm12389_vm15 = vnez %v12388_v15 }
 0x36c   :  { %3665 = vmatmul.mubr.bf16.gmra.mrb[104].mxu0 %v9935_v59 }
 0x36d   :  { %7201 = vmatprep.mubr.msk.bf16.mxu0 %vm12378_vm14, %v9937_v11  ;;  %vm12390_vm14 = vsmask.f32 7424 }
 0x36f   :  { %v3460_v16 = vpop.f32.mrb[0].mxu0 }
 0x370   :  { %v7455_v9 = vadd.f32 %v10253_v35, %v3460_v16  ;;  %v3462_v18 = vpop.f32.mrb[1].mxu0 }
 0x371   :  { %v3463_v41 = vpop.f32.mrb[2].mxu0 }
 0x372   :  { %v7456_v17 = vadd.f32 %v10253_v35, %v3463_v41  ;;  %v3465_v37 = vpop.f32.mrb[3].mxu0  ;;  %v3785_v50 = vmax.f32 %v7455_v9, 0.0  ;;  %v12396_v9 = vld [vmem:[#allocation7_spill] sm:$0xff] }
 0x374   :  { %v3786_v21 = vmax.f32 %v7456_v17, 0.0  ;;  %3673 = vmatmul.mubr.bf16.gmra.mrb[108].mxu0 %v9942_v62 }
 0x375   :  { %7202 = vmatprep.mubr.msk.bf16.mxu0 %vm12379_vm5, %v9944_v33  ;;  %v12382_v33 = vld [vmem:[#allocation5_spill] sm:$0xff]  ;;  %vm12391_vm5 = vmmov %vm12305_vm0 }
 0x376   :  { %v3849_v59 = vpack.c.bf16 %v3786_v21, %v3785_v50  ;;  %vm12383_vm9 = vnez %v12382_v33 }
 0x377   :  { %v3468_v51 = vpop.f32.mrb[4].mxu0 }
 0x378   :  { %v4126_v11 = vsel %vm12381_vm12, %v3849_v59, 0  ;;  %v7457_v28 = vadd.f32 %v10253_v35, %v3468_v51  ;;  %3881 = vrot.lane.b32.xlu0 %v3849_v59, %s8180_s28  ;;  %v3470_v63 = vpop.f32.mrb[5].mxu0  ;;  %v10274_v12 = vsel %vm12385_vm11, %v3849_v59, 0  ;;  %vm12397_vm11 = vnez %v12396_v9 }
 0x379   :  { %v4143_v27 = vshll.u32 %v4126_v11, 16  ;;  %v3471_v0 = vpop.f32.mrb[6].mxu0  ;;  %v4146_v7 = vshrl.u32 %v4126_v11, 16 }
 0x37a   :  { %v7458_v49 = vadd.f32 %v10253_v35, %v3471_v0  ;;  %v3473_v42 = vpop.f32.mrb[7].mxu0  ;;  %v3787_v53 = vmax.f32 %v7457_v28, 0.0 }
 0x37b   :  { %v4145_v62 = vrot.slane %v4143_v27, 1 }
 0x37c   :  { %v3788_v40 = vmax.f32 %v7458_v49, 0.0  ;;  %3681 = vmatmul.mubr.bf16.gmra.mrb[112].mxu0 %v9949_v38 }
 0x37d   :  { %v4287_v61 = vsel %vm12383_vm9, %v4145_v62, %v4286_v25  ;;  %7203 = vmatprep.mubr.msk.bf16.mxu0 %vm12305_vm0, %v9951_v56  ;;  %v3962_v56 = vshrl.u32 %v10274_v12, 16  ;;  %v4148_v20 = vor.u32 %v4146_v7, %v4145_v62 }
 0x37e   :  { %4288 = vst [vmem:[#allocation2 + $0x8] sm:$0x80] %v4287_v61  ;;  %v3850_v55 = vpack.c.bf16 %v3788_v40, %v3787_v53 }
 0x37f   :  { %v3476_v3 = vpop.f32.mrb[8].mxu0  ;;  %v10288_v58 = vrot.slane %v3962_v56, 7 }
 0x380   :  { %v3946_v13 = vsel %vm12387_vm10, %v3850_v55, 0  ;;  %v4127_v60 = vsel %vm12389_vm15, %v3850_v55, 0  ;;  %v7459_v38 = vadd.f32 %v10253_v35, %v3476_v3  ;;  %3883 = vrot.lane.b32.xlu1 %v3850_v55, %s8180_s28  ;;  %v3478_v32 = vpop.f32.mrb[9].mxu0  ;;  %vm12392_vm15 = vmmov %vm12305_vm0  ;;  %vm12393_vm10 = vsmask.f32 256  ;;  %v12402_v55 = vld [vmem:[#allocation15_spill] sm:$0xff] }
 0x381   :  { %v3969_v1 = vshrl.u32 %v3946_v13, 16  ;;  %v4150_v23 = vshll.u32 %v4127_v60, 16  ;;  %v3479_v30 = vpop.f32.mrb[10].mxu0  ;;  %v3972_v5 = vshll.u32 %v3946_v13, 16  ;;  %v4154_v17 = vshrl.u32 %v4127_v60, 16 }
 0x382   :  { %v7460_v22 = vadd.f32 %v10253_v35, %v3479_v30  ;;  %v3481_v39 = vpop.f32.mrb[11].mxu0  ;;  %v3789_v52 = vmax.f32 %v7459_v38, 0.0  ;;  %v3229_v30 = vld [vmem:[#allocation2 + $0x228] sm:$0xff] }
 0x383   :  { %v3971_v46 = vrot.slane %v3969_v1, 7  ;;  %v4152_v29 = vrot.slane %v4150_v23, 1 }
 0x384   :  { %v3790_v14 = vmax.f32 %v7460_v22, 0.0  ;;  %3689 = vmatmul.mubr.bf16.gmra.mrb[116].mxu0 %v9956_v8  ;;  %v10295_v8 = vld [vmem:[#allocation2] sm:$0xff] }
 0x385   :  { %v3974_v6 = vor.u32 %v3972_v5, %v3971_v46  ;;  %v4153_v47 = vsel %vm12390_vm14, %v4148_v20, %v4152_v29  ;;  %v4767_v54 = vld [vmem:[#allocation2 + $0x8] sm:$0xff]  ;;  %7204 = vmatprep.mubr.msk.bf16.mxu0 %vm12391_vm5, %v12349_v44  ;;  %vm12395_vm14 = vnez %v12394_v48  ;;  %v4156_v11 = vor.u32 %v4154_v17, %v4152_v29  ;;  %vm12400_vm5 = vmmov %vm12305_vm0 }
 0x386   :  { %4289 = vst.msk [vmem:[#allocation2 + $0x18] sm:$0xff] %vm12305_vm0, %v4153_v47  ;;  %v3851_v2 = vpack.c.bf16 %v3790_v14, %v3789_v52  ;;  %7219 = vmatprep.mubr.msk.bf16.mxu1 %vm12392_vm15, %v4767_v54  ;;  %vm12399_vm15 = vmmov %vm12305_vm0 }
 0x387   :  { %v3484_v31 = vpop.f32.mrb[12].mxu0  ;;  %5060 = vmatmul.mubr.bf16.vlgmr.msra.gmra.mrb[0].mxu1 %v10295_v8  ;;  %v10300_v34 = vsel %vm12393_vm10, %v10288_v58, %v3974_v6  ;;  %vm12398_vm10 = vsmask.f32 7424  ;;  %v8147_v6 = vld [vmem:[%s11784_s3 + $0x68] sm:$0xff]  }
 0x388   :  { %v3947_v16 = vsel %vm12395_vm14, %v3851_v2, 0  ;;  %v4128_v44 = vsel %vm12397_vm11, %v3851_v2, 0  ;;  %v7461_v18 = vadd.f32 %v10253_v35, %v3484_v31  ;;  %3885 = vrot.lane.b32.xlu0 %v3851_v2, %s8180_s28  ;;  %v3486_v41 = vpop.f32.mrb[13].mxu0  ;;  %5655 = vmatpush1.bf16.msra.mxu1 %v8146_v36  ;;  %vm12401_vm11 = vsmask.f32 256  ;;  %v12410_v2 = vld [vmem:[#allocation17_spill] sm:$0xff] }
 0x389   :  { %v3977_v37 = vshrl.u32 %v3947_v16, 16  ;;  %v4158_v50 = vshll.u32 %v4128_v44, 16  ;;  %v3487_v21 = vpop.f32.mrb[14].mxu0  ;;  %5656 = vmatprep.subr.bf16.mxu1 %v10295_v8  ;;  %v3980_v63 = vshll.u32 %v3947_v16, 16  ;;  %vm12403_vm14 = vnez %v12402_v55 }
 0x38a   :  { %v7462_v59 = vadd.f32 %v10253_v35, %v3487_v21  ;;  %v3489_v51 = vpop.f32.mrb[15].mxu0  ;;  %v3791_v0 = vmax.f32 %v7461_v18, 0.0  ;;  %v4162_v38 = vshrl.u32 %v4128_v44, 16  ;;  %v3228_v21 = vld [vmem:[#allocation2 + $0x220] sm:$0xff] }
 0x38b   :  { %v3979_v28 = vrot.slane %v3977_v37, 7  ;;  %v4160_v27 = vrot.slane %v4158_v50, 1 }
 0x38c   :  { %v3792_v25 = vmax.f32 %v7462_v59, 0.0  ;;  %3697 = vmatmul.mubr.bf16.gmra.mrb[120].mxu0 %v12351_v57  ;;  %v12404_v57 = vld [vmem:[#allocation8_spill] sm:$0xff]  ;;  %5657 = vmatpush1.bf16.msra.mxu1 %v8147_v6 }
 0x38d   :  { %v3982_v49 = vor.u32 %v3980_v63, %v3979_v28  ;;  %v4161_v42 = vsel %vm12398_vm10, %v4156_v11, %v4160_v27  ;;  %v4769_v62 = vld [vmem:[#allocation2 + $0x18] sm:$0xff]  ;;  %7205 = vmatprep.mubr.msk.bf16.mxu0 %vm12399_vm15, %v10131_v24  ;;  %vm12405_vm9 = vnez %v12404_v57  ;;  %v4164_v22 = vor.u32 %v4162_v38, %v4160_v27  ;;  %vm12408_vm15 = vmmov %vm12305_vm0  ;;  %5658 = vmatprep.subr.bf16.mxu1 %v10295_v8 }
 0x38e   :  { %4290 = vst.msk [vmem:[#allocation2 + $0x28] sm:$0xff] %vm12400_vm5, %v4161_v42  ;;  %v3852_v53 = vpack.c.bf16 %v3792_v25, %v3791_v0  ;;  %7220 = vmatprep.mubr.msk.bf16.mxu1 %vm12305_vm0, %v4769_v62  ;;  %vm12409_vm5 = vsmask.f32 256 }
 0x38f   :  { %v3492_v40 = vpop.f32.mrb[16].mxu0  ;;  %v10317_v61 = vsel %vm12401_vm11, %v3971_v46, %v3982_v49  ;;  %vm12406_vm11 = vmmov %vm12398_vm10 }
 0x390   :  { %v3948_v3 = vsel %vm12403_vm14, %v3852_v53, 0  ;;  %v4129_v13 = vsel %vm12405_vm9, %v3852_v53, 0  ;;  %v7463_v60 = vadd.f32 %v10253_v35, %v3492_v40  ;;  %3887 = vrot.lane.b32.xlu1 %v3852_v53, %s8180_s28  ;;  %v3494_v24 = vpop.f32.mrb[17].mxu0  ;;  %vm12407_vm10 = vmmov %vm12305_vm0  ;;  %vm12411_vm0 = vnez %v12410_v2 }
 0x391   :  { %v3985_v32 = vshrl.u32 %v3948_v3, 16  ;;  %v4166_v56 = vshll.u32 %v4129_v13, 16  ;;  %v3495_v7 = vpop.f32.mrb[18].mxu0  ;;  %v3988_v20 = vshll.u32 %v3948_v3, 16  ;;  %v4170_v41 = vshrl.u32 %v4129_v13, 16  ;;  %v12415_v3 = vld [vmem:[#allocation20_spill] sm:$0xff] }
 0x392   :  { %v7464_v1 = vadd.f32 %v10253_v35, %v3495_v7  ;;  %v3497_v23 = vpop.f32.mrb[19].mxu0  ;;  %v3793_v5 = vmax.f32 %v7463_v60, 0.0  ;;  %v12417_v60 = vld [vmem:[#allocation13_spill] sm:$0xff] }
 0x393   :  { %v3987_v39 = vrot.slane %v3985_v32, 7  ;;  %v4168_v46 = vrot.slane %v4166_v56, 1 }
 0x394   :  { %v3794_v29 = vmax.f32 %v7464_v1, 0.0  ;;  %3705 = vmatmul.mubr.bf16.gmra.mrb[124].mxu0 %v10136_v26  ;;  %v12412_v26 = vld [vmem:[#allocation10_spill] sm:$0xff] }
 0x395   :  { %v3990_v52 = vor.u32 %v3988_v20, %v3987_v39  ;;  %v4169_v14 = vsel %vm12406_vm11, %v4164_v22, %v4168_v46  ;;  %7206 = vmatprep.mubr.msk.bf16.mxu0 %vm12407_vm10, %v3229_v30  ;;  %vm12413_vm9 = vnez %v12412_v26  ;;  %v4172_v11 = vor.u32 %v4170_v41, %v4168_v46  ;;  %v12420_v41 = vld [vmem:[#allocation14_spill] sm:$0xff] }
 0x396   :  { %4291 = vst.msk [vmem:[#allocation2 + $0x38] sm:$0xff] %vm12408_vm15, %v4169_v14  ;;  %v3853_v36 = vpack.c.bf16 %v3794_v29, %v3793_v5  ;;  %vm12414_vm15 = vmmov %vm12409_vm5 }
 0x397   :  { %v3500_v47 = vpop.f32.mrb[20].mxu0  ;;  %v10334_v54 = vsel %vm12409_vm5, %v3979_v28, %v3990_v52  ;;  %vm12416_vm5 = vnez %v12415_v3 }
 0x398   :  { %v3949_v31 = vsel %vm12411_vm0, %v3853_v36, 0  ;;  %v4130_v16 = vsel %vm12413_vm9, %v3853_v36, 0  ;;  %v7465_v44 = vadd.f32 %v10253_v35, %v3500_v47  ;;  %3889 = vrot.lane.b32.xlu0 %v3853_v36, %s8180_s28  ;;  %v3502_v18 = vpop.f32.mrb[21].mxu0  ;;  %vm12418_vm9 = vnez %v12417_v60  ;;  %v8148_v47 = vld [vmem:[%s11784_s3 + $0x70] sm:$0xff]  }
 0x399   :  { %v3993_v17 = vshrl.u32 %v3949_v31, 16  ;;  %v4174_v37 = vshll.u32 %v4130_v16, 16  ;;  %v3503_v50 = vpop.f32.mrb[22].mxu0  ;;  %v3996_v63 = vshll.u32 %v3949_v31, 16  ;;  %v4178_v56 = vshrl.u32 %v4130_v16, 16  ;;  %5659 = vmatpush1.bf16.msra.mxu1 %v8148_v47 }
 0x39a   :  { %v7466_v59 = vadd.f32 %v10253_v35, %v3503_v50  ;;  %v3505_v51 = vpop.f32.mrb[23].mxu0  ;;  %v3795_v0 = vmax.f32 %v7465_v44, 0.0  ;;  %5660 = vmatprep.subr.bf16.mxu1 %v10295_v8 }
 0x39b   :  { %v3995_v28 = vrot.slane %v3993_v17, 7  ;;  %v4176_v27 = vrot.slane %v4174_v37, 1 }
 0x39c   :  { %v3796_v25 = vmax.f32 %v7466_v59, 0.0  ;;  %3713 = vmatmul.mubr.bf16.gmra.mrb[128].mxu0 %v3228_v21 }
 0x39d   :  { %v3998_v49 = vor.u32 %v3996_v63, %v3995_v28  ;;  %v4177_v42 = vsel %vm12406_vm11, %v4172_v11, %v4176_v27 }
 0x39e   :  { %4292 = vst.msk [vmem:[#allocation2 + $0x48] sm:$0xff] %vm12407_vm10, %v4177_v42  ;;  %v3854_v62 = vpack.c.bf16 %v3796_v25, %v3795_v0 }
 0x39f   :  { %v3508_v53 = vpop.f32.mrb[24].mxu0  ;;  %v10347_v40 = vsel %vm12414_vm15, %v3987_v39, %v3998_v49  ;;  %v4180_v39 = vor.u32 %v4178_v56, %v4176_v27 }
 0x3a0   :  { %v3950_v13 = vsel %vm12416_vm5, %v3854_v62, 0  ;;  %v4131_v24 = vsel %vm12418_vm9, %v3854_v62, 0  ;;  %v7467_v38 = vadd.f32 %v10253_v35, %v3508_v53  ;;  %3891 = vrot.lane.b32.xlu1 %v3854_v62, %s8180_s28  ;;  %v3510_v32 = vpop.f32.mrb[25].mxu0  ;;  %vm12421_vm9 = vnez %v12420_v41 }
 0x3a1   :  { %v4001_v7 = vshrl.u32 %v3950_v13, 16  ;;  %v4182_v1 = vshll.u32 %v4131_v24, 16  ;;  %v3511_v23 = vpop.f32.mrb[26].mxu0  ;;  %v4004_v46 = vshll.u32 %v3950_v13, 16  ;;  %v4186_v21 = vshrl.u32 %v4131_v24, 16 }
 0x3a2   :  { %v7468_v30 = vadd.f32 %v10253_v35, %v3511_v23  ;;  %v3513_v22 = vpop.f32.mrb[27].mxu0  ;;  %v3797_v29 = vmax.f32 %v7467_v38, 0.0 }
 0x3a3   :  { %v4003_v20 = vrot.slane %v4001_v7, 7  ;;  %v4184_v5 = vrot.slane %v4182_v1, 1  ;;  %v12423_v1 = vld [vmem:[#allocation16_spill] sm:$0xff] }
 0x3a4   :  { %v3798_v52 = vmax.f32 %v7468_v30, 0.0 }
 0x3a5   :  { %v4006_v14 = vor.u32 %v4004_v46, %v4003_v20  ;;  %v4185_v36 = vsel %vm12406_vm11, %v4180_v39, %v4184_v5  ;;  %v4188_v27 = vor.u32 %v4186_v21, %v4184_v5 }
 0x3a6   :  { %4293 = vst.msk [vmem:[#allocation2 + $0x58] sm:$0xff] %vm12407_vm10, %v4185_v36  ;;  %v3855_v6 = vpack.c.bf16 %v3798_v52, %v3797_v29 }
 0x3a7   :  { %v3516_v31 = vpop.f32.mrb[28].mxu0  ;;  %v10362_v16 = vsel %vm12414_vm15, %v3995_v28, %v4006_v14 }
 0x3a8   :  { %v3951_v18 = vsel %vm12237_vm1, %v3855_v6, 0  ;;  %v4132_v17 = vsel %vm12421_vm9, %v3855_v6, 0  ;;  %v7469_v37 = vadd.f32 %v10253_v35, %v3516_v31  ;;  %3893 = vrot.lane.b32.xlu0 %v3855_v6, %s8180_s28  ;;  %v3518_v50 = vpop.f32.mrb[29].mxu0  ;;  %vm12424_vm9 = vnez %v12423_v1 }
 0x3a9   :  { %v4009_v59 = vshrl.u32 %v3951_v18, 16  ;;  %v4190_v51 = vshll.u32 %v4132_v17, 16  ;;  %v3519_v11 = vpop.f32.mrb[30].mxu0  ;;  %v4012_v25 = vshll.u32 %v3951_v18, 16  ;;  %v4194_v39 = vshrl.u32 %v4132_v17, 16 }
 0x3aa   :  { %v7470_v28 = vadd.f32 %v10253_v35, %v3519_v11  ;;  %v3521_v63 = vpop.f32.mrb[31].mxu0  ;;  %v3799_v42 = vmax.f32 %v7469_v37, 0.0 }
 0x3ab   :  { %v4011_v0 = vrot.slane %v4009_v59, 7  ;;  %v4192_v49 = vrot.slane %v4190_v51, 1  ;;  %v12425_v51 = vld [vmem:[#allocation26_spill] sm:$0xff] }
 0x3ac   :  { %v3800_v62 = vmax.f32 %v7470_v28, 0.0  ;;  %v12426_v28 = vld [vmem:[#allocation18_spill] sm:$0xff] }
 0x3ad   :  { %v4014_v53 = vor.u32 %v4012_v25, %v4011_v0  ;;  %v4193_v13 = vsel %vm12406_vm11, %v4188_v27, %v4192_v49 }
 0x3ae   :  { %4294 = vst.msk [vmem:[#allocation2 + $0x68] sm:$0xff] %vm12407_vm10, %v4193_v13  ;;  %v3856_v24 = vpack.c.bf16 %v3800_v62, %v3799_v42 }
 0x3af   :  { %v3524_v38 = vpop.f32.mrb[32].mxu0  ;;  %v10375_v32 = vsel %vm12414_vm15, %v4003_v20, %v4014_v53  ;;  %v4196_v20 = vor.u32 %v4194_v39, %v4192_v49 }
 0x3b0   :  { %v3952_v7 = vsel %vm12244_vm13, %v3856_v24, 0  ;;  %v4133_v23 = vsel %vm12424_vm9, %v3856_v24, 0  ;;  %v7471_v30 = vadd.f32 %v10253_v35, %v3524_v38  ;;  %3895 = vrot.lane.b32.xlu1 %v3856_v24, %s8180_s28  ;;  %v3526_v22 = vpop.f32.mrb[33].mxu0  ;;  %vm12427_vm9 = vnez %v12426_v28 }
 0x3b1   :  { %v4017_v46 = vshrl.u32 %v3952_v7, 16  ;;  %v4198_v5 = vshll.u32 %v4133_v23, 16  ;;  %v3527_v29 = vpop.f32.mrb[34].mxu0  ;;  %v4020_v6 = vshll.u32 %v3952_v7, 16  ;;  %v4202_v49 = vshrl.u32 %v4133_v23, 16  ;;  %v8149_v23 = vld [vmem:[%s11784_s3 + $0x78] sm:$0xff]  }
 0x3b2   :  { %v7472_v52 = vadd.f32 %v10253_v35, %v3527_v29  ;;  %v3529_v14 = vpop.f32.mrb[35].mxu0  ;;  %v3801_v31 = vmax.f32 %v7471_v30, 0.0  ;;  %5661 = vmatpush1.bf16.msra.mxu1 %v8149_v23 }
 0x3b3   :  { %v4019_v36 = vrot.slane %v4017_v46, 7  ;;  %v4200_v47 = vrot.slane %v4198_v5, 1  ;;  %5662 = vmatprep.subr.bf16.mxu1 %v10295_v8 }
 0x3b4   :  { %v3802_v18 = vmax.f32 %v7472_v52, 0.0 }
 0x3b5   :  { %v4022_v37 = vor.u32 %v4020_v6, %v4019_v36  ;;  %v4201_v50 = vsel %vm12406_vm11, %v4196_v20, %v4200_v47  ;;  %v12428_v20 = vld [vmem:[#allocation28_spill] sm:$0xff] }
 0x3b6   :  { %4295 = vst.msk [vmem:[#allocation2 + $0x78] sm:$0xff] %vm12407_vm10, %v4201_v50  ;;  %v3857_v21 = vpack.c.bf16 %v3802_v18, %v3801_v31 }
 0x3b7   :  { %v3532_v59 = vpop.f32.mrb[36].mxu0  ;;  %v10387_v17 = vsel %vm12414_vm15, %v4011_v0, %v4022_v37  ;;  %v4204_v0 = vor.u32 %v4202_v49, %v4200_v47  ;;  %v12430_v47 = vld [vmem:[#allocation19_spill] sm:$0xff] }
 0x3b8   :  { %v3953_v11 = vsel %vm12250_vm7, %v3857_v21, 0  ;;  %v4134_v63 = vsel %vm12427_vm9, %v3857_v21, 0  ;;  %v7473_v27 = vadd.f32 %v10253_v35, %v3532_v59  ;;  %3897 = vrot.lane.b32.xlu0 %v3857_v21, %s8180_s28  ;;  %v3534_v25 = vpop.f32.mrb[37].mxu0  ;;  %vm12429_vm9 = vnez %v12428_v20 }
 0x3b9   :  { %v4025_v42 = vshrl.u32 %v3953_v11, 16  ;;  %v4206_v62 = vshll.u32 %v4134_v63, 16  ;;  %v3535_v53 = vpop.f32.mrb[38].mxu0  ;;  %v4028_v7 = vshll.u32 %v3953_v11, 16  ;;  %vm12431_vm7 = vnez %v12430_v47 }
 0x3ba   :  { %v7474_v13 = vadd.f32 %v10253_v35, %v3535_v53  ;;  %v3537_v24 = vpop.f32.mrb[39].mxu0  ;;  %v3803_v22 = vmax.f32 %v7473_v27, 0.0  ;;  %v4210_v50 = vshrl.u32 %v4134_v63, 16 }
 0x3bb   :  { %v4027_v38 = vrot.slane %v4025_v42, 7  ;;  %v4208_v30 = vrot.slane %v4206_v62, 1 }
 0x3bc   :  { %v3804_v39 = vmax.f32 %v7474_v13, 0.0 }
 0x3bd   :  { %v4030_v46 = vor.u32 %v4028_v7, %v4027_v38  ;;  %v4209_v5 = vsel %vm12406_vm11, %v4204_v0, %v4208_v30  ;;  %v4212_v25 = vor.u32 %v4210_v50, %v4208_v30 }
 0x3be   :  { %4296 = vst.msk [vmem:[#allocation2 + $0x88] sm:$0xff] %vm12407_vm10, %v4209_v5  ;;  %v3858_v29 = vpack.c.bf16 %v3804_v39, %v3803_v22  ;;  %v12432_v39 = vld [vmem:[#allocation30_spill] sm:$0xff] }
 0x3bf   :  { %v3540_v52 = vpop.f32.mrb[40].mxu0  ;;  %v10402_v14 = vsel %vm12414_vm15, %v4019_v36, %v4030_v46  ;;  %v12433_v5 = vld [vmem:[#allocation22_spill] sm:$0xff] }
 0x3c0   :  { %v3954_v6 = vsel %vm12429_vm9, %v3858_v29, 0  ;;  %v4135_v31 = vsel %vm12431_vm7, %v3858_v29, 0  ;;  %v7475_v18 = vadd.f32 %v10253_v35, %v3540_v52  ;;  %3899 = vrot.lane.b32.xlu1 %v3858_v29, %s8180_s28  ;;  %v3542_v37 = vpop.f32.mrb[41].mxu0  ;;  %vm12434_vm7 = vnez %v12433_v5 }
 0x3c1   :  { %v4033_v21 = vshrl.u32 %v3954_v6, 16  ;;  %v4214_v59 = vshll.u32 %v4135_v31, 16  ;;  %v3543_v11 = vpop.f32.mrb[42].mxu0  ;;  %v4036_v42 = vshll.u32 %v3954_v6, 16  ;;  %v4218_v52 = vshrl.u32 %v4135_v31, 16 }
 0x3c2   :  { %v7476_v36 = vadd.f32 %v10253_v35, %v3543_v11  ;;  %v3545_v27 = vpop.f32.mrb[43].mxu0  ;;  %v3805_v53 = vmax.f32 %v7475_v18, 0.0 }
 0x3c3   :  { %v4035_v49 = vrot.slane %v4033_v21, 7  ;;  %v4216_v62 = vrot.slane %v4214_v59, 1 }
 0x3c4   :  { %v3806_v13 = vmax.f32 %v7476_v36, 0.0 }
 0x3c5   :  { %v4038_v24 = vor.u32 %v4036_v42, %v4035_v49  ;;  %v4217_v0 = vsel %vm12406_vm11, %v4212_v25, %v4216_v62 }
 0x3c6   :  { %4297 = vst.msk [vmem:[#allocation2 + $0x98] sm:$0xff] %vm12407_vm10, %v4217_v0  ;;  %v3859_v63 = vpack.c.bf16 %v3806_v13, %v3805_v53  ;;  %v12435_v0 = vld [vmem:[#allocation38_spill] sm:$0xff] }
 0x3c7   :  { %v3548_v7 = vpop.f32.mrb[44].mxu0  ;;  %v10415_v22 = vsel %vm12414_vm15, %v4027_v38, %v4038_v24  ;;  %v4220_v38 = vor.u32 %v4218_v52, %v4216_v62 }
 0x3c8   :  { %v3955_v46 = vsel %vm12261_vm6, %v3859_v63, 0  ;;  %v4136_v30 = vsel %vm12434_vm7, %v3859_v63, 0  ;;  %v7477_v29 = vadd.f32 %v10253_v35, %v3548_v7  ;;  %3901 = vrot.lane.b32.xlu0 %v3859_v63, %s8180_s28  ;;  %v3550_v23 = vpop.f32.mrb[45].mxu0  ;;  %vm12436_vm7 = vnez %v12435_v0  ;;  %v12437_v7 = vld [vmem:[#allocation23_spill] sm:$0xff] }
 0x3c9   :  { %v4041_v6 = vshrl.u32 %v3955_v46, 16  ;;  %v4222_v18 = vshll.u32 %v4136_v30, 16  ;;  %v3551_v37 = vpop.f32.mrb[46].mxu0  ;;  %v4044_v11 = vshll.u32 %v3955_v46, 16  ;;  %vm12438_vm6 = vnez %v12437_v7 }
 0x3ca   :  { %v7478_v50 = vadd.f32 %v10253_v35, %v3551_v37  ;;  %v3553_v21 = vpop.f32.mrb[47].mxu0  ;;  %v3807_v27 = vmax.f32 %v7477_v29, 0.0  ;;  %v4226_v23 = vshrl.u32 %v4136_v30, 16  ;;  %v8150_v30 = vld [vmem:[%s11784_s3 + $0x80] sm:$0xff]  }
 0x3cb   :  { %v4043_v59 = vrot.slane %v4041_v6, 7  ;;  %v4224_v36 = vrot.slane %v4222_v18, 1  ;;  %5663 = vmatpush1.bf16.msra.mxu1 %v8150_v30 }
 0x3cc   :  { %v3808_v25 = vmax.f32 %v7478_v50, 0.0  ;;  %5664 = vmatprep.subr.bf16.mxu1 %v10295_v8 }
 0x3cd   :  { %v4046_v42 = vor.u32 %v4044_v11, %v4043_v59  ;;  %v4225_v53 = vsel %vm12406_vm11, %v4220_v38, %v4224_v36 }
 0x3ce   :  { %4298 = vst.msk [vmem:[#allocation2 + $0xa8] sm:$0xff] %vm12407_vm10, %v4225_v53  ;;  %v3860_v13 = vpack.c.bf16 %v3808_v25, %v3807_v27 }
 0x3cf   :  { %v3556_v24 = vpop.f32.mrb[48].mxu0  ;;  %v10427_v31 = vsel %vm12414_vm15, %v4035_v49, %v4046_v42  ;;  %v4228_v49 = vor.u32 %v4226_v23, %v4224_v36  ;;  %v12440_v23 = vld [vmem:[#allocation27_spill] sm:$0xff] }
 0x3d0   :  { %v3956_v63 = vsel %vm12436_vm7, %v3860_v13, 0  ;;  %v4137_v62 = vsel %vm12438_vm6, %v3860_v13, 0  ;;  %v7479_v46 = vadd.f32 %v10253_v35, %v3556_v24  ;;  %3903 = vrot.lane.b32.xlu1 %v3860_v13, %s8180_s28  ;;  %v3558_v29 = vpop.f32.mrb[49].mxu0  ;;  %vm12441_vm6 = vnez %v12440_v23 }
 0x3d1   :  { %v4049_v52 = vshrl.u32 %v3956_v63, 16  ;;  %v4230_v6 = vshll.u32 %v4137_v62, 16  ;;  %v3559_v18 = vpop.f32.mrb[50].mxu0  ;;  %v4052_v38 = vshll.u32 %v3956_v63, 16 }
 0x3d2   :  { %v7480_v37 = vadd.f32 %v10253_v35, %v3559_v18  ;;  %v3561_v50 = vpop.f32.mrb[51].mxu0  ;;  %v3809_v27 = vmax.f32 %v7479_v46, 0.0  ;;  %v4234_v18 = vshrl.u32 %v4137_v62, 16 }
 0x3d3   :  { %v4051_v21 = vrot.slane %v4049_v52, 7  ;;  %v4232_v11 = vrot.slane %v4230_v6, 1 }
 0x3d4   :  { %v3810_v25 = vmax.f32 %v7480_v37, 0.0 }
 0x3d5   :  { %v4054_v42 = vor.u32 %v4052_v38, %v4051_v21  ;;  %v4233_v53 = vsel %vm12406_vm11, %v4228_v49, %v4232_v11 }
 0x3d6   :  { %4299 = vst.msk [vmem:[#allocation2 + $0xb8] sm:$0xff] %vm12407_vm10, %v4233_v53  ;;  %v3861_v13 = vpack.c.bf16 %v3810_v25, %v3809_v27  ;;  %v4236_v27 = vor.u32 %v4234_v18, %v4232_v11 }
 0x3d7   :  { %v3564_v24 = vpop.f32.mrb[52].mxu0  ;;  %v10442_v29 = vsel %vm12414_vm15, %v4043_v59, %v4054_v42 }
 0x3d8   :  { %v3957_v63 = vsel %vm9202_vm4, %v3861_v13, 0  ;;  %v4138_v46 = vsel %vm12441_vm6, %v3861_v13, 0  ;;  %v7481_v52 = vadd.f32 %v10253_v35, %v3564_v24  ;;  %3905 = vrot.lane.b32.xlu0 %v3861_v13, %s8180_s28  ;;  %v3566_v6 = vpop.f32.mrb[53].mxu0 }
 0x3d9   :  { %v4057_v37 = vshrl.u32 %v3957_v63, 16  ;;  %v4238_v50 = vshll.u32 %v4138_v46, 16  ;;  %v3567_v49 = vpop.f32.mrb[54].mxu0  ;;  %v4060_v42 = vshll.u32 %v3957_v63, 16  ;;  %v4242_v18 = vshrl.u32 %v4138_v46, 16 }
 0x3da   :  { %v7482_v59 = vadd.f32 %v10253_v35, %v3567_v49  ;;  %v3569_v38 = vpop.f32.mrb[55].mxu0  ;;  %v3811_v23 = vmax.f32 %v7481_v52, 0.0 }
 0x3db   :  { %v4059_v25 = vrot.slane %v4057_v37, 7  ;;  %v4240_v53 = vrot.slane %v4238_v50, 1  ;;  %v12443_v38 = vld [vmem:[#allocation29_spill] sm:$0xff] }
 0x3dc   :  { %v3812_v36 = vmax.f32 %v7482_v59, 0.0  ;;  %vm12444_vm6 = vnez %v12443_v38 }
 0x3dd   :  { %v4062_v24 = vor.u32 %v4060_v42, %v4059_v25  ;;  %v4241_v13 = vsel %vm12406_vm11, %v4236_v27, %v4240_v53 }
 0x3de   :  { %4300 = vst.msk [vmem:[#allocation2 + $0xc8] sm:$0xff] %vm12407_vm10, %v4241_v13  ;;  %v3862_v62 = vpack.c.bf16 %v3812_v36, %v3811_v23 }
 0x3df   :  { %v3572_v30 = vpop.f32.mrb[56].mxu0  ;;  %v10455_v6 = vsel %vm12414_vm15, %v4051_v21, %v4062_v24  ;;  %v4244_v21 = vor.u32 %v4242_v18, %v4240_v53 }
 0x3e0   :  { %v3958_v49 = vsel %vm9257_vm8, %v3862_v62, 0  ;;  %v4139_v11 = vsel %vm12444_vm6, %v3862_v62, 0  ;;  %v7483_v63 = vadd.f32 %v10253_v35, %v3572_v30  ;;  %3907 = vrot.lane.b32.xlu1 %v3862_v62, %s8180_s28  ;;  %v3574_v52 = vpop.f32.mrb[57].mxu0 }
 0x3e1   :  { %v4065_v37 = vshrl.u32 %v3958_v49, 16  ;;  %v4246_v50 = vshll.u32 %v4139_v11, 16  ;;  %v3575_v59 = vpop.f32.mrb[58].mxu0  ;;  %v4068_v42 = vshll.u32 %v3958_v49, 16  ;;  %v12445_v52 = vld [vmem:[#allocation41_spill] sm:$0xff]  ;;  %v4250_v18 = vshrl.u32 %v4139_v11, 16 }
 0x3e2   :  { %v7484_v36 = vadd.f32 %v10253_v35, %v3575_v59  ;;  %v3577_v23 = vpop.f32.mrb[59].mxu0  ;;  %v3813_v13 = vmax.f32 %v7483_v63, 0.0  ;;  %vm12446_vm6 = vnez %v12445_v52 }
 0x3e3   :  { %v4067_v27 = vrot.slane %v4065_v37, 7  ;;  %v4248_v24 = vrot.slane %v4246_v50, 1  ;;  %v12447_v23 = vld [vmem:[#allocation31_spill] sm:$0xff] }
 0x3e4   :  { %v3814_v7 = vmax.f32 %v7484_v36, 0.0  ;;  %vm12448_vm8 = vnez %v12447_v23 }
 0x3e5   :  { %v4070_v38 = vor.u32 %v4068_v42, %v4067_v27  ;;  %v4249_v0 = vsel %vm12406_vm11, %v4244_v21, %v4248_v24  ;;  %vm12449_vm11 = vcmask 1048064  }
 0x3e6   :  { %4301 = vst.msk [vmem:[#allocation2 + $0xd8] sm:$0xff] %vm12407_vm10, %v4249_v0  ;;  %v3863_v62 = vpack.c.bf16 %v3814_v7, %v3813_v13  ;;  %vm12450_vm10 = vsmask.f32 7424 }
 0x3e7   :  { %v3580_v30 = vpop.f32.mrb[60].mxu0  ;;  %v10467_v46 = vsel %vm12414_vm15, %v4059_v25, %v4070_v38  ;;  %v4252_v38 = vor.u32 %v4250_v18, %v4248_v24  ;;  %vm12451_vm15 = vcmask 523264  }
 0x3e8   :  { %v3959_v59 = vsel %vm12446_vm6, %v3863_v62, 0  ;;  %v4140_v53 = vsel %vm12448_vm8, %v3863_v62, 0  ;;  %v7485_v49 = vadd.f32 %v10253_v35, %v3580_v30  ;;  %3909 = vrot.lane.b32.xlu0 %v3863_v62, %s8180_s28  ;;  %v3582_v63 = vpop.f32.mrb[61].mxu0  ;;  %vm12452_vm8 = vsmask.f32 256 }
 0x3e9   :  { %v4073_v37 = vshrl.u32 %v3959_v59, 16  ;;  %v4254_v50 = vshll.u32 %v4140_v53, 16  ;;  %v3583_v0 = vpop.f32.mrb[62].mxu0  ;;  %v4076_v42 = vshll.u32 %v3959_v59, 16  ;;  %v8151_v63 = vld [vmem:[%s11784_s3 + $0x88] sm:$0xff]   ;;  %v4258_v18 = vshrl.u32 %v4140_v53, 16 }
 0x3ea   :  { %v7486_v7 = vadd.f32 %v10253_v35, %v3583_v0  ;;  %v3882_v36 = vpop.permute.xlu0 %3881  ;;  %v3585_v25 = vpop.f32.mrb[63].mxu0  ;;  %v3815_v23 = vmax.f32 %v7485_v49, 0.0  ;;  %v3965_v0 = vshll.u32 %v10274_v12, 16  ;;  %5665 = vmatpush1.bf16.msra.mxu1 %v8151_v63  ;;  %v4123_v53 = vld [vmem:[#allocation2 + $0x110] sm:$0x1] }
 0x3eb   :  { %v4075_v21 = vrot.slane %v4073_v37, 7  ;;  %v4256_v13 = vrot.slane %v4254_v50, 1  ;;  %3929 = vst.msk [vmem:[#allocation2 + $0x10] sm:$0xff] %vm12449_vm11, %v3882_v36  ;;  %v12453_v37 = vld [vmem:[#allocation35_spill] sm:$0xff]  ;;  %5666 = vmatprep.subr.bf16.mxu1 %v10295_v8 }
 0x3ec   :  { %v3816_v52 = vmax.f32 %v7486_v7, 0.0  ;;  %vm12454_vm11 = vnez %v12453_v37 }
 0x3ed   :  { %v4078_v30 = vor.u32 %v4076_v42, %v4075_v21  ;;  %v4257_v62 = vsel %vm12450_vm10, %v4252_v38, %v4256_v13  ;;  %vm12457_vm10 = vcmask 1048064  }
 0x3ee   :  { %4302 = vst.msk [vmem:[#allocation2 + $0xe8] sm:$0xff] %vm12451_vm15, %v4257_v62  ;;  %v3864_v11 = vpack.c.bf16 %v3816_v52, %v3815_v23  ;;  %v3967_v23 = vor.u32 %v3965_v0, %v10288_v58  ;;  %v4304_v58 = vld [vmem:[#allocation2 + $0x108] sm:$0xff] }
 0x3ef   :  { %v3588_v24 = vpop.f32.mrb[136].mxu0  ;;  %v10484_v59 = vsel %vm12452_vm8, %v4067_v27, %v4078_v30  ;;  %v4260_v27 = vor.u32 %v4258_v18, %v4256_v13  ;;  %vm12456_vm8 = vnez %v12455_v45  ;;  %v4771_v13 = vld [vmem:[#allocation2 + $0x28] sm:$0xff] }
 0x3f0   :  { %v3960_v49 = vsel %vm9077_vm2, %v3864_v11, 0  ;;  %v4141_v50 = vsel %vm12454_vm11, %v3864_v11, 0  ;;  %3911 = vrot.lane.b32.xlu1 %v3864_v11, %s8180_s28  ;;  %v3589_v52 = vpop.f32.mrb[137].mxu0  ;;  %vm12458_vm11 = vsmask.f32 7424  ;;  %vm12459_vm2 = vmmov %vm12451_vm15 }
 0x3f1   :  { %v4081_v7 = vshrl.u32 %v3960_v49, 16  ;;  %v4262_v36 = vshll.u32 %v4141_v50, 16  ;;  %v3590_v12 = vpop.f32.mrb[138].mxu0  ;;  %v4084_v25 = vshll.u32 %v3960_v49, 16  ;;  %v4266_v37 = vshrl.u32 %v4141_v50, 16  ;;  %v12462_v52 = vld [vmem:[#allocation37_spill] sm:$0xff] }
 0x3f2   :  { %v4105_v38 = vld [vmem:[#allocation2 + $0x10] sm:$0xff]  ;;  %v3884_v42 = vpop.permute.xlu1 %3883  ;;  %v3591_v30 = vpop.f32.mrb[139].mxu0  ;;  %vm12463_vm6 = vnez %v12462_v52 }
 0x3f3   :  { %v4083_v62 = vrot.slane %v4081_v7, 7  ;;  %v4264_v24 = vrot.slane %v4262_v36, 1  ;;  %v4106_v11 = vsel %vm12456_vm8, %v3967_v23, %v4105_v38  ;;  %3930 = vst.msk [vmem:[#allocation2 + $0x20] sm:$0xff] %vm12457_vm10, %v3884_v42  ;;  %vm12460_vm8 = vmmov %vm12459_vm2  ;;  %vm12461_vm10 = vsmask.f32 256  ;;  %v4773_v42 = vld [vmem:[#allocation2 + $0x38] sm:$0xff] }
 0x3f4   :  { %4107 = vst [vmem:[#allocation2 + $0x10] sm:$0xff] %v4106_v11  ;;  %4108 = vst.msk [vmem:[#allocation2 + $0x20] sm:$0xff] %vm12451_vm15, %v10300_v34  ;;  %5068 = vmatmul.mubr.bf16.gmra.mrb[4].mxu1 %v4106_v11 }
 0x3f5   :  { %v4086_v63 = vor.u32 %v4084_v25, %v4083_v62  ;;  %v4124_v0 = vsel %vm8236_vm3, %v4083_v62, %v4123_v53  ;;  %v4265_v18 = vsel %vm12458_vm11, %v4260_v27, %v4264_v24  ;;  %v4268_v49 = vor.u32 %v4266_v37, %v4264_v24  ;;  %7221 = vmatprep.mubr.msk.bf16.mxu1 %vm12459_vm2, %v4771_v13  ;;  %vm12465_vm11 = vmmov %vm12460_vm8  ;;  %v8152_v13 = vld [vmem:[%s11784_s3 + $0x90] sm:$0xff]  }
 0x3f6   :  { %4125 = vst [vmem:[#allocation2 + $0x110] sm:$0x1] %v4124_v0  ;;  %4303 = vst.msk [vmem:[#allocation2 + $0xf8] sm:$0xff] %vm12460_vm8, %v4265_v18  ;;  %vm12464_vm2 = vcmask 1048064   ;;  %v4744_v0 = vld [vmem:[#allocation2 + $0x118] sm:$0x80]  ;;  %5667 = vmatpush1.bf16.msra.mxu1 %v8152_v13 }
 0x3f7   :  { %v10504_v50 = vsel %vm12461_vm10, %v4075_v21, %v4086_v63  ;;  %v10508_v34 = vsel %vm12463_vm6, %v4268_v49, %v4304_v58  ;;  %v3594_v23 = vpop.f32.mrb[68].mxu0  ;;  %vm12466_vm15 = vmmov %vm12464_vm2  ;;  %5668 = vmatprep.subr.bf16.mxu1 %v10295_v8  ;;  %vm12468_vm10 = vnez %v12382_v33 }
 0x3f8   :  { %4306 = vst [vmem:[#allocation2 + $0x108] sm:$0xff] %v10508_v34  ;;  %v7487_v7 = vadd.f32 %v10253_v35, %v3594_v23  ;;  %v3596_v36 = vpop.f32.mrb[69].mxu0 }
 0x3f9   :  { %v3597_v12 = vpop.f32.mrb[70].mxu0 }
 0x3fa   :  { %v7488_v37 = vadd.f32 %v10253_v35, %v3597_v12  ;;  %v3886_v27 = vpop.permute.xlu0 %3885  ;;  %v3599_v25 = vpop.f32.mrb[71].mxu0  ;;  %v3817_v21 = vmax.f32 %v7487_v7, 0.0 }
 0x3fb   :  { %3931 = vst.msk [vmem:[#allocation2 + $0x30] sm:$0xff] %vm12464_vm2, %v3886_v27  ;;  %v4770_v53 = vld [vmem:[#allocation2 + $0x20] sm:$0xff]  ;;  %vm12469_vm2 = vmmov %vm12460_vm8 }
 0x3fc   :  { %v3818_v38 = vmax.f32 %v7488_v37, 0.0  ;;  %4109 = vst.msk [vmem:[#allocation2 + $0x30] sm:$0xff] %vm12465_vm11, %v10317_v61  ;;  %5076 = vmatmul.mubr.bf16.gmra.mrb[8].mxu1 %v4770_v53  ;;  %v4775_v37 = vld [vmem:[#allocation2 + $0x48] sm:$0xff]  ;;  %vm12470_vm11 = vnez %v12384_v10 }
 0x3fd   :  { %7222 = vmatprep.mubr.msk.bf16.mxu1 %vm12460_vm8, %v4773_v42 }
 0x3fe   :  { %v4307_v30 = vpack.c.bf16 %v3818_v38, %v3817_v21 }
 0x3ff   :  { %v3602_v62 = vpop.f32.mrb[72].mxu0 }
 0x400   :  { %v4584_v24 = vsel %vm12381_vm12, %v4307_v30, 0  ;;  %v7489_v11 = vadd.f32 %v10253_v35, %v3602_v62  ;;  %4339 = vrot.lane.b32.xlu0 %v4307_v30, %s8180_s28  ;;  %v3604_v58 = vpop.f32.mrb[73].mxu0  ;;  %vm12467_vm12 = vmmov %vm12460_vm8  ;;  %v10534_v25 = vsel %vm12470_vm11, %v4307_v30, 0  ;;  %vm12471_vm8 = vnez %v12386_v4 }
 0x401   :  { %v4601_v63 = vshll.u32 %v4584_v24, 16  ;;  %v3605_v61 = vpop.f32.mrb[74].mxu0  ;;  %v4420_v62 = vshrl.u32 %v10534_v25, 16 }
 0x402   :  { %v7490_v18 = vadd.f32 %v10253_v35, %v3605_v61  ;;  %v3888_v49 = vpop.permute.xlu1 %3887  ;;  %v3607_v23 = vpop.f32.mrb[75].mxu0  ;;  %v3819_v36 = vmax.f32 %v7489_v11, 0.0  ;;  %v4604_v11 = vshrl.u32 %v4584_v24, 16  ;;  %v4777_v24 = vld [vmem:[#allocation2 + $0x58] sm:$0xff] }
 0x403   :  { %v4603_v7 = vrot.slane %v4601_v63, 1  ;;  %3932 = vst.msk [vmem:[#allocation2 + $0x40] sm:$0xff] %vm12466_vm15, %v3888_v49  ;;  %v4772_v43 = vld [vmem:[#allocation2 + $0x30] sm:$0xff]  ;;  %vm12472_vm15 = vnez %v12388_v15 }
 0x404   :  { %v3820_v12 = vmax.f32 %v7490_v18, 0.0  ;;  %4110 = vst.msk [vmem:[#allocation2 + $0x40] sm:$0xff] %vm12467_vm12, %v10334_v54  ;;  %5084 = vmatmul.mubr.bf16.gmra.mrb[12].mxu1 %v4772_v43  ;;  %vm12473_vm12 = vcmask 1048064  }
 0x405   :  { %v4745_v27 = vsel %vm12468_vm10, %v4603_v7, %v4744_v0  ;;  %7223 = vmatprep.mubr.msk.bf16.mxu1 %vm12469_vm2, %v4775_v37  ;;  %v4606_v4 = vor.u32 %v4604_v11, %v4603_v7  ;;  %vm12474_vm10 = vmmov %vm12469_vm2  ;;  %vm12475_vm2 = vsmask.f32 7424 }
 0x406   :  { %4746 = vst [vmem:[#allocation2 + $0x118] sm:$0x80] %v4745_v27  ;;  %v4308_v53 = vpack.c.bf16 %v3820_v12, %v3819_v36  ;;  %v8153_v36 = vld [vmem:[%s11784_s3 + $0x98] sm:$0xff]   ;;  %v10550_v12 = vrot.slane %v4420_v62, 7  ;;  %vm12476_vm11 = vmmov %vm12474_vm10 }
 0x407   :  { %v3610_v21 = vpop.f32.mrb[76].mxu0  ;;  %5669 = vmatpush1.bf16.msra.mxu1 %v8153_v36 }
 0x408   :  { %v4404_v38 = vsel %vm12471_vm8, %v4308_v53, 0  ;;  %v4585_v54 = vsel %vm12472_vm15, %v4308_v53, 0  ;;  %v7491_v42 = vadd.f32 %v10253_v35, %v3610_v21  ;;  %4341 = vrot.lane.b32.xlu1 %v4308_v53, %s8180_s28  ;;  %v3612_v33 = vpop.f32.mrb[77].mxu0  ;;  %vm12477_vm8 = vmmov %vm12474_vm10  ;;  %vm12478_vm15 = vsmask.f32 256  ;;  %5670 = vmatprep.subr.bf16.mxu1 %v10295_v8 }
 0x409   :  { %v4427_v10 = vshrl.u32 %v4404_v38, 16  ;;  %v4608_v30 = vshll.u32 %v4585_v54, 16  ;;  %v3613_v58 = vpop.f32.mrb[78].mxu0  ;;  %v4430_v18 = vshll.u32 %v4404_v38, 16  ;;  %v4612_v62 = vshrl.u32 %v4585_v54, 16 }
 0x40a   :  { %v7492_v13 = vadd.f32 %v10253_v35, %v3613_v58  ;;  %v3890_v63 = vpop.permute.xlu0 %3889  ;;  %v3615_v61 = vpop.f32.mrb[79].mxu0  ;;  %v3821_v23 = vmax.f32 %v7491_v42, 0.0  ;;  %v10569_v58 = vld [vmem:[%s11785_s2] ss:$0 sm:$0xff] }
 0x40b   :  { %v4429_v0 = vrot.slane %v4427_v10, 7  ;;  %v4610_v15 = vrot.slane %v4608_v30, 1  ;;  %3933 = vst.msk [vmem:[#allocation2 + $0x50] sm:$0xff] %vm12473_vm12, %v3890_v63  ;;  %v4774_v49 = vld [vmem:[#allocation2 + $0x40] sm:$0xff]  ;;  %vm12479_vm12 = vnez %v12394_v48 }
 0x40c   :  { %v3822_v43 = vmax.f32 %v7492_v13, 0.0  ;;  %4111 = vst.msk [vmem:[#allocation2 + $0x50] sm:$0xff] %vm12474_vm10, %v10347_v40  ;;  %5092 = vmatmul.mubr.bf16.gmra.mrb[16].mxu1 %v4774_v49  ;;  %vm12480_vm10 = vnez %v12396_v9  ;;  %v4779_v49 = vld [vmem:[#allocation2 + $0x68] sm:$0xff] }
 0x40d   :  { %v4432_v7 = vor.u32 %v4430_v18, %v4429_v0  ;;  %v4611_v37 = vsel %vm12475_vm2, %v4606_v4, %v4610_v15  ;;  %7224 = vmatprep.mubr.msk.bf16.mxu1 %vm12476_vm11, %v4777_v24  ;;  %v4614_v9 = vor.u32 %v4612_v62, %v4610_v15  ;;  %vm12481_vm2 = vcmask 1048064   ;;  %vm12482_vm11 = vmmov %vm12477_vm8 }
 0x40e   :  { %4747 = vst.msk [vmem:[#allocation2 + $0x128] sm:$0xff] %vm12477_vm8, %v4611_v37  ;;  %v4309_v27 = vpack.c.bf16 %v3822_v43, %v3821_v23  ;;  %vm12483_vm8 = vsmask.f32 7424 }
 0x40f   :  { %v3618_v53 = vpop.f32.mrb[80].mxu0  ;;  %v10557_v40 = vsel %vm12478_vm15, %v10550_v12, %v4432_v7  ;;  %vm12484_vm15 = vmmov %vm12482_vm11 }
 0x410   :  { %v4405_v21 = vsel %vm12479_vm12, %v4309_v27, 0  ;;  %v4586_v38 = vsel %vm12480_vm10, %v4309_v27, 0  ;;  %v7493_v42 = vadd.f32 %v10253_v35, %v3618_v53  ;;  %4343 = vrot.lane.b32.xlu0 %v4309_v27, %s8180_s28  ;;  %v3620_v33 = vpop.f32.mrb[81].mxu0  ;;  %vm12485_vm12 = vmmov %vm12482_vm11  ;;  %vm12486_vm10 = vsmask.f32 256 }
 0x411   :  { %v4435_v11 = vshrl.u32 %v4405_v21, 16  ;;  %v4616_v10 = vshll.u32 %v4586_v38, 16  ;;  %v3621_v30 = vpop.f32.mrb[82].mxu0  ;;  %v4438_v61 = vshll.u32 %v4405_v21, 16  ;;  %v4620_v53 = vshrl.u32 %v4586_v38, 16  ;;  %v4781_v38 = vld [vmem:[#allocation2 + $0x78] sm:$0xff] }
 0x412   :  { %v7494_v8 = vadd.f32 %v10569_v58, %v3621_v30  ;;  %v3892_v48 = vpop.permute.xlu1 %3891  ;;  %v3623_v13 = vpop.f32.mrb[83].mxu0  ;;  %v3823_v54 = vmax.f32 %v7493_v42, 0.0 }
 0x413   :  { %v4437_v63 = vrot.slane %v4435_v11, 7  ;;  %v4618_v35 = vrot.slane %v4616_v10, 1  ;;  %3934 = vst.msk [vmem:[#allocation2 + $0x60] sm:$0xff] %vm12481_vm2, %v3892_v48  ;;  %v4776_v4 = vld [vmem:[#allocation2 + $0x50] sm:$0xff]  ;;  %vm12487_vm2 = vnez %v12404_v57 }
 0x414   :  { %v3824_v18 = vmax.f32 %v7494_v8, 0.0  ;;  %4112 = vst.msk [vmem:[#allocation2 + $0x60] sm:$0xff] %vm12482_vm11, %v10362_v16  ;;  %5100 = vmatmul.mubr.bf16.gmra.mrb[20].mxu1 %v4776_v4 }
 0x415   :  { %v4440_v23 = vor.u32 %v4438_v61, %v4437_v63  ;;  %v4619_v43 = vsel %vm12483_vm8, %v4614_v9, %v4618_v35  ;;  %7225 = vmatprep.mubr.msk.bf16.mxu1 %vm12484_vm15, %v4779_v49  ;;  %v4622_v10 = vor.u32 %v4620_v53, %v4618_v35  ;;  %vm12489_vm15 = vmmov %vm12482_vm11 }
 0x416   :  { %4748 = vst.msk [vmem:[#allocation2 + $0x138] sm:$0xff] %vm12485_vm12, %v4619_v43  ;;  %v4310_v15 = vpack.c.bf16 %v3824_v18, %v3823_v54  ;;  %vm12490_vm12 = vmmov %vm12482_vm11 }
 0x417   :  { %v3626_v24 = vpop.f32.mrb[84].mxu0  ;;  %v10579_v36 = vsel %vm12486_vm10, %v4429_v0, %v4440_v23 }
 0x418   :  { %v4406_v7 = vsel %vm12403_vm14, %v4310_v15, 0  ;;  %v4587_v16 = vsel %vm12487_vm2, %v4310_v15, 0  ;;  %v7495_v37 = vadd.f32 %v10569_v58, %v3626_v24  ;;  %4345 = vrot.lane.b32.xlu1 %v4310_v15, %s8180_s28  ;;  %v3628_v27 = vpop.f32.mrb[85].mxu0  ;;  %vm12488_vm14 = vcmask 1048064  }
 0x419   :  { %v4443_v21 = vshrl.u32 %v4406_v7, 16  ;;  %v4624_v42 = vshll.u32 %v4587_v16, 16  ;;  %v3629_v33 = vpop.f32.mrb[86].mxu0  ;;  %v4446_v55 = vshll.u32 %v4406_v7, 16  ;;  %vm12491_vm2 = vnez %v12412_v26 }
 0x41a   :  { %v7496_v62 = vadd.f32 %v10569_v58, %v3629_v33  ;;  %v3894_v11 = vpop.permute.xlu0 %3893  ;;  %v3631_v0 = vpop.f32.mrb[87].mxu0  ;;  %v3825_v48 = vmax.f32 %v7495_v37, 0.0  ;;  %v4628_v43 = vshrl.u32 %v4587_v16, 16  ;;  %v10610_v16 = vld [vmem:[#allocation2 + $0x88] sm:$0xff] }
 0x41b   :  { %v4445_v30 = vrot.slane %v4443_v21, 7  ;;  %v4626_v8 = vrot.slane %v4624_v42, 1  ;;  %3935 = vst.msk [vmem:[#allocation2 + $0x70] sm:$0xff] %vm12488_vm14, %v3894_v11  ;;  %v4778_v57 = vld [vmem:[#allocation2 + $0x60] sm:$0xff] }
 0x41c   :  { %v3826_v13 = vmax.f32 %v7496_v62, 0.0  ;;  %4113 = vst.msk [vmem:[#allocation2 + $0x70] sm:$0xff] %vm12482_vm11, %v10375_v32  ;;  %5108 = vmatmul.mubr.bf16.gmra.mrb[24].mxu1 %v4778_v57  ;;  %v8154_v11 = vld [vmem:[%s11784_s3 + $0xa0] sm:$0xff]  }
 0x41d   :  { %v4448_v9 = vor.u32 %v4446_v55, %v4445_v30  ;;  %v4627_v61 = vsel %vm12483_vm8, %v4622_v10, %v4626_v8  ;;  %7226 = vmatprep.mubr.msk.bf16.mxu1 %vm12489_vm15, %v4781_v38  ;;  %v4630_v53 = vor.u32 %v4628_v43, %v4626_v8  ;;  %5671 = vmatpush1.bf16.msra.mxu1 %v8154_v11  ;;  %v10622_v57 = vld [vmem:[#allocation2] sm:$0xff] }
 0x41e   :  { %4749 = vst.msk [vmem:[#allocation2 + $0x148] sm:$0xff] %vm12490_vm12, %v4627_v61  ;;  %v4311_v35 = vpack.c.bf16 %v3826_v13, %v3825_v48  ;;  %5672 = vmatprep.subr.bf16.mxu1 %v10622_v57 }
 0x41f   :  { %v3634_v4 = vpop.f32.mrb[88].mxu0  ;;  %v10595_v54 = vsel %vm12486_vm10, %v4437_v63, %v4448_v9 }
 0x420   :  { %v4407_v18 = vsel %vm12411_vm0, %v4311_v35, 0  ;;  %v4588_v32 = vsel %vm12491_vm2, %v4311_v35, 0  ;;  %v7497_v49 = vadd.f32 %v10569_v58, %v3634_v4  ;;  %4347 = vrot.lane.b32.xlu0 %v4311_v35, %s8180_s28  ;;  %v3636_v23 = vpop.f32.mrb[89].mxu0  ;;  %vm12492_vm0 = vmmov %vm12488_vm14 }
 0x421   :  { %v4451_v15 = vshrl.u32 %v4407_v18, 16  ;;  %v4632_v24 = vshll.u32 %v4588_v32, 16  ;;  %v3637_v7 = vpop.f32.mrb[90].mxu0  ;;  %v4454_v2 = vshll.u32 %v4407_v18, 16  ;;  %vm12493_vm14 = vmmov %vm12482_vm11  ;;  %v4636_v61 = vshrl.u32 %v4588_v32, 16  ;;  %v10638_v32 = vld [vmem:[#allocation2 + $0x98] sm:$0xff] }
 0x422   :  { %v7498_v37 = vadd.f32 %v10569_v58, %v3637_v7  ;;  %v3896_v27 = vpop.permute.xlu1 %3895  ;;  %v3639_v63 = vpop.f32.mrb[91].mxu0  ;;  %v3827_v33 = vmax.f32 %v7497_v49, 0.0  ;;  %vm12494_vm11 = vmmov %vm12483_vm8 }
 0x423   :  { %v4453_v21 = vrot.slane %v4451_v15, 7  ;;  %v4634_v42 = vrot.slane %v4632_v24, 1  ;;  %3936 = vst.msk [vmem:[#allocation2 + $0x80] sm:$0xff] %vm12492_vm0, %v3896_v27  ;;  %v10605_v26 = vld [vmem:[#allocation2 + $0x70] sm:$0xff]  ;;  %vm12495_vm8 = vmmov %vm12490_vm12 }
 0x424   :  { %v3828_v62 = vmax.f32 %v7498_v37, 0.0  ;;  %4114 = vst.msk [vmem:[#allocation2 + $0x80] sm:$0xff] %vm12493_vm14, %v10387_v17  ;;  %5116 = vmatmul.mubr.bf16.gmra.mrb[28].mxu1 %v10605_v26  ;;  %vm12496_vm15 = vmmov %vm12495_vm8 }
 0x425   :  { %v4456_v0 = vor.u32 %v4454_v2, %v4453_v21  ;;  %v4635_v10 = vsel %vm12494_vm11, %v4630_v53, %v4634_v42  ;;  %7227 = vmatprep.mubr.msk.bf16.mxu1 %vm12495_vm8, %v10610_v16  ;;  %vm12497_vm12 = vmmov %vm12486_vm10  ;;  %vm12498_vm10 = vnez %v12417_v60  ;;  %v4638_v43 = vor.u32 %v4636_v61, %v4634_v42 }
 0x426   :  { %4750 = vst.msk [vmem:[#allocation2 + $0x158] sm:$0xff] %vm12496_vm15, %v4635_v10  ;;  %v4312_v55 = vpack.c.bf16 %v3828_v62, %v3827_v33  ;;  %vm12500_vm2 = vmmov %vm12495_vm8  ;;  %vm12505_vm15 = vnez %v12420_v41 }
 0x427   :  { %v3642_v8 = vpop.f32.mrb[92].mxu0  ;;  %v10620_v17 = vsel %vm12497_vm12, %v4445_v30, %v4456_v0  ;;  %vm12502_vm14 = vmmov %vm12500_vm2 }
 0x428   :  { %v4408_v48 = vsel %vm12416_vm5, %v4312_v55, 0  ;;  %v4589_v13 = vsel %vm12498_vm10, %v4312_v55, 0  ;;  %v7499_v38 = vadd.f32 %v10569_v58, %v3642_v8  ;;  %4349 = vrot.lane.b32.xlu1 %v4312_v55, %s8180_s28  ;;  %v3644_v9 = vpop.f32.mrb[93].mxu0  ;;  %vm12499_vm5 = vmmov %vm12492_vm0 }
 0x429   :  { %v4459_v35 = vshrl.u32 %v4408_v48, 16  ;;  %v4640_v4 = vshll.u32 %v4589_v13, 16  ;;  %v3645_v30 = vpop.f32.mrb[94].mxu0  ;;  %v4462_v3 = vshll.u32 %v4408_v48, 16  ;;  %vm12501_vm0 = vmmov %vm12494_vm11  ;;  %v4644_v0 = vshrl.u32 %v4589_v13, 16  ;;  %v10660_v13 = vld [vmem:[#allocation2 + $0xa8] sm:$0xff] }
 0x42a   :  { %v7500_v18 = vadd.f32 %v10569_v58, %v3645_v30  ;;  %v3898_v49 = vpop.permute.xlu0 %3897  ;;  %v3647_v23 = vpop.f32.mrb[95].mxu0  ;;  %v3829_v7 = vmax.f32 %v7499_v38, 0.0  ;;  %vm12503_vm11 = vmmov %vm12500_vm2 }
 0x42b   :  { %v4461_v15 = vrot.slane %v4459_v35, 7  ;;  %v4642_v24 = vrot.slane %v4640_v4, 1  ;;  %3937 = vst.msk [vmem:[#allocation2 + $0x90] sm:$0xff] %vm12499_vm5, %v3898_v49  ;;  %v10633_v60 = vld [vmem:[#allocation2 + $0x80] sm:$0xff]  ;;  %vm12504_vm8 = vmmov %vm12497_vm12 }
 0x42c   :  { %v3830_v37 = vmax.f32 %v7500_v18, 0.0  ;;  %4115 = vst.msk [vmem:[#allocation2 + $0x90] sm:$0xff] %vm12500_vm2, %v10402_v14  ;;  %5124 = vmatmul.mubr.bf16.gmra.mrb[32].mxu1 %v10633_v60  ;;  %vm12507_vm12 = vmmov %vm12500_vm2  ;;  %v8155_v18 = vld [vmem:[%s11784_s3 + $0xa8] sm:$0xff]  }
 0x42d   :  { %v4464_v27 = vor.u32 %v4462_v3, %v4461_v15  ;;  %v4643_v63 = vsel %vm12501_vm0, %v4638_v43, %v4642_v24  ;;  %7228 = vmatprep.mubr.msk.bf16.mxu1 %vm12502_vm14, %v10638_v32  ;;  %v4646_v9 = vor.u32 %v4644_v0, %v4642_v24  ;;  %vm12508_vm10 = vmmov %vm12501_vm0  ;;  %5673 = vmatpush1.bf16.msra.mxu1 %v8155_v18 }
 0x42e   :  { %4751 = vst.msk [vmem:[#allocation2 + $0x168] sm:$0xff] %vm12503_vm11, %v4643_v63  ;;  %v4313_v53 = vpack.c.bf16 %v3830_v37, %v3829_v7  ;;  %vm12510_vm0 = vmmov %vm12504_vm8  ;;  %5674 = vmatprep.subr.bf16.mxu1 %v10622_v57  ;;  %vm12511_vm14 = vnez %v12423_v1 }
 0x42f   :  { %v3650_v2 = vpop.f32.mrb[96].mxu0  ;;  %v10645_v42 = vsel %vm12504_vm8, %v4453_v21, %v4464_v27  ;;  %vm12513_vm11 = vmmov %vm12500_vm2 }
 0x430   :  { %v4409_v14 = vsel %vm12237_vm1, %v4313_v53, 0  ;;  %v4590_v33 = vsel %vm12505_vm15, %v4313_v53, 0  ;;  %v7501_v62 = vadd.f32 %v10569_v58, %v3650_v2  ;;  %4351 = vrot.lane.b32.xlu0 %v4313_v53, %s8180_s28  ;;  %v3652_v11 = vpop.f32.mrb[97].mxu0  ;;  %vm12506_vm1 = vmmov %vm12499_vm5 }
 0x431   :  { %v4467_v10 = vshrl.u32 %v4409_v14, 16  ;;  %v4648_v55 = vshll.u32 %v4590_v33, 16  ;;  %v3653_v8 = vpop.f32.mrb[98].mxu0  ;;  %v4470_v44 = vshll.u32 %v4409_v14, 16  ;;  %vm12509_vm5 = vmmov %vm12500_vm2  ;;  %v4652_v63 = vshrl.u32 %v4590_v33, 16  ;;  %v10686_v33 = vld [vmem:[#allocation2 + $0xb8] sm:$0xff] }
 0x432   :  { %v7502_v48 = vadd.f32 %v10569_v58, %v3653_v8  ;;  %v3900_v38 = vpop.permute.xlu1 %3899  ;;  %v3655_v21 = vpop.f32.mrb[99].mxu0  ;;  %v3831_v4 = vmax.f32 %v7501_v62, 0.0  ;;  %vm12514_vm8 = vmmov %vm12508_vm10 }
 0x433   :  { %v4469_v61 = vrot.slane %v4467_v10, 7  ;;  %v4650_v35 = vrot.slane %v4648_v55, 1  ;;  %3938 = vst.msk [vmem:[#allocation2 + $0xa0] sm:$0xff] %vm12506_vm1, %v3900_v38  ;;  %v10655_v41 = vld [vmem:[#allocation2 + $0x90] sm:$0xff]  ;;  %vm12515_vm15 = vmmov %vm12500_vm2 }
 0x434   :  { %v3832_v30 = vmax.f32 %v7502_v48, 0.0  ;;  %4116 = vst.msk [vmem:[#allocation2 + $0xa0] sm:$0xff] %vm12507_vm12, %v10415_v22  ;;  %5132 = vmatmul.mubr.bf16.gmra.mrb[36].mxu1 %v10655_v41  ;;  %vm12517_vm12 = vmmov %vm12510_vm0 }
 0x435   :  { %v4472_v49 = vor.u32 %v4470_v44, %v4469_v61  ;;  %v4651_v23 = vsel %vm12508_vm10, %v4646_v9, %v4650_v35  ;;  %7229 = vmatprep.mubr.msk.bf16.mxu1 %vm12509_vm5, %v10660_v13  ;;  %v4654_v0 = vor.u32 %v4652_v63, %v4650_v35  ;;  %vm12518_vm10 = vnez %v12425_v51 }
 0x436   :  { %4752 = vst.msk [vmem:[#allocation2 + $0x178] sm:$0xff] %vm12500_vm2, %v4651_v23  ;;  %v4314_v43 = vpack.c.bf16 %v3832_v30, %v3831_v4  ;;  %vm12519_vm5 = vnez %v12426_v28 }
 0x437   :  { %v3658_v3 = vpop.f32.mrb[100].mxu0  ;;  %v10670_v22 = vsel %vm12510_vm0, %v4461_v15, %v4472_v49 }
 0x438   :  { %v4410_v24 = vsel %vm12244_vm13, %v4314_v43, 0  ;;  %v4591_v7 = vsel %vm12511_vm14, %v4314_v43, 0  ;;  %v7503_v37 = vadd.f32 %v10569_v58, %v3658_v3  ;;  %4353 = vrot.lane.b32.xlu1 %v4314_v43, %s8180_s28  ;;  %v3660_v27 = vpop.f32.mrb[101].mxu0  ;;  %vm12512_vm13 = vmmov %vm12506_vm1 }
 0x439   :  { %v4475_v53 = vshrl.u32 %v4410_v24, 16  ;;  %v4656_v2 = vshll.u32 %v4591_v7, 16  ;;  %v3661_v14 = vpop.f32.mrb[102].mxu0  ;;  %v4478_v56 = vshll.u32 %v4410_v24, 16  ;;  %vm12516_vm1 = vmmov %vm12500_vm2  ;;  %v4660_v49 = vshrl.u32 %v4591_v7, 16  ;;  %v10708_v7 = vld [vmem:[#allocation2 + $0xc8] sm:$0xff] }
 0x43a   :  { %v7504_v15 = vadd.f32 %v10569_v58, %v3661_v14  ;;  %v3902_v62 = vpop.permute.xlu0 %3901  ;;  %v3663_v11 = vpop.f32.mrb[103].mxu0  ;;  %v3833_v8 = vmax.f32 %v7503_v37, 0.0  ;;  %vm12520_vm2 = vmmov %vm12512_vm13 }
 0x43b   :  { %v4477_v10 = vrot.slane %v4475_v53, 7  ;;  %v4658_v55 = vrot.slane %v4656_v2, 1  ;;  %3939 = vst.msk [vmem:[#allocation2 + $0xb0] sm:$0xff] %vm12512_vm13, %v3902_v62  ;;  %v10681_v1 = vld [vmem:[#allocation2 + $0xa0] sm:$0xff]  ;;  %vm12521_vm0 = vmmov %vm12516_vm1 }
 0x43c   :  { %v3834_v48 = vmax.f32 %v7504_v15, 0.0  ;;  %4117 = vst.msk [vmem:[#allocation2 + $0xb0] sm:$0xff] %vm12513_vm11, %v10427_v31  ;;  %5140 = vmatmul.mubr.bf16.gmra.mrb[40].mxu1 %v10681_v1  ;;  %vm12522_vm14 = vmmov %vm12514_vm8 }
 0x43d   :  { %v4480_v38 = vor.u32 %v4478_v56, %v4477_v10  ;;  %v4659_v21 = vsel %vm12514_vm8, %v4654_v0, %v4658_v55  ;;  %7230 = vmatprep.mubr.msk.bf16.mxu1 %vm12515_vm15, %v10686_v33  ;;  %v4662_v27 = vor.u32 %v4660_v49, %v4658_v55  ;;  %vm12523_vm13 = vmmov %vm12521_vm0  ;;  %vm12526_vm15 = vnez %v12430_v47 }
 0x43e   :  { %4753 = vst.msk [vmem:[#allocation2 + $0x188] sm:$0xff] %vm12516_vm1, %v4659_v21  ;;  %v4315_v9 = vpack.c.bf16 %v3834_v48, %v3833_v8  ;;  %vm12524_vm11 = vmmov %vm12521_vm0 }
 0x43f   :  { %v3666_v44 = vpop.f32.mrb[104].mxu0  ;;  %v10693_v35 = vsel %vm12517_vm12, %v4469_v61, %v4480_v38  ;;  %vm12525_vm8 = vmmov %vm12517_vm12 }
 0x440   :  { %v4411_v31 = vsel %vm12518_vm10, %v4315_v9, 0  ;;  %v4592_v4 = vsel %vm12519_vm5, %v4315_v9, 0  ;;  %v7505_v30 = vadd.f32 %v10569_v58, %v3666_v44  ;;  %4355 = vrot.lane.b32.xlu0 %v4315_v9, %s8180_s28  ;;  %v3668_v18 = vpop.f32.mrb[105].mxu0  ;;  %vm12528_vm1 = vmmov %vm12521_vm0 }
 0x441   :  { %v4483_v23 = vshrl.u32 %v4411_v31, 16  ;;  %v4664_v43 = vshll.u32 %v4592_v4, 16  ;;  %v3669_v3 = vpop.f32.mrb[106].mxu0  ;;  %v4486_v51 = vshll.u32 %v4411_v31, 16  ;;  %v4668_v38 = vshrl.u32 %v4592_v4, 16  ;;  %v10730_v4 = vld [vmem:[#allocation2 + $0xd8] sm:$0xff]  ;;  %vm12529_vm12 = vmmov %vm12522_vm14 }
 0x442   :  { %v7506_v24 = vadd.f32 %v10569_v58, %v3669_v3  ;;  %v3904_v37 = vpop.permute.xlu1 %3903  ;;  %v3671_v61 = vpop.f32.mrb[107].mxu0  ;;  %v3835_v2 = vmax.f32 %v7505_v30, 0.0  ;;  %vm12530_vm10 = vmmov %vm12521_vm0 }
 0x443   :  { %v4485_v63 = vrot.slane %v4483_v23, 7  ;;  %v4666_v53 = vrot.slane %v4664_v43, 1  ;;  %3940 = vst.msk [vmem:[#allocation2 + $0xc0] sm:$0xff] %vm12520_vm2, %v3904_v37  ;;  %v10703_v28 = vld [vmem:[#allocation2 + $0xb0] sm:$0xff]  ;;  %vm12531_vm5 = vmmov %vm12521_vm0 }
 0x444   :  { %v3836_v14 = vmax.f32 %v7506_v24, 0.0  ;;  %4118 = vst.msk [vmem:[#allocation2 + $0xc0] sm:$0xff] %vm12521_vm0, %v10442_v29  ;;  %5148 = vmatmul.mubr.bf16.gmra.mrb[44].mxu1 %v10703_v28  ;;  %v8156_v24 = vld [vmem:[%s11784_s3 + $0xb0] sm:$0xff]   ;;  %vm12533_vm0 = vnez %v12432_v39 }
 0x445   :  { %v4488_v15 = vor.u32 %v4486_v51, %v4485_v63  ;;  %v4667_v62 = vsel %vm12522_vm14, %v4662_v27, %v4666_v53  ;;  %7231 = vmatprep.mubr.msk.bf16.mxu1 %vm12523_vm13, %v10708_v7  ;;  %v4670_v18 = vor.u32 %v4668_v38, %v4666_v53  ;;  %5675 = vmatpush1.bf16.msra.mxu1 %v8156_v24 }
 0x446   :  { %4754 = vst.msk [vmem:[#allocation2 + $0x198] sm:$0xff] %vm12524_vm11, %v4667_v62  ;;  %v4316_v11 = vpack.c.bf16 %v3836_v14, %v3835_v2  ;;  %5676 = vmatprep.subr.bf16.mxu1 %v10622_v57  ;;  %vm12534_vm14 = vnez %v12433_v5  ;;  %vm12536_vm11 = vmmov %vm12528_vm1 }
 0x447   :  { %v3674_v0 = vpop.f32.mrb[108].mxu0  ;;  %v10715_v56 = vsel %vm12525_vm8, %v4477_v10, %v4488_v15 }
 0x448   :  { %v4412_v29 = vsel %vm12429_vm9, %v4316_v11, 0  ;;  %v4593_v55 = vsel %vm12526_vm15, %v4316_v11, 0  ;;  %v7507_v8 = vadd.f32 %v10569_v58, %v3674_v0  ;;  %4357 = vrot.lane.b32.xlu1 %v4316_v11, %s8180_s28  ;;  %v3676_v48 = vpop.f32.mrb[109].mxu0  ;;  %vm12527_vm9 = vmmov %vm12520_vm2 }
 0x449   :  { %v4491_v21 = vshrl.u32 %v4412_v29, 16  ;;  %v4672_v9 = vshll.u32 %v4593_v55, 16  ;;  %v3677_v44 = vpop.f32.mrb[110].mxu0  ;;  %v4494_v20 = vshll.u32 %v4412_v29, 16  ;;  %vm12532_vm2 = vmmov %vm12525_vm8  ;;  %v4676_v62 = vshrl.u32 %v4593_v55, 16  ;;  %v10756_v55 = vld [vmem:[#allocation2 + $0xe8] sm:$0xff] }
 0x44a   :  { %v7508_v31 = vadd.f32 %v10569_v58, %v3677_v44  ;;  %v3906_v30 = vpop.permute.xlu0 %3905  ;;  %v3679_v10 = vpop.f32.mrb[111].mxu0  ;;  %v3837_v43 = vmax.f32 %v7507_v8, 0.0  ;;  %vm12535_vm13 = vmmov %vm12527_vm9 }
 0x44b   :  { %v4493_v49 = vrot.slane %v4491_v21, 7  ;;  %v4674_v23 = vrot.slane %v4672_v9, 1  ;;  %3941 = vst.msk [vmem:[#allocation2 + $0xd0] sm:$0xff] %vm12527_vm9, %v3906_v30  ;;  %v10725_v47 = vld [vmem:[#allocation2 + $0xc0] sm:$0xff]  ;;  %vm12537_vm8 = vmmov %vm12529_vm12 }
 0x44c   :  { %v3838_v3 = vmax.f32 %v7508_v31, 0.0  ;;  %4119 = vst.msk [vmem:[#allocation2 + $0xd0] sm:$0xff] %vm12528_vm1, %v10455_v6  ;;  %5156 = vmatmul.mubr.bf16.gmra.mrb[48].mxu1 %v10725_v47  ;;  %vm12538_vm15 = vmmov %vm12528_vm1 }
 0x44d   :  { %v4496_v37 = vor.u32 %v4494_v20, %v4493_v49  ;;  %v4675_v61 = vsel %vm12529_vm12, %v4670_v18, %v4674_v23  ;;  %7232 = vmatprep.mubr.msk.bf16.mxu1 %vm12530_vm10, %v10730_v4  ;;  %v4678_v38 = vor.u32 %v4676_v62, %v4674_v23  ;;  %vm12539_vm9 = vmmov %vm12528_vm1 }
 0x44e   :  { %4755 = vst.msk [vmem:[#allocation2 + $0x1a8] sm:$0xff] %vm12531_vm5, %v4675_v61  ;;  %v4317_v27 = vpack.c.bf16 %v3838_v3, %v3837_v43  ;;  %vm12540_vm1 = vmmov %vm12532_vm2  ;;  %v12542_v3 = vld [vmem:[#allocation23_spill] sm:$0xff] }
 0x44f   :  { %v3682_v51 = vpop.f32.mrb[112].mxu0  ;;  %v10740_v6 = vsel %vm12532_vm2, %v4485_v63, %v4496_v37  ;;  %vm12543_vm12 = vnez %v12542_v3  ;;  %vm12545_vm10 = vmmov %vm12531_vm5 }
 0x450   :  { %v4413_v53 = vsel %vm12533_vm0, %v4317_v27, 0  ;;  %v4594_v2 = vsel %vm12534_vm14, %v4317_v27, 0  ;;  %v7509_v14 = vadd.f32 %v10569_v58, %v3682_v51  ;;  %4359 = vrot.lane.b32.xlu0 %v4317_v27, %s8180_s28  ;;  %v3684_v15 = vpop.f32.mrb[113].mxu0  ;;  %vm12546_vm5 = vmmov %vm12537_vm8 }
 0x451   :  { %v4499_v11 = vshrl.u32 %v4413_v53, 16  ;;  %v4680_v0 = vshll.u32 %v4594_v2, 16  ;;  %v3685_v29 = vpop.f32.mrb[114].mxu0  ;;  %v4502_v39 = vshll.u32 %v4413_v53, 16  ;;  %v4684_v27 = vshrl.u32 %v4594_v2, 16  ;;  %v10778_v2 = vld [vmem:[#allocation2 + $0xf8] sm:$0xff]  ;;  %vm12547_vm2 = vmmov %vm12539_vm9 }
 0x452   :  { %v7510_v63 = vadd.f32 %v10569_v58, %v3685_v29  ;;  %v3908_v8 = vpop.permute.xlu1 %3907  ;;  %v3687_v48 = vpop.f32.mrb[115].mxu0  ;;  %v3839_v44 = vmax.f32 %v7509_v14, 0.0  ;;  %vm12548_vm0 = vmmov %vm12547_vm2 }
 0x453   :  { %v4501_v21 = vrot.slane %v4499_v11, 7  ;;  %v4682_v9 = vrot.slane %v4680_v0, 1  ;;  %3942 = vst.msk [vmem:[#allocation2 + $0xe0] sm:$0xff] %vm12535_vm13, %v3908_v8  ;;  %v10751_v5 = vld [vmem:[#allocation2 + $0xd0] sm:$0xff]  ;;  %vm12549_vm14 = vmmov %vm12540_vm1 }
 0x454   :  { %v3840_v31 = vmax.f32 %v7510_v63, 0.0  ;;  %4120 = vst.msk [vmem:[#allocation2 + $0xe0] sm:$0xff] %vm12536_vm11, %v10467_v46  ;;  %5164 = vmatmul.mubr.bf16.gmra.mrb[52].mxu1 %v10751_v5  ;;  %vm12554_vm11 = vmmov %vm12548_vm0 }
 0x455   :  { %v4504_v30 = vor.u32 %v4502_v39, %v4501_v21  ;;  %v4683_v10 = vsel %vm12537_vm8, %v4678_v38, %v4682_v9  ;;  %7233 = vmatprep.mubr.msk.bf16.mxu1 %vm12538_vm15, %v10756_v55  ;;  %v4686_v11 = vor.u32 %v4684_v27, %v4682_v9  ;;  %vm12555_vm8 = vmmov %vm12546_vm5 }
 0x456   :  { %4756 = vst.msk [vmem:[#allocation2 + $0x1b8] sm:$0xff] %vm12539_vm9, %v4683_v10  ;;  %v4318_v18 = vpack.c.bf16 %v3840_v31, %v3839_v44  ;;  %vm12556_vm15 = vmmov %vm12548_vm0  ;;  %v12560_v10 = vld [vmem:[#allocation29_spill] sm:$0xff] }
 0x457   :  { %v3690_v20 = vpop.f32.mrb[116].mxu0  ;;  %v10763_v23 = vsel %vm12540_vm1, %v4493_v49, %v4504_v30  ;;  %vm12557_vm9 = vmmov %vm12548_vm0 }
 0x458   :  { %v4414_v46 = vsel %vm12436_vm7, %v4318_v18, 0  ;;  %v4595_v24 = vsel %vm12543_vm12, %v4318_v18, 0  ;;  %v7511_v37 = vadd.f32 %v10569_v58, %v3690_v20  ;;  %4361 = vrot.lane.b32.xlu1 %v4318_v18, %s8180_s28  ;;  %v3692_v61 = vpop.f32.mrb[117].mxu0  ;;  %vm12544_vm7 = vmmov %vm12535_vm13  ;;  %v12551_v18 = vld [vmem:[#allocation27_spill] sm:$0xff] }
 0x459   :  { %v4507_v51 = vshrl.u32 %v4414_v46, 16  ;;  %v4688_v53 = vshll.u32 %v4595_v24, 16  ;;  %v3693_v14 = vpop.f32.mrb[118].mxu0  ;;  %v4510_v29 = vshll.u32 %v4414_v46, 16  ;;  %vm12552_vm13 = vnez %v12551_v18 }
 0x45a   :  { %v7512_v15 = vadd.f32 %v10569_v58, %v3693_v14  ;;  %v3910_v62 = vpop.permute.xlu0 %3909  ;;  %v3695_v49 = vpop.f32.mrb[119].mxu0  ;;  %v3841_v48 = vmax.f32 %v7511_v37, 0.0  ;;  %v4692_v3 = vshrl.u32 %v4595_v24, 16  ;;  %v8157_v24 = vld [vmem:[%s11784_s3 + $0xb8] sm:$0xff]  }
 0x45b   :  { %v4509_v0 = vrot.slane %v4507_v51, 7  ;;  %v4690_v63 = vrot.slane %v4688_v53, 1  ;;  %3943 = vst.msk [vmem:[#allocation2 + $0xf0] sm:$0xff] %vm12544_vm7, %v3910_v62  ;;  %v10773_v8 = vld [vmem:[#allocation2 + $0xe0] sm:$0xff]  ;;  %5677 = vmatpush1.bf16.msra.mxu1 %v8157_v24 }
 0x45c   :  { %v3842_v38 = vmax.f32 %v7512_v15, 0.0  ;;  %4121 = vst.msk [vmem:[#allocation2 + $0xf0] sm:$0xff] %vm12545_vm10, %v10484_v59  ;;  %5172 = vmatmul.mubr.bf16.gmra.mrb[56].mxu1 %v10773_v8  ;;  %6275 = vmatprep.subr.bf16.mxu1 %v10622_v57  ;;  %vm12562_vm10 = vmmov %vm12546_vm5 }
 0x45d   :  { %v4512_v39 = vor.u32 %v4510_v29, %v4509_v0  ;;  %v4691_v44 = vsel %vm12546_vm5, %v4686_v11, %v4690_v63  ;;  %7234 = vmatprep.mubr.msk.bf16.mxu1 %vm12547_vm2, %v10778_v2  ;;  %v4694_v14 = vor.u32 %v4692_v3, %v4690_v63  ;;  %vm12563_vm5 = vmmov %vm12548_vm0 }
 0x45e   :  { %4757 = vst.msk [vmem:[#allocation2 + $0x1c8] sm:$0xff] %vm12548_vm0, %v4691_v44  ;;  %v4319_v9 = vpack.c.bf16 %v3842_v38, %v3841_v48  ;;  %vm12564_vm2 = vmmov %vm12548_vm0 }
 0x45f   :  { %v3698_v31 = vpop.f32.mrb[120].mxu0  ;;  %v10785_v30 = vsel %vm12549_vm14, %v4501_v21, %v4512_v39  ;;  %vm12565_vm0 = vmmov %vm12540_vm1 }
 0x460   :  { %v4415_v59 = vsel %vm9202_vm4, %v4319_v9, 0  ;;  %v4596_v20 = vsel %vm12552_vm13, %v4319_v9, 0  ;;  %v7513_v43 = vadd.f32 %v10569_v58, %v3698_v31  ;;  %4363 = vrot.lane.b32.xlu0 %v4319_v9, %s8180_s28  ;;  %v3700_v46 = vpop.f32.mrb[121].mxu0  ;;  %vm12553_vm4 = vmmov %vm12544_vm7  ;;  %vm12561_vm7 = vnez %v12560_v10 }
 0x461   :  { %v4515_v37 = vshrl.u32 %v4415_v59, 16  ;;  %v4696_v61 = vshll.u32 %v4596_v20, 16  ;;  %v3701_v27 = vpop.f32.mrb[122].mxu0  ;;  %v4518_v62 = vshll.u32 %v4415_v59, 16 }
 0x462   :  { %v7514_v51 = vadd.f32 %v10569_v58, %v3701_v27  ;;  %v3912_v53 = vpop.permute.xlu1 %3911  ;;  %v3703_v21 = vpop.f32.mrb[123].mxu0  ;;  %v3843_v29 = vmax.f32 %v7513_v43, 0.0  ;;  %v4700_v43 = vshrl.u32 %v4596_v20, 16 }
 0x463   :  { %v4517_v15 = vrot.slane %v4515_v37, 7  ;;  %v4698_v49 = vrot.slane %v4696_v61, 1  ;;  %3944 = vst.msk [vmem:[#allocation2 + $0x100] sm:$0xff] %vm12553_vm4, %v3912_v53  ;;  %v10795_v11 = vld [vmem:[#allocation2 + $0xf0] sm:$0xff] }
 0x464   :  { %v3844_v48 = vmax.f32 %v7514_v51, 0.0  ;;  %4122 = vst.msk [vmem:[#allocation2 + $0x100] sm:$0xff] %vm12554_vm11, %v10504_v50  ;;  %5180 = vmatmul.mubr.bf16.gmra.mrb[60].mxu1 %v10795_v11  ;;  %v12558_v50 = vld [vmem:[#allocation40_spill] sm:$0xff]  ;;  %vm12570_vm11 = vmmov %vm12555_vm8 }
 0x465   :  { %v4520_v38 = vor.u32 %v4518_v62, %v4517_v15  ;;  %v4699_v63 = vsel %vm12555_vm8, %v4694_v14, %v4698_v49  ;;  %7235 = vmatprep.mubr.msk.bf16.mxu1 %vm12556_vm15, %v10508_v34  ;;  %vm12559_vm12 = vnez %v12558_v50  ;;  %v4702_v27 = vor.u32 %v4700_v43, %v4698_v49  ;;  %v12568_v50 = vld [vmem:[#allocation31_spill] sm:$0xff]  ;;  %vm12571_vm8 = vmmov %vm12564_vm2 }
 0x466   :  { %4758 = vst.msk [vmem:[#allocation2 + $0x1d8] sm:$0xff] %vm12557_vm9, %v4699_v63  ;;  %v4320_v39 = vpack.c.bf16 %v3844_v48, %v3843_v29  ;;  %v10821_v48 = vld [vmem:[#allocation2 + $0x118] sm:$0xff]  ;;  %vm12569_vm13 = vnez %v12568_v50  ;;  %vm12572_vm15 = vmmov %vm12564_vm2  ;;  %v12574_v50 = vld [vmem:[#allocation34_spill] sm:$0xff] }
 0x467   :  { %v3706_v44 = vpop.f32.mrb[124].mxu0  ;;  %v10808_v9 = vsel %vm12540_vm1, %v4509_v0, %v4520_v38  ;;  %vm12573_vm9 = vmmov %vm12565_vm0  ;;  %vm12575_vm1 = vnez %v12574_v50  ;;  %v10898_v50 = vld [vmem:[#allocation2 + $0x158] sm:$0xff] }
 0x468   :  { %v4416_v31 = vsel %vm12559_vm12, %v4320_v39, 0  ;;  %v4597_v59 = vsel %vm12561_vm7, %v4320_v39, 0  ;;  %v7515_v18 = vadd.f32 %v10569_v58, %v3706_v44  ;;  %4365 = vrot.lane.b32.xlu1 %v4320_v39, %s8180_s28  ;;  %v3708_v34 = vpop.f32.mrb[125].mxu0  ;;  %v12566_v39 = vld [vmem:[#allocation41_spill] sm:$0xff]  ;;  %vm12578_vm7 = vnez %v12455_v45 }
 0x469   :  { %v4523_v46 = vshrl.u32 %v4416_v31, 16  ;;  %v4704_v3 = vshll.u32 %v4597_v59, 16  ;;  %v3709_v37 = vpop.f32.mrb[126].mxu0  ;;  %v4526_v53 = vshll.u32 %v4416_v31, 16  ;;  %vm12567_vm14 = vnez %v12566_v39 }
 0x46a   :  { %v7516_v0 = vadd.f32 %v10569_v58, %v3709_v37  ;;  %v3711_v61 = vpop.f32.mrb[127].mxu0  ;;  %v3845_v62 = vmax.f32 %v7515_v18, 0.0  ;;  %v4708_v34 = vshrl.u32 %v4597_v59, 16  ;;  %v10841_v59 = vld [vmem:[#allocation2 + $0x128] sm:$0xff] }
 0x46b   :  { %v4525_v51 = vrot.slane %v4523_v46, 7  ;;  %v4706_v21 = vrot.slane %v4704_v3, 1  ;;  %v10818_v14 = vld [vmem:[#allocation2 + $0x100] sm:$0xff] }
 0x46c   :  { %v3846_v29 = vmax.f32 %v7516_v0, 0.0  ;;  %5188 = vmatmul.mubr.bf16.gmra.mrb[64].mxu1 %v10818_v14 }
 0x46d   :  { %v4528_v24 = vor.u32 %v4526_v53, %v4525_v51  ;;  %v4707_v20 = vsel %vm12562_vm10, %v4702_v27, %v4706_v21  ;;  %7236 = vmatprep.mubr.msk.bf16.mxu1 %vm12563_vm5, %v10821_v48  ;;  %v4710_v61 = vor.u32 %v4708_v34, %v4706_v21  ;;  %v4423_v21 = vshll.u32 %v10534_v25, 16  ;;  %vm12579_vm10 = vmmov %vm12553_vm4 }
 0x46e   :  { %4759 = vst.msk [vmem:[#allocation2 + $0x1e8] sm:$0xff] %vm12564_vm2, %v4707_v20  ;;  %v4321_v49 = vpack.c.bf16 %v3846_v29, %v3845_v62  ;;  %v10838_v29 = vld [vmem:[#allocation2 + $0x110] sm:$0xff]  ;;  %vm12580_vm5 = vmmov %vm12564_vm2 }
 0x46f   :  { %v3714_v38 = vpop.f32.mrb[128].mxu0  ;;  %v10828_v63 = vsel %vm12565_vm0, %v4517_v15, %v4528_v24  ;;  %vm12581_vm2 = vmmov %vm12570_vm11 }
 0x470   :  { %v4417_v44 = vsel %vm12567_vm14, %v4321_v49, 0  ;;  %v4598_v31 = vsel %vm12569_vm13, %v4321_v49, 0  ;;  %v7517_v10 = vadd.f32 %v10569_v58, %v3714_v38  ;;  %4367 = vrot.lane.b32.xlu0 %v4321_v49, %s8180_s28  ;;  %v3716_v18 = vpop.f32.mrb[129].mxu0  ;;  %vm12582_vm0 = vmmov %vm12580_vm5 }
 0x471   :  { %v4531_v43 = vshrl.u32 %v4417_v44, 16  ;;  %v4712_v46 = vshll.u32 %v4598_v31, 16  ;;  %v3717_v3 = vpop.f32.mrb[130].mxu0  ;;  %v4534_v53 = vshll.u32 %v4417_v44, 16  ;;  %v4716_v44 = vshrl.u32 %v4598_v31, 16  ;;  %v12576_v18 = vld [vmem:[#allocation35_spill] sm:$0xff]  ;;  %vm12583_vm14 = vmmov %vm12582_vm0 }
 0x472   :  { %v7518_v37 = vadd.f32 %v10569_v58, %v3717_v3  ;;  %v4340_v0 = vpop.permute.xlu0 %4339  ;;  %v3719_v15 = vpop.f32.mrb[131].mxu0  ;;  %v3847_v24 = vmax.f32 %v7517_v10, 0.0  ;;  %vm12577_vm12 = vnez %v12576_v18  ;;  %vm12584_vm13 = vmmov %vm12573_vm9  ;;  %v10908_v18 = vld [vmem:[#allocation2 + $0x168] sm:$0xff] }
 0x473   :  { %v4533_v27 = vrot.slane %v4531_v43, 7  ;;  %v4714_v62 = vrot.slane %v4712_v46, 1  ;;  %4387 = vst.msk [vmem:[#allocation2 + $0x120] sm:$0xff] %vm12553_vm4, %v4340_v0  ;;  %v4425_v43 = vor.u32 %v4423_v21, %v10550_v12  ;;  %v4581_v15 = vld [vmem:[#allocation2 + $0x220] sm:$0x1]  ;;  %v10866_v12 = vld [vmem:[#allocation2 + $0x138] sm:$0xff] }
 0x474   :  { %v3848_v20 = vmax.f32 %v7518_v37, 0.0  ;;  %5194 = vmatmul.mubr.bf16.gmra.mrb[68].mxu1 %v10838_v29 }
 0x475   :  { %v4536_v49 = vor.u32 %v4534_v53, %v4533_v27  ;;  %v4715_v38 = vsel %vm12570_vm11, %v4710_v61, %v4714_v62  ;;  %7237 = vmatprep.mubr.msk.bf16.mxu1 %vm12571_vm8, %v10841_v59  ;;  %v4718_v37 = vor.u32 %v4716_v44, %v4714_v62  ;;  %v10888_v44 = vld [vmem:[#allocation2 + $0x148] sm:$0xff]  ;;  %vm12587_vm11 = vmmov %vm12582_vm0 }
 0x476   :  { %4760 = vst.msk [vmem:[#allocation2 + $0x1f8] sm:$0xff] %vm12572_vm15, %v4715_v38  ;;  %v4322_v58 = vpack.c.bf16 %v3848_v20, %v3847_v24  ;;  %v4762_v20 = vld [vmem:[#allocation2 + $0x218] sm:$0xff]  ;;  %vm12589_vm8 = vmmov %vm12582_vm0 }
 0x477   :  { %v10849_v39 = vsel %vm12573_vm9, %v4525_v51, %v4536_v49  ;;  %vm12590_vm15 = vmmov %vm12582_vm0 }
 0x478   :  { %v4418_v10 = vsel %vm12575_vm1, %v4322_v58, 0  ;;  %v4599_v34 = vsel %vm12577_vm12, %v4322_v58, 0  ;;  %4369 = vrot.lane.b32.xlu1 %v4322_v58, %s8180_s28  ;;  %vm12592_vm1 = vmmov %vm12582_vm0 }
 0x479   :  { %v4539_v46 = vshrl.u32 %v4418_v10, 16  ;;  %v4720_v3 = vshll.u32 %v4599_v34, 16  ;;  %v4542_v0 = vshll.u32 %v4418_v10, 16  ;;  %v4724_v31 = vshrl.u32 %v4599_v34, 16  ;;  %vm12593_vm12 = vmmov %vm12582_vm0 }
 0x47a   :  { %v4563_v25 = vld [vmem:[#allocation2 + $0x120] sm:$0xff]  ;;  %v4342_v61 = vpop.permute.xlu1 %4341 }
 0x47b   :  { %v4541_v51 = vrot.slane %v4539_v46, 7  ;;  %v4722_v53 = vrot.slane %v4720_v3, 1  ;;  %v10859_v24 = vsel %vm12578_vm7, %v4425_v43, %v4563_v25  ;;  %4388 = vst.msk [vmem:[#allocation2 + $0x130] sm:$0xff] %vm12579_vm10, %v4342_v61  ;;  %vm12595_vm10 = vmmov %vm12582_vm0  ;;  %v10918_v43 = vld [vmem:[#allocation2 + $0x178] sm:$0xff]  ;;  %v10928_v3 = vld [vmem:[#allocation2 + $0x188] sm:$0xff] }
 0x47c   :  { %4565 = vst [vmem:[#allocation2 + $0x120] sm:$0xff] %v10859_v24  ;;  %4566 = vst.msk [vmem:[#allocation2 + $0x130] sm:$0xff] %vm12580_vm5, %v10557_v40  ;;  %5202 = vmatmul.mubr.bf16.gmra.mrb[72].mxu1 %v10859_v24  ;;  %v10948_v25 = vld [vmem:[#allocation2 + $0x1a8] sm:$0xff] }
 0x47d   :  { %v4544_v62 = vor.u32 %v4542_v0, %v4541_v51  ;;  %v4582_v49 = vsel %vm8236_vm3, %v4541_v51, %v4581_v15  ;;  %v4723_v45 = vsel %vm12581_vm2, %v4718_v37, %v4722_v53  ;;  %v4726_v38 = vor.u32 %v4724_v31, %v4722_v53  ;;  %7238 = vmatprep.mubr.msk.bf16.mxu1 %vm12582_vm0, %v10866_v12  ;;  %vm12585_vm3 = vmmov %vm12553_vm4  ;;  %v10938_v0 = vld [vmem:[#allocation2 + $0x198] sm:$0xff]  ;;  %v10968_v31 = vld [vmem:[#allocation2 + $0x1c8] sm:$0xff] }
 0x47e   :  { %4583 = vst [vmem:[#allocation2 + $0x220] sm:$0x1] %v4582_v49  ;;  %4761 = vst.msk [vmem:[#allocation2 + $0x208] sm:$0xff] %vm12583_vm14, %v4723_v45  ;;  %v10958_v51 = vld [vmem:[#allocation2 + $0x1b8] sm:$0xff]  ;;  %v10988_v45 = vld [vmem:[#allocation2 + $0x1e8] sm:$0xff] }
 0x47f   :  { %v10875_v58 = vsel %vm12584_vm13, %v4533_v27, %v4544_v62  ;;  %v10879_v40 = vsel %vm12463_vm6, %v4726_v38, %v4762_v20  ;;  %vm12586_vm4 = vmmov %vm12582_vm0  ;;  %v10978_v62 = vld [vmem:[#allocation2 + $0x1d8] sm:$0xff] }
 0x480   :  { %4764 = vst [vmem:[#allocation2 + $0x218] sm:$0xff] %v10879_v40  ;;  %vm12588_vm6 = vmmov %vm12585_vm3 }
 0x481   :  { %vm12591_vm9 = vmmov %vm12585_vm3 }
 0x482   :  { %v4344_v19 = vpop.permute.xlu0 %4343  ;;  %vm12594_vm7 = vmmov %vm12585_vm3 }
 0x483   :  { %4389 = vst.msk [vmem:[#allocation2 + $0x140] sm:$0xff] %vm12585_vm3, %v4344_v19  ;;  %v10883_v21 = vld [vmem:[#allocation2 + $0x130] sm:$0xff]  ;;  %vm12596_vm5 = vmmov %vm12582_vm0  ;;  %v10998_v19 = vld [vmem:[#allocation2 + $0x1f8] sm:$0xff] }
 0x484   :  { %4567 = vst.msk [vmem:[#allocation2 + $0x140] sm:$0xff] %vm12586_vm4, %v10579_v36  ;;  %5210 = vmatmul.mubr.bf16.gmra.mrb[76].mxu1 %v10883_v21  ;;  %vm12597_vm2 = vmmov %vm12585_vm3 }
 0x485   :  { %7239 = vmatprep.mubr.msk.bf16.mxu1 %vm12587_vm11, %v10888_v44  ;;  %vm12598_vm14 = vmmov %vm12582_vm0 }
 0x486   :  { %vm12599_vm13 = vmmov %vm12597_vm2 }
 0x487   :  { %vm12600_vm3 = vmmov %vm12582_vm0 }
 0x488   :  { %vm12601_vm4 = vmmov %vm12582_vm0 }
 0x489   :  { %vm12602_vm11 = vmmov %vm12597_vm2 }
 0x48a   :  { %v4346_v52 = vpop.permute.xlu1 %4345 }
 0x48b   :  { %4390 = vst.msk [vmem:[#allocation2 + $0x150] sm:$0xff] %vm12588_vm6, %v4346_v52  ;;  %v10893_v27 = vld [vmem:[#allocation2 + $0x140] sm:$0xff]  ;;  %vm12603_vm6 = vmmov %vm12582_vm0 }
 0x48c   :  { %4568 = vst.msk [vmem:[#allocation2 + $0x150] sm:$0xff] %vm12589_vm8, %v10595_v54  ;;  %5218 = vmatmul.mubr.bf16.gmra.mrb[80].mxu1 %v10893_v27  ;;  %vm12604_vm8 = vmmov %vm12582_vm0 }
 0x48d   :  { %7240 = vmatprep.mubr.msk.bf16.mxu1 %vm12590_vm15, %v10898_v50  ;;  %vm12605_vm15 = vmmov %vm12597_vm2 }
 0x492   :  { %v4348_v36 = vpop.permute.xlu0 %4347 }
 0x493   :  { %4391 = vst.msk [vmem:[#allocation2 + $0x160] sm:$0xff] %vm12591_vm9, %v4348_v36  ;;  %v10903_v10 = vld [vmem:[#allocation2 + $0x150] sm:$0xff]  ;;  %vm12606_vm9 = vmmov %vm12582_vm0  ;;  %v11008_v36 = vld [vmem:[#allocation2 + $0x208] sm:$0xff] }
 0x494   :  { %4569 = vst.msk [vmem:[#allocation2 + $0x160] sm:$0xff] %vm12592_vm1, %v10620_v17  ;;  %5226 = vmatmul.mubr.bf16.gmra.mrb[84].mxu1 %v10903_v10  ;;  %vm12607_vm1 = vmmov %vm12582_vm0 }
 0x495   :  { %7241 = vmatprep.mubr.msk.bf16.mxu1 %vm12593_vm12, %v10908_v18  ;;  %vm12608_vm12 = vmmov %vm12597_vm2 }
 0x49a   :  { %v4350_v54 = vpop.permute.xlu1 %4349 }
 0x49b   :  { %4392 = vst.msk [vmem:[#allocation2 + $0x170] sm:$0xff] %vm12594_vm7, %v4350_v54  ;;  %v10913_v34 = vld [vmem:[#allocation2 + $0x160] sm:$0xff]  ;;  %vm12609_vm7 = vmmov %vm12582_vm0 }
 0x49c   :  { %4570 = vst.msk [vmem:[#allocation2 + $0x170] sm:$0xff] %vm12595_vm10, %v10645_v42  ;;  %5234 = vmatmul.mubr.bf16.gmra.mrb[88].mxu1 %v10913_v34  ;;  %vm12610_vm10 = vmmov %vm12582_vm0 }
 0x49d   :  { %7242 = vmatprep.mubr.msk.bf16.mxu1 %vm12596_vm5, %v10918_v43  ;;  %vm12611_vm5 = vmmov %vm12597_vm2 }
 0x4a2   :  { %v4352_v17 = vpop.permute.xlu0 %4351 }
 0x4a3   :  { %4393 = vst.msk [vmem:[#allocation2 + $0x180] sm:$0xff] %vm12597_vm2, %v4352_v17  ;;  %v10923_v46 = vld [vmem:[#allocation2 + $0x170] sm:$0xff]  ;;  %vm12612_vm2 = vmmov %vm12582_vm0  ;;  %v5393_v17 = vld [vmem:[#allocation2 + $0x18] sm:$0xff] }
 0x4a4   :  { %4571 = vst.msk [vmem:[#allocation2 + $0x180] sm:$0xff] %vm12582_vm0, %v10670_v22  ;;  %5242 = vmatmul.mubr.bf16.gmra.mrb[92].mxu1 %v10923_v46 }
 0x4a5   :  { %7243 = vmatprep.mubr.msk.bf16.mxu1 %vm12598_vm14, %v10928_v3  ;;  %vm12613_vm14 = vmmov %vm12611_vm5 }
 0x4aa   :  { %v4354_v42 = vpop.permute.xlu1 %4353 }
 0x4ab   :  { %4394 = vst.msk [vmem:[#allocation2 + $0x190] sm:$0xff] %vm12599_vm13, %v4354_v42  ;;  %v10933_v37 = vld [vmem:[#allocation2 + $0x180] sm:$0xff]  ;;  %vm12614_vm13 = vmmov %vm12582_vm0  ;;  %v5392_v42 = vld [vmem:[#allocation2 + $0x10] sm:$0xff] }
 0x4ac   :  { %4572 = vst.msk [vmem:[#allocation2 + $0x190] sm:$0xff] %vm12600_vm3, %v10693_v35  ;;  %5250 = vmatmul.mubr.bf16.gmra.mrb[96].mxu1 %v10933_v37  ;;  %vm12615_vm3 = vmmov %vm12582_vm0 }
 0x4ad   :  { %7244 = vmatprep.mubr.msk.bf16.mxu1 %vm12601_vm4, %v10938_v0  ;;  %vm12616_vm4 = vmmov %vm12611_vm5 }
 0x4b2   :  { %v4356_v22 = vpop.permute.xlu0 %4355 }
 0x4b3   :  { %4395 = vst.msk [vmem:[#allocation2 + $0x1a0] sm:$0xff] %vm12602_vm11, %v4356_v22  ;;  %v10943_v15 = vld [vmem:[#allocation2 + $0x190] sm:$0xff]  ;;  %vm12617_vm11 = vmmov %vm12582_vm0  ;;  %v11022_v22 = vld [vmem:[#allocation2 + $0x28] sm:$0xff] }
 0x4b4   :  { %4573 = vst.msk [vmem:[#allocation2 + $0x1a0] sm:$0xff] %vm12603_vm6, %v10715_v56  ;;  %5258 = vmatmul.mubr.bf16.gmra.mrb[100].mxu1 %v10943_v15  ;;  %vm12618_vm6 = vmmov %vm12582_vm0 }
 0x4b5   :  { %7245 = vmatprep.mubr.msk.bf16.mxu1 %vm12604_vm8, %v10948_v25  ;;  %vm12619_vm8 = vmmov %vm12616_vm4 }
 0x4ba   :  { %v4358_v35 = vpop.permute.xlu1 %4357 }
 0x4bb   :  { %4396 = vst.msk [vmem:[#allocation2 + $0x1b0] sm:$0xff] %vm12605_vm15, %v4358_v35  ;;  %v10953_v61 = vld [vmem:[#allocation2 + $0x1a0] sm:$0xff]  ;;  %vm12620_vm15 = vmmov %vm12582_vm0  ;;  %v8160_v35 = vld [vmem:[%s11784_s3 + $0xd0] sm:$0xff]  }
 0x4bc   :  { %4574 = vst.msk [vmem:[#allocation2 + $0x1b0] sm:$0xff] %vm12606_vm9, %v10740_v6  ;;  %5266 = vmatmul.mubr.bf16.gmra.mrb[104].mxu1 %v10953_v61  ;;  %vm12621_vm9 = vmmov %vm12582_vm0 }
 0x4bd   :  { %7246 = vmatprep.mubr.msk.bf16.mxu1 %vm12607_vm1, %v10958_v51  ;;  %vm12622_vm1 = vmmov %vm12616_vm4 }
 0x4c2   :  { %v4360_v56 = vpop.permute.xlu0 %4359 }
 0x4c3   :  { %4397 = vst.msk [vmem:[#allocation2 + $0x1c0] sm:$0xff] %vm12608_vm12, %v4360_v56  ;;  %v10963_v53 = vld [vmem:[#allocation2 + $0x1b0] sm:$0xff]  ;;  %vm12623_vm12 = vmmov %vm12582_vm0  ;;  %v11034_v56 = vld [vmem:[#allocation2 + $0x20] sm:$0xff] }
 0x4c4   :  { %4575 = vst.msk [vmem:[#allocation2 + $0x1c0] sm:$0xff] %vm12609_vm7, %v10763_v23  ;;  %5274 = vmatmul.mubr.bf16.gmra.mrb[108].mxu1 %v10963_v53  ;;  %vm12624_vm7 = vmmov %vm12582_vm0 }
 0x4c5   :  { %7247 = vmatprep.mubr.msk.bf16.mxu1 %vm12610_vm10, %v10968_v31  ;;  %vm12625_vm10 = vmmov %vm12582_vm0 }
 0x4ca   :  { %v4362_v6 = vpop.permute.xlu1 %4361 }
 0x4cb   :  { %4398 = vst.msk [vmem:[#allocation2 + $0x1d0] sm:$0xff] %vm12611_vm5, %v4362_v6  ;;  %v10973_v20 = vld [vmem:[#allocation2 + $0x1c0] sm:$0xff]  ;;  %v11037_v6 = vld [vmem:[#allocation2 + $0x38] sm:$0xff]  ;;  %vm12626_vm5 = vmmov %vm12582_vm0 }
 0x4cc   :  { %4576 = vst.msk [vmem:[#allocation2 + $0x1d0] sm:$0xff] %vm12612_vm2, %v10785_v30  ;;  %5282 = vmatmul.mubr.bf16.gmra.mrb[112].mxu1 %v10973_v20  ;;  %vm12627_vm2 = vmmov %vm12582_vm0 }
 0x4cd   :  { %7248 = vmatprep.mubr.msk.bf16.mxu1 %vm12582_vm0, %v10978_v62 }
 0x4d2   :  { %v4364_v23 = vpop.permute.xlu0 %4363 }
 0x4d3   :  { %4399 = vst.msk [vmem:[#allocation2 + $0x1e0] sm:$0xff] %vm12613_vm14, %v4364_v23  ;;  %v10983_v49 = vld [vmem:[#allocation2 + $0x1d0] sm:$0xff]  ;;  %v8161_v23 = vld [vmem:[%s11784_s3 + $0xd8] sm:$0xff]   ;;  %vm12628_vm14 = vmmov %vm12582_vm0 }
 0x4d4   :  { %4577 = vst.msk [vmem:[#allocation2 + $0x1e0] sm:$0xff] %vm12614_vm13, %v10808_v9  ;;  %5290 = vmatmul.mubr.bf16.gmra.mrb[116].mxu1 %v10983_v49  ;;  %vm12629_vm13 = vmmov %vm12582_vm0 }
 0x4d5   :  { %7249 = vmatprep.mubr.msk.bf16.mxu1 %vm12615_vm3, %v10988_v45  ;;  %vm12630_vm3 = vmmov %vm12582_vm0 }
 0x4da   :  { %v4366_v30 = vpop.permute.xlu1 %4365 }
 0x4db   :  { %4400 = vst.msk [vmem:[#allocation2 + $0x1f0] sm:$0xff] %vm12616_vm4, %v4366_v30  ;;  %v10993_v38 = vld [vmem:[#allocation2 + $0x1e0] sm:$0xff]  ;;  %vm12631_vm4 = vmmov %vm12582_vm0 }
 0x4dc   :  { %4578 = vst.msk [vmem:[#allocation2 + $0x1f0] sm:$0xff] %vm12617_vm11, %v10828_v63  ;;  %5298 = vmatmul.mubr.bf16.gmra.mrb[120].mxu1 %v10993_v38  ;;  %v8162_v30 = vld [vmem:[%s11784_s3 + $0xe0] sm:$0xff]   ;;  %vm12632_vm11 = vmmov %vm12582_vm0 }
 0x4dd   :  { %7250 = vmatprep.mubr.msk.bf16.mxu1 %vm12618_vm6, %v10998_v19  ;;  %vm12633_vm6 = vmmov %vm12582_vm0 }
 0x4e2   :  { %v4368_v9 = vpop.permute.xlu0 %4367 }
 0x4e3   :  { %4401 = vst.msk [vmem:[#allocation2 + $0x200] sm:$0xff] %vm12619_vm8, %v4368_v9  ;;  %v11003_v52 = vld [vmem:[#allocation2 + $0x1f0] sm:$0xff]  ;;  %vm12634_vm8 = vmmov %vm12582_vm0 }
 0x4e4   :  { %4579 = vst.msk [vmem:[#allocation2 + $0x200] sm:$0xff] %vm12620_vm15, %v10849_v39  ;;  %5306 = vmatmul.mubr.bf16.gmra.mrb[124].mxu1 %v11003_v52  ;;  %v8158_v39 = vld [vmem:[%s11784_s3 + $0xc0] sm:$0xff]   ;;  %v11049_v9 = vld [vmem:[#allocation2 + $0x30] sm:$0xff]  ;;  %vm12635_vm15 = vmmov %vm12582_vm0 }
 0x4e5   :  { %7251 = vmatprep.mubr.msk.bf16.mxu1 %vm12621_vm9, %v11008_v36  ;;  %vm12636_vm9 = vmmov %vm12582_vm0 }
 0x4ea   :  { %v4370_v63 = vpop.permute.xlu1 %4369 }
 0x4eb   :  { %4402 = vst.msk [vmem:[#allocation2 + $0x210] sm:$0xff] %vm12622_vm1, %v4370_v63  ;;  %v11013_v54 = vld [vmem:[#allocation2 + $0x200] sm:$0xff]  ;;  %v11052_v63 = vld [vmem:[#allocation2 + $0x48] sm:$0xff]  ;;  %vm12637_vm1 = vmmov %vm12582_vm0 }
 0x4ec   :  { %4580 = vst.msk [vmem:[#allocation2 + $0x210] sm:$0xff] %vm12623_vm12, %v10875_v58  ;;  %5314 = vmatmul.mubr.bf16.gmra.mrb[128].mxu1 %v11013_v54  ;;  %v8159_v58 = vld [vmem:[%s11784_s3 + $0xc8] sm:$0xff]   ;;  %vm12638_vm12 = vmmov %vm12582_vm0 }
 0x4ed   :  { %7289 = vmatprep.mubr.msk.bf16.mxu1 %vm12624_vm7, %v5393_v17  ;;  %v8163_v17 = vld [vmem:[%s11784_s3 + $0xe8] sm:$0xff]   ;;  %vm12639_vm7 = vmmov %vm12582_vm0 }
 0x4f4   :  { %5687 = vmatmul.mubr.bf16.vlgmr.msra.gmra.mrb[0].mxu1 %v5392_v42  ;;  %v11064_v42 = vld [vmem:[#allocation2 + $0x40] sm:$0xff] }
 0x4f5   :  { %6276 = vmatpush1.bf16.msra.mxu1 %v8158_v39  ;;  %7290 = vmatprep.mubr.msk.bf16.mxu1 %vm12625_vm10, %v11022_v22  ;;  %v8164_v39 = vld [vmem:[%s11784_s3 + $0xf0] sm:$0xff]   ;;  %vm12640_vm10 = vmmov %vm12582_vm0 }
 0x4f6   :  { %6277 = vmatprep.subr.bf16.mxu1 %v10622_v57 }
 0x4f9   :  { %6278 = vmatpush1.bf16.msra.mxu1 %v8159_v58  ;;  %v11067_v58 = vld [vmem:[#allocation2 + $0x58] sm:$0xff] }
 0x4fa   :  { %6279 = vmatprep.subr.bf16.mxu1 %v10622_v57 }
 0x4fc   :  { %5695 = vmatmul.mubr.bf16.gmra.mrb[4].mxu1 %v11034_v56 }
 0x4fd   :  { %7291 = vmatprep.mubr.msk.bf16.mxu1 %vm12626_vm5, %v11037_v6  ;;  %6280 = vmatpush1.bf16.msra.mxu1 %v8160_v35  ;;  %v8165_v35 = vld [vmem:[%s11784_s3 + $0xf8] sm:$0xff]   ;;  %vm12641_vm5 = vmmov %vm12582_vm0 }
 0x4fe   :  { %6281 = vmatprep.subr.bf16.mxu1 %v10622_v57 }
 0x501   :  { %6282 = vmatpush1.bf16.msra.mxu1 %v8161_v23  ;;  %v11076_v23 = vld [vmem:[#allocation2 + $0x50] sm:$0xff] }
 0x502   :  { %6283 = vmatprep.subr.bf16.mxu1 %v10622_v57 }
 0x504   :  { %5703 = vmatmul.mubr.bf16.gmra.mrb[8].mxu1 %v11049_v9 }
 0x505   :  { %7292 = vmatprep.mubr.msk.bf16.mxu1 %vm12627_vm2, %v11052_v63  ;;  %6284 = vmatpush1.bf16.msra.mxu1 %v8162_v30  ;;  %v11079_v30 = vld [vmem:[#allocation2 + $0x68] sm:$0xff]  ;;  %vm12642_vm2 = vmmov %vm12582_vm0 }
 0x506   :  { %6285 = vmatprep.subr.bf16.mxu1 %v10622_v57 }
 0x509   :  { %6286 = vmatpush1.bf16.msra.mxu1 %v8163_v17  ;;  %v8175_v17 = vld [vmem:[#allocation2 + $0x60] sm:$0xff] }
 0x50a   :  { %6287 = vmatprep.subr.bf16.mxu1 %v10622_v57 }
 0x50c   :  { %5711 = vmatmul.mubr.bf16.gmra.mrb[12].mxu1 %v11064_v42 }
 0x50d   :  { %7293 = vmatprep.mubr.msk.bf16.mxu1 %vm12582_vm0, %v11067_v58  ;;  %6288 = vmatpush1.bf16.msra.mxu1 %v8164_v39  ;;  %v8176_v39 = vld [vmem:[#allocation2 + $0x78] sm:$0xff] }
 0x50e   :  { %6289 = vmatprep.subr.bf16.mxu1 %v10622_v57 }
 0x511   :  { %6290 = vmatpush1.bf16.msra.mxu1 %v8165_v35  ;;  %v8166_v35 = vld [vmem:[%s11784_s3 + $0x100] sm:$0xff]  }
 0x512   :  { %6291 = vmatprep.subr.bf16.mxu1 %v10622_v57 }
 0x514   :  { %5719 = vmatmul.mubr.bf16.gmra.mrb[16].mxu1 %v11076_v23 }
 0x515   :  { %7294 = vmatprep.mubr.msk.bf16.mxu1 %vm12628_vm14, %v11079_v30  ;;  %6292 = vmatpush1.bf16.msra.mxu1 %v8166_v35  ;;  %vm12643_vm14 = vmmov %vm12582_vm0  ;;  %v6033_v35 = vld [vmem:[#allocation2 + $0xc0] sm:$0xff] }
 0x516   :  { %6293 = vmatprep.subr.bf16.mxu1 %v10622_v57 }
 0x51c   :  { %5727 = vmatmul.mubr.bf16.gmra.mrb[20].mxu1 %v8175_v17 }
 0x51d   :  { %7295 = vmatprep.mubr.msk.bf16.mxu1 %vm12629_vm13, %v8176_v39  ;;  %vm12644_vm13 = vmmov %vm12582_vm0 }
 0x524   :  { %5735 = vmatmul.mubr.bf16.gmra.mrb[24].mxu1 %v10605_v26  ;;  %v8167_v26 = vld [vmem:[%s11784_s3 + $0x108] sm:$0xff]  }
 0x525   :  { %7296 = vmatprep.mubr.msk.bf16.mxu1 %vm12630_vm3, %v10610_v16  ;;  %6294 = vmatpush1.bf16.msra.mxu1 %v8167_v26  ;;  %vm12645_vm3 = vmmov %vm12582_vm0  ;;  %v6036_v26 = vld [vmem:[#allocation2 + $0xd8] sm:$0xff] }
 0x526   :  { %6295 = vmatprep.subr.bf16.mxu1 %v10622_v57 }
 0x52c   :  { %5743 = vmatmul.mubr.bf16.gmra.mrb[28].mxu1 %v10633_v60 }
 0x52d   :  { %7297 = vmatprep.mubr.msk.bf16.mxu1 %vm12631_vm4, %v10638_v32  ;;  %vm12646_vm4 = vmmov %vm12582_vm0 }
 0x534   :  { %5751 = vmatmul.mubr.bf16.gmra.mrb[32].mxu1 %v10655_v41  ;;  %v8168_v41 = vld [vmem:[%s11784_s3 + $0x110] sm:$0xff]  }
 0x535   :  { %7298 = vmatprep.mubr.msk.bf16.mxu1 %vm12632_vm11, %v10660_v13  ;;  %6296 = vmatpush1.bf16.msra.mxu1 %v8168_v41  ;;  %v11121_v13 = vld [vmem:[#allocation2 + $0x108] sm:$0xff]  ;;  %vm12647_vm11 = vmmov %vm12582_vm0 }
 0x536   :  { %6297 = vmatprep.subr.bf16.mxu1 %v10622_v57  ;;  %v8169_v57 = vld [vmem:[%s11784_s3 + $0x118] sm:$0xff]  }
 0x539   :  { %6298 = vmatpush1.bf16.msra.mxu1 %v8169_v57 }
 0x53c   :  { %5759 = vmatmul.mubr.bf16.gmra.mrb[36].mxu1 %v10681_v1  ;;  %v11179_v1 = vld [vmem:[#allocation2 + $0x210] sm:$0xff] }
 0x53d   :  { %7299 = vmatprep.mubr.msk.bf16.mxu1 %vm12633_vm6, %v10686_v33  ;;  %vm12648_vm6 = vmmov %vm12582_vm0  ;;  %v6021_v33 = vld [vmem:[#allocation2 + $0x60] sm:$0xff] }
 0x53f   :  { %v5189_v16 = vpop.f32.mrb[64].mxu1 }
 0x540   :  { %v5190_v60 = vpop.f32.mrb[65].mxu1 }
 0x541   :  { %v5191_v32 = vpop.f32.mrb[66].mxu1 }
 0x542   :  { %v5192_v17 = vpop.f32.mrb[67].mxu1  ;;  %v6703_v32 = vld [vmem:[%s11782_s0 + $0x28] sm:$0xff] }
 0x544   :  { %5767 = vmatmul.mubr.bf16.gmra.mrb[40].mxu1 %v10703_v28  ;;  %v6024_v28 = vld [vmem:[#allocation2 + $0x78] sm:$0xff] }
 0x545   :  { %7300 = vmatprep.mubr.msk.bf16.mxu1 %vm12634_vm8, %v10708_v7  ;;  %vm12649_vm8 = vmmov %vm12582_vm0  ;;  %v6023_v7 = vld [vmem:[#allocation2 + $0x70] sm:$0xff] }
 0x54c   :  { %5775 = vmatmul.mubr.bf16.gmra.mrb[44].mxu1 %v10725_v47  ;;  %v6026_v47 = vld [vmem:[#allocation2 + $0x88] sm:$0xff] }
 0x54d   :  { %7301 = vmatprep.mubr.msk.bf16.mxu1 %vm12635_vm15, %v10730_v4  ;;  %vm12650_vm15 = vmmov %vm12582_vm0  ;;  %v6025_v4 = vld [vmem:[#allocation2 + $0x80] sm:$0xff] }
 0x554   :  { %5783 = vmatmul.mubr.bf16.gmra.mrb[48].mxu1 %v10751_v5 }
 0x555   :  { %7302 = vmatprep.mubr.msk.bf16.mxu1 %vm12636_vm9, %v10756_v55  ;;  %vm12651_vm9 = vmmov %vm12582_vm0 }
 0x55c   :  { %5791 = vmatmul.mubr.bf16.gmra.mrb[52].mxu1 %v10773_v8 }
 0x55d   :  { %7303 = vmatprep.mubr.msk.bf16.mxu1 %vm12637_vm1, %v10778_v2  ;;  %vm12652_vm1 = vmmov %vm12582_vm0 }
 0x564   :  { %5799 = vmatmul.mubr.bf16.gmra.mrb[56].mxu1 %v10795_v11 }
 0x565   :  { %7304 = vmatprep.mubr.msk.bf16.mxu1 %vm12638_vm12, %v11121_v13  ;;  %vm12653_vm12 = vmmov %vm12582_vm0 }
 0x56c   :  { %5807 = vmatmul.mubr.bf16.gmra.mrb[60].mxu1 %v10818_v14 }
 0x56d   :  { %7305 = vmatprep.mubr.msk.bf16.mxu1 %vm12639_vm7, %v10821_v48  ;;  %vm12654_vm7 = vmmov %vm12582_vm0 }
 0x574   :  { %5815 = vmatmul.mubr.bf16.gmra.mrb[132].mxu1 %v10838_v29 }
 0x575   :  { %7306 = vmatprep.mubr.msk.bf16.mxu1 %vm12640_vm10, %v10841_v59  ;;  %vm12655_vm10 = vmmov %vm12582_vm0 }
 0x57c   :  { %5821 = vmatmul.mubr.bf16.gmra.mrb[68].mxu1 %v10859_v24 }
 0x57d   :  { %7307 = vmatprep.mubr.msk.bf16.mxu1 %vm12641_vm5, %v10866_v12  ;;  %vm12656_vm5 = vmmov %vm12582_vm0 }
 0x584   :  { %5829 = vmatmul.mubr.bf16.gmra.mrb[72].mxu1 %v10883_v21 }
 0x585   :  { %7308 = vmatprep.mubr.msk.bf16.mxu1 %vm12642_vm2, %v10888_v44  ;;  %vm12657_vm2 = vmmov %vm12582_vm0 }
 0x58c   :  { %5837 = vmatmul.mubr.bf16.gmra.mrb[76].mxu1 %v10893_v27 }
 0x58d   :  { %7309 = vmatprep.mubr.msk.bf16.mxu1 %vm12582_vm0, %v10898_v50 }
 0x594   :  { %5845 = vmatmul.mubr.bf16.gmra.mrb[80].mxu1 %v10903_v10 }
 0x595   :  { %7310 = vmatprep.mubr.msk.bf16.mxu1 %vm12643_vm14, %v10908_v18  ;;  %vm12658_vm14 = vmmov %vm12582_vm0 }
 0x59c   :  { %5853 = vmatmul.mubr.bf16.gmra.mrb[84].mxu1 %v10913_v34 }
 0x59d   :  { %7311 = vmatprep.mubr.msk.bf16.mxu1 %vm12644_vm13, %v10918_v43  ;;  %vm12659_vm13 = vmmov %vm12582_vm0 }
 0x5a4   :  { %5861 = vmatmul.mubr.bf16.gmra.mrb[88].mxu1 %v10923_v46 }
 0x5a5   :  { %7312 = vmatprep.mubr.msk.bf16.mxu1 %vm12645_vm3, %v10928_v3  ;;  %vm12660_vm3 = vmmov %vm12582_vm0 }
 0x5ac   :  { %5869 = vmatmul.mubr.bf16.gmra.mrb[92].mxu1 %v10933_v37 }
 0x5ad   :  { %7313 = vmatprep.mubr.msk.bf16.mxu1 %vm12646_vm4, %v10938_v0  ;;  %vm12661_vm4 = vmmov %vm12582_vm0 }
 0x5b4   :  { %5877 = vmatmul.mubr.bf16.gmra.mrb[96].mxu1 %v10943_v15 }
 0x5b5   :  { %7314 = vmatprep.mubr.msk.bf16.mxu1 %vm12647_vm11, %v10948_v25  ;;  %vm12662_vm11 = vmmov %vm12582_vm0 }
 0x5bc   :  { %5885 = vmatmul.mubr.bf16.gmra.mrb[100].mxu1 %v10953_v61 }
 0x5bd   :  { %7315 = vmatprep.mubr.msk.bf16.mxu1 %vm12648_vm6, %v10958_v51  ;;  %vm12663_vm6 = vmmov %vm12582_vm0 }
 0x5c4   :  { %5893 = vmatmul.mubr.bf16.gmra.mrb[104].mxu1 %v10963_v53 }
 0x5c5   :  { %7316 = vmatprep.mubr.msk.bf16.mxu1 %vm12649_vm8, %v10968_v31  ;;  %vm12664_vm8 = vmmov %vm12582_vm0 }
 0x5cc   :  { %5901 = vmatmul.mubr.bf16.gmra.mrb[108].mxu1 %v10973_v20 }
 0x5cd   :  { %7317 = vmatprep.mubr.msk.bf16.mxu1 %vm12650_vm15, %v10978_v62  ;;  %vm12665_vm15 = vmmov %vm12582_vm0 }
 0x5d4   :  { %5909 = vmatmul.mubr.bf16.gmra.mrb[112].mxu1 %v10983_v49 }
 0x5d5   :  { %7318 = vmatprep.mubr.msk.bf16.mxu1 %vm12651_vm9, %v10988_v45  ;;  %vm12666_vm9 = vmmov %vm12582_vm0 }
 0x5dc   :  { %5917 = vmatmul.mubr.bf16.gmra.mrb[116].mxu1 %v10993_v38 }
 0x5dd   :  { %7319 = vmatprep.mubr.msk.bf16.mxu1 %vm12652_vm1, %v10998_v19  ;;  %vm12667_vm1 = vmmov %vm12582_vm0 }
 0x5e4   :  { %5925 = vmatmul.mubr.bf16.gmra.mrb[120].mxu1 %v11003_v52 }
 0x5e5   :  { %7320 = vmatprep.mubr.msk.bf16.mxu1 %vm12653_vm12, %v11008_v36  ;;  %vm12668_vm12 = vmmov %vm12582_vm0 }
 0x5ec   :  { %5933 = vmatmul.mubr.bf16.gmra.mrb[124].mxu1 %v11013_v54 }
 0x5ed   :  { %7321 = vmatprep.mubr.msk.bf16.mxu1 %vm12654_vm7, %v10879_v40  ;;  %v6028_v40 = vld [vmem:[#allocation2 + $0x98] sm:$0xff]  ;;  %vm12669_vm7 = vmmov %vm12582_vm0 }
 0x5f4   :  { %5941 = vmatmul.mubr.bf16.gmra.mrb[128].mxu1 %v11179_v1 }
 0x5f5   :  { %7358 = vmatprep.mubr.msk.bf16.mxu1 %vm12655_vm10, %v11022_v22  ;;  %v6027_v22 = vld [vmem:[#allocation2 + $0x90] sm:$0xff]  ;;  %vm12670_vm10 = vmmov %vm12582_vm0 }
 0x5fc   :  { %6308 = vmatmul.mubr.bf16.vlgmr.msra.gmra.mrb[0].mxu1 %v11034_v56  ;;  %v6030_v56 = vld [vmem:[#allocation2 + $0xa8] sm:$0xff] }
 0x5fd   :  { %7359 = vmatprep.mubr.msk.bf16.mxu1 %vm12656_vm5, %v11037_v6  ;;  %v6029_v6 = vld [vmem:[#allocation2 + $0xa0] sm:$0xff]  ;;  %vm12671_vm5 = vmmov %vm12582_vm0 }
 0x604   :  { %6316 = vmatmul.mubr.bf16.gmra.mrb[4].mxu1 %v11049_v9  ;;  %v6032_v9 = vld [vmem:[#allocation2 + $0xb8] sm:$0xff] }
 0x605   :  { %7360 = vmatprep.mubr.msk.bf16.mxu1 %vm12657_vm2, %v11052_v63  ;;  %v6031_v63 = vld [vmem:[#allocation2 + $0xb0] sm:$0xff]  ;;  %vm12672_vm2 = vmmov %vm12582_vm0 }
 0x60c   :  { %6324 = vmatmul.mubr.bf16.gmra.mrb[8].mxu1 %v11064_v42  ;;  %v6034_v42 = vld [vmem:[#allocation2 + $0xc8] sm:$0xff] }
 0x60d   :  { %7361 = vmatprep.mubr.msk.bf16.mxu1 %vm12582_vm0, %v11067_v58 }
 0x614   :  { %6332 = vmatmul.mubr.bf16.gmra.mrb[12].mxu1 %v11076_v23 }
 0x615   :  { %7362 = vmatprep.mubr.msk.bf16.mxu1 %vm12658_vm14, %v11079_v30  ;;  %vm12673_vm14 = vmmov %vm12582_vm0 }
 0x61c   :  { %6340 = vmatmul.mubr.bf16.gmra.mrb[16].mxu1 %v6021_v33 }
 0x61d   :  { %7363 = vmatprep.mubr.msk.bf16.mxu1 %vm12659_vm13, %v6024_v28  ;;  %vm12674_vm13 = vmmov %vm12582_vm0 }
 0x624   :  { %6348 = vmatmul.mubr.bf16.gmra.mrb[20].mxu1 %v6023_v7 }
 0x625   :  { %7364 = vmatprep.mubr.msk.bf16.mxu1 %vm12660_vm3, %v6026_v47  ;;  %vm12675_vm3 = vmmov %vm12582_vm0 }
 0x62c   :  { %6356 = vmatmul.mubr.bf16.gmra.mrb[24].mxu1 %v6025_v4  ;;  %v6704_v4 = vld [vmem:[%s11782_s0 + $0x30] sm:$0xff] }
 0x62d   :  { %7365 = vmatprep.mubr.msk.bf16.mxu1 %vm12661_vm4, %v6028_v40  ;;  %vm12676_vm4 = vmmov %vm12582_vm0 }
 0x634   :  { %6364 = vmatmul.mubr.bf16.gmra.mrb[28].mxu1 %v6027_v22 }
 0x635   :  { %7366 = vmatprep.mubr.msk.bf16.mxu1 %vm12662_vm11, %v6030_v56  ;;  %vm12677_vm11 = vmmov %vm12582_vm0  ;;  %v6705_v56 = vld [vmem:[%s11782_s0 + $0x38] sm:$0xff] }
 0x63c   :  { %6372 = vmatmul.mubr.bf16.gmra.mrb[32].mxu1 %v6029_v6 }
 0x63d   :  { %7367 = vmatprep.mubr.msk.bf16.mxu1 %vm12663_vm6, %v6032_v9  ;;  %vm12678_vm6 = vmmov %vm12582_vm0 }
 0x644   :  { %6380 = vmatmul.mubr.bf16.gmra.mrb[36].mxu1 %v6031_v63  ;;  %v6076_v63 = vld [vmem:[#allocation2 + $0x218] sm:$0xff] }
 0x645   :  { %7368 = vmatprep.mubr.msk.bf16.mxu1 %vm12664_vm8, %v6034_v42  ;;  %vm12679_vm8 = vmmov %vm12582_vm0 }
 0x647   :  { %v5816_v58 = vpop.f32.mrb[132].mxu1 }
 0x648   :  { %v5817_v23 = vpop.f32.mrb[133].mxu1 }
 0x649   :  { %v5818_v30 = vpop.f32.mrb[134].mxu1 }
 0x64a   :  { %v5819_v39 = vpop.f32.mrb[135].mxu1 }
 0x64c   :  { %6388 = vmatmul.mubr.bf16.gmra.mrb[40].mxu1 %v6033_v35 }
 0x64d   :  { %7369 = vmatprep.mubr.msk.bf16.mxu1 %vm12665_vm15, %v6036_v26  ;;  %vm12680_vm15 = vmmov %vm12582_vm0  ;;  %v6706_v26 = vld [vmem:[%s11782_s0 + $0x40] sm:$0xff] }
 0x654   :  { %6396 = vmatmul.mubr.bf16.gmra.mrb[44].mxu1 %v10751_v5  ;;  %v11254_v5 = vld [vmem:[%s11786_s4] ss:$0 sm:$0xff] }
 0x655   :  { %7370 = vmatprep.mubr.msk.bf16.mxu1 %vm12666_vm9, %v10756_v55  ;;  %vm12681_vm9 = vmmov %vm12582_vm0 }
 0x65c   :  { %6404 = vmatmul.mubr.bf16.gmra.mrb[48].mxu1 %v10773_v8 }
 0x65d   :  { %7371 = vmatprep.mubr.msk.bf16.mxu1 %vm12667_vm1, %v10778_v2  ;;  %vm12682_vm1 = vmmov %vm12582_vm0 }
 0x664   :  { %6412 = vmatmul.mubr.bf16.gmra.mrb[52].mxu1 %v10795_v11  ;;  %v6698_v11 = vld [vmem:[%s11782_s0] sm:$0xff] }
 0x665   :  { %7372 = vmatprep.mubr.msk.bf16.mxu1 %vm12668_vm12, %v11121_v13  ;;  %vm12683_vm12 = vmmov %vm12582_vm0 }
 0x66c   :  { %6420 = vmatmul.mubr.bf16.gmra.mrb[56].mxu1 %v10818_v14 }
 0x66d   :  { %7373 = vmatprep.mubr.msk.bf16.mxu1 %vm12669_vm7, %v10821_v48  ;;  %vm12684_vm7 = vmmov %vm12582_vm0 }
 0x674   :  { %6428 = vmatmul.mubr.bf16.gmra.mrb[60].mxu1 %v10838_v29 }
 0x675   :  { %7374 = vmatprep.mubr.msk.bf16.mxu1 %vm12670_vm10, %v10841_v59  ;;  %vm12685_vm10 = vmmov %vm12582_vm0 }
 0x67c   :  { %6436 = vmatmul.mubr.bf16.gmra.mrb[136].mxu1 %v10859_v24  ;;  %v6699_v24 = vld [vmem:[%s11782_s0 + $0x8] sm:$0xff] }
 0x67d   :  { %7375 = vmatprep.mubr.msk.bf16.mxu1 %vm12671_vm5, %v10866_v12  ;;  %vm12686_vm5 = vmmov %vm12582_vm0 }
 0x684   :  { %6442 = vmatmul.mubr.bf16.gmra.mrb[68].mxu1 %v10883_v21 }
 0x685   :  { %7376 = vmatprep.mubr.msk.bf16.mxu1 %vm12672_vm2, %v10888_v44  ;;  %vm12687_vm2 = vmmov %vm12582_vm0 }
 0x68c   :  { %6450 = vmatmul.mubr.bf16.gmra.mrb[72].mxu1 %v10893_v27 }
 0x68d   :  { %7377 = vmatprep.mubr.msk.bf16.mxu1 %vm12582_vm0, %v10898_v50 }
 0x694   :  { %6458 = vmatmul.mubr.bf16.gmra.mrb[76].mxu1 %v10903_v10 }
 0x695   :  { %7378 = vmatprep.mubr.msk.bf16.mxu1 %vm12673_vm14, %v10908_v18  ;;  %vm12688_vm14 = vmmov %vm12582_vm0 }
 0x69c   :  { %6466 = vmatmul.mubr.bf16.gmra.mrb[80].mxu1 %v10913_v34 }
 0x69d   :  { %7379 = vmatprep.mubr.msk.bf16.mxu1 %vm12674_vm13, %v10918_v43  ;;  %v6700_v43 = vld [vmem:[%s11782_s0 + $0x10] sm:$0xff]  ;;  %vm12689_vm13 = vmmov %vm12582_vm0 }
 0x6a4   :  { %6474 = vmatmul.mubr.bf16.gmra.mrb[84].mxu1 %v10923_v46 }
 0x6a5   :  { %7380 = vmatprep.mubr.msk.bf16.mxu1 %vm12675_vm3, %v10928_v3  ;;  %vm12690_vm3 = vmmov %vm12582_vm0 }
 0x6ac   :  { %6482 = vmatmul.mubr.bf16.gmra.mrb[88].mxu1 %v10933_v37 }
 0x6ad   :  { %7381 = vmatprep.mubr.msk.bf16.mxu1 %vm12676_vm4, %v10938_v0  ;;  %vm12691_vm4 = vmmov %vm12582_vm0 }
 0x6b4   :  { %6490 = vmatmul.mubr.bf16.gmra.mrb[92].mxu1 %v10943_v15  ;;  %v6701_v15 = vld [vmem:[%s11782_s0 + $0x18] sm:$0xff] }
 0x6b5   :  { %7382 = vmatprep.mubr.msk.bf16.mxu1 %vm12677_vm11, %v10948_v25  ;;  %vm12692_vm11 = vmmov %vm12582_vm0 }
 0x6bc   :  { %6498 = vmatmul.mubr.bf16.gmra.mrb[96].mxu1 %v10953_v61 }
 0x6bd   :  { %7383 = vmatprep.mubr.msk.bf16.mxu1 %vm12678_vm6, %v10958_v51  ;;  %vm12693_vm6 = vmmov %vm12582_vm0 }
 0x6c4   :  { %6506 = vmatmul.mubr.bf16.gmra.mrb[100].mxu1 %v10963_v53 }
 0x6c5   :  { %7384 = vmatprep.mubr.msk.bf16.mxu1 %vm12679_vm8, %v10968_v31  ;;  %vm12694_vm8 = vmmov %vm12582_vm0 }
 0x6cc   :  { %6514 = vmatmul.mubr.bf16.gmra.mrb[104].mxu1 %v10973_v20 }
 0x6cd   :  { %7385 = vmatprep.mubr.msk.bf16.mxu1 %vm12680_vm15, %v10978_v62  ;;  %vm12695_vm15 = vmmov %vm12582_vm0 }
 0x6cf   :  { %v6309_v55 = vpop.f32.mrb[0].mxu1 }
 0x6d0   :  { %v7519_v8 = vadd.f32 %v11254_v5, %v6309_v55  ;;  %v6311_v2 = vpop.f32.mrb[1].mxu1 }
 0x6d1   :  { %v6312_v14 = vpop.f32.mrb[2].mxu1 }
 0x6d2   :  { %v6634_v48 = vmax.f32 %v7519_v8, 0.0  ;;  %v7520_v29 = vadd.f32 %v11254_v5, %v6312_v14  ;;  %v6314_v59 = vpop.f32.mrb[3].mxu1  ;;  %v6707_v14 = vld [vmem:[%s11782_s0 + $0x48] sm:$0xff] }
 0x6d4   :  { %v6730_v12 = vadd.f32 %v6698_v11, %v6634_v48  ;;  %v6635_v21 = vmax.f32 %v7520_v29, 0.0  ;;  %6522 = vmatmul.mubr.bf16.gmra.mrb[108].mxu1 %v10983_v49  ;;  %v6078_v11 = vld [vmem:[#allocation2 + $0x228] sm:$0xff] }
 0x6d5   :  { %7386 = vmatprep.mubr.msk.bf16.mxu1 %vm12681_vm9, %v10988_v45  ;;  %v6702_v45 = vld [vmem:[%s11782_s0 + $0x20] sm:$0xff]  ;;  %vm12696_vm9 = vmmov %vm12582_vm0 }
 0x6d6   :  { %v6762_v44 = vmax.f32 %v6730_v12, 0.0  ;;  %v6731_v27 = vadd.f32 %v6699_v24, %v6635_v21 }
 0x6d7   :  { %v6317_v50 = vpop.f32.mrb[4].mxu1 }
 0x6d8   :  { %6794 = vst.msk [vmem:[%s11787_s5] sm:$0xff] %vm12682_vm1, %v6762_v44  ;;  %v6763_v10 = vmax.f32 %v6731_v27, 0.0  ;;  %v7521_v18 = vadd.f32 %v11254_v5, %v6317_v50  ;;  %v6319_v34 = vpop.f32.mrb[5].mxu1  ;;  %v6708_v50 = vld [vmem:[%s11782_s0 + $0x50] sm:$0xff]  ;;  %vm12697_vm1 = vmmov %vm12582_vm0 }
 0x6d9   :  { %v6320_v46 = vpop.f32.mrb[6].mxu1 }
 0x6da   :  { %6795 = vst.msk [vmem:[%s11787_s5 + $0x8] sm:$0xff] %vm12683_vm12, %v6763_v10  ;;  %v6636_v3 = vmax.f32 %v7521_v18, 0.0  ;;  %v7522_v37 = vadd.f32 %v11254_v5, %v6320_v46  ;;  %v6322_v0 = vpop.f32.mrb[7].mxu1  ;;  %v6077_v46 = vld [vmem:[#allocation2 + $0x220] sm:$0xff]  ;;  %vm12698_vm12 = vmmov %vm12582_vm0 }
 0x6dc   :  { %v6732_v25 = vadd.f32 %v6700_v43, %v6636_v3  ;;  %v6637_v61 = vmax.f32 %v7522_v37, 0.0  ;;  %6530 = vmatmul.mubr.bf16.gmra.mrb[112].mxu1 %v10993_v38  ;;  %v6709_v43 = vld [vmem:[%s11782_s0 + $0x58] sm:$0xff] }
 0x6dd   :  { %7387 = vmatprep.mubr.msk.bf16.mxu1 %vm12684_vm7, %v10998_v19  ;;  %vm12699_vm7 = vmmov %vm12582_vm0 }
 0x6de   :  { %v6764_v51 = vmax.f32 %v6732_v25, 0.0  ;;  %v6733_v53 = vadd.f32 %v6701_v15, %v6637_v61 }
 0x6df   :  { %v6325_v31 = vpop.f32.mrb[8].mxu1 }
 0x6e0   :  { %6796 = vst.msk [vmem:[%s11787_s5 + $0x10] sm:$0xff] %vm12685_vm10, %v6764_v51  ;;  %v6765_v20 = vmax.f32 %v6733_v53, 0.0  ;;  %v7523_v62 = vadd.f32 %v11254_v5, %v6325_v31  ;;  %v6327_v49 = vpop.f32.mrb[9].mxu1  ;;  %v6710_v31 = vld [vmem:[%s11782_s0 + $0x60] sm:$0xff]  ;;  %vm12700_vm10 = vmmov %vm12582_vm0 }
 0x6e1   :  { %v6328_v38 = vpop.f32.mrb[10].mxu1 }
 0x6e2   :  { %6797 = vst.msk [vmem:[%s11787_s5 + $0x18] sm:$0xff] %vm12686_vm5, %v6765_v20  ;;  %v6638_v19 = vmax.f32 %v7523_v62, 0.0  ;;  %v7524_v16 = vadd.f32 %v11254_v5, %v6328_v38  ;;  %v6330_v60 = vpop.f32.mrb[11].mxu1  ;;  %v6711_v38 = vld [vmem:[%s11782_s0 + $0x68] sm:$0xff]  ;;  %vm12701_vm5 = vmmov %vm12582_vm0 }
 0x6e4   :  { %v6734_v17 = vadd.f32 %v6702_v45, %v6638_v19  ;;  %v6639_v41 = vmax.f32 %v7524_v16, 0.0  ;;  %6538 = vmatmul.mubr.bf16.gmra.mrb[116].mxu1 %v11003_v52 }
 0x6e5   :  { %7388 = vmatprep.mubr.msk.bf16.mxu1 %vm12687_vm2, %v11008_v36  ;;  %vm12702_vm2 = vmmov %vm12582_vm0 }
 0x6e6   :  { %v6766_v13 = vmax.f32 %v6734_v17, 0.0  ;;  %v6735_v57 = vadd.f32 %v6703_v32, %v6639_v41 }
 0x6e7   :  { %v6333_v33 = vpop.f32.mrb[12].mxu1 }
 0x6e8   :  { %6798 = vst.msk [vmem:[%s11787_s5 + $0x20] sm:$0xff] %vm12582_vm0, %v6766_v13  ;;  %v6767_v28 = vmax.f32 %v6735_v57, 0.0  ;;  %v7525_v7 = vadd.f32 %v11254_v5, %v6333_v33  ;;  %v6335_v47 = vpop.f32.mrb[13].mxu1  ;;  %v6712_v33 = vld [vmem:[%s11782_s0 + $0x70] sm:$0xff] }
 0x6e9   :  { %v6336_v52 = vpop.f32.mrb[14].mxu1 }
 0x6ea   :  { %6799 = vst.msk [vmem:[%s11787_s5 + $0x28] sm:$0xff] %vm12688_vm14, %v6767_v28  ;;  %v6640_v36 = vmax.f32 %v7525_v7, 0.0  ;;  %v7526_v40 = vadd.f32 %v11254_v5, %v6336_v52  ;;  %v6338_v22 = vpop.f32.mrb[15].mxu1  ;;  %v6713_v52 = vld [vmem:[%s11782_s0 + $0x78] sm:$0xff]  ;;  %vm12703_vm14 = vmmov %vm12582_vm0 }
 0x6ec   :  { %v6736_v6 = vadd.f32 %v6704_v4, %v6640_v36  ;;  %v6641_v9 = vmax.f32 %v7526_v40, 0.0  ;;  %6546 = vmatmul.mubr.bf16.gmra.mrb[120].mxu1 %v11013_v54 }
 0x6ed   :  { %7389 = vmatprep.mubr.msk.bf16.mxu1 %vm12689_vm13, %v6076_v63  ;;  %vm12704_vm13 = vmmov %vm12582_vm0 }
 0x6ee   :  { %v6768_v42 = vmax.f32 %v6736_v6, 0.0  ;;  %v6737_v58 = vadd.f32 %v6705_v56, %v6641_v9 }
 0x6ef   :  { %v6341_v23 = vpop.f32.mrb[16].mxu1 }
 0x6f0   :  { %6800 = vst.msk [vmem:[%s11787_s5 + $0x30] sm:$0xff] %vm12690_vm3, %v6768_v42  ;;  %v6769_v30 = vmax.f32 %v6737_v58, 0.0  ;;  %v7527_v39 = vadd.f32 %v11254_v5, %v6341_v23  ;;  %v6343_v35 = vpop.f32.mrb[17].mxu1  ;;  %v6714_v58 = vld [vmem:[%s11782_s0 + $0x80] sm:$0xff]  ;;  %vm12705_vm3 = vmmov %vm12582_vm0 }
 0x6f1   :  { %v6344_v54 = vpop.f32.mrb[18].mxu1 }
 0x6f2   :  { %6801 = vst.msk [vmem:[%s11787_s5 + $0x38] sm:$0xff] %vm12691_vm4, %v6769_v30  ;;  %v6642_v55 = vmax.f32 %v7527_v39, 0.0  ;;  %v7528_v8 = vadd.f32 %v11254_v5, %v6344_v54  ;;  %v6346_v2 = vpop.f32.mrb[19].mxu1  ;;  %vm12706_vm4 = vmmov %vm12582_vm0 }
 0x6f4   :  { %v6738_v48 = vadd.f32 %v6706_v26, %v6642_v55  ;;  %v6643_v29 = vmax.f32 %v7528_v8, 0.0  ;;  %6554 = vmatmul.mubr.bf16.gmra.mrb[124].mxu1 %v11179_v1  ;;  %v6715_v26 = vld [vmem:[%s11782_s0 + $0x88] sm:$0xff] }
 0x6f5   :  { %7390 = vmatprep.mubr.msk.bf16.mxu1 %vm12692_vm11, %v6078_v11  ;;  %vm12707_vm11 = vmmov %vm12582_vm0 }
 0x6f6   :  { %v6770_v59 = vmax.f32 %v6738_v48, 0.0  ;;  %v6739_v24 = vadd.f32 %v6707_v14, %v6643_v29 }
 0x6f7   :  { %v6349_v12 = vpop.f32.mrb[20].mxu1 }
 0x6f8   :  { %6802 = vst.msk [vmem:[%s11787_s5 + $0x40] sm:$0xff] %vm12693_vm6, %v6770_v59  ;;  %v6771_v21 = vmax.f32 %v6739_v24, 0.0  ;;  %v7529_v44 = vadd.f32 %v11254_v5, %v6349_v12  ;;  %v6351_v27 = vpop.f32.mrb[21].mxu1  ;;  %v6716_v59 = vld [vmem:[%s11782_s0 + $0x90] sm:$0xff]  ;;  %vm12708_vm6 = vmmov %vm12582_vm0 }
 0x6f9   :  { %v6352_v10 = vpop.f32.mrb[22].mxu1  ;;  %v6717_v27 = vld [vmem:[%s11782_s0 + $0x98] sm:$0xff] }
 0x6fa   :  { %6803 = vst.msk [vmem:[%s11787_s5 + $0x48] sm:$0xff] %vm12694_vm8, %v6771_v21  ;;  %v6644_v1 = vmax.f32 %v7529_v44, 0.0  ;;  %v7530_v18 = vadd.f32 %v11254_v5, %v6352_v10  ;;  %v6354_v34 = vpop.f32.mrb[23].mxu1  ;;  %vm12709_vm8 = vmmov %vm12582_vm0 }
 0x6fc   :  { %v6740_v3 = vadd.f32 %v6708_v50, %v6644_v1  ;;  %v6645_v37 = vmax.f32 %v7530_v18, 0.0  ;;  %6562 = vmatmul.mubr.bf16.gmra.mrb[128].mxu1 %v6077_v46 }
 0x6fe   :  { %v6772_v0 = vmax.f32 %v6740_v3, 0.0  ;;  %v6741_v15 = vadd.f32 %v6709_v43, %v6645_v37  ;;  %v6718_v37 = vld [vmem:[%s11782_s0 + $0xa0] sm:$0xff] }
 0x6ff   :  { %v6357_v25 = vpop.f32.mrb[24].mxu1 }
 0x700   :  { %6804 = vst.msk [vmem:[%s11787_s5 + $0x50] sm:$0xff] %vm12695_vm15, %v6772_v0  ;;  %v6773_v61 = vmax.f32 %v6741_v15, 0.0  ;;  %v7531_v51 = vadd.f32 %v11254_v5, %v6357_v25  ;;  %v6359_v53 = vpop.f32.mrb[25].mxu1  ;;  %vm12710_vm15 = vmmov %vm12582_vm0 }
 0x701   :  { %v6360_v20 = vpop.f32.mrb[26].mxu1 }
 0x702   :  { %6805 = vst.msk [vmem:[%s11787_s5 + $0x58] sm:$0xff] %vm12696_vm9, %v6773_v61  ;;  %v6646_v62 = vmax.f32 %v7531_v51, 0.0  ;;  %v7532_v49 = vadd.f32 %v11254_v5, %v6360_v20  ;;  %v6362_v45 = vpop.f32.mrb[27].mxu1  ;;  %v6719_v51 = vld [vmem:[%s11782_s0 + $0xa8] sm:$0xff]  ;;  %vm12711_vm9 = vmmov %vm12582_vm0 }
 0x704   :  { %v6742_v19 = vadd.f32 %v6710_v31, %v6646_v62  ;;  %v6647_v16 = vmax.f32 %v7532_v49, 0.0 }
 0x706   :  { %v6774_v60 = vmax.f32 %v6742_v19, 0.0  ;;  %v6743_v32 = vadd.f32 %v6711_v38, %v6647_v16  ;;  %v6720_v16 = vld [vmem:[%s11782_s0 + $0xb0] sm:$0xff] }
 0x707   :  { %v6365_v17 = vpop.f32.mrb[28].mxu1 }
 0x708   :  { %6806 = vst.msk [vmem:[%s11787_s5 + $0x60] sm:$0xff] %vm12697_vm1, %v6774_v60  ;;  %v6775_v41 = vmax.f32 %v6743_v32, 0.0  ;;  %v7533_v13 = vadd.f32 %v11254_v5, %v6365_v17  ;;  %v6367_v57 = vpop.f32.mrb[29].mxu1  ;;  %vm12712_vm1 = vmmov %vm12582_vm0 }
 0x709   :  { %v6368_v28 = vpop.f32.mrb[30].mxu1 }
 0x70a   :  { %6807 = vst.msk [vmem:[%s11787_s5 + $0x68] sm:$0xff] %vm12698_vm12, %v6775_v41  ;;  %v6648_v7 = vmax.f32 %v7533_v13, 0.0  ;;  %v7534_v47 = vadd.f32 %v11254_v5, %v6368_v28  ;;  %v6370_v4 = vpop.f32.mrb[31].mxu1  ;;  %v6721_v13 = vld [vmem:[%s11782_s0 + $0xb8] sm:$0xff]  ;;  %vm12713_vm12 = vmmov %vm12582_vm0 }
 0x70c   :  { %v6744_v36 = vadd.f32 %v6712_v33, %v6648_v7  ;;  %v6649_v40 = vmax.f32 %v7534_v47, 0.0 }
 0x70e   :  { %v6776_v22 = vmax.f32 %v6744_v36, 0.0  ;;  %v6745_v56 = vadd.f32 %v6713_v52, %v6649_v40  ;;  %v6722_v40 = vld [vmem:[%s11782_s0 + $0xc0] sm:$0xff] }
 0x70f   :  { %v6373_v6 = vpop.f32.mrb[32].mxu1 }
 0x710   :  { %6808 = vst.msk [vmem:[%s11787_s5 + $0x70] sm:$0xff] %vm12699_vm7, %v6776_v22  ;;  %v6777_v9 = vmax.f32 %v6745_v56, 0.0  ;;  %v7535_v63 = vadd.f32 %v11254_v5, %v6373_v6  ;;  %v6375_v42 = vpop.f32.mrb[33].mxu1  ;;  %vm12714_vm7 = vmmov %vm12582_vm0 }
 0x711   :  { %v6376_v23 = vpop.f32.mrb[34].mxu1 }
 0x712   :  { %6809 = vst.msk [vmem:[%s11787_s5 + $0x78] sm:$0xff] %vm12700_vm10, %v6777_v9  ;;  %v6650_v30 = vmax.f32 %v7535_v63, 0.0  ;;  %v7536_v39 = vadd.f32 %v11254_v5, %v6376_v23  ;;  %v6378_v35 = vpop.f32.mrb[35].mxu1  ;;  %v6723_v63 = vld [vmem:[%s11782_s0 + $0xc8] sm:$0xff]  ;;  %vm12715_vm10 = vmmov %vm12582_vm0 }
 0x714   :  { %v6746_v54 = vadd.f32 %v6714_v58, %v6650_v30  ;;  %v6651_v55 = vmax.f32 %v7536_v39, 0.0 }
 0x716   :  { %v6778_v8 = vmax.f32 %v6746_v54, 0.0  ;;  %v6747_v2 = vadd.f32 %v6715_v26, %v6651_v55  ;;  %v6724_v55 = vld [vmem:[%s11782_s0 + $0xd0] sm:$0xff] }
 0x717   :  { %v6381_v11 = vpop.f32.mrb[36].mxu1 }
 0x718   :  { %6810 = vst.msk [vmem:[%s11787_s5 + $0x80] sm:$0xff] %vm12701_vm5, %v6778_v8  ;;  %v6779_v14 = vmax.f32 %v6747_v2, 0.0  ;;  %v7537_v48 = vadd.f32 %v11254_v5, %v6381_v11  ;;  %v6383_v29 = vpop.f32.mrb[37].mxu1  ;;  %vm12716_vm5 = vmmov %vm12582_vm0 }
 0x719   :  { %v6384_v24 = vpop.f32.mrb[38].mxu1 }
 0x71a   :  { %6811 = vst.msk [vmem:[%s11787_s5 + $0x88] sm:$0xff] %vm12702_vm2, %v6779_v14  ;;  %v6652_v12 = vmax.f32 %v7537_v48, 0.0  ;;  %v7538_v21 = vadd.f32 %v11254_v5, %v6384_v24  ;;  %v6386_v44 = vpop.f32.mrb[39].mxu1  ;;  %v6725_v48 = vld [vmem:[%s11782_s0 + $0xd8] sm:$0xff]  ;;  %vm12717_vm2 = vmmov %vm12582_vm0 }
 0x71c   :  { %v6748_v50 = vadd.f32 %v6716_v59, %v6652_v12  ;;  %v6653_v10 = vmax.f32 %v7538_v21, 0.0 }
 0x71e   :  { %v6780_v1 = vmax.f32 %v6748_v50, 0.0  ;;  %v6749_v18 = vadd.f32 %v6717_v27, %v6653_v10  ;;  %v6726_v10 = vld [vmem:[%s11782_s0 + $0xe0] sm:$0xff] }
 0x71f   :  { %v6389_v34 = vpop.f32.mrb[40].mxu1 }
 0x720   :  { %6812 = vst.msk [vmem:[%s11787_s5 + $0x90] sm:$0xff] %vm12582_vm0, %v6780_v1  ;;  %v6781_v43 = vmax.f32 %v6749_v18, 0.0  ;;  %v7539_v46 = vadd.f32 %v11254_v5, %v6389_v34  ;;  %v6391_v3 = vpop.f32.mrb[41].mxu1 }
 0x721   :  { %v6392_v0 = vpop.f32.mrb[42].mxu1 }
 0x722   :  { %6813 = vst.msk [vmem:[%s11787_s5 + $0x98] sm:$0xff] %vm12703_vm14, %v6781_v43  ;;  %v6654_v15 = vmax.f32 %v7539_v46, 0.0  ;;  %v7540_v25 = vadd.f32 %v11254_v5, %v6392_v0  ;;  %v6394_v61 = vpop.f32.mrb[43].mxu1  ;;  %v6727_v46 = vld [vmem:[%s11782_s0 + $0xe8] sm:$0xff]  ;;  %vm12718_vm14 = vmmov %vm12582_vm0 }
 0x724   :  { %v6750_v53 = vadd.f32 %v6718_v37, %v6654_v15  ;;  %v6655_v31 = vmax.f32 %v7540_v25, 0.0 }
 0x726   :  { %v6782_v20 = vmax.f32 %v6750_v53, 0.0  ;;  %v6751_v62 = vadd.f32 %v6719_v51, %v6655_v31  ;;  %v6728_v31 = vld [vmem:[%s11782_s0 + $0xf0] sm:$0xff] }
 0x727   :  { %v6397_v49 = vpop.f32.mrb[44].mxu1 }
 0x728   :  { %6814 = vst.msk [vmem:[%s11787_s5 + $0xa0] sm:$0xff] %vm12704_vm13, %v6782_v20  ;;  %v6783_v45 = vmax.f32 %v6751_v62, 0.0  ;;  %v7541_v38 = vadd.f32 %v11254_v5, %v6397_v49  ;;  %v6399_v19 = vpop.f32.mrb[45].mxu1  ;;  %vm12719_vm13 = vmmov %vm12582_vm0 }
 0x729   :  { %v6400_v60 = vpop.f32.mrb[46].mxu1 }
 0x72a   :  { %6815 = vst.msk [vmem:[%s11787_s5 + $0xa8] sm:$0xff] %vm12705_vm3, %v6783_v45  ;;  %v6656_v32 = vmax.f32 %v7541_v38, 0.0  ;;  %v7542_v17 = vadd.f32 %v11254_v5, %v6400_v60  ;;  %v6402_v41 = vpop.f32.mrb[47].mxu1  ;;  %v6729_v38 = vld [vmem:[%s11782_s0 + $0xf8] sm:$0xff]  ;;  %vm12720_vm3 = vmmov %vm12582_vm0 }
 0x72c   :  { %v6752_v57 = vadd.f32 %v6720_v16, %v6656_v32  ;;  %v6657_v33 = vmax.f32 %v7542_v17, 0.0 }
 0x72e   :  { %v6784_v28 = vmax.f32 %v6752_v57, 0.0  ;;  %v6753_v7 = vadd.f32 %v6721_v13, %v6657_v33 }
 0x72f   :  { %v6405_v47 = vpop.f32.mrb[48].mxu1 }
 0x730   :  { %6816 = vst.msk [vmem:[%s11787_s5 + $0xb0] sm:$0xff] %vm12706_vm4, %v6784_v28  ;;  %v6785_v4 = vmax.f32 %v6753_v7, 0.0  ;;  %v7543_v52 = vadd.f32 %v11254_v5, %v6405_v47  ;;  %v6407_v36 = vpop.f32.mrb[49].mxu1  ;;  %vm12721_vm4 = vmmov %vm12582_vm0 }
 0x731   :  { %v6408_v22 = vpop.f32.mrb[50].mxu1 }
 0x732   :  { %6817 = vst.msk [vmem:[%s11787_s5 + $0xb8] sm:$0xff] %vm12707_vm11, %v6785_v4  ;;  %v6658_v56 = vmax.f32 %v7543_v52, 0.0  ;;  %v7544_v6 = vadd.f32 %v11254_v5, %v6408_v22  ;;  %v6410_v9 = vpop.f32.mrb[51].mxu1  ;;  %v7391_v4 = vld [vmem:[%s11782_s0 + $0x100] sm:$0xff]  ;;  %vm12722_vm11 = vmmov %vm12582_vm0 }
 0x734   :  { %v6754_v42 = vadd.f32 %v6722_v40, %v6658_v56  ;;  %v6659_v58 = vmax.f32 %v7544_v6, 0.0  ;;  %v7392_v56 = vld [vmem:[%s11782_s0 + $0x108] sm:$0xff] }
 0x736   :  { %v6786_v23 = vmax.f32 %v6754_v42, 0.0  ;;  %v6755_v30 = vadd.f32 %v6723_v63, %v6659_v58 }
 0x737   :  { %v6413_v39 = vpop.f32.mrb[52].mxu1 }
 0x738   :  { %6818 = vst.msk [vmem:[%s11787_s5 + $0xc0] sm:$0xff] %vm12708_vm6, %v6786_v23  ;;  %v6787_v35 = vmax.f32 %v6755_v30, 0.0  ;;  %v7545_v26 = vadd.f32 %v11254_v5, %v6413_v39  ;;  %v6415_v54 = vpop.f32.mrb[53].mxu1  ;;  %vm12723_vm6 = vmmov %vm12582_vm0 }
 0x739   :  { %v6416_v8 = vpop.f32.mrb[54].mxu1 }
 0x73a   :  { %6819 = vst.msk [vmem:[%s11787_s5 + $0xc8] sm:$0xff] %vm12709_vm8, %v6787_v35  ;;  %v6660_v2 = vmax.f32 %v7545_v26, 0.0  ;;  %v7546_v11 = vadd.f32 %v11254_v5, %v6416_v8  ;;  %v6418_v14 = vpop.f32.mrb[55].mxu1  ;;  %v7393_v35 = vld [vmem:[%s11782_s0 + $0x110] sm:$0xff]  ;;  %vm12724_vm8 = vmmov %vm12582_vm0 }
 0x73c   :  { %v6756_v29 = vadd.f32 %v6724_v55, %v6660_v2  ;;  %v6661_v59 = vmax.f32 %v7546_v11, 0.0  ;;  %v7394_v2 = vld [vmem:[%s11782_s0 + $0x118] sm:$0xff] }
 0x73e   :  { %v6788_v24 = vmax.f32 %v6756_v29, 0.0  ;;  %v6757_v12 = vadd.f32 %v6725_v48, %v6661_v59 }
 0x73f   :  { %v6421_v21 = vpop.f32.mrb[56].mxu1 }
 0x740   :  { %6820 = vst.msk [vmem:[%s11787_s5 + $0xd0] sm:$0xff] %vm12710_vm15, %v6788_v24  ;;  %v6789_v44 = vmax.f32 %v6757_v12, 0.0  ;;  %v7547_v27 = vadd.f32 %v11254_v5, %v6421_v21  ;;  %v6423_v50 = vpop.f32.mrb[57].mxu1  ;;  %vm12725_vm15 = vmmov %vm12582_vm0 }
 0x741   :  { %v6424_v1 = vpop.f32.mrb[58].mxu1 }
 0x742   :  { %6821 = vst.msk [vmem:[%s11787_s5 + $0xd8] sm:$0xff] %vm12711_vm9, %v6789_v44  ;;  %v6662_v18 = vmax.f32 %v7547_v27, 0.0  ;;  %v7548_v34 = vadd.f32 %v11254_v5, %v6424_v1  ;;  %v6426_v43 = vpop.f32.mrb[59].mxu1  ;;  %v7395_v44 = vld [vmem:[%s11782_s0 + $0x120] sm:$0xff]  ;;  %vm12726_vm9 = vmmov %vm12582_vm0 }
 0x744   :  { %v6758_v3 = vadd.f32 %v6726_v10, %v6662_v18  ;;  %v6663_v37 = vmax.f32 %v7548_v34, 0.0  ;;  %v7396_v18 = vld [vmem:[%s11782_s0 + $0x128] sm:$0xff] }
 0x746   :  { %v6790_v0 = vmax.f32 %v6758_v3, 0.0  ;;  %v6759_v15 = vadd.f32 %v6727_v46, %v6663_v37 }
 0x747   :  { %v6429_v25 = vpop.f32.mrb[60].mxu1 }
 0x748   :  { %6822 = vst.msk [vmem:[%s11787_s5 + $0xe0] sm:$0xff] %vm12712_vm1, %v6790_v0  ;;  %v6791_v61 = vmax.f32 %v6759_v15, 0.0  ;;  %v7549_v51 = vadd.f32 %v11254_v5, %v6429_v25  ;;  %v6431_v53 = vpop.f32.mrb[61].mxu1  ;;  %vm12727_vm1 = vmmov %vm12582_vm0 }
 0x749   :  { %v6432_v20 = vpop.f32.mrb[62].mxu1 }
 0x74a   :  { %6823 = vst.msk [vmem:[%s11787_s5 + $0xe8] sm:$0xff] %vm12713_vm12, %v6791_v61  ;;  %v6664_v62 = vmax.f32 %v7549_v51, 0.0  ;;  %v7550_v49 = vadd.f32 %v11254_v5, %v6432_v20  ;;  %v6434_v45 = vpop.f32.mrb[63].mxu1  ;;  %v7397_v61 = vld [vmem:[%s11782_s0 + $0x130] sm:$0xff]  ;;  %vm12728_vm12 = vmmov %vm12582_vm0 }
 0x74c   :  { %v6760_v19 = vadd.f32 %v6728_v31, %v6664_v62  ;;  %v6665_v16 = vmax.f32 %v7550_v49, 0.0  ;;  %v7398_v62 = vld [vmem:[%s11782_s0 + $0x138] sm:$0xff] }
 0x74e   :  { %v6792_v60 = vmax.f32 %v6760_v19, 0.0  ;;  %v6761_v32 = vadd.f32 %v6729_v38, %v6665_v16 }
 0x74f   :  { %v6437_v17 = vpop.f32.mrb[136].mxu1 }
 0x750   :  { %6824 = vst.msk [vmem:[%s11787_s5 + $0xf0] sm:$0xff] %vm12714_vm7, %v6792_v60  ;;  %v6793_v41 = vmax.f32 %v6761_v32, 0.0  ;;  %v6438_v13 = vpop.f32.mrb[137].mxu1  ;;  %vm12729_vm7 = vmmov %vm12582_vm0 }
 0x751   :  { %v6439_v57 = vpop.f32.mrb[138].mxu1 }
 0x752   :  { %6825 = vst.msk [vmem:[%s11787_s5 + $0xf8] sm:$0xff] %vm12715_vm10, %v6793_v41  ;;  %v6440_v33 = vpop.f32.mrb[139].mxu1  ;;  %v7399_v41 = vld [vmem:[%s11782_s0 + $0x140] sm:$0xff]  ;;  %vm12730_vm10 = vmmov %vm12582_vm0 }
 0x757   :  { %v6443_v28 = vpop.f32.mrb[68].mxu1 }
 0x758   :  { %v7551_v7 = vadd.f32 %v11254_v5, %v6443_v28  ;;  %v6445_v47 = vpop.f32.mrb[69].mxu1 }
 0x759   :  { %v6446_v52 = vpop.f32.mrb[70].mxu1 }
 0x75a   :  { %v6666_v36 = vmax.f32 %v7551_v7, 0.0  ;;  %v7552_v40 = vadd.f32 %v11254_v5, %v6446_v52  ;;  %v6448_v22 = vpop.f32.mrb[71].mxu1  ;;  %v7400_v7 = vld [vmem:[%s11782_s0 + $0x148] sm:$0xff] }
 0x75c   :  { %v6858_v6 = vadd.f32 %v7391_v4, %v6666_v36  ;;  %v6667_v9 = vmax.f32 %v7552_v40, 0.0 }
 0x75e   :  { %v6890_v63 = vmax.f32 %v6858_v6, 0.0  ;;  %v6859_v42 = vadd.f32 %v7392_v56, %v6667_v9  ;;  %v7401_v9 = vld [vmem:[%s11782_s0 + $0x150] sm:$0xff] }
 0x75f   :  { %v6451_v58 = vpop.f32.mrb[72].mxu1 }
 0x760   :  { %7423 = vst.msk [vmem:[%s11787_s5 + $0x100] sm:$0xff] %vm12716_vm5, %v6890_v63  ;;  %v6891_v23 = vmax.f32 %v6859_v42, 0.0  ;;  %v7553_v30 = vadd.f32 %v11254_v5, %v6451_v58  ;;  %v6453_v39 = vpop.f32.mrb[73].mxu1  ;;  %vm12731_vm5 = vmmov %vm12582_vm0 }
 0x761   :  { %v6454_v26 = vpop.f32.mrb[74].mxu1 }
 0x762   :  { %7424 = vst.msk [vmem:[%s11787_s5 + $0x108] sm:$0xff] %vm12717_vm2, %v6891_v23  ;;  %v6668_v54 = vmax.f32 %v7553_v30, 0.0  ;;  %v7554_v55 = vadd.f32 %v11254_v5, %v6454_v26  ;;  %v6456_v8 = vpop.f32.mrb[75].mxu1  ;;  %v7402_v30 = vld [vmem:[%s11782_s0 + $0x158] sm:$0xff]  ;;  %vm12732_vm2 = vmmov %vm12582_vm0 }
 0x764   :  { %v6860_v11 = vadd.f32 %v7393_v35, %v6668_v54  ;;  %v6669_v14 = vmax.f32 %v7554_v55, 0.0 }
 0x766   :  { %v6892_v48 = vmax.f32 %v6860_v11, 0.0  ;;  %v6861_v29 = vadd.f32 %v7394_v2, %v6669_v14  ;;  %v7403_v14 = vld [vmem:[%s11782_s0 + $0x160] sm:$0xff] }
 0x767   :  { %v6459_v59 = vpop.f32.mrb[76].mxu1 }
 0x768   :  { %7425 = vst.msk [vmem:[%s11787_s5 + $0x110] sm:$0xff] %vm12582_vm0, %v6892_v48  ;;  %v6893_v24 = vmax.f32 %v6861_v29, 0.0  ;;  %v7555_v12 = vadd.f32 %v11254_v5, %v6459_v59  ;;  %v6461_v21 = vpop.f32.mrb[77].mxu1 }
 0x769   :  { %v6462_v27 = vpop.f32.mrb[78].mxu1 }
 0x76a   :  { %7426 = vst.msk [vmem:[%s11787_s5 + $0x118] sm:$0xff] %vm12718_vm14, %v6893_v24  ;;  %v6670_v50 = vmax.f32 %v7555_v12, 0.0  ;;  %v7556_v10 = vadd.f32 %v11254_v5, %v6462_v27  ;;  %v6464_v1 = vpop.f32.mrb[79].mxu1  ;;  %v7404_v12 = vld [vmem:[%s11782_s0 + $0x168] sm:$0xff]  ;;  %vm12733_vm14 = vmmov %vm12582_vm0 }
 0x76c   :  { %v6862_v34 = vadd.f32 %v7395_v44, %v6670_v50  ;;  %v6671_v43 = vmax.f32 %v7556_v10, 0.0 }
 0x76e   :  { %v6894_v46 = vmax.f32 %v6862_v34, 0.0  ;;  %v6863_v3 = vadd.f32 %v7396_v18, %v6671_v43  ;;  %v7405_v43 = vld [vmem:[%s11782_s0 + $0x170] sm:$0xff] }
 0x76f   :  { %v6467_v37 = vpop.f32.mrb[80].mxu1 }
 0x770   :  { %7427 = vst.msk [vmem:[%s11787_s5 + $0x120] sm:$0xff] %vm12719_vm13, %v6894_v46  ;;  %v6895_v0 = vmax.f32 %v6863_v3, 0.0  ;;  %v7557_v15 = vadd.f32 %v11254_v5, %v6467_v37  ;;  %v6469_v25 = vpop.f32.mrb[81].mxu1  ;;  %vm12734_vm13 = vmmov %vm12582_vm0 }
 0x771   :  { %v6470_v51 = vpop.f32.mrb[82].mxu1 }
 0x772   :  { %7428 = vst.msk [vmem:[%s11787_s5 + $0x128] sm:$0xff] %vm12720_vm3, %v6895_v0  ;;  %v6672_v53 = vmax.f32 %v7557_v15, 0.0  ;;  %v7558_v31 = vadd.f32 %v11254_v5, %v6470_v51  ;;  %v6472_v20 = vpop.f32.mrb[83].mxu1  ;;  %v7406_v15 = vld [vmem:[%s11782_s0 + $0x178] sm:$0xff]  ;;  %vm12735_vm3 = vmmov %vm12582_vm0 }
 0x774   :  { %v6864_v49 = vadd.f32 %v7397_v61, %v6672_v53  ;;  %v6673_v45 = vmax.f32 %v7558_v31, 0.0 }
 0x776   :  { %v6896_v38 = vmax.f32 %v6864_v49, 0.0  ;;  %v6865_v19 = vadd.f32 %v7398_v62, %v6673_v45  ;;  %v7407_v45 = vld [vmem:[%s11782_s0 + $0x180] sm:$0xff] }
 0x777   :  { %v6475_v16 = vpop.f32.mrb[84].mxu1 }
 0x778   :  { %7429 = vst.msk [vmem:[%s11787_s5 + $0x130] sm:$0xff] %vm12721_vm4, %v6896_v38  ;;  %v6897_v60 = vmax.f32 %v6865_v19, 0.0  ;;  %v7559_v32 = vadd.f32 %v11254_v5, %v6475_v16  ;;  %v6477_v17 = vpop.f32.mrb[85].mxu1  ;;  %vm12736_vm4 = vmmov %vm12582_vm0 }
 0x779   :  { %v6478_v13 = vpop.f32.mrb[86].mxu1 }
 0x77a   :  { %7430 = vst.msk [vmem:[%s11787_s5 + $0x138] sm:$0xff] %vm12722_vm11, %v6897_v60  ;;  %v6674_v57 = vmax.f32 %v7559_v32, 0.0  ;;  %v7560_v33 = vadd.f32 %v11254_v5, %v6478_v13  ;;  %v6480_v28 = vpop.f32.mrb[87].mxu1  ;;  %v7408_v32 = vld [vmem:[%s11782_s0 + $0x188] sm:$0xff]  ;;  %vm12737_vm11 = vmmov %vm12582_vm0 }
 0x77c   :  { %v6866_v47 = vadd.f32 %v7399_v41, %v6674_v57  ;;  %v6675_v4 = vmax.f32 %v7560_v33, 0.0 }
 0x77e   :  { %v6898_v52 = vmax.f32 %v6866_v47, 0.0  ;;  %v6867_v36 = vadd.f32 %v7400_v7, %v6675_v4  ;;  %v7409_v4 = vld [vmem:[%s11782_s0 + $0x190] sm:$0xff] }
 0x77f   :  { %v6483_v40 = vpop.f32.mrb[88].mxu1 }
 0x780   :  { %7431 = vst.msk [vmem:[%s11787_s5 + $0x140] sm:$0xff] %vm12723_vm6, %v6898_v52  ;;  %v6899_v22 = vmax.f32 %v6867_v36, 0.0  ;;  %v7561_v56 = vadd.f32 %v11254_v5, %v6483_v40  ;;  %v6485_v6 = vpop.f32.mrb[89].mxu1  ;;  %vm12738_vm6 = vmmov %vm12582_vm0 }
 0x781   :  { %v6486_v63 = vpop.f32.mrb[90].mxu1 }
 0x782   :  { %7432 = vst.msk [vmem:[%s11787_s5 + $0x148] sm:$0xff] %vm12724_vm8, %v6899_v22  ;;  %v6676_v42 = vmax.f32 %v7561_v56, 0.0  ;;  %v7562_v58 = vadd.f32 %v11254_v5, %v6486_v63  ;;  %v6488_v23 = vpop.f32.mrb[91].mxu1  ;;  %v7410_v56 = vld [vmem:[%s11782_s0 + $0x198] sm:$0xff]  ;;  %vm12739_vm8 = vmmov %vm12582_vm0 }
 0x784   :  { %v6868_v39 = vadd.f32 %v7401_v9, %v6676_v42  ;;  %v6677_v35 = vmax.f32 %v7562_v58, 0.0 }
 0x786   :  { %v6900_v26 = vmax.f32 %v6868_v39, 0.0  ;;  %v6869_v54 = vadd.f32 %v7402_v30, %v6677_v35  ;;  %v7411_v35 = vld [vmem:[%s11782_s0 + $0x1a0] sm:$0xff] }
 0x787   :  { %v6491_v55 = vpop.f32.mrb[92].mxu1 }
 0x788   :  { %7433 = vst.msk [vmem:[%s11787_s5 + $0x150] sm:$0xff] %vm12725_vm15, %v6900_v26  ;;  %v6901_v8 = vmax.f32 %v6869_v54, 0.0  ;;  %v7563_v2 = vadd.f32 %v11254_v5, %v6491_v55  ;;  %v6493_v11 = vpop.f32.mrb[93].mxu1  ;;  %vm12740_vm15 = vmmov %vm12582_vm0 }
 0x789   :  { %v6494_v48 = vpop.f32.mrb[94].mxu1 }
 0x78a   :  { %7434 = vst.msk [vmem:[%s11787_s5 + $0x158] sm:$0xff] %vm12726_vm9, %v6901_v8  ;;  %v6678_v29 = vmax.f32 %v7563_v2, 0.0  ;;  %v7564_v59 = vadd.f32 %v11254_v5, %v6494_v48  ;;  %v6496_v24 = vpop.f32.mrb[95].mxu1  ;;  %v7412_v2 = vld [vmem:[%s11782_s0 + $0x1a8] sm:$0xff]  ;;  %vm12741_vm9 = vmmov %vm12582_vm0 }
 0x78c   :  { %v6870_v21 = vadd.f32 %v7403_v14, %v6678_v29  ;;  %v6679_v44 = vmax.f32 %v7564_v59, 0.0 }
 0x78e   :  { %v6902_v27 = vmax.f32 %v6870_v21, 0.0  ;;  %v6871_v50 = vadd.f32 %v7404_v12, %v6679_v44  ;;  %v7413_v44 = vld [vmem:[%s11782_s0 + $0x1b0] sm:$0xff] }
 0x78f   :  { %v6499_v10 = vpop.f32.mrb[96].mxu1 }
 0x790   :  { %7435 = vst.msk [vmem:[%s11787_s5 + $0x160] sm:$0xff] %vm12727_vm1, %v6902_v27  ;;  %v6903_v1 = vmax.f32 %v6871_v50, 0.0  ;;  %v7565_v18 = vadd.f32 %v11254_v5, %v6499_v10  ;;  %v6501_v34 = vpop.f32.mrb[97].mxu1  ;;  %vm12742_vm1 = vmmov %vm12582_vm0 }
 0x791   :  { %v6502_v46 = vpop.f32.mrb[98].mxu1 }
 0x792   :  { %7436 = vst.msk [vmem:[%s11787_s5 + $0x168] sm:$0xff] %vm12728_vm12, %v6903_v1  ;;  %v6680_v3 = vmax.f32 %v7565_v18, 0.0  ;;  %v7566_v37 = vadd.f32 %v11254_v5, %v6502_v46  ;;  %v6504_v0 = vpop.f32.mrb[99].mxu1  ;;  %v7414_v18 = vld [vmem:[%s11782_s0 + $0x1b8] sm:$0xff]  ;;  %vm12743_vm12 = vmmov %vm12582_vm0 }
 0x794   :  { %v6872_v25 = vadd.f32 %v7405_v43, %v6680_v3  ;;  %v6681_v61 = vmax.f32 %v7566_v37, 0.0 }
 0x796   :  { %v6904_v51 = vmax.f32 %v6872_v25, 0.0  ;;  %v6873_v53 = vadd.f32 %v7406_v15, %v6681_v61  ;;  %v7415_v61 = vld [vmem:[%s11782_s0 + $0x1c0] sm:$0xff] }
 0x797   :  { %v6507_v31 = vpop.f32.mrb[100].mxu1 }
 0x798   :  { %7437 = vst.msk [vmem:[%s11787_s5 + $0x170] sm:$0xff] %vm12729_vm7, %v6904_v51  ;;  %v6905_v20 = vmax.f32 %v6873_v53, 0.0  ;;  %v7567_v62 = vadd.f32 %v11254_v5, %v6507_v31  ;;  %v6509_v49 = vpop.f32.mrb[101].mxu1  ;;  %vm12744_vm7 = vmmov %vm12582_vm0 }
 0x799   :  { %v6510_v38 = vpop.f32.mrb[102].mxu1 }
 0x79a   :  { %7438 = vst.msk [vmem:[%s11787_s5 + $0x178] sm:$0xff] %vm12730_vm10, %v6905_v20  ;;  %v6682_v19 = vmax.f32 %v7567_v62, 0.0  ;;  %v7568_v16 = vadd.f32 %v11254_v5, %v6510_v38  ;;  %v6512_v60 = vpop.f32.mrb[103].mxu1  ;;  %v7416_v62 = vld [vmem:[%s11782_s0 + $0x1c8] sm:$0xff]  ;;  %vm12745_vm10 = vmmov %vm12582_vm0 }
 0x79c   :  { %v6874_v17 = vadd.f32 %v7407_v45, %v6682_v19  ;;  %v6683_v41 = vmax.f32 %v7568_v16, 0.0 }
 0x79e   :  { %v6906_v13 = vmax.f32 %v6874_v17, 0.0  ;;  %v6875_v57 = vadd.f32 %v7408_v32, %v6683_v41  ;;  %v7417_v41 = vld [vmem:[%s11782_s0 + $0x1d0] sm:$0xff] }
 0x79f   :  { %v6515_v33 = vpop.f32.mrb[104].mxu1 }
 0x7a0   :  { %7439 = vst.msk [vmem:[%s11787_s5 + $0x180] sm:$0xff] %vm12731_vm5, %v6906_v13  ;;  %v6907_v28 = vmax.f32 %v6875_v57, 0.0  ;;  %v7569_v7 = vadd.f32 %v11254_v5, %v6515_v33  ;;  %v6517_v47 = vpop.f32.mrb[105].mxu1 }
 0x7a1   :  { %v6518_v52 = vpop.f32.mrb[106].mxu1 }
 0x7a2   :  { %7440 = vst.msk [vmem:[%s11787_s5 + $0x188] sm:$0xff] %vm12732_vm2, %v6907_v28  ;;  %v6684_v36 = vmax.f32 %v7569_v7, 0.0  ;;  %v7570_v40 = vadd.f32 %v11254_v5, %v6518_v52  ;;  %v6520_v22 = vpop.f32.mrb[107].mxu1  ;;  %v7418_v7 = vld [vmem:[%s11782_s0 + $0x1d8] sm:$0xff] }
 0x7a4   :  { %v6876_v6 = vadd.f32 %v7409_v4, %v6684_v36  ;;  %v6685_v9 = vmax.f32 %v7570_v40, 0.0 }
 0x7a6   :  { %v6908_v63 = vmax.f32 %v6876_v6, 0.0  ;;  %v6877_v42 = vadd.f32 %v7410_v56, %v6685_v9  ;;  %v7419_v9 = vld [vmem:[%s11782_s0 + $0x1e0] sm:$0xff] }
 0x7a7   :  { %v6523_v58 = vpop.f32.mrb[108].mxu1 }
 0x7a8   :  { %7441 = vst.msk [vmem:[%s11787_s5 + $0x190] sm:$0xff] %vm12582_vm0, %v6908_v63  ;;  %v6909_v23 = vmax.f32 %v6877_v42, 0.0  ;;  %v7571_v30 = vadd.f32 %v11254_v5, %v6523_v58  ;;  %v6525_v39 = vpop.f32.mrb[109].mxu1 }
 0x7a9   :  { %v6526_v26 = vpop.f32.mrb[110].mxu1 }
 0x7aa   :  { %7442 = vst.msk [vmem:[%s11787_s5 + $0x198] sm:$0xff] %vm12733_vm14, %v6909_v23  ;;  %v6686_v54 = vmax.f32 %v7571_v30, 0.0  ;;  %v7572_v55 = vadd.f32 %v11254_v5, %v6526_v26  ;;  %v6528_v8 = vpop.f32.mrb[111].mxu1  ;;  %v7420_v30 = vld [vmem:[%s11782_s0 + $0x1e8] sm:$0xff] }
 0x7ac   :  { %v6878_v11 = vadd.f32 %v7411_v35, %v6686_v54  ;;  %v6687_v14 = vmax.f32 %v7572_v55, 0.0 }
 0x7ae   :  { %v6910_v48 = vmax.f32 %v6878_v11, 0.0  ;;  %v6879_v29 = vadd.f32 %v7412_v2, %v6687_v14  ;;  %v7421_v14 = vld [vmem:[%s11782_s0 + $0x1f0] sm:$0xff] }
 0x7af   :  { %v6531_v59 = vpop.f32.mrb[112].mxu1 }
 0x7b0   :  { %7443 = vst.msk [vmem:[%s11787_s5 + $0x1a0] sm:$0xff] %vm12734_vm13, %v6910_v48  ;;  %v6911_v24 = vmax.f32 %v6879_v29, 0.0  ;;  %v7573_v12 = vadd.f32 %v11254_v5, %v6531_v59  ;;  %v6533_v21 = vpop.f32.mrb[113].mxu1 }
 0x7b1   :  { %v6534_v27 = vpop.f32.mrb[114].mxu1 }
 0x7b2   :  { %7444 = vst.msk [vmem:[%s11787_s5 + $0x1a8] sm:$0xff] %vm12735_vm3, %v6911_v24  ;;  %v6688_v50 = vmax.f32 %v7573_v12, 0.0  ;;  %v7574_v10 = vadd.f32 %v11254_v5, %v6534_v27  ;;  %v6536_v1 = vpop.f32.mrb[115].mxu1  ;;  %v7422_v12 = vld [vmem:[%s11782_s0 + $0x1f8] sm:$0xff] }
 0x7b4   :  { %v6880_v34 = vadd.f32 %v7413_v44, %v6688_v50  ;;  %v6689_v43 = vmax.f32 %v7574_v10, 0.0 }
 0x7b6   :  { %v6912_v46 = vmax.f32 %v6880_v34, 0.0  ;;  %v6881_v3 = vadd.f32 %v7414_v18, %v6689_v43 }
 0x7b7   :  { %v6539_v37 = vpop.f32.mrb[116].mxu1 }
 0x7b8   :  { %7445 = vst.msk [vmem:[%s11787_s5 + $0x1b0] sm:$0xff] %vm12736_vm4, %v6912_v46  ;;  %v6913_v0 = vmax.f32 %v6881_v3, 0.0  ;;  %v7575_v15 = vadd.f32 %v11254_v5, %v6539_v37  ;;  %v6541_v25 = vpop.f32.mrb[117].mxu1 }
 0x7b9   :  { %v6542_v51 = vpop.f32.mrb[118].mxu1 }
 0x7ba   :  { %7446 = vst.msk [vmem:[%s11787_s5 + $0x1b8] sm:$0xff] %vm12737_vm11, %v6913_v0  ;;  %v6690_v53 = vmax.f32 %v7575_v15, 0.0  ;;  %v7576_v31 = vadd.f32 %v11254_v5, %v6542_v51  ;;  %v6544_v20 = vpop.f32.mrb[119].mxu1 }
 0x7bc   :  { %v6882_v49 = vadd.f32 %v7415_v61, %v6690_v53  ;;  %v6691_v45 = vmax.f32 %v7576_v31, 0.0 }
 0x7be   :  { %v6914_v38 = vmax.f32 %v6882_v49, 0.0  ;;  %v6883_v19 = vadd.f32 %v7416_v62, %v6691_v45 }
 0x7bf   :  { %v6547_v16 = vpop.f32.mrb[120].mxu1 }
 0x7c0   :  { %7447 = vst.msk [vmem:[%s11787_s5 + $0x1c0] sm:$0xff] %vm12738_vm6, %v6914_v38  ;;  %v6915_v60 = vmax.f32 %v6883_v19, 0.0  ;;  %v7577_v32 = vadd.f32 %v11254_v5, %v6547_v16  ;;  %v6549_v17 = vpop.f32.mrb[121].mxu1 }
 0x7c1   :  { %v6550_v13 = vpop.f32.mrb[122].mxu1 }
 0x7c2   :  { %7448 = vst.msk [vmem:[%s11787_s5 + $0x1c8] sm:$0xff] %vm12739_vm8, %v6915_v60  ;;  %v6692_v57 = vmax.f32 %v7577_v32, 0.0  ;;  %v7578_v33 = vadd.f32 %v11254_v5, %v6550_v13  ;;  %v6552_v28 = vpop.f32.mrb[123].mxu1 }
 0x7c4   :  { %v6884_v47 = vadd.f32 %v7417_v41, %v6692_v57  ;;  %v6693_v4 = vmax.f32 %v7578_v33, 0.0 }
 0x7c6   :  { %v6916_v52 = vmax.f32 %v6884_v47, 0.0  ;;  %v6885_v36 = vadd.f32 %v7418_v7, %v6693_v4 }
 0x7c7   :  { %v6555_v40 = vpop.f32.mrb[124].mxu1 }
 0x7c8   :  { %7449 = vst.msk [vmem:[%s11787_s5 + $0x1d0] sm:$0xff] %vm12740_vm15, %v6916_v52  ;;  %v6917_v22 = vmax.f32 %v6885_v36, 0.0  ;;  %v7579_v56 = vadd.f32 %v11254_v5, %v6555_v40  ;;  %v6557_v6 = vpop.f32.mrb[125].mxu1 }
 0x7c9   :  { %v6558_v63 = vpop.f32.mrb[126].mxu1 }
 0x7ca   :  { %7450 = vst.msk [vmem:[%s11787_s5 + $0x1d8] sm:$0xff] %vm12741_vm9, %v6917_v22  ;;  %v6694_v42 = vmax.f32 %v7579_v56, 0.0  ;;  %v7580_v58 = vadd.f32 %v11254_v5, %v6558_v63  ;;  %v6560_v23 = vpop.f32.mrb[127].mxu1  ;;  %v8177_v5 = vld [vmem:[%s11786_s4] ss:$0 sm:$0xff] }
 0x7cc   :  { %v6886_v39 = vadd.f32 %v7419_v9, %v6694_v42  ;;  %v6695_v35 = vmax.f32 %v7580_v58, 0.0 }
 0x7ce   :  { %v6918_v26 = vmax.f32 %v6886_v39, 0.0  ;;  %v6887_v54 = vadd.f32 %v7420_v30, %v6695_v35 }
 0x7cf   :  { %v6563_v55 = vpop.f32.mrb[128].mxu1 }
 0x7d0   :  { %7451 = vst.msk [vmem:[%s11787_s5 + $0x1e0] sm:$0xff] %vm12742_vm1, %v6918_v26  ;;  %v6919_v8 = vmax.f32 %v6887_v54, 0.0  ;;  %v7581_v2 = vadd.f32 %v8177_v5, %v6563_v55  ;;  %v6565_v11 = vpop.f32.mrb[129].mxu1 }
 0x7d1   :  { %v6566_v48 = vpop.f32.mrb[130].mxu1 }
 0x7d2   :  { %7452 = vst.msk [vmem:[%s11787_s5 + $0x1e8] sm:$0xff] %vm12743_vm12, %v6919_v8  ;;  %v6696_v29 = vmax.f32 %v7581_v2, 0.0  ;;  %v7582_v59 = vadd.f32 %v8177_v5, %v6566_v48  ;;  %v6568_v24 = vpop.f32.mrb[131].mxu1 }
 0x7d4   :  { %v6888_v21 = vadd.f32 %v7421_v14, %v6696_v29  ;;  %v6697_v44 = vmax.f32 %v7582_v59, 0.0 }
 0x7d6   :  { %v6920_v27 = vmax.f32 %v6888_v21, 0.0  ;;  %v6889_v50 = vadd.f32 %v7422_v12, %v6697_v44 }
 0x7d8   :  { %7453 = vst.msk [vmem:[%s11787_s5 + $0x1f0] sm:$0xff] %vm12744_vm7, %v6920_v27  ;;  %v6921_v10 = vmax.f32 %v6889_v50, 0.0 }
 0x7da   :  { %7454 = vst.msk [vmem:[%s11787_s5 + $0x1f8] sm:$0xff] %vm12745_vm10, %v6921_v10 }

</bundles_post_ra>
